<compile_context>
chip_gen: v6e
topology: v6e:2x2x1
jax: 0.10.0
libtpu: 0.0.40
codegen_flags: <defaults>
</compile_context>

<pallas_src>
import math

import jax
import jax.numpy as jnp
from jax import lax
from jax.experimental import pallas as pl
from jax.experimental.pallas import tpu as pltpu

# ---- dims fixed by SemAttention5LN ----
D_IN = 1024      # layer1 input dim
D_MID = 256      # layer1 / layer2 output dim
D_OUT = 64       # layer3 output dim
HEAD1 = 2        # args.head1
HEAD2 = 2        # args.head2
T_DFF = 1        # args.t_dff
LN_EPS = 1e-5

# Resident weights ~3.6 MB bf16 (+double buffering); stay well under the
# 64 MiB physical VMEM of a v7x TensorCore.
_VMEM_LIMIT = 32 * 1024 * 1024


# --------------------------------------------------------------------------
# In-kernel helpers (bf16 MXU operands, f32 accumulation).
# --------------------------------------------------------------------------
def _mm(x, w, b=None):
    """x[M, K] @ w[K, N] (bf16 weights) -> f32; optional (1, N) bias."""
    y = lax.dot_general(x.astype(jnp.bfloat16), w,
                        (((1,), (0,)), ((), ())),
                        preferred_element_type=jnp.float32)
    if b is not None:
        y = y + b
    return y


def _layer_norm(y, g, b):
    # var = E[y^2] - E[y]^2: both reductions read y directly (no broadcast-sub
    # on the critical path into the second XLU reduction).
    mu = jnp.mean(y, axis=-1, keepdims=True)
    ms = jnp.mean(y * y, axis=-1, keepdims=True)
    var = ms - mu * mu
    return (y - mu) * lax.rsqrt(var + LN_EPS) * g + b


def _sigmoid(x):
    # exp + approx reciprocal -> EUP slot instead of a full-precision divide.
    return pl.reciprocal(1.0 + jnp.exp(-x), approx=True)


def _mha(q, k, v, wo, bo, ln_g, ln_b, *, n_heads):
    """SelfAttention2/3 body with residual='V' (projected V) + LayerNorm.
    q, k, v are the already-projected [S, E] activations for ONE batch elem."""
    e = q.shape[-1]
    dk = e // n_heads
    scale = 1.0 / math.sqrt(dk)
    heads = []
    for h in range(n_heads):                      # n_heads == 2, unrolled
        c = h * dk
        qh = q[:, c:c + dk].astype(jnp.bfloat16)
        kh = k[:, c:c + dk].astype(jnp.bfloat16)
        vh = v[:, c:c + dk].astype(jnp.bfloat16)
        s = lax.dot_general(qh, kh, (((1,), (1,)), ((), ())),
                            preferred_element_type=jnp.float32) * scale
        s = s - jnp.max(s, axis=-1, keepdims=True)
        p = jnp.exp(s)
        p = p * pl.reciprocal(jnp.sum(p, axis=-1, keepdims=True), approx=True)
        heads.append(jnp.dot(p.astype(jnp.bfloat16), vh,
                             preferred_element_type=jnp.float32))
    ctx = heads[0] if n_heads == 1 else jnp.concatenate(heads, axis=-1)
    out = _mm(ctx, wo, bo)
    return _layer_norm(out + v, ln_g, ln_b)


def _ffn(x, w1, b1, w2, b2, ln_g=None, ln_b=None):
    """PoswiseFeedForwardNet (LN=True) / PoswiseFeedForwardNet2 (LN=False)."""
    h = jnp.maximum(_mm(x, w1, b1), 0.0)
    y = _mm(h, w2, b2) + x
    if ln_g is not None:
        y = _layer_norm(y, ln_g, ln_b)
    return y


def _gate(out, forget, wg_out, wg_fgt, bg):
    """outputs * sigmoid(forgetgate(cat(outputs, forget))) via split matmuls."""
    g = _mm(out, wg_out) + _mm(forget, wg_fgt) + bg
    return out * _sigmoid(g)


# --------------------------------------------------------------------------
# The fused kernel: one batch element per grid step, everything VMEM-resident.
# --------------------------------------------------------------------------
def _sem5ln_kernel(x_ref,
                   wqkv1, wo1, wf1a, wf1b, wg1o, wg1f, b1_ref,
                   wqk2, wv2, wo2, wf2a, wf2b, wg2o, wg2f, b2_ref,
                   wqk3, wv3, wo3, wf3a, wf3b, b3_ref,
                   o_ref):
    B1 = b1_ref[...]
    B2 = b2_ref[...]
    B3 = b3_ref[...]

    def row(bpack, i):
        return bpack[i:i + 1, :]

    # ---- layer1: NLPStageAttention(1024 -> 256, LN=True) ----
    # Q, K, V share the same LHS (enc_inputs == forget == x): one fused matmul.
    qkv = _mm(x_ref[0], wqkv1[...])                         # [S, 768] f32
    q = qkv[:, 0 * D_MID:1 * D_MID] + row(B1, 0)
    k = qkv[:, 1 * D_MID:2 * D_MID] + row(B1, 1)
    v = qkv[:, 2 * D_MID:3 * D_MID] + row(B1, 2)
    a1 = _mha(q, k, v, wo1[...], row(B1, 3), row(B1, 4), row(B1, 5),
              n_heads=HEAD1)
    o1 = _ffn(a1, wf1a[...], row(B1, 6), wf1b[...], row(B1, 7),
              row(B1, 8), row(B1, 9))
    f1 = _gate(o1, x_ref[0], wg1o[...], wg1f[...], row(B1, 10))

    # ---- layer2: BasicSemAttention(256 -> 256, LN=True) ----
    qk = _mm(o1, wqk2[...])                                 # fused Q|K
    q = qk[:, 0 * D_MID:1 * D_MID] + row(B2, 0)
    k = qk[:, 1 * D_MID:2 * D_MID] + row(B2, 1)
    v = _mm(f1, wv2[...], row(B2, 2))                       # V from `forget`
    a2 = _mha(q, k, v, wo2[...], row(B2, 3), row(B2, 4), row(B2, 5),
              n_heads=HEAD1)
    o2 = _ffn(a2, wf2a[...], row(B2, 6), wf2b[...], row(B2, 7),
              row(B2, 8), row(B2, 9))
    f2 = _gate(o2, f1, wg2o[...], wg2f[...], row(B2, 10))

    # ---- layer3: BasicSemAttention(256 -> 64, LN=False) ----
    qk = _mm(o2, wqk3[...])
    q = qk[:, 0 * D_OUT:1 * D_OUT] + row(B3, 0)
    k = qk[:, 1 * D_OUT:2 * D_OUT] + row(B3, 1)
    v = _mm(f2, wv3[...], row(B3, 2))
    a3 = _mha(q, k, v, wo3[...], row(B3, 3), row(B3, 4), row(B3, 5),
              n_heads=HEAD2)
    o3 = _ffn(a3, wf3a[...], row(B3, 6), wf3b[...], row(B3, 7))
    # layer3's forget-gate output is discarded by SemAttention5LN -> removed.

    o_ref[0] = o3.astype(o_ref.dtype)


# --------------------------------------------------------------------------
# Parameter init (PyTorch nn.Linear default U(-1/sqrt(fan_in), +)).
# Weights stored transposed [in, out], pre-cast to bf16, Q/K(/V) fused;
# all per-layer bias / LayerNorm vectors packed into one small f32 matrix.
# --------------------------------------------------------------------------
def _uniform(key, shape, bound):
    return jax.random.uniform(key, shape, jnp.float32, -bound, bound)


def _init_layer(key, d_in, d_out, d_ff, *, ln, gate, fuse_v):
    assert d_ff == 1, "bias packing assumes hidden == d_out (t_dff == 1)"
    hid = d_out * d_ff
    ks = jax.random.split(key, 16)
    b_proj = 1.0 / math.sqrt(d_in)
    b_out = 1.0 / math.sqrt(d_out)
    b_f2 = 1.0 / math.sqrt(hid)
    b_g = 1.0 / math.sqrt(d_out + d_in)

    w = []
    if fuse_v:
        w.append(_uniform(ks[0], (d_in, 3 * d_out), b_proj).astype(jnp.bfloat16))  # W_{Q|K|V}
    else:
        w.append(_uniform(ks[0], (d_in, 2 * d_out), b_proj).astype(jnp.bfloat16))  # W_{Q|K}
        w.append(_uniform(ks[1], (d_in, d_out), b_proj).astype(jnp.bfloat16))      # W_V
    w.append(_uniform(ks[2], (d_out, d_out), b_out).astype(jnp.bfloat16))          # W_O
    w.append(_uniform(ks[3], (d_out, hid), b_out).astype(jnp.bfloat16))            # FFN W1
    w.append(_uniform(ks[4], (hid, d_out), b_f2).astype(jnp.bfloat16))             # FFN W2
    if gate:
        # forgetgate = Linear(d_out + d_in, d_out), split at the torch.cat
        # boundary: rows [:d_out] act on `outputs`, rows [d_out:] on `forget`.
        w.append(_uniform(ks[5], (d_out, d_out), b_g).astype(jnp.bfloat16))
        w.append(_uniform(ks[6], (d_in, d_out), b_g).astype(jnp.bfloat16))

    rows = [
        _uniform(ks[7], (d_out,), b_proj),        # 0: b_Q
        _uniform(ks[8], (d_out,), b_proj),        # 1: b_K
        _uniform(ks[9], (d_out,), b_proj),        # 2: b_V
        _uniform(ks[10], (d_out,), b_out),        # 3: b_O
        jnp.ones((d_out,), jnp.float32),          # 4: attn LN gamma
        jnp.zeros((d_out,), jnp.float32),         # 5: attn LN beta
        _uniform(ks[11], (hid,), b_out),          # 6: FFN b1
        _uniform(ks[12], (d_out,), b_f2),         # 7: FFN b2
    ]
    if ln:
        rows += [jnp.ones((d_out,), jnp.float32),   # 8: FFN LN gamma
                 jnp.zeros((d_out,), jnp.float32)]  # 9: FFN LN beta
    if gate:
        rows.append(_uniform(ks[13], (d_out,), b_g))  # 10: gate bias
    w.append(jnp.stack(rows, axis=0))                 # packed bias matrix
    return w


def init_params(key):
    k1, k2, k3 = jax.random.split(key, 3)
    return (_init_layer(k1, D_IN, D_MID, T_DFF, ln=True, gate=True, fuse_v=True)
            + _init_layer(k2, D_MID, D_MID, T_DFF, ln=True, gate=True, fuse_v=False)
            + _init_layer(k3, D_MID, D_OUT, T_DFF, ln=False, gate=False, fuse_v=False))


# --------------------------------------------------------------------------
# Wrapper: grid over batch (parallel -> both v7x TCs), weights resident via
# constant index maps, input/output blocks pipelined per batch element.
# --------------------------------------------------------------------------
def _cost_estimate(b, s, params):
    m = b * s
    mm_cols = (D_IN * 3 * D_MID + 4 * D_MID * D_MID + D_IN * D_MID          # layer1
               + 2 * D_MID * D_MID + 6 * D_MID * D_MID                      # layer2
               + D_MID * 2 * D_OUT + D_MID * D_OUT + 3 * D_OUT * D_OUT)     # layer3
    attn = 4 * b * s * s * (2 * D_MID + D_OUT)          # scores + p@V
    flops = 2 * m * mm_cols + attn
    transcendentals = (b * s * s * (2 * HEAD1 + HEAD2)   # softmax exp
                       + 2 * m * D_MID                    # sigmoid gates
                       + 5 * m)                           # LayerNorm rsqrt
    bytes_accessed = (m * D_IN * 2 + m * D_OUT * 4
                      + sum(int(p.size) * p.dtype.itemsize for p in params))
    return pl.CostEstimate(flops=int(flops),
                           transcendentals=int(transcendentals),
                           bytes_accessed=int(bytes_accessed))


def sem_attention5ln(params, inputs):
    b, s, d = inputs.shape
    assert d == D_IN
    x = inputs.astype(jnp.bfloat16)   # only ever consumed as a bf16 matmul LHS

    def const_spec(a):
        zeros = (0,) * a.ndim
        return pl.BlockSpec(a.shape, lambda i, _z=zeros: _z)

    return pl.pallas_call(
        _sem5ln_kernel,
        grid=(b,),
        in_specs=[pl.BlockSpec((1, s, D_IN), lambda i: (i, 0, 0))]
                 + [const_spec(p) for p in params],
        out_specs=pl.BlockSpec((1, s, D_OUT), lambda i: (i, 0, 0)),
        out_shape=jax.ShapeDtypeStruct((b, s, D_OUT), jnp.float32),
        compiler_params=pltpu.CompilerParams(
            dimension_semantics=("parallel",),
            vmem_limit_bytes=_VMEM_LIMIT),
        cost_estimate=_cost_estimate(b, s, params),
    )(x, *params)


if __name__ == "__main__":
    key = jax.random.PRNGKey(0)
    pkey, xkey = jax.random.split(key)
    params = init_params(pkey)
    # small shapes: batch=2, seq(neg)=8; feature dim fixed at 1024 by the module
    inputs = jax.random.normal(xkey, (2, 8, D_IN), jnp.float32)
    fwd = jax.jit(sem_attention5ln)
    out = jax.block_until_ready(fwd(params, inputs))
    assert out.shape == (2, 8, D_OUT)
    assert bool(jnp.all(jnp.isfinite(out)))
    print("KERNEL_OK")
</pallas_src>

<mosaic_0001>
module attributes {stable_mosaic.version = 11 : i64} {
  func.func @_sem5ln_kernel(%arg0: i32, %arg1: memref<1x8x1024xbf16, #tpu.memory_space<vmem>>, %arg2: memref<1024x768xbf16, #tpu.memory_space<vmem>>, %arg3: memref<256x256xbf16, #tpu.memory_space<vmem>>, %arg4: memref<256x256xbf16, #tpu.memory_space<vmem>>, %arg5: memref<256x256xbf16, #tpu.memory_space<vmem>>, %arg6: memref<256x256xbf16, #tpu.memory_space<vmem>>, %arg7: memref<1024x256xbf16, #tpu.memory_space<vmem>>, %arg8: memref<11x256xf32, #tpu.memory_space<vmem>>, %arg9: memref<256x512xbf16, #tpu.memory_space<vmem>>, %arg10: memref<256x256xbf16, #tpu.memory_space<vmem>>, %arg11: memref<256x256xbf16, #tpu.memory_space<vmem>>, %arg12: memref<256x256xbf16, #tpu.memory_space<vmem>>, %arg13: memref<256x256xbf16, #tpu.memory_space<vmem>>, %arg14: memref<256x256xbf16, #tpu.memory_space<vmem>>, %arg15: memref<256x256xbf16, #tpu.memory_space<vmem>>, %arg16: memref<11x256xf32, #tpu.memory_space<vmem>>, %arg17: memref<256x128xbf16, #tpu.memory_space<vmem>>, %arg18: memref<256x64xbf16, #tpu.memory_space<vmem>>, %arg19: memref<64x64xbf16, #tpu.memory_space<vmem>>, %arg20: memref<64x64xbf16, #tpu.memory_space<vmem>>, %arg21: memref<64x64xbf16, #tpu.memory_space<vmem>>, %arg22: memref<8x64xf32, #tpu.memory_space<vmem>>, %arg23: memref<1x8x64xf32, #tpu.memory_space<vmem>>) attributes {dimension_semantics = [#tpu.dimension_semantics<parallel>], iteration_bounds = array<i64: 2>, scalar_prefetch = 0 : i64, scratch_operands = 0 : i64, tpu.core_type = #tpu.core_type<tc>, window_params = [{transform_indices = @transform_0, window_bounds = array<i64: 1, 8, 1024>}, {pipeline_mode = #tpu.pipeline_mode<synchronous>, transform_indices = @transform_1, window_bounds = array<i64: 1024, 768>}, {pipeline_mode = #tpu.pipeline_mode<synchronous>, transform_indices = @transform_2, window_bounds = array<i64: 256, 256>}, {pipeline_mode = #tpu.pipeline_mode<synchronous>, transform_indices = @transform_3, window_bounds = array<i64: 256, 256>}, {pipeline_mode = #tpu.pipeline_mode<synchronous>, transform_indices = @transform_4, window_bounds = array<i64: 256, 256>}, {pipeline_mode = #tpu.pipeline_mode<synchronous>, transform_indices = @transform_5, window_bounds = array<i64: 256, 256>}, {pipeline_mode = #tpu.pipeline_mode<synchronous>, transform_indices = @transform_6, window_bounds = array<i64: 1024, 256>}, {pipeline_mode = #tpu.pipeline_mode<synchronous>, transform_indices = @transform_7, window_bounds = array<i64: 11, 256>}, {pipeline_mode = #tpu.pipeline_mode<synchronous>, transform_indices = @transform_8, window_bounds = array<i64: 256, 512>}, {pipeline_mode = #tpu.pipeline_mode<synchronous>, transform_indices = @transform_9, window_bounds = array<i64: 256, 256>}, {pipeline_mode = #tpu.pipeline_mode<synchronous>, transform_indices = @transform_10, window_bounds = array<i64: 256, 256>}, {pipeline_mode = #tpu.pipeline_mode<synchronous>, transform_indices = @transform_11, window_bounds = array<i64: 256, 256>}, {pipeline_mode = #tpu.pipeline_mode<synchronous>, transform_indices = @transform_12, window_bounds = array<i64: 256, 256>}, {pipeline_mode = #tpu.pipeline_mode<synchronous>, transform_indices = @transform_13, window_bounds = array<i64: 256, 256>}, {pipeline_mode = #tpu.pipeline_mode<synchronous>, transform_indices = @transform_14, window_bounds = array<i64: 256, 256>}, {pipeline_mode = #tpu.pipeline_mode<synchronous>, transform_indices = @transform_15, window_bounds = array<i64: 11, 256>}, {pipeline_mode = #tpu.pipeline_mode<synchronous>, transform_indices = @transform_16, window_bounds = array<i64: 256, 128>}, {pipeline_mode = #tpu.pipeline_mode<synchronous>, transform_indices = @transform_17, window_bounds = array<i64: 256, 64>}, {pipeline_mode = #tpu.pipeline_mode<synchronous>, transform_indices = @transform_18, window_bounds = array<i64: 64, 64>}, {pipeline_mode = #tpu.pipeline_mode<synchronous>, transform_indices = @transform_19, window_bounds = array<i64: 64, 64>}, {pipeline_mode = #tpu.pipeline_mode<synchronous>, transform_indices = @transform_20, window_bounds = array<i64: 64, 64>}, {pipeline_mode = #tpu.pipeline_mode<synchronous>, transform_indices = @transform_21, window_bounds = array<i64: 8, 64>}, {transform_indices = @transform_22, window_bounds = array<i64: 1, 8, 64>}]} {
    %c0 = arith.constant 0 : index
    %c0_0 = arith.constant 0 : index
    %0 = vector.load %arg8[%c0, %c0_0] : memref<11x256xf32, #tpu.memory_space<vmem>>, vector<11x256xf32>
    %c0_1 = arith.constant 0 : index
    %c0_2 = arith.constant 0 : index
    %1 = vector.load %arg16[%c0_1, %c0_2] : memref<11x256xf32, #tpu.memory_space<vmem>>, vector<11x256xf32>
    %c0_3 = arith.constant 0 : index
    %c0_4 = arith.constant 0 : index
    %2 = vector.load %arg22[%c0_3, %c0_4] : memref<8x64xf32, #tpu.memory_space<vmem>>, vector<8x64xf32>
    %c0_5 = arith.constant 0 : index
    %c0_6 = arith.constant 0 : index
    %c0_7 = arith.constant 0 : index
    %3 = vector.load %arg1[%c0_5, %c0_6, %c0_7] : memref<1x8x1024xbf16, #tpu.memory_space<vmem>>, vector<1x8x1024xbf16>
    %4 = vector.shape_cast %3 : vector<1x8x1024xbf16> to vector<8x1024xbf16>
    %c0_8 = arith.constant 0 : index
    %c0_9 = arith.constant 0 : index
    %5 = vector.load %arg2[%c0_8, %c0_9] : memref<1024x768xbf16, #tpu.memory_space<vmem>>, vector<1024x768xbf16>
    %cst = arith.constant dense<0.000000e+00> : vector<8x768xf32>
    %6 = tpu.matmul %4, %5, %cst {dimension_numbers = #tpu.dot_dimension_numbers<[1], [0], [0], [1], [0, 0, 1, 1], [], []>} : vector<8x1024xbf16>, vector<1024x768xbf16>, vector<8x768xf32> -> vector<8x768xf32>
    %7 = vector.extract_strided_slice %6 {offsets = [0, 0], sizes = [8, 256], strides = [1, 1]} : vector<8x768xf32> to vector<8x256xf32>
    %8 = vector.extract_strided_slice %0 {offsets = [0, 0], sizes = [1, 256], strides = [1, 1]} : vector<11x256xf32> to vector<1x256xf32>
    %9 = vector.broadcast %8 : vector<1x256xf32> to vector<8x256xf32>
    %10 = arith.addf %7, %9 : vector<8x256xf32>
    %11 = vector.extract_strided_slice %6 {offsets = [0, 256], sizes = [8, 256], strides = [1, 1]} : vector<8x768xf32> to vector<8x256xf32>
    %12 = vector.extract_strided_slice %0 {offsets = [1, 0], sizes = [1, 256], strides = [1, 1]} : vector<11x256xf32> to vector<1x256xf32>
    %13 = vector.broadcast %12 : vector<1x256xf32> to vector<8x256xf32>
    %14 = arith.addf %11, %13 : vector<8x256xf32>
    %15 = vector.extract_strided_slice %6 {offsets = [0, 512], sizes = [8, 256], strides = [1, 1]} : vector<8x768xf32> to vector<8x256xf32>
    %16 = vector.extract_strided_slice %0 {offsets = [2, 0], sizes = [1, 256], strides = [1, 1]} : vector<11x256xf32> to vector<1x256xf32>
    %17 = vector.broadcast %16 : vector<1x256xf32> to vector<8x256xf32>
    %18 = arith.addf %15, %17 : vector<8x256xf32>
    %c0_10 = arith.constant 0 : index
    %c0_11 = arith.constant 0 : index
    %19 = vector.load %arg3[%c0_10, %c0_11] : memref<256x256xbf16, #tpu.memory_space<vmem>>, vector<256x256xbf16>
    %20 = vector.extract_strided_slice %0 {offsets = [3, 0], sizes = [1, 256], strides = [1, 1]} : vector<11x256xf32> to vector<1x256xf32>
    %21 = vector.extract_strided_slice %0 {offsets = [4, 0], sizes = [1, 256], strides = [1, 1]} : vector<11x256xf32> to vector<1x256xf32>
    %22 = vector.extract_strided_slice %0 {offsets = [5, 0], sizes = [1, 256], strides = [1, 1]} : vector<11x256xf32> to vector<1x256xf32>
    %23 = vector.extract_strided_slice %10 {offsets = [0, 0], sizes = [8, 128], strides = [1, 1]} : vector<8x256xf32> to vector<8x128xf32>
    %24 = arith.truncf %23 : vector<8x128xf32> to vector<8x128xbf16>
    %25 = vector.extract_strided_slice %14 {offsets = [0, 0], sizes = [8, 128], strides = [1, 1]} : vector<8x256xf32> to vector<8x128xf32>
    %26 = arith.truncf %25 : vector<8x128xf32> to vector<8x128xbf16>
    %27 = vector.extract_strided_slice %18 {offsets = [0, 0], sizes = [8, 128], strides = [1, 1]} : vector<8x256xf32> to vector<8x128xf32>
    %28 = arith.truncf %27 : vector<8x128xf32> to vector<8x128xbf16>
    %cst_12 = arith.constant dense<0.000000e+00> : vector<8x8xf32>
    %29 = tpu.matmul %24, %26, %cst_12 {dimension_numbers = #tpu.dot_dimension_numbers<[1], [1], [0], [0], [0, 0, 1, 0], [], []>} : vector<8x128xbf16>, vector<8x128xbf16>, vector<8x8xf32> -> vector<8x8xf32>
    %cst_13 = arith.constant 0.0883883461 : f32
    %30 = vector.broadcast %cst_13 : f32 to vector<8x8xf32>
    %31 = arith.mulf %29, %30 : vector<8x8xf32>
    %cst_14 = arith.constant dense<0xFF800000> : vector<8xf32>
    %32 = vector.multi_reduction <maximumf>, %31, %cst_14 [1] : vector<8x8xf32> to vector<8xf32>
    %33 = vector.shape_cast %32 : vector<8xf32> to vector<8x1xf32>
    %34 = vector.broadcast %33 : vector<8x1xf32> to vector<8x8xf32>
    %35 = arith.subf %31, %34 : vector<8x8xf32>
    %36 = math.exp %35 : vector<8x8xf32>
    %cst_15 = arith.constant dense<0.000000e+00> : vector<8xf32>
    %37 = vector.multi_reduction <add>, %36, %cst_15 [1] : vector<8x8xf32> to vector<8xf32>
    %38 = vector.shape_cast %37 : vector<8xf32> to vector<8x1xf32>
    %39 = tpu.reciprocal %38 {approx = true} : vector<8x1xf32> -> vector<8x1xf32>
    %40 = vector.broadcast %39 : vector<8x1xf32> to vector<8x8xf32>
    %41 = arith.mulf %36, %40 : vector<8x8xf32>
    %42 = arith.truncf %41 : vector<8x8xf32> to vector<8x8xbf16>
    %cst_16 = arith.constant dense<0.000000e+00> : vector<8x128xf32>
    %43 = tpu.matmul %42, %28, %cst_16 {dimension_numbers = #tpu.dot_dimension_numbers<[1], [0], [0], [1], [0, 0, 1, 1], [], []>} : vector<8x8xbf16>, vector<8x128xbf16>, vector<8x128xf32> -> vector<8x128xf32>
    %44 = vector.extract_strided_slice %10 {offsets = [0, 128], sizes = [8, 128], strides = [1, 1]} : vector<8x256xf32> to vector<8x128xf32>
    %45 = arith.truncf %44 : vector<8x128xf32> to vector<8x128xbf16>
    %46 = vector.extract_strided_slice %14 {offsets = [0, 128], sizes = [8, 128], strides = [1, 1]} : vector<8x256xf32> to vector<8x128xf32>
    %47 = arith.truncf %46 : vector<8x128xf32> to vector<8x128xbf16>
    %48 = vector.extract_strided_slice %18 {offsets = [0, 128], sizes = [8, 128], strides = [1, 1]} : vector<8x256xf32> to vector<8x128xf32>
    %49 = arith.truncf %48 : vector<8x128xf32> to vector<8x128xbf16>
    %cst_17 = arith.constant dense<0.000000e+00> : vector<8x8xf32>
    %50 = tpu.matmul %45, %47, %cst_17 {dimension_numbers = #tpu.dot_dimension_numbers<[1], [1], [0], [0], [0, 0, 1, 0], [], []>} : vector<8x128xbf16>, vector<8x128xbf16>, vector<8x8xf32> -> vector<8x8xf32>
    %cst_18 = arith.constant 0.0883883461 : f32
    %51 = vector.broadcast %cst_18 : f32 to vector<8x8xf32>
    %52 = arith.mulf %50, %51 : vector<8x8xf32>
    %cst_19 = arith.constant dense<0xFF800000> : vector<8xf32>
    %53 = vector.multi_reduction <maximumf>, %52, %cst_19 [1] : vector<8x8xf32> to vector<8xf32>
    %54 = vector.shape_cast %53 : vector<8xf32> to vector<8x1xf32>
    %55 = vector.broadcast %54 : vector<8x1xf32> to vector<8x8xf32>
    %56 = arith.subf %52, %55 : vector<8x8xf32>
    %57 = math.exp %56 : vector<8x8xf32>
    %cst_20 = arith.constant dense<0.000000e+00> : vector<8xf32>
    %58 = vector.multi_reduction <add>, %57, %cst_20 [1] : vector<8x8xf32> to vector<8xf32>
    %59 = vector.shape_cast %58 : vector<8xf32> to vector<8x1xf32>
    %60 = tpu.reciprocal %59 {approx = true} : vector<8x1xf32> -> vector<8x1xf32>
    %61 = vector.broadcast %60 : vector<8x1xf32> to vector<8x8xf32>
    %62 = arith.mulf %57, %61 : vector<8x8xf32>
    %63 = arith.truncf %62 : vector<8x8xf32> to vector<8x8xbf16>
    %cst_21 = arith.constant dense<0.000000e+00> : vector<8x128xf32>
    %64 = tpu.matmul %63, %49, %cst_21 {dimension_numbers = #tpu.dot_dimension_numbers<[1], [0], [0], [1], [0, 0, 1, 1], [], []>} : vector<8x8xbf16>, vector<8x128xbf16>, vector<8x128xf32> -> vector<8x128xf32>
    %65 = tpu.concatenate %43, %64 in 1 : vector<8x128xf32>, vector<8x128xf32> -> vector<8x256xf32>
    %66 = arith.truncf %65 : vector<8x256xf32> to vector<8x256xbf16>
    %cst_22 = arith.constant dense<0.000000e+00> : vector<8x256xf32>
    %67 = tpu.matmul %66, %19, %cst_22 {dimension_numbers = #tpu.dot_dimension_numbers<[1], [0], [0], [1], [0, 0, 1, 1], [], []>} : vector<8x256xbf16>, vector<256x256xbf16>, vector<8x256xf32> -> vector<8x256xf32>
    %68 = vector.broadcast %20 : vector<1x256xf32> to vector<8x256xf32>
    %69 = arith.addf %67, %68 : vector<8x256xf32>
    %70 = arith.addf %69, %18 : vector<8x256xf32>
    %cst_23 = arith.constant dense<0.000000e+00> : vector<8xf32>
    %71 = vector.multi_reduction <add>, %70, %cst_23 [1] : vector<8x256xf32> to vector<8xf32>
    %72 = vector.shape_cast %71 : vector<8xf32> to vector<8x1xf32>
    %cst_24 = arith.constant 2.560000e+02 : f32
    %73 = vector.broadcast %cst_24 : f32 to vector<8x1xf32>
    %74 = arith.divf %72, %73 : vector<8x1xf32>
    %75 = arith.mulf %70, %70 : vector<8x256xf32>
    %cst_25 = arith.constant dense<0.000000e+00> : vector<8xf32>
    %76 = vector.multi_reduction <add>, %75, %cst_25 [1] : vector<8x256xf32> to vector<8xf32>
    %77 = vector.shape_cast %76 : vector<8xf32> to vector<8x1xf32>
    %cst_26 = arith.constant 2.560000e+02 : f32
    %78 = vector.broadcast %cst_26 : f32 to vector<8x1xf32>
    %79 = arith.divf %77, %78 : vector<8x1xf32>
    %80 = arith.mulf %74, %74 : vector<8x1xf32>
    %81 = arith.subf %79, %80 : vector<8x1xf32>
    %82 = vector.broadcast %74 : vector<8x1xf32> to vector<8x256xf32>
    %83 = arith.subf %70, %82 : vector<8x256xf32>
    %cst_27 = arith.constant 9.99999974E-6 : f32
    %84 = vector.broadcast %cst_27 : f32 to vector<8x1xf32>
    %85 = arith.addf %81, %84 : vector<8x1xf32>
    %86 = math.rsqrt %85 : vector<8x1xf32>
    %87 = vector.broadcast %86 : vector<8x1xf32> to vector<8x256xf32>
    %88 = arith.mulf %83, %87 : vector<8x256xf32>
    %89 = vector.broadcast %21 : vector<1x256xf32> to vector<8x256xf32>
    %90 = arith.mulf %88, %89 : vector<8x256xf32>
    %91 = vector.broadcast %22 : vector<1x256xf32> to vector<8x256xf32>
    %92 = arith.addf %90, %91 : vector<8x256xf32>
    %c0_28 = arith.constant 0 : index
    %c0_29 = arith.constant 0 : index
    %93 = vector.load %arg4[%c0_28, %c0_29] : memref<256x256xbf16, #tpu.memory_space<vmem>>, vector<256x256xbf16>
    %94 = vector.extract_strided_slice %0 {offsets = [6, 0], sizes = [1, 256], strides = [1, 1]} : vector<11x256xf32> to vector<1x256xf32>
    %c0_30 = arith.constant 0 : index
    %c0_31 = arith.constant 0 : index
    %95 = vector.load %arg5[%c0_30, %c0_31] : memref<256x256xbf16, #tpu.memory_space<vmem>>, vector<256x256xbf16>
    %96 = vector.extract_strided_slice %0 {offsets = [7, 0], sizes = [1, 256], strides = [1, 1]} : vector<11x256xf32> to vector<1x256xf32>
    %97 = vector.extract_strided_slice %0 {offsets = [8, 0], sizes = [1, 256], strides = [1, 1]} : vector<11x256xf32> to vector<1x256xf32>
    %98 = vector.extract_strided_slice %0 {offsets = [9, 0], sizes = [1, 256], strides = [1, 1]} : vector<11x256xf32> to vector<1x256xf32>
    %99 = arith.truncf %92 : vector<8x256xf32> to vector<8x256xbf16>
    %cst_32 = arith.constant dense<0.000000e+00> : vector<8x256xf32>
    %100 = tpu.matmul %99, %93, %cst_32 {dimension_numbers = #tpu.dot_dimension_numbers<[1], [0], [0], [1], [0, 0, 1, 1], [], []>} : vector<8x256xbf16>, vector<256x256xbf16>, vector<8x256xf32> -> vector<8x256xf32>
    %101 = vector.broadcast %94 : vector<1x256xf32> to vector<8x256xf32>
    %102 = arith.addf %100, %101 : vector<8x256xf32>
    %cst_33 = arith.constant 0.000000e+00 : f32
    %103 = vector.broadcast %cst_33 : f32 to vector<8x256xf32>
    %104 = arith.maximumf %102, %103 : vector<8x256xf32>
    %105 = arith.truncf %104 : vector<8x256xf32> to vector<8x256xbf16>
    %cst_34 = arith.constant dense<0.000000e+00> : vector<8x256xf32>
    %106 = tpu.matmul %105, %95, %cst_34 {dimension_numbers = #tpu.dot_dimension_numbers<[1], [0], [0], [1], [0, 0, 1, 1], [], []>} : vector<8x256xbf16>, vector<256x256xbf16>, vector<8x256xf32> -> vector<8x256xf32>
    %107 = vector.broadcast %96 : vector<1x256xf32> to vector<8x256xf32>
    %108 = arith.addf %106, %107 : vector<8x256xf32>
    %109 = arith.addf %108, %92 : vector<8x256xf32>
    %cst_35 = arith.constant dense<0.000000e+00> : vector<8xf32>
    %110 = vector.multi_reduction <add>, %109, %cst_35 [1] : vector<8x256xf32> to vector<8xf32>
    %111 = vector.shape_cast %110 : vector<8xf32> to vector<8x1xf32>
    %cst_36 = arith.constant 2.560000e+02 : f32
    %112 = vector.broadcast %cst_36 : f32 to vector<8x1xf32>
    %113 = arith.divf %111, %112 : vector<8x1xf32>
    %114 = arith.mulf %109, %109 : vector<8x256xf32>
    %cst_37 = arith.constant dense<0.000000e+00> : vector<8xf32>
    %115 = vector.multi_reduction <add>, %114, %cst_37 [1] : vector<8x256xf32> to vector<8xf32>
    %116 = vector.shape_cast %115 : vector<8xf32> to vector<8x1xf32>
    %cst_38 = arith.constant 2.560000e+02 : f32
    %117 = vector.broadcast %cst_38 : f32 to vector<8x1xf32>
    %118 = arith.divf %116, %117 : vector<8x1xf32>
    %119 = arith.mulf %113, %113 : vector<8x1xf32>
    %120 = arith.subf %118, %119 : vector<8x1xf32>
    %121 = vector.broadcast %113 : vector<8x1xf32> to vector<8x256xf32>
    %122 = arith.subf %109, %121 : vector<8x256xf32>
    %cst_39 = arith.constant 9.99999974E-6 : f32
    %123 = vector.broadcast %cst_39 : f32 to vector<8x1xf32>
    %124 = arith.addf %120, %123 : vector<8x1xf32>
    %125 = math.rsqrt %124 : vector<8x1xf32>
    %126 = vector.broadcast %125 : vector<8x1xf32> to vector<8x256xf32>
    %127 = arith.mulf %122, %126 : vector<8x256xf32>
    %128 = vector.broadcast %97 : vector<1x256xf32> to vector<8x256xf32>
    %129 = arith.mulf %127, %128 : vector<8x256xf32>
    %130 = vector.broadcast %98 : vector<1x256xf32> to vector<8x256xf32>
    %131 = arith.addf %129, %130 : vector<8x256xf32>
    %c0_40 = arith.constant 0 : index
    %c0_41 = arith.constant 0 : index
    %c0_42 = arith.constant 0 : index
    %132 = vector.load %arg1[%c0_40, %c0_41, %c0_42] : memref<1x8x1024xbf16, #tpu.memory_space<vmem>>, vector<1x8x1024xbf16>
    %133 = vector.shape_cast %132 : vector<1x8x1024xbf16> to vector<8x1024xbf16>
    %c0_43 = arith.constant 0 : index
    %c0_44 = arith.constant 0 : index
    %134 = vector.load %arg6[%c0_43, %c0_44] : memref<256x256xbf16, #tpu.memory_space<vmem>>, vector<256x256xbf16>
    %c0_45 = arith.constant 0 : index
    %c0_46 = arith.constant 0 : index
    %135 = vector.load %arg7[%c0_45, %c0_46] : memref<1024x256xbf16, #tpu.memory_space<vmem>>, vector<1024x256xbf16>
    %136 = vector.extract_strided_slice %0 {offsets = [10, 0], sizes = [1, 256], strides = [1, 1]} : vector<11x256xf32> to vector<1x256xf32>
    %137 = arith.truncf %131 : vector<8x256xf32> to vector<8x256xbf16>
    %cst_47 = arith.constant dense<0.000000e+00> : vector<8x256xf32>
    %138 = tpu.matmul %137, %134, %cst_47 {dimension_numbers = #tpu.dot_dimension_numbers<[1], [0], [0], [1], [0, 0, 1, 1], [], []>} : vector<8x256xbf16>, vector<256x256xbf16>, vector<8x256xf32> -> vector<8x256xf32>
    %cst_48 = arith.constant dense<0.000000e+00> : vector<8x256xf32>
    %139 = tpu.matmul %133, %135, %cst_48 {dimension_numbers = #tpu.dot_dimension_numbers<[1], [0], [0], [1], [0, 0, 1, 1], [], []>} : vector<8x1024xbf16>, vector<1024x256xbf16>, vector<8x256xf32> -> vector<8x256xf32>
    %140 = arith.addf %138, %139 : vector<8x256xf32>
    %141 = vector.broadcast %136 : vector<1x256xf32> to vector<8x256xf32>
    %142 = arith.addf %140, %141 : vector<8x256xf32>
    %cst_49 = arith.constant 0.000000e+00 : f32
    %143 = vector.broadcast %cst_49 : f32 to vector<8x256xf32>
    %144 = arith.subf %143, %142 : vector<8x256xf32>
    %145 = math.exp %144 : vector<8x256xf32>
    %cst_50 = arith.constant 1.000000e+00 : f32
    %146 = vector.broadcast %cst_50 : f32 to vector<8x256xf32>
    %147 = arith.addf %146, %145 : vector<8x256xf32>
    %148 = tpu.reciprocal %147 {approx = true} : vector<8x256xf32> -> vector<8x256xf32>
    %149 = arith.mulf %131, %148 : vector<8x256xf32>
    %c0_51 = arith.constant 0 : index
    %c0_52 = arith.constant 0 : index
    %150 = vector.load %arg9[%c0_51, %c0_52] : memref<256x512xbf16, #tpu.memory_space<vmem>>, vector<256x512xbf16>
    %151 = arith.truncf %131 : vector<8x256xf32> to vector<8x256xbf16>
    %cst_53 = arith.constant dense<0.000000e+00> : vector<8x512xf32>
    %152 = tpu.matmul %151, %150, %cst_53 {dimension_numbers = #tpu.dot_dimension_numbers<[1], [0], [0], [1], [0, 0, 1, 1], [], []>} : vector<8x256xbf16>, vector<256x512xbf16>, vector<8x512xf32> -> vector<8x512xf32>
    %153 = vector.extract_strided_slice %152 {offsets = [0, 0], sizes = [8, 256], strides = [1, 1]} : vector<8x512xf32> to vector<8x256xf32>
    %154 = vector.extract_strided_slice %1 {offsets = [0, 0], sizes = [1, 256], strides = [1, 1]} : vector<11x256xf32> to vector<1x256xf32>
    %155 = vector.broadcast %154 : vector<1x256xf32> to vector<8x256xf32>
    %156 = arith.addf %153, %155 : vector<8x256xf32>
    %157 = vector.extract_strided_slice %152 {offsets = [0, 256], sizes = [8, 256], strides = [1, 1]} : vector<8x512xf32> to vector<8x256xf32>
    %158 = vector.extract_strided_slice %1 {offsets = [1, 0], sizes = [1, 256], strides = [1, 1]} : vector<11x256xf32> to vector<1x256xf32>
    %159 = vector.broadcast %158 : vector<1x256xf32> to vector<8x256xf32>
    %160 = arith.addf %157, %159 : vector<8x256xf32>
    %c0_54 = arith.constant 0 : index
    %c0_55 = arith.constant 0 : index
    %161 = vector.load %arg10[%c0_54, %c0_55] : memref<256x256xbf16, #tpu.memory_space<vmem>>, vector<256x256xbf16>
    %162 = vector.extract_strided_slice %1 {offsets = [2, 0], sizes = [1, 256], strides = [1, 1]} : vector<11x256xf32> to vector<1x256xf32>
    %163 = arith.truncf %149 : vector<8x256xf32> to vector<8x256xbf16>
    %cst_56 = arith.constant dense<0.000000e+00> : vector<8x256xf32>
    %164 = tpu.matmul %163, %161, %cst_56 {dimension_numbers = #tpu.dot_dimension_numbers<[1], [0], [0], [1], [0, 0, 1, 1], [], []>} : vector<8x256xbf16>, vector<256x256xbf16>, vector<8x256xf32> -> vector<8x256xf32>
    %165 = vector.broadcast %162 : vector<1x256xf32> to vector<8x256xf32>
    %166 = arith.addf %164, %165 : vector<8x256xf32>
    %c0_57 = arith.constant 0 : index
    %c0_58 = arith.constant 0 : index
    %167 = vector.load %arg11[%c0_57, %c0_58] : memref<256x256xbf16, #tpu.memory_space<vmem>>, vector<256x256xbf16>
    %168 = vector.extract_strided_slice %1 {offsets = [3, 0], sizes = [1, 256], strides = [1, 1]} : vector<11x256xf32> to vector<1x256xf32>
    %169 = vector.extract_strided_slice %1 {offsets = [4, 0], sizes = [1, 256], strides = [1, 1]} : vector<11x256xf32> to vector<1x256xf32>
    %170 = vector.extract_strided_slice %1 {offsets = [5, 0], sizes = [1, 256], strides = [1, 1]} : vector<11x256xf32> to vector<1x256xf32>
    %171 = vector.extract_strided_slice %156 {offsets = [0, 0], sizes = [8, 128], strides = [1, 1]} : vector<8x256xf32> to vector<8x128xf32>
    %172 = arith.truncf %171 : vector<8x128xf32> to vector<8x128xbf16>
    %173 = vector.extract_strided_slice %160 {offsets = [0, 0], sizes = [8, 128], strides = [1, 1]} : vector<8x256xf32> to vector<8x128xf32>
    %174 = arith.truncf %173 : vector<8x128xf32> to vector<8x128xbf16>
    %175 = vector.extract_strided_slice %166 {offsets = [0, 0], sizes = [8, 128], strides = [1, 1]} : vector<8x256xf32> to vector<8x128xf32>
    %176 = arith.truncf %175 : vector<8x128xf32> to vector<8x128xbf16>
    %cst_59 = arith.constant dense<0.000000e+00> : vector<8x8xf32>
    %177 = tpu.matmul %172, %174, %cst_59 {dimension_numbers = #tpu.dot_dimension_numbers<[1], [1], [0], [0], [0, 0, 1, 0], [], []>} : vector<8x128xbf16>, vector<8x128xbf16>, vector<8x8xf32> -> vector<8x8xf32>
    %cst_60 = arith.constant 0.0883883461 : f32
    %178 = vector.broadcast %cst_60 : f32 to vector<8x8xf32>
    %179 = arith.mulf %177, %178 : vector<8x8xf32>
    %cst_61 = arith.constant dense<0xFF800000> : vector<8xf32>
    %180 = vector.multi_reduction <maximumf>, %179, %cst_61 [1] : vector<8x8xf32> to vector<8xf32>
    %181 = vector.shape_cast %180 : vector<8xf32> to vector<8x1xf32>
    %182 = vector.broadcast %181 : vector<8x1xf32> to vector<8x8xf32>
    %183 = arith.subf %179, %182 : vector<8x8xf32>
    %184 = math.exp %183 : vector<8x8xf32>
    %cst_62 = arith.constant dense<0.000000e+00> : vector<8xf32>
    %185 = vector.multi_reduction <add>, %184, %cst_62 [1] : vector<8x8xf32> to vector<8xf32>
    %186 = vector.shape_cast %185 : vector<8xf32> to vector<8x1xf32>
    %187 = tpu.reciprocal %186 {approx = true} : vector<8x1xf32> -> vector<8x1xf32>
    %188 = vector.broadcast %187 : vector<8x1xf32> to vector<8x8xf32>
    %189 = arith.mulf %184, %188 : vector<8x8xf32>
    %190 = arith.truncf %189 : vector<8x8xf32> to vector<8x8xbf16>
    %cst_63 = arith.constant dense<0.000000e+00> : vector<8x128xf32>
    %191 = tpu.matmul %190, %176, %cst_63 {dimension_numbers = #tpu.dot_dimension_numbers<[1], [0], [0], [1], [0, 0, 1, 1], [], []>} : vector<8x8xbf16>, vector<8x128xbf16>, vector<8x128xf32> -> vector<8x128xf32>
    %192 = vector.extract_strided_slice %156 {offsets = [0, 128], sizes = [8, 128], strides = [1, 1]} : vector<8x256xf32> to vector<8x128xf32>
    %193 = arith.truncf %192 : vector<8x128xf32> to vector<8x128xbf16>
    %194 = vector.extract_strided_slice %160 {offsets = [0, 128], sizes = [8, 128], strides = [1, 1]} : vector<8x256xf32> to vector<8x128xf32>
    %195 = arith.truncf %194 : vector<8x128xf32> to vector<8x128xbf16>
    %196 = vector.extract_strided_slice %166 {offsets = [0, 128], sizes = [8, 128], strides = [1, 1]} : vector<8x256xf32> to vector<8x128xf32>
    %197 = arith.truncf %196 : vector<8x128xf32> to vector<8x128xbf16>
    %cst_64 = arith.constant dense<0.000000e+00> : vector<8x8xf32>
    %198 = tpu.matmul %193, %195, %cst_64 {dimension_numbers = #tpu.dot_dimension_numbers<[1], [1], [0], [0], [0, 0, 1, 0], [], []>} : vector<8x128xbf16>, vector<8x128xbf16>, vector<8x8xf32> -> vector<8x8xf32>
    %cst_65 = arith.constant 0.0883883461 : f32
    %199 = vector.broadcast %cst_65 : f32 to vector<8x8xf32>
    %200 = arith.mulf %198, %199 : vector<8x8xf32>
    %cst_66 = arith.constant dense<0xFF800000> : vector<8xf32>
    %201 = vector.multi_reduction <maximumf>, %200, %cst_66 [1] : vector<8x8xf32> to vector<8xf32>
    %202 = vector.shape_cast %201 : vector<8xf32> to vector<8x1xf32>
    %203 = vector.broadcast %202 : vector<8x1xf32> to vector<8x8xf32>
    %204 = arith.subf %200, %203 : vector<8x8xf32>
    %205 = math.exp %204 : vector<8x8xf32>
    %cst_67 = arith.constant dense<0.000000e+00> : vector<8xf32>
    %206 = vector.multi_reduction <add>, %205, %cst_67 [1] : vector<8x8xf32> to vector<8xf32>
    %207 = vector.shape_cast %206 : vector<8xf32> to vector<8x1xf32>
    %208 = tpu.reciprocal %207 {approx = true} : vector<8x1xf32> -> vector<8x1xf32>
    %209 = vector.broadcast %208 : vector<8x1xf32> to vector<8x8xf32>
    %210 = arith.mulf %205, %209 : vector<8x8xf32>
    %211 = arith.truncf %210 : vector<8x8xf32> to vector<8x8xbf16>
    %cst_68 = arith.constant dense<0.000000e+00> : vector<8x128xf32>
    %212 = tpu.matmul %211, %197, %cst_68 {dimension_numbers = #tpu.dot_dimension_numbers<[1], [0], [0], [1], [0, 0, 1, 1], [], []>} : vector<8x8xbf16>, vector<8x128xbf16>, vector<8x128xf32> -> vector<8x128xf32>
    %213 = tpu.concatenate %191, %212 in 1 : vector<8x128xf32>, vector<8x128xf32> -> vector<8x256xf32>
    %214 = arith.truncf %213 : vector<8x256xf32> to vector<8x256xbf16>
    %cst_69 = arith.constant dense<0.000000e+00> : vector<8x256xf32>
    %215 = tpu.matmul %214, %167, %cst_69 {dimension_numbers = #tpu.dot_dimension_numbers<[1], [0], [0], [1], [0, 0, 1, 1], [], []>} : vector<8x256xbf16>, vector<256x256xbf16>, vector<8x256xf32> -> vector<8x256xf32>
    %216 = vector.broadcast %168 : vector<1x256xf32> to vector<8x256xf32>
    %217 = arith.addf %215, %216 : vector<8x256xf32>
    %218 = arith.addf %217, %166 : vector<8x256xf32>
    %cst_70 = arith.constant dense<0.000000e+00> : vector<8xf32>
    %219 = vector.multi_reduction <add>, %218, %cst_70 [1] : vector<8x256xf32> to vector<8xf32>
    %220 = vector.shape_cast %219 : vector<8xf32> to vector<8x1xf32>
    %cst_71 = arith.constant 2.560000e+02 : f32
    %221 = vector.broadcast %cst_71 : f32 to vector<8x1xf32>
    %222 = arith.divf %220, %221 : vector<8x1xf32>
    %223 = arith.mulf %218, %218 : vector<8x256xf32>
    %cst_72 = arith.constant dense<0.000000e+00> : vector<8xf32>
    %224 = vector.multi_reduction <add>, %223, %cst_72 [1] : vector<8x256xf32> to vector<8xf32>
    %225 = vector.shape_cast %224 : vector<8xf32> to vector<8x1xf32>
    %cst_73 = arith.constant 2.560000e+02 : f32
    %226 = vector.broadcast %cst_73 : f32 to vector<8x1xf32>
    %227 = arith.divf %225, %226 : vector<8x1xf32>
    %228 = arith.mulf %222, %222 : vector<8x1xf32>
    %229 = arith.subf %227, %228 : vector<8x1xf32>
    %230 = vector.broadcast %222 : vector<8x1xf32> to vector<8x256xf32>
    %231 = arith.subf %218, %230 : vector<8x256xf32>
    %cst_74 = arith.constant 9.99999974E-6 : f32
    %232 = vector.broadcast %cst_74 : f32 to vector<8x1xf32>
    %233 = arith.addf %229, %232 : vector<8x1xf32>
    %234 = math.rsqrt %233 : vector<8x1xf32>
    %235 = vector.broadcast %234 : vector<8x1xf32> to vector<8x256xf32>
    %236 = arith.mulf %231, %235 : vector<8x256xf32>
    %237 = vector.broadcast %169 : vector<1x256xf32> to vector<8x256xf32>
    %238 = arith.mulf %236, %237 : vector<8x256xf32>
    %239 = vector.broadcast %170 : vector<1x256xf32> to vector<8x256xf32>
    %240 = arith.addf %238, %239 : vector<8x256xf32>
    %c0_75 = arith.constant 0 : index
    %c0_76 = arith.constant 0 : index
    %241 = vector.load %arg12[%c0_75, %c0_76] : memref<256x256xbf16, #tpu.memory_space<vmem>>, vector<256x256xbf16>
    %242 = vector.extract_strided_slice %1 {offsets = [6, 0], sizes = [1, 256], strides = [1, 1]} : vector<11x256xf32> to vector<1x256xf32>
    %c0_77 = arith.constant 0 : index
    %c0_78 = arith.constant 0 : index
    %243 = vector.load %arg13[%c0_77, %c0_78] : memref<256x256xbf16, #tpu.memory_space<vmem>>, vector<256x256xbf16>
    %244 = vector.extract_strided_slice %1 {offsets = [7, 0], sizes = [1, 256], strides = [1, 1]} : vector<11x256xf32> to vector<1x256xf32>
    %245 = vector.extract_strided_slice %1 {offsets = [8, 0], sizes = [1, 256], strides = [1, 1]} : vector<11x256xf32> to vector<1x256xf32>
    %246 = vector.extract_strided_slice %1 {offsets = [9, 0], sizes = [1, 256], strides = [1, 1]} : vector<11x256xf32> to vector<1x256xf32>
    %247 = arith.truncf %240 : vector<8x256xf32> to vector<8x256xbf16>
    %cst_79 = arith.constant dense<0.000000e+00> : vector<8x256xf32>
    %248 = tpu.matmul %247, %241, %cst_79 {dimension_numbers = #tpu.dot_dimension_numbers<[1], [0], [0], [1], [0, 0, 1, 1], [], []>} : vector<8x256xbf16>, vector<256x256xbf16>, vector<8x256xf32> -> vector<8x256xf32>
    %249 = vector.broadcast %242 : vector<1x256xf32> to vector<8x256xf32>
    %250 = arith.addf %248, %249 : vector<8x256xf32>
    %cst_80 = arith.constant 0.000000e+00 : f32
    %251 = vector.broadcast %cst_80 : f32 to vector<8x256xf32>
    %252 = arith.maximumf %250, %251 : vector<8x256xf32>
    %253 = arith.truncf %252 : vector<8x256xf32> to vector<8x256xbf16>
    %cst_81 = arith.constant dense<0.000000e+00> : vector<8x256xf32>
    %254 = tpu.matmul %253, %243, %cst_81 {dimension_numbers = #tpu.dot_dimension_numbers<[1], [0], [0], [1], [0, 0, 1, 1], [], []>} : vector<8x256xbf16>, vector<256x256xbf16>, vector<8x256xf32> -> vector<8x256xf32>
    %255 = vector.broadcast %244 : vector<1x256xf32> to vector<8x256xf32>
    %256 = arith.addf %254, %255 : vector<8x256xf32>
    %257 = arith.addf %256, %240 : vector<8x256xf32>
    %cst_82 = arith.constant dense<0.000000e+00> : vector<8xf32>
    %258 = vector.multi_reduction <add>, %257, %cst_82 [1] : vector<8x256xf32> to vector<8xf32>
    %259 = vector.shape_cast %258 : vector<8xf32> to vector<8x1xf32>
    %cst_83 = arith.constant 2.560000e+02 : f32
    %260 = vector.broadcast %cst_83 : f32 to vector<8x1xf32>
    %261 = arith.divf %259, %260 : vector<8x1xf32>
    %262 = arith.mulf %257, %257 : vector<8x256xf32>
    %cst_84 = arith.constant dense<0.000000e+00> : vector<8xf32>
    %263 = vector.multi_reduction <add>, %262, %cst_84 [1] : vector<8x256xf32> to vector<8xf32>
    %264 = vector.shape_cast %263 : vector<8xf32> to vector<8x1xf32>
    %cst_85 = arith.constant 2.560000e+02 : f32
    %265 = vector.broadcast %cst_85 : f32 to vector<8x1xf32>
    %266 = arith.divf %264, %265 : vector<8x1xf32>
    %267 = arith.mulf %261, %261 : vector<8x1xf32>
    %268 = arith.subf %266, %267 : vector<8x1xf32>
    %269 = vector.broadcast %261 : vector<8x1xf32> to vector<8x256xf32>
    %270 = arith.subf %257, %269 : vector<8x256xf32>
    %cst_86 = arith.constant 9.99999974E-6 : f32
    %271 = vector.broadcast %cst_86 : f32 to vector<8x1xf32>
    %272 = arith.addf %268, %271 : vector<8x1xf32>
    %273 = math.rsqrt %272 : vector<8x1xf32>
    %274 = vector.broadcast %273 : vector<8x1xf32> to vector<8x256xf32>
    %275 = arith.mulf %270, %274 : vector<8x256xf32>
    %276 = vector.broadcast %245 : vector<1x256xf32> to vector<8x256xf32>
    %277 = arith.mulf %275, %276 : vector<8x256xf32>
    %278 = vector.broadcast %246 : vector<1x256xf32> to vector<8x256xf32>
    %279 = arith.addf %277, %278 : vector<8x256xf32>
    %c0_87 = arith.constant 0 : index
    %c0_88 = arith.constant 0 : index
    %280 = vector.load %arg14[%c0_87, %c0_88] : memref<256x256xbf16, #tpu.memory_space<vmem>>, vector<256x256xbf16>
    %c0_89 = arith.constant 0 : index
    %c0_90 = arith.constant 0 : index
    %281 = vector.load %arg15[%c0_89, %c0_90] : memref<256x256xbf16, #tpu.memory_space<vmem>>, vector<256x256xbf16>
    %282 = vector.extract_strided_slice %1 {offsets = [10, 0], sizes = [1, 256], strides = [1, 1]} : vector<11x256xf32> to vector<1x256xf32>
    %283 = arith.truncf %279 : vector<8x256xf32> to vector<8x256xbf16>
    %cst_91 = arith.constant dense<0.000000e+00> : vector<8x256xf32>
    %284 = tpu.matmul %283, %280, %cst_91 {dimension_numbers = #tpu.dot_dimension_numbers<[1], [0], [0], [1], [0, 0, 1, 1], [], []>} : vector<8x256xbf16>, vector<256x256xbf16>, vector<8x256xf32> -> vector<8x256xf32>
    %285 = arith.truncf %149 : vector<8x256xf32> to vector<8x256xbf16>
    %cst_92 = arith.constant dense<0.000000e+00> : vector<8x256xf32>
    %286 = tpu.matmul %285, %281, %cst_92 {dimension_numbers = #tpu.dot_dimension_numbers<[1], [0], [0], [1], [0, 0, 1, 1], [], []>} : vector<8x256xbf16>, vector<256x256xbf16>, vector<8x256xf32> -> vector<8x256xf32>
    %287 = arith.addf %284, %286 : vector<8x256xf32>
    %288 = vector.broadcast %282 : vector<1x256xf32> to vector<8x256xf32>
    %289 = arith.addf %287, %288 : vector<8x256xf32>
    %cst_93 = arith.constant 0.000000e+00 : f32
    %290 = vector.broadcast %cst_93 : f32 to vector<8x256xf32>
    %291 = arith.subf %290, %289 : vector<8x256xf32>
    %292 = math.exp %291 : vector<8x256xf32>
    %cst_94 = arith.constant 1.000000e+00 : f32
    %293 = vector.broadcast %cst_94 : f32 to vector<8x256xf32>
    %294 = arith.addf %293, %292 : vector<8x256xf32>
    %295 = tpu.reciprocal %294 {approx = true} : vector<8x256xf32> -> vector<8x256xf32>
    %296 = arith.mulf %279, %295 : vector<8x256xf32>
    %c0_95 = arith.constant 0 : index
    %c0_96 = arith.constant 0 : index
    %297 = vector.load %arg17[%c0_95, %c0_96] : memref<256x128xbf16, #tpu.memory_space<vmem>>, vector<256x128xbf16>
    %298 = arith.truncf %279 : vector<8x256xf32> to vector<8x256xbf16>
    %cst_97 = arith.constant dense<0.000000e+00> : vector<8x128xf32>
    %299 = tpu.matmul %298, %297, %cst_97 {dimension_numbers = #tpu.dot_dimension_numbers<[1], [0], [0], [1], [0, 0, 1, 1], [], []>} : vector<8x256xbf16>, vector<256x128xbf16>, vector<8x128xf32> -> vector<8x128xf32>
    %300 = vector.extract_strided_slice %299 {offsets = [0, 0], sizes = [8, 64], strides = [1, 1]} : vector<8x128xf32> to vector<8x64xf32>
    %301 = vector.extract_strided_slice %2 {offsets = [0, 0], sizes = [1, 64], strides = [1, 1]} : vector<8x64xf32> to vector<1x64xf32>
    %302 = vector.broadcast %301 : vector<1x64xf32> to vector<8x64xf32>
    %303 = arith.addf %300, %302 : vector<8x64xf32>
    %304 = vector.extract_strided_slice %299 {offsets = [0, 64], sizes = [8, 64], strides = [1, 1]} : vector<8x128xf32> to vector<8x64xf32>
    %305 = vector.extract_strided_slice %2 {offsets = [1, 0], sizes = [1, 64], strides = [1, 1]} : vector<8x64xf32> to vector<1x64xf32>
    %306 = vector.broadcast %305 : vector<1x64xf32> to vector<8x64xf32>
    %307 = arith.addf %304, %306 : vector<8x64xf32>
    %c0_98 = arith.constant 0 : index
    %c0_99 = arith.constant 0 : index
    %308 = vector.load %arg18[%c0_98, %c0_99] : memref<256x64xbf16, #tpu.memory_space<vmem>>, vector<256x64xbf16>
    %309 = vector.extract_strided_slice %2 {offsets = [2, 0], sizes = [1, 64], strides = [1, 1]} : vector<8x64xf32> to vector<1x64xf32>
    %310 = arith.truncf %296 : vector<8x256xf32> to vector<8x256xbf16>
    %cst_100 = arith.constant dense<0.000000e+00> : vector<8x64xf32>
    %311 = tpu.matmul %310, %308, %cst_100 {dimension_numbers = #tpu.dot_dimension_numbers<[1], [0], [0], [1], [0, 0, 1, 1], [], []>} : vector<8x256xbf16>, vector<256x64xbf16>, vector<8x64xf32> -> vector<8x64xf32>
    %312 = vector.broadcast %309 : vector<1x64xf32> to vector<8x64xf32>
    %313 = arith.addf %311, %312 : vector<8x64xf32>
    %c0_101 = arith.constant 0 : index
    %c0_102 = arith.constant 0 : index
    %314 = vector.load %arg19[%c0_101, %c0_102] : memref<64x64xbf16, #tpu.memory_space<vmem>>, vector<64x64xbf16>
    %315 = vector.extract_strided_slice %2 {offsets = [3, 0], sizes = [1, 64], strides = [1, 1]} : vector<8x64xf32> to vector<1x64xf32>
    %316 = vector.extract_strided_slice %2 {offsets = [4, 0], sizes = [1, 64], strides = [1, 1]} : vector<8x64xf32> to vector<1x64xf32>
    %317 = vector.extract_strided_slice %2 {offsets = [5, 0], sizes = [1, 64], strides = [1, 1]} : vector<8x64xf32> to vector<1x64xf32>
    %318 = vector.extract_strided_slice %303 {offsets = [0, 0], sizes = [8, 32], strides = [1, 1]} : vector<8x64xf32> to vector<8x32xf32>
    %319 = arith.truncf %318 : vector<8x32xf32> to vector<8x32xbf16>
    %320 = vector.extract_strided_slice %307 {offsets = [0, 0], sizes = [8, 32], strides = [1, 1]} : vector<8x64xf32> to vector<8x32xf32>
    %321 = arith.truncf %320 : vector<8x32xf32> to vector<8x32xbf16>
    %322 = vector.extract_strided_slice %313 {offsets = [0, 0], sizes = [8, 32], strides = [1, 1]} : vector<8x64xf32> to vector<8x32xf32>
    %323 = arith.truncf %322 : vector<8x32xf32> to vector<8x32xbf16>
    %cst_103 = arith.constant dense<0.000000e+00> : vector<8x8xf32>
    %324 = tpu.matmul %319, %321, %cst_103 {dimension_numbers = #tpu.dot_dimension_numbers<[1], [1], [0], [0], [0, 0, 1, 0], [], []>} : vector<8x32xbf16>, vector<8x32xbf16>, vector<8x8xf32> -> vector<8x8xf32>
    %cst_104 = arith.constant 0.176776692 : f32
    %325 = vector.broadcast %cst_104 : f32 to vector<8x8xf32>
    %326 = arith.mulf %324, %325 : vector<8x8xf32>
    %cst_105 = arith.constant dense<0xFF800000> : vector<8xf32>
    %327 = vector.multi_reduction <maximumf>, %326, %cst_105 [1] : vector<8x8xf32> to vector<8xf32>
    %328 = vector.shape_cast %327 : vector<8xf32> to vector<8x1xf32>
    %329 = vector.broadcast %328 : vector<8x1xf32> to vector<8x8xf32>
    %330 = arith.subf %326, %329 : vector<8x8xf32>
    %331 = math.exp %330 : vector<8x8xf32>
    %cst_106 = arith.constant dense<0.000000e+00> : vector<8xf32>
    %332 = vector.multi_reduction <add>, %331, %cst_106 [1] : vector<8x8xf32> to vector<8xf32>
    %333 = vector.shape_cast %332 : vector<8xf32> to vector<8x1xf32>
    %334 = tpu.reciprocal %333 {approx = true} : vector<8x1xf32> -> vector<8x1xf32>
    %335 = vector.broadcast %334 : vector<8x1xf32> to vector<8x8xf32>
    %336 = arith.mulf %331, %335 : vector<8x8xf32>
    %337 = arith.truncf %336 : vector<8x8xf32> to vector<8x8xbf16>
    %cst_107 = arith.constant dense<0.000000e+00> : vector<8x32xf32>
    %338 = tpu.matmul %337, %323, %cst_107 {dimension_numbers = #tpu.dot_dimension_numbers<[1], [0], [0], [1], [0, 0, 1, 1], [], []>} : vector<8x8xbf16>, vector<8x32xbf16>, vector<8x32xf32> -> vector<8x32xf32>
    %339 = vector.extract_strided_slice %303 {offsets = [0, 32], sizes = [8, 32], strides = [1, 1]} : vector<8x64xf32> to vector<8x32xf32>
    %340 = arith.truncf %339 : vector<8x32xf32> to vector<8x32xbf16>
    %341 = vector.extract_strided_slice %307 {offsets = [0, 32], sizes = [8, 32], strides = [1, 1]} : vector<8x64xf32> to vector<8x32xf32>
    %342 = arith.truncf %341 : vector<8x32xf32> to vector<8x32xbf16>
    %343 = vector.extract_strided_slice %313 {offsets = [0, 32], sizes = [8, 32], strides = [1, 1]} : vector<8x64xf32> to vector<8x32xf32>
    %344 = arith.truncf %343 : vector<8x32xf32> to vector<8x32xbf16>
    %cst_108 = arith.constant dense<0.000000e+00> : vector<8x8xf32>
    %345 = tpu.matmul %340, %342, %cst_108 {dimension_numbers = #tpu.dot_dimension_numbers<[1], [1], [0], [0], [0, 0, 1, 0], [], []>} : vector<8x32xbf16>, vector<8x32xbf16>, vector<8x8xf32> -> vector<8x8xf32>
    %cst_109 = arith.constant 0.176776692 : f32
    %346 = vector.broadcast %cst_109 : f32 to vector<8x8xf32>
    %347 = arith.mulf %345, %346 : vector<8x8xf32>
    %cst_110 = arith.constant dense<0xFF800000> : vector<8xf32>
    %348 = vector.multi_reduction <maximumf>, %347, %cst_110 [1] : vector<8x8xf32> to vector<8xf32>
    %349 = vector.shape_cast %348 : vector<8xf32> to vector<8x1xf32>
    %350 = vector.broadcast %349 : vector<8x1xf32> to vector<8x8xf32>
    %351 = arith.subf %347, %350 : vector<8x8xf32>
    %352 = math.exp %351 : vector<8x8xf32>
    %cst_111 = arith.constant dense<0.000000e+00> : vector<8xf32>
    %353 = vector.multi_reduction <add>, %352, %cst_111 [1] : vector<8x8xf32> to vector<8xf32>
    %354 = vector.shape_cast %353 : vector<8xf32> to vector<8x1xf32>
    %355 = tpu.reciprocal %354 {approx = true} : vector<8x1xf32> -> vector<8x1xf32>
    %356 = vector.broadcast %355 : vector<8x1xf32> to vector<8x8xf32>
    %357 = arith.mulf %352, %356 : vector<8x8xf32>
    %358 = arith.truncf %357 : vector<8x8xf32> to vector<8x8xbf16>
    %cst_112 = arith.constant dense<0.000000e+00> : vector<8x32xf32>
    %359 = tpu.matmul %358, %344, %cst_112 {dimension_numbers = #tpu.dot_dimension_numbers<[1], [0], [0], [1], [0, 0, 1, 1], [], []>} : vector<8x8xbf16>, vector<8x32xbf16>, vector<8x32xf32> -> vector<8x32xf32>
    %360 = tpu.concatenate %338, %359 in 1 : vector<8x32xf32>, vector<8x32xf32> -> vector<8x64xf32>
    %361 = arith.truncf %360 : vector<8x64xf32> to vector<8x64xbf16>
    %cst_113 = arith.constant dense<0.000000e+00> : vector<8x64xf32>
    %362 = tpu.matmul %361, %314, %cst_113 {dimension_numbers = #tpu.dot_dimension_numbers<[1], [0], [0], [1], [0, 0, 1, 1], [], []>} : vector<8x64xbf16>, vector<64x64xbf16>, vector<8x64xf32> -> vector<8x64xf32>
    %363 = vector.broadcast %315 : vector<1x64xf32> to vector<8x64xf32>
    %364 = arith.addf %362, %363 : vector<8x64xf32>
    %365 = arith.addf %364, %313 : vector<8x64xf32>
    %cst_114 = arith.constant dense<0.000000e+00> : vector<8xf32>
    %366 = vector.multi_reduction <add>, %365, %cst_114 [1] : vector<8x64xf32> to vector<8xf32>
    %367 = vector.shape_cast %366 : vector<8xf32> to vector<8x1xf32>
    %cst_115 = arith.constant 6.400000e+01 : f32
    %368 = vector.broadcast %cst_115 : f32 to vector<8x1xf32>
    %369 = arith.divf %367, %368 : vector<8x1xf32>
    %370 = arith.mulf %365, %365 : vector<8x64xf32>
    %cst_116 = arith.constant dense<0.000000e+00> : vector<8xf32>
    %371 = vector.multi_reduction <add>, %370, %cst_116 [1] : vector<8x64xf32> to vector<8xf32>
    %372 = vector.shape_cast %371 : vector<8xf32> to vector<8x1xf32>
    %cst_117 = arith.constant 6.400000e+01 : f32
    %373 = vector.broadcast %cst_117 : f32 to vector<8x1xf32>
    %374 = arith.divf %372, %373 : vector<8x1xf32>
    %375 = arith.mulf %369, %369 : vector<8x1xf32>
    %376 = arith.subf %374, %375 : vector<8x1xf32>
    %377 = vector.broadcast %369 : vector<8x1xf32> to vector<8x64xf32>
    %378 = arith.subf %365, %377 : vector<8x64xf32>
    %cst_118 = arith.constant 9.99999974E-6 : f32
    %379 = vector.broadcast %cst_118 : f32 to vector<8x1xf32>
    %380 = arith.addf %376, %379 : vector<8x1xf32>
    %381 = math.rsqrt %380 : vector<8x1xf32>
    %382 = vector.broadcast %381 : vector<8x1xf32> to vector<8x64xf32>
    %383 = arith.mulf %378, %382 : vector<8x64xf32>
    %384 = vector.broadcast %316 : vector<1x64xf32> to vector<8x64xf32>
    %385 = arith.mulf %383, %384 : vector<8x64xf32>
    %386 = vector.broadcast %317 : vector<1x64xf32> to vector<8x64xf32>
    %387 = arith.addf %385, %386 : vector<8x64xf32>
    %c0_119 = arith.constant 0 : index
    %c0_120 = arith.constant 0 : index
    %388 = vector.load %arg20[%c0_119, %c0_120] : memref<64x64xbf16, #tpu.memory_space<vmem>>, vector<64x64xbf16>
    %389 = vector.extract_strided_slice %2 {offsets = [6, 0], sizes = [1, 64], strides = [1, 1]} : vector<8x64xf32> to vector<1x64xf32>
    %c0_121 = arith.constant 0 : index
    %c0_122 = arith.constant 0 : index
    %390 = vector.load %arg21[%c0_121, %c0_122] : memref<64x64xbf16, #tpu.memory_space<vmem>>, vector<64x64xbf16>
    %391 = vector.extract_strided_slice %2 {offsets = [7, 0], sizes = [1, 64], strides = [1, 1]} : vector<8x64xf32> to vector<1x64xf32>
    %392 = arith.truncf %387 : vector<8x64xf32> to vector<8x64xbf16>
    %cst_123 = arith.constant dense<0.000000e+00> : vector<8x64xf32>
    %393 = tpu.matmul %392, %388, %cst_123 {dimension_numbers = #tpu.dot_dimension_numbers<[1], [0], [0], [1], [0, 0, 1, 1], [], []>} : vector<8x64xbf16>, vector<64x64xbf16>, vector<8x64xf32> -> vector<8x64xf32>
    %394 = vector.broadcast %389 : vector<1x64xf32> to vector<8x64xf32>
    %395 = arith.addf %393, %394 : vector<8x64xf32>
    %cst_124 = arith.constant 0.000000e+00 : f32
    %396 = vector.broadcast %cst_124 : f32 to vector<8x64xf32>
    %397 = arith.maximumf %395, %396 : vector<8x64xf32>
    %398 = arith.truncf %397 : vector<8x64xf32> to vector<8x64xbf16>
    %cst_125 = arith.constant dense<0.000000e+00> : vector<8x64xf32>
    %399 = tpu.matmul %398, %390, %cst_125 {dimension_numbers = #tpu.dot_dimension_numbers<[1], [0], [0], [1], [0, 0, 1, 1], [], []>} : vector<8x64xbf16>, vector<64x64xbf16>, vector<8x64xf32> -> vector<8x64xf32>
    %400 = vector.broadcast %391 : vector<1x64xf32> to vector<8x64xf32>
    %401 = arith.addf %399, %400 : vector<8x64xf32>
    %402 = arith.addf %401, %387 : vector<8x64xf32>
    %c0_126 = arith.constant 0 : index
    %c0_127 = arith.constant 0 : index
    %c0_128 = arith.constant 0 : index
    %403 = vector.load %arg23[%c0_126, %c0_127, %c0_128] : memref<1x8x64xf32, #tpu.memory_space<vmem>>, vector<1x8x64xf32>
    %404 = vector.shape_cast %403 : vector<1x8x64xf32> to vector<8x64xf32>
    %405 = vector.shape_cast %402 : vector<8x64xf32> to vector<1x8x64xf32>
    tpu.vector_store %arg23[%c0_126, %c0_127, %c0_128], %405 {strides = array<i32>} : memref<1x8x64xf32, #tpu.memory_space<vmem>>, vector<1x8x64xf32>,
    return
  }
  func.func @transform_0(%arg0: i32) -> (i32, i32, i32) {
    %c0_i32 = arith.constant 0 : i32
    %c0_i32_0 = arith.constant 0 : i32
    %c0_i32_1 = arith.constant 0 : i32
    return %arg0, %c0_i32, %c0_i32_0 : i32, i32, i32
  }
  func.func @transform_1(%arg0: i32) -> (i32, i32) {
    %c0_i32 = arith.constant 0 : i32
    %c0_i32_0 = arith.constant 0 : i32
    %c0_i32_1 = arith.constant 0 : i32
    return %c0_i32, %c0_i32_0 : i32, i32
  }
  func.func @transform_2(%arg0: i32) -> (i32, i32) {
    %c0_i32 = arith.constant 0 : i32
    %c0_i32_0 = arith.constant 0 : i32
    %c0_i32_1 = arith.constant 0 : i32
    return %c0_i32, %c0_i32_0 : i32, i32
  }
  func.func @transform_3(%arg0: i32) -> (i32, i32) {
    %c0_i32 = arith.constant 0 : i32
    %c0_i32_0 = arith.constant 0 : i32
    %c0_i32_1 = arith.constant 0 : i32
    return %c0_i32, %c0_i32_0 : i32, i32
  }
  func.func @transform_4(%arg0: i32) -> (i32, i32) {
    %c0_i32 = arith.constant 0 : i32
    %c0_i32_0 = arith.constant 0 : i32
    %c0_i32_1 = arith.constant 0 : i32
    return %c0_i32, %c0_i32_0 : i32, i32
  }
  func.func @transform_5(%arg0: i32) -> (i32, i32) {
    %c0_i32 = arith.constant 0 : i32
    %c0_i32_0 = arith.constant 0 : i32
    %c0_i32_1 = arith.constant 0 : i32
    return %c0_i32, %c0_i32_0 : i32, i32
  }
  func.func @transform_6(%arg0: i32) -> (i32, i32) {
    %c0_i32 = arith.constant 0 : i32
    %c0_i32_0 = arith.constant 0 : i32
    %c0_i32_1 = arith.constant 0 : i32
    return %c0_i32, %c0_i32_0 : i32, i32
  }
  func.func @transform_7(%arg0: i32) -> (i32, i32) {
    %c0_i32 = arith.constant 0 : i32
    %c0_i32_0 = arith.constant 0 : i32
    %c0_i32_1 = arith.constant 0 : i32
    return %c0_i32, %c0_i32_0 : i32, i32
  }
  func.func @transform_8(%arg0: i32) -> (i32, i32) {
    %c0_i32 = arith.constant 0 : i32
    %c0_i32_0 = arith.constant 0 : i32
    %c0_i32_1 = arith.constant 0 : i32
    return %c0_i32, %c0_i32_0 : i32, i32
  }
  func.func @transform_9(%arg0: i32) -> (i32, i32) {
    %c0_i32 = arith.constant 0 : i32
    %c0_i32_0 = arith.constant 0 : i32
    %c0_i32_1 = arith.constant 0 : i32
    return %c0_i32, %c0_i32_0 : i32, i32
  }
  func.func @transform_10(%arg0: i32) -> (i32, i32) {
    %c0_i32 = arith.constant 0 : i32
    %c0_i32_0 = arith.constant 0 : i32
    %c0_i32_1 = arith.constant 0 : i32
    return %c0_i32, %c0_i32_0 : i32, i32
  }
  func.func @transform_11(%arg0: i32) -> (i32, i32) {
    %c0_i32 = arith.constant 0 : i32
    %c0_i32_0 = arith.constant 0 : i32
    %c0_i32_1 = arith.constant 0 : i32
    return %c0_i32, %c0_i32_0 : i32, i32
  }
  func.func @transform_12(%arg0: i32) -> (i32, i32) {
    %c0_i32 = arith.constant 0 : i32
    %c0_i32_0 = arith.constant 0 : i32
    %c0_i32_1 = arith.constant 0 : i32
    return %c0_i32, %c0_i32_0 : i32, i32
  }
  func.func @transform_13(%arg0: i32) -> (i32, i32) {
    %c0_i32 = arith.constant 0 : i32
    %c0_i32_0 = arith.constant 0 : i32
    %c0_i32_1 = arith.constant 0 : i32
    return %c0_i32, %c0_i32_0 : i32, i32
  }
  func.func @transform_14(%arg0: i32) -> (i32, i32) {
    %c0_i32 = arith.constant 0 : i32
    %c0_i32_0 = arith.constant 0 : i32
    %c0_i32_1 = arith.constant 0 : i32
    return %c0_i32, %c0_i32_0 : i32, i32
  }
  func.func @transform_15(%arg0: i32) -> (i32, i32) {
    %c0_i32 = arith.constant 0 : i32
    %c0_i32_0 = arith.constant 0 : i32
    %c0_i32_1 = arith.constant 0 : i32
    return %c0_i32, %c0_i32_0 : i32, i32
  }
  func.func @transform_16(%arg0: i32) -> (i32, i32) {
    %c0_i32 = arith.constant 0 : i32
    %c0_i32_0 = arith.constant 0 : i32
    %c0_i32_1 = arith.constant 0 : i32
    return %c0_i32, %c0_i32_0 : i32, i32
  }
  func.func @transform_17(%arg0: i32) -> (i32, i32) {
    %c0_i32 = arith.constant 0 : i32
    %c0_i32_0 = arith.constant 0 : i32
    %c0_i32_1 = arith.constant 0 : i32
    return %c0_i32, %c0_i32_0 : i32, i32
  }
  func.func @transform_18(%arg0: i32) -> (i32, i32) {
    %c0_i32 = arith.constant 0 : i32
    %c0_i32_0 = arith.constant 0 : i32
    %c0_i32_1 = arith.constant 0 : i32
    return %c0_i32, %c0_i32_0 : i32, i32
  }
  func.func @transform_19(%arg0: i32) -> (i32, i32) {
    %c0_i32 = arith.constant 0 : i32
    %c0_i32_0 = arith.constant 0 : i32
    %c0_i32_1 = arith.constant 0 : i32
    return %c0_i32, %c0_i32_0 : i32, i32
  }
  func.func @transform_20(%arg0: i32) -> (i32, i32) {
    %c0_i32 = arith.constant 0 : i32
    %c0_i32_0 = arith.constant 0 : i32
    %c0_i32_1 = arith.constant 0 : i32
    return %c0_i32, %c0_i32_0 : i32, i32
  }
  func.func @transform_21(%arg0: i32) -> (i32, i32) {
    %c0_i32 = arith.constant 0 : i32
    %c0_i32_0 = arith.constant 0 : i32
    %c0_i32_1 = arith.constant 0 : i32
    return %c0_i32, %c0_i32_0 : i32, i32
  }
  func.func @transform_22(%arg0: i32) -> (i32, i32, i32) {
    %c0_i32 = arith.constant 0 : i32
    %c0_i32_0 = arith.constant 0 : i32
    %c0_i32_1 = arith.constant 0 : i32
    return %arg0, %c0_i32, %c0_i32_0 : i32, i32, i32
  }
}

</mosaic_0001>

<bundles_post_ra>
// kernel: sem_attention5ln.1
= control target key start
LH: loop header
LB: loop body
LE: loop exit
PB: predicated region body
PF: predicated region fallthrough
CT: control target
= control target key end

     0   :  { %s13962_s0 = inlined_call_operand.vmem [shape: bf16[2,8,1024], index: 0, kind: input, shape index: {}]   ;;  %s13963_s1 = inlined_call_operand.hbm [shape: bf16[1024,768], index: 1, kind: input, shape index: {}]   ;;  %s13964_s2 = inlined_call_operand.hbm [shape: bf16[256,256], index: 2, kind: input, shape index: {}]   ;;  %s13965_s3 = inlined_call_operand.hbm [shape: bf16[256,256], index: 3, kind: input, shape index: {}]   ;;  %s13966_s4 = inlined_call_operand.hbm [shape: bf16[256,256], index: 4, kind: input, shape index: {}]   ;;  %s13967_s5 = inlined_call_operand.hbm [shape: bf16[256,256], index: 5, kind: input, shape index: {}]   ;;  %s13968_s6 = inlined_call_operand.hbm [shape: bf16[1024,256], index: 6, kind: input, shape index: {}]   ;;  %s13969_s7 = inlined_call_operand.hbm [shape: f32[11,256], index: 7, kind: input, shape index: {}]   ;;  %s13970_s8 = inlined_call_operand.hbm [shape: bf16[256,512], index: 8, kind: input, shape index: {}]   ;;  %s13971_s9 = inlined_call_operand.hbm [shape: bf16[256,256], index: 9, kind: input, shape index: {}]   ;;  %s13972_s10 = inlined_call_operand.hbm [shape: bf16[256,256], index: 10, kind: input, shape index: {}]   ;;  %s13973_s11 = inlined_call_operand.hbm [shape: bf16[256,256], index: 11, kind: input, shape index: {}]   ;;  %s13974_s12 = inlined_call_operand.hbm [shape: bf16[256,256], index: 12, kind: input, shape index: {}]   ;;  %s13975_s13 = inlined_call_operand.hbm [shape: bf16[256,256], index: 13, kind: input, shape index: {}]   ;;  %s13976_s14 = inlined_call_operand.hbm [shape: bf16[256,256], index: 14, kind: input, shape index: {}]   ;;  %s13977_s15 = inlined_call_operand.hbm [shape: f32[11,256], index: 15, kind: input, shape index: {}]   ;;  %s13978_s16 = inlined_call_operand.hbm [shape: bf16[256,128], index: 16, kind: input, shape index: {}]   ;;  %s13979_s17 = inlined_call_operand.vmem [shape: bf16[256,64], index: 17, kind: input, shape index: {}]   ;;  %s13980_s18 = inlined_call_operand.hbm [shape: bf16[64,64], index: 18, kind: input, shape index: {}]   ;;  %s13981_s19 = inlined_call_operand.hbm [shape: bf16[64,64], index: 19, kind: input, shape index: {}]   ;;  %s13982_s20 = inlined_call_operand.hbm [shape: bf16[64,64], index: 20, kind: input, shape index: {}]   ;;  %s13983_s21 = inlined_call_operand.hbm [shape: f32[8,64], index: 21, kind: input, shape index: {}]   ;;  %s13984_s22 = inlined_call_operand.hbm [shape: f32[2,8,64], index: 22, kind: output, shape index: {}]  }
   0x1   :  { %14008 = sst [smem:[#allocation55_spill]] %s13962_s0 }
   0x2   :  { %14009 = sst [smem:[#allocation56_spill]] %s13963_s1 }
   0x3   :  { %14010 = sst [smem:[#allocation57_spill]] %s13964_s2 }
   0x4   :  { %14011 = sst [smem:[#allocation58_spill]] %s13965_s3 }
   0x5   :  { %14012 = sst [smem:[#allocation59_spill]] %s13966_s4 }
   0x6   :  { %14013 = sst [smem:[#allocation60_spill]] %s13967_s5 }
   0x7   :  { %14014 = sst [smem:[#allocation61_spill]] %s13968_s6 }
   0x8   :  { %14015 = sst [smem:[#allocation62_spill]] %s13984_s22 }
   0x9   :  { %27 = vsyncpa [#allocation3], 0 }
   0xa   :  { %28 = vsyncpa [#allocation6], 0 }
   0xb   :  { %29 = vsyncpa [#allocation9], 0 }
   0xc   :  { %30 = vsyncpa [#allocation12], 0 }
   0xd   :  { %31 = vsyncpa [#allocation15], 0 }
   0xe   :  { %32 = vsyncpa [#allocation18], 0 }
   0xf   :  { %33 = vsyncpa [#allocation21], 0 }
  0x10   :  { %34 = vsyncpa [#allocation24], 0 }
  0x11   :  { %35 = vsyncpa [#allocation27], 0 }
  0x12   :  { %36 = vsyncpa [#allocation30], 0 }
  0x13   :  { %37 = vsyncpa [#allocation33], 0 }
  0x14   :  { %38 = vsyncpa [#allocation4], 0 }
  0x15   :  { %40 = vsyncpa [#allocation4 + $0x1], 0  ;;  %s13081_s3 = smov 0   ;;  %s13083_s28 = smov 0  }
  0x16   :  { %s13085_s29 = smov 0   ;;  %s13087_s30 = smov 0  }
  0x17 LB: > { %14016 = sst [smem:[#allocation47_spill]] %s12918_s3  ;;  %s13102_s4 = sadd.s32 4294967295, %s12930_s30   ;;  %s12930_s30 = sphi %s13087_s30, %s14070_s30   ;;  %s12926_s29 = sphi %s13085_s29, %s14073_s29   ;;  %s12922_s28 = sphi %s13083_s28, %s14072_s28   ;;  %s12918_s3 = sphi %s13081_s3, %s14071_s3  }
  0x18   : > { %14017 = sst [smem:[#allocation48_spill]] %s12922_s28  ;;  %s9403_s0 = sadd.s32 4294967294, %s12930_s30  }
  0x19   : > { %14018 = sst [smem:[#allocation49_spill]] %s12926_s29  ;;  %s13106_s23 = sadd.s32 1, %s12930_s30  }
  0x1a   : > { %14019 = sst [smem:[#allocation50_spill]] %s12930_s30  ;;  %s520_s1 = sadd.s32 1, %s12926_s29 }
  0x1b   : > { %14020 = sst [smem:[#allocation51_spill]] %s13106_s23  ;;  %s517_s5 = ssub.s32 %s12930_s30, %s13106_s23 }
  0x1c   : > { %p530_p0 = scmp.ne.s32.totalorder %s12926_s29, %s12922_s28  ;;  %p518_p1 = scmp.eq.s32.totalorder %s517_s5, 0 }
  0x1d   : > { %p531_p2 = scmp.eq.s32.totalorder %s13102_s4, 1  ;;  %p536_p3 = scmp.ne.s32.totalorder %s12922_s28, %s12918_s3 }
  0x1e   : > { %p537_p4 = scmp.eq.s32.totalorder %s9403_s0, 1  ;;  %p9404_p7 = scmp.ge.s32.totalorder %s12930_s30, 1 }
  0x1f   : > { %s13117_s24 = scalar_select %p518_p1, %s12926_s29, %s520_s1  }
  0x20   : > { %p13119_p5 = por %p531_p2, %p530_p0  ;;  %p13123_p6 = por %p537_p4, %p536_p3 }
  0x21   : > { %14021 = sst [smem:[#allocation52_spill]] %s13117_s24  ;;  %p544_p8 = scmp.lt.s32.totalorder %s12930_s30, 3 }
  0x22   : > { %s14022_s6 = scalar_select %p13119_p5, 1, 0 }
  0x23   : > { %s14024_s25 = scalar_select %p13123_p6, 1, 0 }
  0x24   : > { %14023 = sst [smem:[#allocation53_spill]] %s14022_s6  ;;  %p13995_p9 = scmp.eq.s32.totalorder %s13102_s4, 0 }
  0x25   : > { %14025 = sst [smem:[#allocation54_spill]] %s14024_s25  ;;  %p13130_p10 = pnand %p9404_p7, %p544_p8 }
  0x26   : > { %s12932_s2 = smov [#allocation5]   ;;  %s12933_s1 = smov [#allocation8]  }
  0x27   : > { %s569_s27 = sshll.u32 %s12932_s2, 4  ;;  %p10687_p11 = pneg %p13130_p10  ;;  %s570_s27 = int_to_ptr.vmem [resolvable:$true] %s569_s27 }
  0x28   : > { %s595_s5 = sshll.u32 %s12933_s1, 4  ;;  %s12934_s24 = smov [#allocation11]   ;;  %s596_s5 = int_to_ptr.vmem [resolvable:$true] %s595_s5 }
  0x29   : > { %p13138_p12 = pnand %p13995_p9, %p10687_p11  ;;  %s621_s29 = sshll.u32 %s12934_s24, 4  ;;  %s622_s29 = int_to_ptr.vmem [resolvable:$true] %s621_s29 }
  0x2a   : > { %s12317_s2 = scalar_lea.vmem %s570_s27, 4096  ;;  %p12325_p3 = scmp.lt.s32.totalorder %s570_s27, %s570_s27 }
  0x2b   : > { %p13144_p13 = pneg %p13138_p12  ;;  %p12318_p0 = scmp.ne.s32.totalorder %s570_s27, %s12317_s2 }
  0x2c   : > { %p12326_p4 = scmp.lt.s32.totalorder %s12317_s2, %s12317_s2 }
  0x2d   : > { %p12320_p1 = pnand %p12318_p0, %p13144_p13 }
  0x2e   : > { %p12327_p7 = por %p12326_p4, %p12325_p3 }
  0x2f   : > { %p12321_p2 = pneg %p12320_p1 }
  0x31   : > { %p12328_p8 = pnand %p12327_p7, %p12321_p2 }
  0x33   : > { %12331 = shalt.err (!%p12328_p8)
}
  0x34   : > { %s14000_s1 = smov 128   ;;  %s14006_s24 = smov 8  }
  0x35   : > { %s14029_s30 = sld [smem:[#allocation57_spill]]  ;;  %s12343_s22 = scalar_lea.vmem %s596_s5, 4096 }
  0x36   : > { %p12344_p11 = scmp.ne.s32.totalorder %s596_s5, %s12343_s22  ;;  %p12351_p3 = scmp.lt.s32.totalorder %s596_s5, %s596_s5 }
  0x37   : > { %p12352_p2 = scmp.lt.s32.totalorder %s12343_s22, %s12343_s22 }
  0x38   : > { %p12346_p0 = pnand %p12344_p11, %p13144_p13 }
  0x39   : > { %p12353_p4 = por %p12352_p2, %p12351_p3 }
  0x3a   : > { %p12347_p1 = pneg %p12346_p0 }
  0x3b   : > { %10693 = dma.hbm_to_vmem [thread:$0]  (!%p13138_p12), %s14029_s30, 4096, %s570_s27, [#allocation6], %s14000_s1, %s14000_s1, %s14006_s24  }
  0x3c   : > { %p12354_p7 = pnand %p12353_p4, %p12347_p1 }
  0x3e   : > { %12357 = shalt.err (!%p12354_p7)
}
  0x3f   : > { %s14030_s28 = sld [smem:[#allocation59_spill]]  ;;  %s12369_s3 = scalar_lea.vmem %s622_s29, 16384 }
  0x40   : > { %p12370_p8 = scmp.ne.s32.totalorder %s622_s29, %s12369_s3  ;;  %p12377_p9 = scmp.lt.s32.totalorder %s622_s29, %s622_s29 }
  0x41   : > { %p12378_p3 = scmp.lt.s32.totalorder %s12369_s3, %s12369_s3 }
  0x42   : > { %p12372_p11 = pnand %p12370_p8, %p13144_p13 }
  0x43   : > { %p12379_p1 = por %p12378_p3, %p12377_p9 }
  0x44   : > { %p12373_p0 = pneg %p12372_p11 }
  0x45   : > { %10699 = dma.hbm_to_vmem [thread:$0]  (!%p13138_p12), %s14030_s28, 4096, %s596_s5, [#allocation9], %s14000_s1, %s14000_s1, %s14006_s24  }
  0x46   : > { %p12380_p2 = pnand %p12379_p1, %p12373_p0 }
  0x48   : > { %12383 = shalt.err (!%p12380_p2)
}
  0x49   : > { %s14031_s6 = sld [smem:[#allocation61_spill]]  ;;  %s12937_s28 = smov [#allocation14]  }
  0x4a   : > { %s647_s25 = sshll.u32 %s12937_s28, 4  ;;  %s12938_s27 = smov [#allocation17]   ;;  %s648_s25 = int_to_ptr.vmem [resolvable:$true] %s647_s25 }
  0x4b   : > { %s673_s5 = sshll.u32 %s12938_s27, 4  ;;  %s12395_s2 = scalar_lea.vmem %s648_s25, 8192  ;;  %s674_s5 = int_to_ptr.vmem [resolvable:$true] %s673_s5 }
  0x4c   : > { %p12396_p4 = scmp.ne.s32.totalorder %s648_s25, %s12395_s2  ;;  %p12403_p8 = scmp.lt.s32.totalorder %s648_s25, %s648_s25 }
  0x4d   : > { %p12404_p11 = scmp.lt.s32.totalorder %s12395_s2, %s12395_s2 }
  0x4e   : > { %p12398_p9 = pnand %p12396_p4, %p13144_p13 }
  0x4f   : > { %10705 = dma.hbm_to_vmem [thread:$0]  (!%p13138_p12), %s14031_s6, 16384, %s622_s29, [#allocation12], %s14000_s1, %s14000_s1, %s14006_s24  }
  0x50   : > { %p12399_p7 = pneg %p12398_p9  ;;  %p12405_p0 = por %p12404_p11, %p12403_p8 }
  0x52   : > { %p12406_p3 = pnand %p12405_p0, %p12399_p7 }
  0x54   : > { %12409 = shalt.err (!%p12406_p3)
}
  0x55   : > { %s13996_s3 = smov 256   ;;  %s13998_s22 = smov 16  }
  0x56   : > { %10711 = dma.hbm_to_vmem [thread:$0]  (!%p13138_p12), %s13970_s8, 8192, %s648_s25, [#allocation15], %s13996_s3, %s13996_s3, %s13998_s22  }
  0x57   : > { %s12421_s6 = scalar_lea.vmem %s674_s5, 4096  ;;  %p12429_p9 = scmp.lt.s32.totalorder %s674_s5, %s674_s5 }
  0x58   : > { %p12422_p1 = scmp.ne.s32.totalorder %s674_s5, %s12421_s6  ;;  %p12430_p7 = scmp.lt.s32.totalorder %s12421_s6, %s12421_s6 }
  0x5a   : > { %p12424_p2 = pnand %p12422_p1, %p13144_p13  ;;  %p12431_p8 = por %p12430_p7, %p12429_p9 }
  0x5c   : > { %p12425_p4 = pneg %p12424_p2 }
  0x5e   : > { %p12432_p11 = pnand %p12431_p8, %p12425_p4 }
  0x60   : > { %12435 = shalt.err (!%p12432_p11)
}
  0x61   : > { %10717 = dma.hbm_to_vmem [thread:$0]  (!%p13138_p12), %s13972_s10, 4096, %s674_s5, [#allocation18], %s14000_s1, %s14000_s1, %s14006_s24  }
  0x62   : > { %s12941_s25 = smov [#allocation20]   ;;  %s12942_s29 = smov [#allocation23]  }
  0x63   : > { %s699_s2 = sshll.u32 %s12941_s25, 4  ;;  %s725_s30 = sshll.u32 %s12942_s29, 4  ;;  %s700_s2 = int_to_ptr.vmem [resolvable:$true] %s699_s2  ;;  %s726_s30 = int_to_ptr.vmem [resolvable:$true] %s725_s30 }
  0x64   : > { %s12447_s3 = scalar_lea.vmem %s700_s2, 4096  ;;  %p12455_p2 = scmp.lt.s32.totalorder %s700_s2, %s700_s2 }
  0x65   : > { %p12448_p0 = scmp.ne.s32.totalorder %s700_s2, %s12447_s3  ;;  %p12456_p4 = scmp.lt.s32.totalorder %s12447_s3, %s12447_s3 }
  0x67   : > { %p12450_p3 = pnand %p12448_p0, %p13144_p13  ;;  %p12457_p9 = por %p12456_p4, %p12455_p2 }
  0x69   : > { %p12451_p1 = pneg %p12450_p3 }
  0x6b   : > { %p12458_p7 = pnand %p12457_p9, %p12451_p1 }
  0x6d   : > { %12461 = shalt.err (!%p12458_p7)
}
  0x6e   : > { %10723 = dma.hbm_to_vmem [thread:$0]  (!%p13138_p12), %s13974_s12, 4096, %s700_s2, [#allocation21], %s14000_s1, %s14000_s1, %s14006_s24  }
  0x6f   : > { %s12473_s28 = scalar_lea.vmem %s726_s30, 4096  ;;  %p12481_p3 = scmp.lt.s32.totalorder %s726_s30, %s726_s30 }
  0x70   : > { %p12474_p8 = scmp.ne.s32.totalorder %s726_s30, %s12473_s28  ;;  %p12482_p2 = scmp.lt.s32.totalorder %s12473_s28, %s12473_s28 }
  0x72   : > { %p12476_p11 = pnand %p12474_p8, %p13144_p13  ;;  %p12483_p1 = por %p12482_p2, %p12481_p3 }
  0x74   : > { %p12477_p0 = pneg %p12476_p11 }
  0x76   : > { %p12484_p4 = pnand %p12483_p1, %p12477_p0 }
  0x78   : > { %12487 = shalt.err (!%p12484_p4)
}
  0x79   : > { %10729 = dma.hbm_to_vmem [thread:$0]  (!%p13138_p12), %s13976_s14, 4096, %s726_s30, [#allocation24], %s14000_s1, %s14000_s1, %s14006_s24  }
  0x7a   : > { %s12943_s25 = smov [#allocation26]  }
  0x7b   : > { %s751_s2 = sshll.u32 %s12943_s25, 4  ;;  %s752_s2 = int_to_ptr.vmem [resolvable:$true] %s751_s2 }
  0x7c   : > { %s12499_s29 = scalar_lea.vmem %s752_s2, 2048  ;;  %p12507_p11 = scmp.lt.s32.totalorder %s752_s2, %s752_s2 }
  0x7d   : > { %p12500_p9 = scmp.ne.s32.totalorder %s752_s2, %s12499_s29  ;;  %p12508_p0 = scmp.lt.s32.totalorder %s12499_s29, %s12499_s29 }
  0x7f   : > { %p12502_p7 = pnand %p12500_p9, %p13144_p13  ;;  %p12509_p3 = por %p12508_p0, %p12507_p11 }
  0x81   : > { %p12503_p8 = pneg %p12502_p7 }
  0x83   : > { %p12510_p2 = pnand %p12509_p3, %p12503_p8 }
  0x85   : > { %12513 = shalt.err (!%p12510_p2)
}
  0x86   : > { %s14002_s5 = smov 64   ;;  %s14004_s6 = smov 4  }
  0x87   : > { %10735 = dma.hbm_to_vmem [thread:$0]  (!%p13138_p12), %s13978_s16, 2048, %s752_s2, [#allocation27], %s14002_s5, %s14002_s5, %s14004_s6  }
  0x88   : > { %s12946_s3 = smov [#allocation29]   ;;  %s12947_s25 = smov [#allocation2]  }
  0x89   : > { %s780_s27 = sshll.u32 %s12946_s3, 4  ;;  %s556_s22 = sshll.u32 %s12947_s25, 4  ;;  %s781_s27 = int_to_ptr.vmem [resolvable:$true] %s780_s27  ;;  %s557_s22 = int_to_ptr.vmem [resolvable:$true] %s556_s22 }
  0x8a   : > { %s12525_s29 = scalar_lea.vmem %s781_s27, 512  ;;  %p12533_p7 = scmp.lt.s32.totalorder %s781_s27, %s781_s27 }
  0x8b   : > { %p12526_p1 = scmp.ne.s32.totalorder %s781_s27, %s12525_s29  ;;  %p12534_p8 = scmp.lt.s32.totalorder %s12525_s29, %s12525_s29 }
  0x8d   : > { %p12528_p4 = pnand %p12526_p1, %p13144_p13  ;;  %p12535_p11 = por %p12534_p8, %p12533_p7 }
  0x8f   : > { %p12529_p9 = pneg %p12528_p4 }
  0x91   : > { %p12536_p0 = pnand %p12535_p11, %p12529_p9 }
  0x93   : > { %12539 = shalt.err (!%p12536_p0)
}
  0x94   : > { %10741 = dma.hbm_to_vmem [thread:$0]  (!%p13138_p12), %s13981_s19, 512, %s781_s27, [#allocation30], %s14002_s5, %s14002_s5, %s14004_s6  }
  0x95   : > { %s12551_s28 = scalar_lea.vmem %s557_s22, 49152  ;;  %p12559_p4 = scmp.lt.s32.totalorder %s557_s22, %s557_s22 }
  0x96   : > { %p12552_p3 = scmp.ne.s32.totalorder %s557_s22, %s12551_s28  ;;  %p12560_p6 = scmp.lt.s32.totalorder %s12551_s28, %s12551_s28 }
  0x98   : > { %p12554_p2 = pnand %p12552_p3, %p13144_p13  ;;  %p12561_p7 = por %p12560_p6, %p12559_p4 }
  0x9a   : > { %p12555_p1 = pneg %p12554_p2 }
  0x9c   : > { %p12562_p9 = pnand %p12561_p7, %p12555_p1 }
  0x9e   : > { %12565 = shalt.err (!%p12562_p9)
}
  0x9f   : > { %s12948_s3 = smov 384   ;;  %s12949_s25 = smov 24  }
  0xa0   : > { %s14032_s2 = sld [smem:[#allocation56_spill]]  ;;  %s12950_s27 = smov [#allocation7]  }
  0xa1   : > { %s582_s30 = sshll.u32 %s12950_s27, 4  ;;  %s12951_s5 = smov [#allocation10]   ;;  %s583_s30 = int_to_ptr.vmem [resolvable:$true] %s582_s30 }
  0xa2   : > { %s608_s6 = sshll.u32 %s12951_s5, 4  ;;  %s12577_s24 = scalar_lea.vmem %s583_s30, 4096  ;;  %s609_s6 = int_to_ptr.vmem [resolvable:$true] %s608_s6 }
  0xa3   : > { %p12578_p8 = scmp.ne.s32.totalorder %s583_s30, %s12577_s24  ;;  %p12585_p0 = scmp.lt.s32.totalorder %s583_s30, %s583_s30 }
  0xa4   : > { %p12586_p3 = scmp.lt.s32.totalorder %s12577_s24, %s12577_s24 }
  0xa5   : > { %p12580_p6 = pnand %p12578_p8, %p13144_p13 }
  0xa6   : > { %10690 = dma.hbm_to_vmem [thread:$0]  (!%p13138_p12), %s14032_s2, 49152, %s557_s22, [#allocation3], %s12948_s3, %s12948_s3, %s12949_s25  }
  0xa7   : > { %p12581_p11 = pneg %p12580_p6  ;;  %p12587_p2 = por %p12586_p3, %p12585_p0 }
  0xa9   : > { %p12588_p1 = pnand %p12587_p2, %p12581_p11 }
  0xab   : > { %12591 = shalt.err (!%p12588_p1)
}
  0xac   : > { %s14033_s1 = smov 8   ;;  %s14034_s22 = smov 128  }
  0xad   : > { %s14035_s5 = sld [smem:[#allocation58_spill]]  ;;  %s12603_s25 = scalar_lea.vmem %s609_s6, 4096 }
  0xae   : > { %p12604_p4 = scmp.ne.s32.totalorder %s609_s6, %s12603_s25  ;;  %p12611_p8 = scmp.lt.s32.totalorder %s609_s6, %s609_s6 }
  0xaf   : > { %p12612_p6 = scmp.lt.s32.totalorder %s12603_s25, %s12603_s25 }
  0xb0   : > { %p12606_p7 = pnand %p12604_p4, %p13144_p13 }
  0xb1   : > { %p12613_p0 = por %p12612_p6, %p12611_p8 }
  0xb2   : > { %p12607_p9 = pneg %p12606_p7 }
  0xb3   : > { %10696 = dma.hbm_to_vmem [thread:$0]  (!%p13138_p12), %s14035_s5, 4096, %s583_s30, [#allocation6], %s14034_s22, %s14034_s22, %s14033_s1  }
  0xb4   : > { %p12614_p11 = pnand %p12613_p0, %p12607_p9 }
  0xb6   : > { %12617 = shalt.err (!%p12614_p11)
}
  0xb7   : > { %s14036_s2 = sld [smem:[#allocation60_spill]]  ;;  %s12952_s27 = smov [#allocation13]  }
  0xb8   : > { %s634_s30 = sshll.u32 %s12952_s27, 4  ;;  %s12953_s28 = smov [#allocation16]   ;;  %s635_s30 = int_to_ptr.vmem [resolvable:$true] %s634_s30 }
  0xb9   : > { %s660_s3 = sshll.u32 %s12953_s28, 4  ;;  %s12629_s5 = scalar_lea.vmem %s635_s30, 512  ;;  %s661_s3 = int_to_ptr.vmem [resolvable:$true] %s660_s3 }
  0xba   : > { %p12630_p3 = scmp.ne.s32.totalorder %s635_s30, %s12629_s5  ;;  %p12637_p4 = scmp.lt.s32.totalorder %s635_s30, %s635_s30 }
  0xbb   : > { %p12638_p7 = scmp.lt.s32.totalorder %s12629_s5, %s12629_s5 }
  0xbc   : > { %p12632_p2 = pnand %p12630_p3, %p13144_p13 }
  0xbd   : > { %10702 = dma.hbm_to_vmem [thread:$0]  (!%p13138_p12), %s14036_s2, 4096, %s609_s6, [#allocation9], %s14034_s22, %s14034_s22, %s14033_s1  }
  0xbe   : > { %p12633_p1 = pneg %p12632_p2  ;;  %p12639_p9 = por %p12638_p7, %p12637_p4 }
  0xc0   : > { %p12640_p8 = pnand %p12639_p9, %p12633_p1 }
  0xc2   : > { %12643 = shalt.err (!%p12640_p8)
}
  0xc3   : > { %s14037_s25 = smov 16   ;;  %s14038_s6 = smov 256  }
  0xc4   : > { %10708 = dma.hbm_to_vmem [thread:$0]  (!%p13138_p12), %s13969_s7, 512, %s635_s30, [#allocation12], %s14038_s6, %s14038_s6, %s14037_s25  }
  0xc5   : > { %s12655_s2 = scalar_lea.vmem %s661_s3, 4096  ;;  %p12663_p3 = scmp.lt.s32.totalorder %s661_s3, %s661_s3 }
  0xc6   : > { %p12656_p6 = scmp.ne.s32.totalorder %s661_s3, %s12655_s2  ;;  %p12664_p2 = scmp.lt.s32.totalorder %s12655_s2, %s12655_s2 }
  0xc8   : > { %p12658_p0 = pnand %p12656_p6, %p13144_p13  ;;  %p12665_p4 = por %p12664_p2, %p12663_p3 }
  0xca   : > { %p12659_p11 = pneg %p12658_p0 }
  0xcc   : > { %p12666_p1 = pnand %p12665_p4, %p12659_p11 }
  0xce   : > { %12669 = shalt.err (!%p12666_p1)
}
  0xcf   : > { %10714 = dma.hbm_to_vmem [thread:$0]  (!%p13138_p12), %s13971_s9, 4096, %s661_s3, [#allocation15], %s14034_s22, %s14034_s22, %s14033_s1  }
  0xd0   : > { %s12954_s30 = smov [#allocation19]   ;;  %s12955_s24 = smov [#allocation22]  }
  0xd1   : > { %s686_s5 = sshll.u32 %s12954_s30, 4  ;;  %s712_s29 = sshll.u32 %s12955_s24, 4  ;;  %s687_s5 = int_to_ptr.vmem [resolvable:$true] %s686_s5  ;;  %s713_s29 = int_to_ptr.vmem [resolvable:$true] %s712_s29 }
  0xd2   : > { %s12681_s2 = scalar_lea.vmem %s687_s5, 4096  ;;  %p12689_p6 = scmp.lt.s32.totalorder %s687_s5, %s687_s5 }
  0xd3   : > { %p12682_p7 = scmp.ne.s32.totalorder %s687_s5, %s12681_s2  ;;  %p12690_p0 = scmp.lt.s32.totalorder %s12681_s2, %s12681_s2 }
  0xd5   : > { %p12684_p9 = pnand %p12682_p7, %p13144_p13  ;;  %p12691_p11 = por %p12690_p0, %p12689_p6 }
  0xd7   : > { %p12685_p8 = pneg %p12684_p9 }
  0xd9   : > { %p12692_p3 = pnand %p12691_p11, %p12685_p8 }
  0xdb   : > { %12695 = shalt.err (!%p12692_p3)
}
  0xdc   : > { %10720 = dma.hbm_to_vmem [thread:$0]  (!%p13138_p12), %s13973_s11, 4096, %s687_s5, [#allocation18], %s14034_s22, %s14034_s22, %s14033_s1  }
  0xdd   : > { %s12707_s28 = scalar_lea.vmem %s713_s29, 4096  ;;  %p12715_p7 = scmp.lt.s32.totalorder %s713_s29, %s713_s29 }
  0xde   : > { %p12708_p2 = scmp.ne.s32.totalorder %s713_s29, %s12707_s28  ;;  %p12716_p9 = scmp.lt.s32.totalorder %s12707_s28, %s12707_s28 }
  0xe0   : > { %p12710_p4 = pnand %p12708_p2, %p13144_p13  ;;  %p12717_p6 = por %p12716_p9, %p12715_p7 }
  0xe2   : > { %p12711_p1 = pneg %p12710_p4 }
  0xe4   : > { %p12718_p8 = pnand %p12717_p6, %p12711_p1 }
  0xe6   : > { %12721 = shalt.err (!%p12718_p8)
}
  0xe7   : > { %10726 = dma.hbm_to_vmem [thread:$0]  (!%p13138_p12), %s13975_s13, 4096, %s713_s29, [#allocation21], %s14034_s22, %s14034_s22, %s14033_s1  }
  0xe8   : > { %s12956_s5 = smov [#allocation25]   ;;  %s12957_s3 = smov [#allocation28]  }
  0xe9   : > { %s738_s2 = sshll.u32 %s12956_s5, 4  ;;  %s767_s27 = sshll.u32 %s12957_s3, 4  ;;  %s739_s2 = int_to_ptr.vmem [resolvable:$true] %s738_s2  ;;  %s768_s27 = int_to_ptr.vmem [resolvable:$true] %s767_s27 }
  0xea   : > { %s12733_s28 = scalar_lea.vmem %s739_s2, 512  ;;  %p12741_p2 = scmp.lt.s32.totalorder %s739_s2, %s739_s2 }
  0xeb   : > { %p12734_p0 = scmp.ne.s32.totalorder %s739_s2, %s12733_s28  ;;  %p12742_p4 = scmp.lt.s32.totalorder %s12733_s28, %s12733_s28 }
  0xed   : > { %p12736_p11 = pnand %p12734_p0, %p13144_p13  ;;  %p12743_p1 = por %p12742_p4, %p12741_p2 }
  0xef   : > { %p12737_p3 = pneg %p12736_p11 }
  0xf1   : > { %p12744_p7 = pnand %p12743_p1, %p12737_p3 }
  0xf3   : > { %12747 = shalt.err (!%p12744_p7)
}
  0xf4   : > { %10732 = dma.hbm_to_vmem [thread:$0]  (!%p13138_p12), %s13977_s15, 512, %s739_s2, [#allocation24], %s14038_s6, %s14038_s6, %s14037_s25  }
  0xf5   : > { %s12759_s29 = scalar_lea.vmem %s768_s27, 512  ;;  %p12767_p0 = scmp.lt.s32.totalorder %s768_s27, %s768_s27 }
  0xf6   : > { %p12760_p9 = scmp.ne.s32.totalorder %s768_s27, %s12759_s29  ;;  %p12768_p11 = scmp.lt.s32.totalorder %s12759_s29, %s12759_s29 }
  0xf8   : > { %p12762_p6 = pnand %p12760_p9, %p13144_p13  ;;  %p12769_p2 = por %p12768_p11, %p12767_p0 }
  0xfa   : > { %p12763_p8 = pneg %p12762_p6 }
  0xfc   : > { %p12770_p3 = pnand %p12769_p2, %p12763_p8 }
  0xfe   : > { %12773 = shalt.err (!%p12770_p3)
}
  0xff   : > { %s14039_s30 = smov 4   ;;  %s14040_s24 = smov 64  }
 0x100   : > { %10738 = dma.hbm_to_vmem [thread:$0]  (!%p13138_p12), %s13980_s18, 512, %s768_s27, [#allocation27], %s14040_s24, %s14040_s24, %s14039_s30  }
 0x101   : > { %s12958_s25 = smov [#allocation31]   ;;  %s12959_s2 = smov [#allocation32]  }
 0x102   : > { %s793_s6 = sshll.u32 %s12958_s25, 4  ;;  %s807_s28 = sshll.u32 %s12959_s2, 4  ;;  %s794_s6 = int_to_ptr.vmem [resolvable:$true] %s793_s6  ;;  %s808_s28 = int_to_ptr.vmem [resolvable:$true] %s807_s28 }
 0x103   : > { %s12785_s1 = scalar_lea.vmem %s794_s6, 512  ;;  %p12793_p9 = scmp.lt.s32.totalorder %s794_s6, %s794_s6 }
 0x104   : > { %p12786_p4 = scmp.ne.s32.totalorder %s794_s6, %s12785_s1  ;;  %p12794_p6 = scmp.lt.s32.totalorder %s12785_s1, %s12785_s1 }
 0x106   : > { %p12788_p1 = pnand %p12786_p4, %p13144_p13  ;;  %p12795_p8 = por %p12794_p6, %p12793_p9 }
 0x108   : > { %p12789_p7 = pneg %p12788_p1 }
 0x10a   : > { %p12796_p0 = pnand %p12795_p8, %p12789_p7 }
 0x10c   : > { %12799 = shalt.err (!%p12796_p0)
}
 0x10d   : > { %10744 = dma.hbm_to_vmem [thread:$0]  (!%p13138_p12), %s13982_s20, 512, %s794_s6, [#allocation30], %s14040_s24, %s14040_s24, %s14039_s30  }
 0x10e   : > { %s12811_s29 = scalar_lea.vmem %s808_s28, 128  ;;  %p12819_p4 = scmp.lt.s32.totalorder %s808_s28, %s808_s28 }
 0x10f   : > { %p12812_p11 = scmp.ne.s32.totalorder %s808_s28, %s12811_s29  ;;  %p12820_p1 = scmp.lt.s32.totalorder %s12811_s29, %s12811_s29 }
 0x111   : > { %p12814_p2 = pnand %p12812_p11, %p13144_p13  ;;  %p12821_p9 = por %p12820_p1, %p12819_p4 }
 0x113   : > { %p12815_p3 = pneg %p12814_p2 }
 0x115   : > { %p12822_p7 = pnand %p12821_p9, %p12815_p3 }
 0x117   : > { %12825 = shalt.err (!%p12822_p7)
}
 0x118   : > { %10747 = dma.hbm_to_vmem [thread:$0]  (!%p13138_p12), %s13983_s21, 128, %s808_s28, [#allocation33]  }
 0x119   : > { %828 = sbr.rel (%p13130_p10) target bundleno = 7306 (0x1c8a), region = 108  ;;  %p14041_p6 = scmp.eq.s32.totalorder (!%p13130_p10), %s13102_s4, 0 }
 0x11e   : > { %12869 = dma.done.wait (%p14041_p6), [#allocation3], 49152   ;;  %p14042_p13 = pmov %p14041_p6 }
 0x11f   : > { %p14043_p8 = pmov %p14041_p6 }
 0x120   : > { %12871 = vsyncadd (%p14042_p13), [#allocation3], 4294918144 }
 0x121   : > { %12873 = dma.done.wait (%p14043_p8), [#allocation6], 8192   ;;  %p14044_p0 = pmov %p14041_p6 }
 0x123   : > { %12875 = vsyncadd (%p14044_p0), [#allocation6], 4294959104  ;;  %p14045_p11 = pmov %p14044_p0 }
 0x124   : > { %p14046_p12 = pmov %p14044_p0 }
 0x125   : > { %12877 = dma.done.wait (%p14045_p11), [#allocation9], 8192  }
 0x126   : > { %12879 = vsyncadd (%p14046_p12), [#allocation9], 4294959104  ;;  %p14047_p10 = pmov %p14044_p0 }
 0x127   : > { %p14048_p2 = pmov %p14044_p0 }
 0x128   : > { %12881 = dma.done.wait (%p14047_p10), [#allocation12], 16896  }
 0x129   : > { %12883 = vsyncadd (%p14048_p2), [#allocation12], 4294950400  ;;  %p14049_p3 = pmov %p14044_p0 }
 0x12a   : > { %p14050_p4 = pmov %p14044_p0 }
 0x12b   : > { %12885 = dma.done.wait (%p14049_p3), [#allocation15], 12288  }
 0x12c   : > { %12887 = vsyncadd (%p14050_p4), [#allocation15], 4294955008  ;;  %p14051_p1 = pmov %p14044_p0 }
 0x12d   : > { %p14052_p9 = pmov %p14044_p0 }
 0x12e   : > { %12889 = dma.done.wait (%p14051_p1), [#allocation18], 8192  }
 0x12f   : > { %12891 = vsyncadd (%p14052_p9), [#allocation18], 4294959104  ;;  %p14053_p7 = pmov %p14044_p0 }
 0x130   : > { %p14054_p6 = pmov %p14044_p0 }
 0x131   : > { %12893 = dma.done.wait (%p14053_p7), [#allocation21], 8192  }
 0x132   : > { %12895 = vsyncadd (%p14054_p6), [#allocation21], 4294959104  ;;  %p14055_p13 = pmov %p14044_p0 }
 0x133   : > { %p14056_p8 = pmov %p14044_p0 }
 0x134   : > { %12897 = dma.done.wait (%p14055_p13), [#allocation24], 4608  }
 0x135   : > { %12899 = vsyncadd (%p14056_p8), [#allocation24], 4294962688 }
 0x136   : > { %12901 = dma.done.wait (%p14044_p0), [#allocation27], 2560   ;;  %p14057_p11 = pmov %p14044_p0 }
 0x137   : > { %p14058_p12 = pmov %p14044_p0 }
 0x138   : > { %12903 = vsyncadd (%p14057_p11), [#allocation27], 4294964736 }
 0x139   : > { %12905 = dma.done.wait (%p14058_p12), [#allocation30], 1024   ;;  %p14059_p10 = pmov %p14044_p0 }
 0x13a   : > { %p14060_p2 = pmov %p14044_p0 }
 0x13b   : > { %12907 = vsyncadd (%p14059_p10), [#allocation30], 4294966272 }
 0x13c   : > { %12909 = dma.done.wait (%p14060_p2), [#allocation33], 128   ;;  %p14061_p3 = pmov %p14044_p0 }
 0x13d   : > { %v10858_v0 = vld [vmem:[#allocation2 + $0x154] ss:$24 sps:$4 sm:$0xff]   ;;  %v10862_v2 = vld [vmem:[#allocation2 + $0x150] ss:$24 sps:$4 sm:$0xff]   ;;  %v10864_v4 = vld [vmem:[#allocation2 + $0x124] ss:$24 sps:$4 sm:$0xff]  }
 0x13e   : > { %12911 = vsyncadd (%p14061_p3), [#allocation33], 4294967168  ;;  %v10860_v1 = vld [vmem:[#allocation2 + $0x454] ss:$24 sps:$4 sm:$0xff]   ;;  %3317 = vmatprep.subr.bf16.mxu0 %v10858_v0  ;;  %v10863_v3 = vld [vmem:[#allocation2 + $0x450] ss:$24 sps:$4 sm:$0xff]  }
 0x13f   : > { %3358 = vmatprep.subr.bf16.mxu1 %v10860_v1  ;;  %3318 = vmatpush1.bf16.msra.mxu0 %v10862_v2  ;;  %v10866_v5 = vld [vmem:[#allocation2 + $0x424] ss:$24 sps:$4 sm:$0xff]   ;;  %v10868_v6 = vld [vmem:[#allocation2 + $0x120] ss:$24 sps:$4 sm:$0xff]   ;;  %v10870_v8 = vld [vmem:[#allocation2 + $0xf4] ss:$24 sps:$4 sm:$0xff]  }
 0x140   : > { %3359 = vmatpush1.bf16.msra.mxu1 %v10863_v3  ;;  %3319 = vmatprep.subr.bf16.mxu0 %v10864_v4  ;;  %v10869_v7 = vld [vmem:[#allocation2 + $0x420] ss:$24 sps:$4 sm:$0xff]   ;;  %v10872_v9 = vld [vmem:[#allocation2 + $0x3f4] ss:$24 sps:$4 sm:$0xff]   ;;  %v10874_v10 = vld [vmem:[#allocation2 + $0xf0] ss:$24 sps:$4 sm:$0xff]  }
 0x141   : > { %3360 = vmatprep.subr.bf16.mxu1 %v10866_v5  ;;  %v10875_v11 = vld [vmem:[#allocation2 + $0x3f0] ss:$24 sps:$4 sm:$0xff]   ;;  %v10876_v12 = vld [vmem:[#allocation2 + $0xc4] ss:$24 sps:$4 sm:$0xff]   ;;  %v10880_v14 = vld [vmem:[#allocation2 + $0xc0] ss:$24 sps:$4 sm:$0xff]  }
 0x142   : > { %v10878_v13 = vld [vmem:[#allocation2 + $0x3c4] ss:$24 sps:$4 sm:$0xff]   ;;  %v10881_v15 = vld [vmem:[#allocation2 + $0x3c0] ss:$24 sps:$4 sm:$0xff]   ;;  %v10882_v16 = vld [vmem:[#allocation2 + $0x94] ss:$24 sps:$4 sm:$0xff]  }
 0x143   : > { %3320 = vmatpush1.bf16.msra.mxu0 %v10868_v6  ;;  %v10884_v17 = vld [vmem:[#allocation2 + $0x394] ss:$24 sps:$4 sm:$0xff]   ;;  %v10886_v18 = vld [vmem:[#allocation2 + $0x90] ss:$24 sps:$4 sm:$0xff]   ;;  %v10888_v20 = vld [vmem:[#allocation2 + $0x64] ss:$24 sps:$4 sm:$0xff]  }
 0x144   : > { %3361 = vmatpush1.bf16.msra.mxu1 %v10869_v7  ;;  %3321 = vmatprep.subr.bf16.mxu0 %v10870_v8  ;;  %v10887_v19 = vld [vmem:[#allocation2 + $0x390] ss:$24 sps:$4 sm:$0xff]   ;;  %v10890_v21 = vld [vmem:[#allocation2 + $0x364] ss:$24 sps:$4 sm:$0xff]   ;;  %v10892_v22 = vld [vmem:[#allocation2 + $0x60] ss:$24 sps:$4 sm:$0xff]  }
 0x145   : > { %3362 = vmatprep.subr.bf16.mxu1 %v10872_v9  ;;  %v10893_v23 = vld [vmem:[#allocation2 + $0x360] ss:$24 sps:$4 sm:$0xff]   ;;  %v10894_v24 = vld [vmem:[#allocation2 + $0x34] ss:$24 sps:$4 sm:$0xff]   ;;  %v10898_v26 = vld [vmem:[#allocation2 + $0x30] ss:$24 sps:$4 sm:$0xff]  }
 0x146   : > { %v10896_v25 = vld [vmem:[#allocation2 + $0x334] ss:$24 sps:$4 sm:$0xff]   ;;  %v10899_v27 = vld [vmem:[#allocation2 + $0x330] ss:$24 sps:$4 sm:$0xff]   ;;  %v10900_v28 = vld [vmem:[#allocation2 + $0x4] ss:$24 sps:$4 sm:$0xff]  }
 0x147   : > { %3322 = vmatpush1.bf16.msra.mxu0 %v10874_v10  ;;  %v10902_v29 = vld [vmem:[#allocation2 + $0x304] ss:$24 sps:$4 sm:$0xff]   ;;  %v10904_v30 = vld [vmem:[#allocation2] ss:$24 sps:$4 sm:$0xff]   ;;  %v10906_v32 = vld [vmem:[#allocation2 + $0x2d4] ss:$24 sps:$4 sm:$0xff]  }
 0x148   : > { %3363 = vmatpush1.bf16.msra.mxu1 %v10875_v11  ;;  %3323 = vmatprep.subr.bf16.mxu0 %v10876_v12  ;;  %v10905_v31 = vld [vmem:[#allocation2 + $0x300] ss:$24 sps:$4 sm:$0xff]   ;;  %p966_p4 = scmp.lt.s32.totalorder %s13102_s4, 1  ;;  %v10908_v33 = vld [vmem:[#allocation2 + $0x5d4] ss:$24 sps:$4 sm:$0xff]   ;;  %s14062_s24 = sld [smem:[#allocation55_spill]] }
 0x149   : > { %3364 = vmatprep.subr.bf16.mxu1 %v10878_v13  ;;  %v10910_v34 = vld [vmem:[#allocation2 + $0x2d0] ss:$24 sps:$4 sm:$0xff]   ;;  %v10912_v36 = vld [vmem:[#allocation2 + $0x2a4] ss:$24 sps:$4 sm:$0xff]   ;;  %v10916_v38 = vld [vmem:[#allocation2 + $0x2a0] ss:$24 sps:$4 sm:$0xff]  }
 0x14a   : > { %v10911_v35 = vld [vmem:[#allocation2 + $0x5d0] ss:$24 sps:$4 sm:$0xff]   ;;  %s967_s23 = scalar_select %p966_p4, %s13102_s4, 1  ;;  %v10914_v37 = vld [vmem:[#allocation2 + $0x5a4] ss:$24 sps:$4 sm:$0xff]   ;;  %vm12961_vm0 = vmmov 0  }
 0x14b   : > { %3324 = vmatpush1.bf16.msra.mxu0 %v10880_v14  ;;  %v10917_v39 = vld [vmem:[#allocation2 + $0x5a0] ss:$24 sps:$4 sm:$0xff]   ;;  %v10918_v40 = vld [vmem:[#allocation2 + $0x274] ss:$24 sps:$4 sm:$0xff]   ;;  %v10922_v42 = vld [vmem:[#allocation2 + $0x270] ss:$24 sps:$4 sm:$0xff]  }
 0x14c   : > { %3365 = vmatpush1.bf16.msra.mxu1 %v10881_v15  ;;  %3325 = vmatprep.subr.bf16.mxu0 %v10882_v16  ;;  %s10413_s26 = sshll.u32 %s967_s23, 5  ;;  %v10920_v41 = vld [vmem:[#allocation2 + $0x574] ss:$24 sps:$4 sm:$0xff]   ;;  %v10923_v43 = vld [vmem:[#allocation2 + $0x570] ss:$24 sps:$4 sm:$0xff]   ;;  %vm3931_vm1 = vcmask 1043456  }
 0x14d   : > { %3366 = vmatprep.subr.bf16.mxu1 %v10884_v17  ;;  %v10924_v44 = vld [vmem:[#allocation2 + $0x244] ss:$24 sps:$4 sm:$0xff]   ;;  %v10928_v49 = vld [vmem:[#allocation2 + $0x240] ss:$24 sps:$4 sm:$0xff]   ;;  %v10930_v52 = vld [vmem:[#allocation2 + $0x214] ss:$24 sps:$4 sm:$0xff]  }
 0x14e   : > { %s13393_s25 = scalar_lea.vmem %s14062_s24, %s10413_s26  ;;  %v10926_v45 = vld [vmem:[#allocation2 + $0x544] ss:$24 sps:$4 sm:$0xff]   ;;  %v10929_v50 = vld [vmem:[#allocation2 + $0x540] ss:$24 sps:$4 sm:$0xff]   ;;  %v10932_v53 = vld [vmem:[#allocation2 + $0x514] ss:$24 sps:$4 sm:$0xff]  }
 0x14f   : > { %3326 = vmatpush1.bf16.msra.mxu0 %v10886_v18  ;;  %v981_v46 = vld [vmem:[%s13393_s25] sm:$0xff]  ;;  %v982_v48 = vld [vmem:[%s13393_s25 + $0x8] sm:$0xff]  ;;  %vm3915_vm2 = vcmask 64512   ;;  %s12962_s6 = smov 64   ;;  %vm8650_vm3 = vcmask 261120   ;;  %s12964_s22 = smov 32  }
 0x150   : > { %3367 = vmatpush1.bf16.msra.mxu1 %v10887_v19  ;;  %3327 = vmatprep.subr.bf16.mxu0 %v10888_v20  ;;  %v13396_v47 = vcombine.high %v981_v46, %v981_v46  ;;  %v13399_v51 = vcombine.high %v982_v48, %v982_v48  ;;  %v10934_v54 = vld [vmem:[#allocation2 + $0x210] ss:$24 sps:$4 sm:$0xff]   ;;  %v10936_v56 = vld [vmem:[#allocation2 + $0x1e4] ss:$24 sps:$4 sm:$0xff]   ;;  %v10940_v58 = vld [vmem:[#allocation2 + $0x1e0] ss:$24 sps:$4 sm:$0xff]   ;;  %v13403_v6 = vcombine.low %v981_v46, %v981_v46 }
 0x151   : > { %3368 = vmatprep.subr.bf16.mxu1 %v10890_v21  ;;  %v10935_v55 = vld [vmem:[#allocation2 + $0x510] ss:$24 sps:$4 sm:$0xff]   ;;  %v10938_v57 = vld [vmem:[#allocation2 + $0x4e4] ss:$24 sps:$4 sm:$0xff]   ;;  %v10941_v59 = vld [vmem:[#allocation2 + $0x4e0] ss:$24 sps:$4 sm:$0xff]   ;;  %v13405_v7 = vcombine.low %v982_v48, %v982_v48 }
 0x152   : > { %3349 = vmatprep.mubr.bf16.mxu0 %v13396_v47  ;;  %3390 = vmatprep.mubr.bf16.mxu1 %v13399_v51  ;;  %v10942_v60 = vld [vmem:[#allocation2 + $0x1b4] ss:$24 sps:$4 sm:$0xff]   ;;  %v10946_v62 = vld [vmem:[#allocation2 + $0x1b0] ss:$24 sps:$4 sm:$0xff]   ;;  %v10948_v0 = vld [vmem:[#allocation2 + $0x184] ss:$24 sps:$4 sm:$0xff]  }
 0x153   : > { %3328 = vmatpush1.bf16.msra.mxu0 %v10892_v22  ;;  %v10944_v61 = vld [vmem:[#allocation2 + $0x4b4] ss:$24 sps:$4 sm:$0xff]   ;;  %v10947_v63 = vld [vmem:[#allocation2 + $0x4b0] ss:$24 sps:$4 sm:$0xff]   ;;  %v10950_v1 = vld [vmem:[#allocation2 + $0x484] ss:$24 sps:$4 sm:$0xff]  }
 0x154   : > { %3369 = vmatpush1.bf16.msra.mxu1 %v10893_v23  ;;  %3329 = vmatprep.subr.bf16.mxu0 %v10894_v24  ;;  %v10952_v2 = vld [vmem:[#allocation2 + $0x180] ss:$24 sps:$4 sm:$0xff]   ;;  %v10960_v4 = vld [vmem:[#allocation2 + $0x754] ss:$24 sps:$4 sm:$0xff]   ;;  %v10958_v8 = vld [vmem:[#allocation2 + $0x750] ss:$24 sps:$4 sm:$0xff]  }
 0x155   : > { %3370 = vmatprep.subr.bf16.mxu1 %v10896_v25  ;;  %v10953_v3 = vld [vmem:[#allocation2 + $0x480] ss:$24 sps:$4 sm:$0xff]   ;;  %v10963_v5 = vld [vmem:[#allocation2 + $0xa54] ss:$24 sps:$4 sm:$0xff]   ;;  %v10961_v9 = vld [vmem:[#allocation2 + $0xa50] ss:$24 sps:$4 sm:$0xff]  }
 0x156   : > { %v10966_v10 = vld [vmem:[#allocation2 + $0x724] ss:$24 sps:$4 sm:$0xff]   ;;  %v10964_v12 = vld [vmem:[#allocation2 + $0x720] ss:$24 sps:$4 sm:$0xff]   ;;  %v10972_v14 = vld [vmem:[#allocation2 + $0x6f4] ss:$24 sps:$4 sm:$0xff]  }
 0x157   : > { %3330 = vmatpush1.bf16.msra.mxu0 %v10898_v26  ;;  %v10969_v11 = vld [vmem:[#allocation2 + $0xa24] ss:$24 sps:$4 sm:$0xff]   ;;  %v10967_v13 = vld [vmem:[#allocation2 + $0xa20] ss:$24 sps:$4 sm:$0xff]   ;;  %v10975_v15 = vld [vmem:[#allocation2 + $0x9f4] ss:$24 sps:$4 sm:$0xff]  }
 0x158   : > { %3371 = vmatpush1.bf16.msra.mxu1 %v10899_v27  ;;  %3331 = vmatprep.subr.bf16.mxu0 %v10900_v28  ;;  %v10970_v16 = vld [vmem:[#allocation2 + $0x6f0] ss:$24 sps:$4 sm:$0xff]   ;;  %v10978_v18 = vld [vmem:[#allocation2 + $0x6c4] ss:$24 sps:$4 sm:$0xff]   ;;  %v10976_v20 = vld [vmem:[#allocation2 + $0x6c0] ss:$24 sps:$4 sm:$0xff]  }
 0x159   : > { %3372 = vmatprep.subr.bf16.mxu1 %v10902_v29  ;;  %v10973_v17 = vld [vmem:[#allocation2 + $0x9f0] ss:$24 sps:$4 sm:$0xff]   ;;  %v10981_v19 = vld [vmem:[#allocation2 + $0x9c4] ss:$24 sps:$4 sm:$0xff]   ;;  %v10979_v21 = vld [vmem:[#allocation2 + $0x9c0] ss:$24 sps:$4 sm:$0xff]  }
 0x15a   : > { %v10984_v22 = vld [vmem:[#allocation2 + $0x694] ss:$24 sps:$4 sm:$0xff]   ;;  %v10982_v24 = vld [vmem:[#allocation2 + $0x690] ss:$24 sps:$4 sm:$0xff]   ;;  %v10990_v26 = vld [vmem:[#allocation2 + $0x664] ss:$24 sps:$4 sm:$0xff]  }
 0x15b   : > { %3332 = vmatpush1.bf16.msra.mxu0 %v10904_v30  ;;  %v10987_v23 = vld [vmem:[#allocation2 + $0x994] ss:$24 sps:$4 sm:$0xff]   ;;  %v10985_v25 = vld [vmem:[#allocation2 + $0x990] ss:$24 sps:$4 sm:$0xff]   ;;  %v10993_v27 = vld [vmem:[#allocation2 + $0x964] ss:$24 sps:$4 sm:$0xff]  }
 0x15c   : > { %3373 = vmatpush1.bf16.msra.mxu1 %v10905_v31  ;;  %3333 = vmatprep.subr.bf16.mxu0 %v10906_v32  ;;  %v10988_v28 = vld [vmem:[#allocation2 + $0x660] ss:$24 sps:$4 sm:$0xff]   ;;  %v10996_v30 = vld [vmem:[#allocation2 + $0x634] ss:$24 sps:$4 sm:$0xff]   ;;  %v11014_v46 = vld [vmem:[#allocation2 + $0x8a4] ss:$24 sps:$4 sm:$0xff]  }
 0x15d   : > { %3374 = vmatprep.subr.bf16.mxu1 %v10908_v33  ;;  %v10991_v29 = vld [vmem:[#allocation2 + $0x960] ss:$24 sps:$4 sm:$0xff]   ;;  %v10999_v31 = vld [vmem:[#allocation2 + $0x934] ss:$24 sps:$4 sm:$0xff]   ;;  %v11017_v48 = vld [vmem:[#allocation2 + $0xba4] ss:$24 sps:$4 sm:$0xff]  }
 0x15e   : > { %v13410_v32 = vld [vmem:[%s13393_s25 + $0x10] sm:$0xff]  ;;  %v13413_v33 = vld [vmem:[%s13393_s25 + $0x18] sm:$0xff]  ;;  %vm8903_vm4 = vcmask 523264   ;;  %s14063_s29 = sld [smem:[#allocation48_spill]]  ;;  %s10410_s26 = sshll.u32 %s13102_s4, 7 }
 0x15f   : > { %3334 = vmatpush2.bf16.msra.mxu0 %v10910_v34  ;;  %v10994_v34 = vld [vmem:[#allocation2 + $0x630] ss:$24 sps:$4 sm:$0xff]   ;;  %s14065_s2 = sld [smem:[#allocation62_spill]]  ;;  %s12965_s27 = smov [#allocation34]  }
 0x160   : > { %3375 = vmatpush2.bf16.msra.mxu1 %v10911_v35  ;;  %3335 = vmatprep.subr.bf16.mxu0 %v10912_v36  ;;  %v10997_v35 = vld [vmem:[#allocation2 + $0x930] ss:$24 sps:$4 sm:$0xff]   ;;  %v13417_v36 = vcombine.high %v13410_v32, %v13410_v32 }
 0x161   : > { %3376 = vmatprep.subr.bf16.mxu1 %v10914_v37  ;;  %v13421_v37 = vcombine.high %v13413_v33, %v13413_v33 }
 0x163   : > { %3336 = vmatpush2.bf16.msra.mxu0 %v10916_v38  ;;  %v11002_v38 = vld [vmem:[#allocation2 + $0x604] ss:$24 sps:$4 sm:$0xff]  }
 0x164   : > { %3377 = vmatpush2.bf16.msra.mxu1 %v10917_v39  ;;  %3337 = vmatprep.subr.bf16.mxu0 %v10918_v40  ;;  %v11005_v39 = vld [vmem:[#allocation2 + $0x904] ss:$24 sps:$4 sm:$0xff]   ;;  %v11000_v40 = vld [vmem:[#allocation2 + $0x600] ss:$24 sps:$4 sm:$0xff]   ;;  %s963_s5 = sand.u32 1, %s14063_s29  }
 0x165   : > { %3378 = vmatprep.subr.bf16.mxu1 %v10920_v41  ;;  %v11003_v41 = vld [vmem:[#allocation2 + $0x900] ss:$24 sps:$4 sm:$0xff]   ;;  %s9447_s3 = sshll.u32 %s963_s5, 3  ;;  %s13920_s28 = scalar_lea.hbm %s14065_s2, %s10410_s26 }
 0x166   : > { %s965_s0 = scalar_lea.vmem [#allocation34], %s9447_s3  ;;  %s9138_s4 = scalar_lea.sflag [#allocation4], %s963_s5 }
 0x167   : > { %3338 = vmatpush2.bf16.msra.mxu0 %v10922_v42  ;;  %v11008_v42 = vld [vmem:[#allocation2 + $0x8d4] ss:$24 sps:$4 sm:$0xff]   ;;  %s9151_s30 = sshll.u32 %s965_s0, 4  ;;  %s13922_s30 = int_to_ptr.vmem [resolvable:$true] %s9151_s30 }
 0x168   : > { %3379 = vmatpush2.bf16.msra.mxu1 %v10923_v43  ;;  %3339 = vmatprep.subr.bf16.mxu0 %v10924_v44  ;;  %v11011_v43 = vld [vmem:[#allocation2 + $0xbd4] ss:$24 sps:$4 sm:$0xff]   ;;  %v11006_v44 = vld [vmem:[#allocation2 + $0x8d0] ss:$24 sps:$4 sm:$0xff]   ;;  %s12826_s1 = scalar_lea.vmem %s13922_s30, 128 }
 0x169   : > { %3380 = vmatprep.subr.bf16.mxu1 %v10926_v45  ;;  %v11009_v45 = vld [vmem:[#allocation2 + $0xbd0] ss:$24 sps:$4 sm:$0xff]   ;;  %p12827_p1 = scmp.ne.s32.totalorder %s13922_s30, %s12826_s1 }
 0x16b   : > { %3340 = vmatpush2.bf16.msra.mxu0 %v10928_v49  ;;  %v11012_v49 = vld [vmem:[#allocation2 + $0x8a0] ss:$24 sps:$4 sm:$0xff]   ;;  %p12828_p9 = pnand %p12827_p1, %p13119_p5 }
 0x16c   : > { %3381 = vmatpush2.bf16.msra.mxu1 %v10929_v50  ;;  %3341 = vmatprep.subr.bf16.mxu0 %v10930_v52  ;;  %v11015_v50 = vld [vmem:[#allocation2 + $0xba0] ss:$24 sps:$4 sm:$0xff]   ;;  %v11020_v52 = vld [vmem:[#allocation2 + $0x874] ss:$24 sps:$4 sm:$0xff]  }
 0x16d   : > { %3382 = vmatprep.subr.bf16.mxu1 %v10932_v53  ;;  %v11023_v53 = vld [vmem:[#allocation2 + $0xb74] ss:$24 sps:$4 sm:$0xff]   ;;  %p12829_p7 = pneg %p12828_p9 }
 0x16f   : > { %3342 = vmatpush2.bf16.msra.mxu0 %v10934_v54  ;;  %v11018_v54 = vld [vmem:[#allocation2 + $0x870] ss:$24 sps:$4 sm:$0xff]  }
 0x170   : > { %3383 = vmatpush2.bf16.msra.mxu1 %v10935_v55  ;;  %3343 = vmatprep.subr.bf16.mxu0 %v10936_v56  ;;  %v11021_v55 = vld [vmem:[#allocation2 + $0xb70] ss:$24 sps:$4 sm:$0xff]   ;;  %v11026_v56 = vld [vmem:[#allocation2 + $0x844] ss:$24 sps:$4 sm:$0xff]  }
 0x171   : > { %3384 = vmatprep.subr.bf16.mxu1 %v10938_v57  ;;  %v11029_v57 = vld [vmem:[#allocation2 + $0xb44] ss:$24 sps:$4 sm:$0xff]  }
 0x173   : > { %3344 = vmatpush2.bf16.msra.mxu0 %v10940_v58  ;;  %v11024_v58 = vld [vmem:[#allocation2 + $0x840] ss:$24 sps:$4 sm:$0xff]  }
 0x174   : > { %3385 = vmatpush2.bf16.msra.mxu1 %v10941_v59  ;;  %3345 = vmatprep.subr.bf16.mxu0 %v10942_v60  ;;  %v11027_v59 = vld [vmem:[#allocation2 + $0xb40] ss:$24 sps:$4 sm:$0xff]   ;;  %v11032_v60 = vld [vmem:[#allocation2 + $0x814] ss:$24 sps:$4 sm:$0xff]  }
 0x175   : > { %3386 = vmatprep.subr.bf16.mxu1 %v10944_v61  ;;  %v11035_v61 = vld [vmem:[#allocation2 + $0xb14] ss:$24 sps:$4 sm:$0xff]  }
 0x177   : > { %3346 = vmatpush2.bf16.msra.mxu0 %v10946_v62  ;;  %v11030_v62 = vld [vmem:[#allocation2 + $0x810] ss:$24 sps:$4 sm:$0xff]  }
 0x178   : > { %3387 = vmatpush2.bf16.msra.mxu1 %v10947_v63  ;;  %3347 = vmatprep.subr.bf16.mxu0 %v10948_v0  ;;  %v11033_v63 = vld [vmem:[#allocation2 + $0xb10] ss:$24 sps:$4 sm:$0xff]   ;;  %v11038_v0 = vld [vmem:[#allocation2 + $0x7e4] ss:$24 sps:$4 sm:$0xff]  }
 0x179   : > { %3388 = vmatprep.subr.bf16.mxu1 %v10950_v1  ;;  %v11041_v1 = vld [vmem:[#allocation2 + $0xae4] ss:$24 sps:$4 sm:$0xff]  }
 0x17b   : > { %3348 = vmatpush2.bf16.msra.mxu0 %v10952_v2  ;;  %v11036_v2 = vld [vmem:[#allocation2 + $0x7e0] ss:$24 sps:$4 sm:$0xff]  }
 0x17c   : > { %3389 = vmatpush2.bf16.msra.mxu1 %v10953_v3  ;;  %3399 = vmatprep.subr.bf16.mxu0 %v10960_v4  ;;  %v11039_v3 = vld [vmem:[#allocation2 + $0xae0] ss:$24 sps:$4 sm:$0xff]   ;;  %v11044_v4 = vld [vmem:[#allocation2 + $0x7b4] ss:$24 sps:$4 sm:$0xff]  }
 0x17d   : > { %3440 = vmatprep.subr.bf16.mxu1 %v10963_v5  ;;  %v11047_v5 = vld [vmem:[#allocation2 + $0xab4] ss:$24 sps:$4 sm:$0xff]  }
 0x17e   : > { %3350 = vmatmul.mubr.bf16.vlgmr.msra.gmra.mxu0 %v13403_v6 }
 0x17f   : > { %3391 = vmatmul.mubr.bf16.vlgmr.msra.gmra.mxu1 %v13405_v7  ;;  %3400 = vmatpush1.bf16.msra.mxu0 %v10958_v8  ;;  %v11042_v8 = vld [vmem:[#allocation2 + $0x7b0] ss:$24 sps:$4 sm:$0xff]  }
 0x180   : > { %3441 = vmatpush1.bf16.msra.mxu1 %v10961_v9  ;;  %3401 = vmatprep.subr.bf16.mxu0 %v10966_v10  ;;  %v11045_v9 = vld [vmem:[#allocation2 + $0xab0] ss:$24 sps:$4 sm:$0xff]   ;;  %v11050_v10 = vld [vmem:[#allocation2 + $0x784] ss:$24 sps:$4 sm:$0xff]  }
 0x181   : > { %3442 = vmatprep.subr.bf16.mxu1 %v10969_v11  ;;  %3431 = vmatprep.mubr.bf16.mxu0 %v13417_v36  ;;  %v11053_v11 = vld [vmem:[#allocation2 + $0xa84] ss:$24 sps:$4 sm:$0xff]  }
 0x182   : > { %3472 = vmatprep.mubr.bf16.mxu1 %v13421_v37 }
 0x183   : > { %3402 = vmatpush1.bf16.msra.mxu0 %v10964_v12  ;;  %v11048_v12 = vld [vmem:[#allocation2 + $0x780] ss:$24 sps:$4 sm:$0xff]  }
 0x184   : > { %3443 = vmatpush1.bf16.msra.mxu1 %v10967_v13  ;;  %3403 = vmatprep.subr.bf16.mxu0 %v10972_v14  ;;  %v11051_v13 = vld [vmem:[#allocation2 + $0xa80] ss:$24 sps:$4 sm:$0xff]   ;;  %v11060_v14 = vld [vmem:[#allocation2 + $0x15c] ss:$24 sps:$4 sm:$0xff]  }
 0x185   : > { %3444 = vmatprep.subr.bf16.mxu1 %v10975_v15  ;;  %v11063_v15 = vld [vmem:[#allocation2 + $0x45c] ss:$24 sps:$4 sm:$0xff]  }
 0x187   : > { %3404 = vmatpush1.bf16.msra.mxu0 %v10970_v16  ;;  %v13427_v16 = vcombine.low %v13410_v32, %v13410_v32  ;;  %v11084_v32 = vld [vmem:[#allocation2 + $0x9c] ss:$24 sps:$4 sm:$0xff]  }
 0x188   : > { %3445 = vmatpush1.bf16.msra.mxu1 %v10973_v17  ;;  %3405 = vmatprep.subr.bf16.mxu0 %v10978_v18  ;;  %v13431_v17 = vcombine.low %v13413_v33, %v13413_v33  ;;  %v11058_v18 = vld [vmem:[#allocation2 + $0x158] ss:$24 sps:$4 sm:$0xff]   ;;  %v11087_v33 = vld [vmem:[#allocation2 + $0x39c] ss:$24 sps:$4 sm:$0xff]  }
 0x189   : > { %3446 = vmatprep.subr.bf16.mxu1 %v10981_v19  ;;  %v11061_v19 = vld [vmem:[#allocation2 + $0x458] ss:$24 sps:$4 sm:$0xff]  }
 0x18b   : > { %3406 = vmatpush1.bf16.msra.mxu0 %v10976_v20  ;;  %v11066_v20 = vld [vmem:[#allocation2 + $0x12c] ss:$24 sps:$4 sm:$0xff]  }
 0x18c   : > { %3447 = vmatpush1.bf16.msra.mxu1 %v10979_v21  ;;  %3407 = vmatprep.subr.bf16.mxu0 %v10984_v22  ;;  %v11069_v21 = vld [vmem:[#allocation2 + $0x42c] ss:$24 sps:$4 sm:$0xff]   ;;  %v11064_v22 = vld [vmem:[#allocation2 + $0x128] ss:$24 sps:$4 sm:$0xff]  }
 0x18d   : > { %3448 = vmatprep.subr.bf16.mxu1 %v10987_v23  ;;  %v11067_v23 = vld [vmem:[#allocation2 + $0x428] ss:$24 sps:$4 sm:$0xff]  }
 0x18f   : > { %3408 = vmatpush1.bf16.msra.mxu0 %v10982_v24  ;;  %v11072_v24 = vld [vmem:[#allocation2 + $0xfc] ss:$24 sps:$4 sm:$0xff]  }
 0x190   : > { %3449 = vmatpush1.bf16.msra.mxu1 %v10985_v25  ;;  %3409 = vmatprep.subr.bf16.mxu0 %v10990_v26  ;;  %v11075_v25 = vld [vmem:[#allocation2 + $0x3fc] ss:$24 sps:$4 sm:$0xff]   ;;  %v11070_v26 = vld [vmem:[#allocation2 + $0xf8] ss:$24 sps:$4 sm:$0xff]  }
 0x191   : > { %3450 = vmatprep.subr.bf16.mxu1 %v10993_v27  ;;  %v11073_v27 = vld [vmem:[#allocation2 + $0x3f8] ss:$24 sps:$4 sm:$0xff]  }
 0x193   : > { %3410 = vmatpush1.bf16.msra.mxu0 %v10988_v28  ;;  %v11078_v28 = vld [vmem:[#allocation2 + $0xcc] ss:$24 sps:$4 sm:$0xff]  }
 0x194   : > { %3451 = vmatpush1.bf16.msra.mxu1 %v10991_v29  ;;  %3411 = vmatprep.subr.bf16.mxu0 %v10996_v30  ;;  %v11081_v29 = vld [vmem:[#allocation2 + $0x3cc] ss:$24 sps:$4 sm:$0xff]   ;;  %v11076_v30 = vld [vmem:[#allocation2 + $0xc8] ss:$24 sps:$4 sm:$0xff]  }
 0x195   : > { %3452 = vmatprep.subr.bf16.mxu1 %v10999_v31  ;;  %v11079_v31 = vld [vmem:[#allocation2 + $0x3c8] ss:$24 sps:$4 sm:$0xff]  }
 0x197   : > { %3412 = vmatpush1.bf16.msra.mxu0 %v10994_v34  ;;  %v11082_v34 = vld [vmem:[#allocation2 + $0x98] ss:$24 sps:$4 sm:$0xff]  }
 0x198   : > { %3453 = vmatpush1.bf16.msra.mxu1 %v10997_v35  ;;  %3413 = vmatprep.subr.bf16.mxu0 %v11002_v38  ;;  %v11085_v35 = vld [vmem:[#allocation2 + $0x398] ss:$24 sps:$4 sm:$0xff]   ;;  %v11090_v38 = vld [vmem:[#allocation2 + $0x6c] ss:$24 sps:$4 sm:$0xff]  }
 0x199   : > { %3454 = vmatprep.subr.bf16.mxu1 %v11005_v39  ;;  %v11093_v39 = vld [vmem:[#allocation2 + $0x36c] ss:$24 sps:$4 sm:$0xff]  }
 0x19b   : > { %3414 = vmatpush1.bf16.msra.mxu0 %v11000_v40  ;;  %v11088_v40 = vld [vmem:[#allocation2 + $0x68] ss:$24 sps:$4 sm:$0xff]  }
 0x19c   : > { %3455 = vmatpush1.bf16.msra.mxu1 %v11003_v41  ;;  %3415 = vmatprep.subr.bf16.mxu0 %v11008_v42  ;;  %v11091_v41 = vld [vmem:[#allocation2 + $0x368] ss:$24 sps:$4 sm:$0xff]   ;;  %v11096_v42 = vld [vmem:[#allocation2 + $0x3c] ss:$24 sps:$4 sm:$0xff]  }
 0x19d   : > { %3456 = vmatprep.subr.bf16.mxu1 %v11011_v43  ;;  %v11099_v43 = vld [vmem:[#allocation2 + $0x33c] ss:$24 sps:$4 sm:$0xff]  }
 0x19f   : > { %3416 = vmatpush2.bf16.msra.mxu0 %v11006_v44  ;;  %v11094_v44 = vld [vmem:[#allocation2 + $0x38] ss:$24 sps:$4 sm:$0xff]  }
 0x1a0   : > { %3457 = vmatpush2.bf16.msra.mxu1 %v11009_v45  ;;  %3417 = vmatprep.subr.bf16.mxu0 %v11014_v46  ;;  %v11097_v45 = vld [vmem:[#allocation2 + $0x338] ss:$24 sps:$4 sm:$0xff]   ;;  %v11102_v46 = vld [vmem:[#allocation2 + $0xc] ss:$24 sps:$4 sm:$0xff]  }
 0x1a1   : > { %3458 = vmatprep.subr.bf16.mxu1 %v11017_v48  ;;  %v11105_v48 = vld [vmem:[#allocation2 + $0x30c] ss:$24 sps:$4 sm:$0xff]  }
 0x1a3   : > { %3418 = vmatpush2.bf16.msra.mxu0 %v11012_v49  ;;  %v11100_v49 = vld [vmem:[#allocation2 + $0x8] ss:$24 sps:$4 sm:$0xff]  }
 0x1a4   : > { %3459 = vmatpush2.bf16.msra.mxu1 %v11015_v50  ;;  %3419 = vmatprep.subr.bf16.mxu0 %v11020_v52  ;;  %v11103_v50 = vld [vmem:[#allocation2 + $0x308] ss:$24 sps:$4 sm:$0xff]   ;;  %v11108_v52 = vld [vmem:[#allocation2 + $0x2dc] ss:$24 sps:$4 sm:$0xff]  }
 0x1a5   : > { %3460 = vmatprep.subr.bf16.mxu1 %v11023_v53  ;;  %v11111_v53 = vld [vmem:[#allocation2 + $0x5dc] ss:$24 sps:$4 sm:$0xff]  }
 0x1a7   : > { %3420 = vmatpush2.bf16.msra.mxu0 %v11018_v54  ;;  %v11106_v54 = vld [vmem:[#allocation2 + $0x2d8] ss:$24 sps:$4 sm:$0xff]  }
 0x1a8   : > { %3461 = vmatpush2.bf16.msra.mxu1 %v11021_v55  ;;  %3421 = vmatprep.subr.bf16.mxu0 %v11026_v56  ;;  %v11109_v55 = vld [vmem:[#allocation2 + $0x5d8] ss:$24 sps:$4 sm:$0xff]   ;;  %v11114_v56 = vld [vmem:[#allocation2 + $0x2ac] ss:$24 sps:$4 sm:$0xff]  }
 0x1a9   : > { %3462 = vmatprep.subr.bf16.mxu1 %v11029_v57  ;;  %v11117_v57 = vld [vmem:[#allocation2 + $0x5ac] ss:$24 sps:$4 sm:$0xff]  }
 0x1ab   : > { %3422 = vmatpush2.bf16.msra.mxu0 %v11024_v58  ;;  %v11112_v58 = vld [vmem:[#allocation2 + $0x2a8] ss:$24 sps:$4 sm:$0xff]  }
 0x1ac   : > { %3463 = vmatpush2.bf16.msra.mxu1 %v11027_v59  ;;  %3423 = vmatprep.subr.bf16.mxu0 %v11032_v60  ;;  %v11115_v59 = vld [vmem:[#allocation2 + $0x5a8] ss:$24 sps:$4 sm:$0xff]   ;;  %v11120_v60 = vld [vmem:[#allocation2 + $0x27c] ss:$24 sps:$4 sm:$0xff]  }
 0x1ad   : > { %3464 = vmatprep.subr.bf16.mxu1 %v11035_v61  ;;  %v11123_v61 = vld [vmem:[#allocation2 + $0x57c] ss:$24 sps:$4 sm:$0xff]  }
 0x1af   : > { %3424 = vmatpush2.bf16.msra.mxu0 %v11030_v62  ;;  %v11118_v62 = vld [vmem:[#allocation2 + $0x278] ss:$24 sps:$4 sm:$0xff]  }
 0x1b0   : > { %3465 = vmatpush2.bf16.msra.mxu1 %v11033_v63  ;;  %3425 = vmatprep.subr.bf16.mxu0 %v11038_v0  ;;  %v11121_v63 = vld [vmem:[#allocation2 + $0x578] ss:$24 sps:$4 sm:$0xff]   ;;  %v11126_v0 = vld [vmem:[#allocation2 + $0x24c] ss:$24 sps:$4 sm:$0xff]  }
 0x1b1   : > { %3466 = vmatprep.subr.bf16.mxu1 %v11041_v1  ;;  %v11129_v1 = vld [vmem:[#allocation2 + $0x54c] ss:$24 sps:$4 sm:$0xff]  }
 0x1b3   : > { %3426 = vmatpush2.bf16.msra.mxu0 %v11036_v2  ;;  %v11124_v2 = vld [vmem:[#allocation2 + $0x248] ss:$24 sps:$4 sm:$0xff]  }
 0x1b4   : > { %3467 = vmatpush2.bf16.msra.mxu1 %v11039_v3  ;;  %3427 = vmatprep.subr.bf16.mxu0 %v11044_v4  ;;  %v11127_v3 = vld [vmem:[#allocation2 + $0x548] ss:$24 sps:$4 sm:$0xff]   ;;  %v11132_v4 = vld [vmem:[#allocation2 + $0x21c] ss:$24 sps:$4 sm:$0xff]  }
 0x1b5   : > { %3468 = vmatprep.subr.bf16.mxu1 %v11047_v5  ;;  %v11135_v5 = vld [vmem:[#allocation2 + $0x51c] ss:$24 sps:$4 sm:$0xff]  }
 0x1b7   : > { %3428 = vmatpush2.bf16.msra.mxu0 %v11042_v8  ;;  %v11130_v8 = vld [vmem:[#allocation2 + $0x218] ss:$24 sps:$4 sm:$0xff]  }
 0x1b8   : > { %3469 = vmatpush2.bf16.msra.mxu1 %v11045_v9  ;;  %3429 = vmatprep.subr.bf16.mxu0 %v11050_v10  ;;  %v11133_v9 = vld [vmem:[#allocation2 + $0x518] ss:$24 sps:$4 sm:$0xff]   ;;  %v11138_v10 = vld [vmem:[#allocation2 + $0x1ec] ss:$24 sps:$4 sm:$0xff]  }
 0x1b9   : > { %3470 = vmatprep.subr.bf16.mxu1 %v11053_v11  ;;  %v11141_v11 = vld [vmem:[#allocation2 + $0x4ec] ss:$24 sps:$4 sm:$0xff]  }
 0x1bb   : > { %3430 = vmatpush2.bf16.msra.mxu0 %v11048_v12  ;;  %v11136_v12 = vld [vmem:[#allocation2 + $0x1e8] ss:$24 sps:$4 sm:$0xff]  }
 0x1bc   : > { %3471 = vmatpush2.bf16.msra.mxu1 %v11051_v13  ;;  %3481 = vmatprep.subr.bf16.mxu0 %v11060_v14  ;;  %v11139_v13 = vld [vmem:[#allocation2 + $0x4e8] ss:$24 sps:$4 sm:$0xff]   ;;  %v11144_v14 = vld [vmem:[#allocation2 + $0x1bc] ss:$24 sps:$4 sm:$0xff]  }
 0x1bd   : > { %3522 = vmatprep.subr.bf16.mxu1 %v11063_v15  ;;  %v11147_v15 = vld [vmem:[#allocation2 + $0x4bc] ss:$24 sps:$4 sm:$0xff]  }
 0x1be   : > { %3432 = vmatmul.mubr.bf16.vlgmr.msra.gmra.mxu0 %v13427_v16 }
 0x1bf   : > { %3473 = vmatmul.mubr.bf16.vlgmr.msra.gmra.mxu1 %v13431_v17  ;;  %3482 = vmatpush1.bf16.msra.mxu0 %v11058_v18  ;;  %v11142_v18 = vld [vmem:[#allocation2 + $0x1b8] ss:$24 sps:$4 sm:$0xff]  }
 0x1c0   : > { %3523 = vmatpush1.bf16.msra.mxu1 %v11061_v19  ;;  %3483 = vmatprep.subr.bf16.mxu0 %v11066_v20  ;;  %v11145_v19 = vld [vmem:[#allocation2 + $0x4b8] ss:$24 sps:$4 sm:$0xff]   ;;  %v11150_v20 = vld [vmem:[#allocation2 + $0x18c] ss:$24 sps:$4 sm:$0xff]  }
 0x1c1   : > { %3524 = vmatprep.subr.bf16.mxu1 %v11069_v21  ;;  %3513 = vmatprep.mubr.bf16.mxu0 %v13396_v47  ;;  %v11153_v21 = vld [vmem:[#allocation2 + $0x48c] ss:$24 sps:$4 sm:$0xff]  }
 0x1c2   : > { %3554 = vmatprep.mubr.bf16.mxu1 %v13399_v51 }
 0x1c3   : > { %3484 = vmatpush1.bf16.msra.mxu0 %v11064_v22  ;;  %v11148_v22 = vld [vmem:[#allocation2 + $0x188] ss:$24 sps:$4 sm:$0xff]  }
 0x1c4   : > { %3525 = vmatpush1.bf16.msra.mxu1 %v11067_v23  ;;  %3485 = vmatprep.subr.bf16.mxu0 %v11072_v24  ;;  %v11151_v23 = vld [vmem:[#allocation2 + $0x488] ss:$24 sps:$4 sm:$0xff]   ;;  %v11156_v24 = vld [vmem:[#allocation2 + $0x75c] ss:$24 sps:$4 sm:$0xff]  }
 0x1c5   : > { %3526 = vmatprep.subr.bf16.mxu1 %v11075_v25  ;;  %v11159_v25 = vld [vmem:[#allocation2 + $0xa5c] ss:$24 sps:$4 sm:$0xff]  }
 0x1c7   : > { %3486 = vmatpush1.bf16.msra.mxu0 %v11070_v26  ;;  %v11154_v26 = vld [vmem:[#allocation2 + $0x758] ss:$24 sps:$4 sm:$0xff]  }
 0x1c8   : > { %3527 = vmatpush1.bf16.msra.mxu1 %v11073_v27  ;;  %3487 = vmatprep.subr.bf16.mxu0 %v11078_v28  ;;  %v11157_v27 = vld [vmem:[#allocation2 + $0xa58] ss:$24 sps:$4 sm:$0xff]   ;;  %v11162_v28 = vld [vmem:[#allocation2 + $0x72c] ss:$24 sps:$4 sm:$0xff]  }
 0x1c9   : > { %3528 = vmatprep.subr.bf16.mxu1 %v11081_v29  ;;  %v11165_v29 = vld [vmem:[#allocation2 + $0xa2c] ss:$24 sps:$4 sm:$0xff]  }
 0x1cb   : > { %3488 = vmatpush1.bf16.msra.mxu0 %v11076_v30  ;;  %v11160_v30 = vld [vmem:[#allocation2 + $0x728] ss:$24 sps:$4 sm:$0xff]  }
 0x1cc   : > { %3529 = vmatpush1.bf16.msra.mxu1 %v11079_v31  ;;  %3489 = vmatprep.subr.bf16.mxu0 %v11084_v32  ;;  %v11163_v31 = vld [vmem:[#allocation2 + $0xa28] ss:$24 sps:$4 sm:$0xff]   ;;  %v11168_v32 = vld [vmem:[#allocation2 + $0x6fc] ss:$24 sps:$4 sm:$0xff]  }
 0x1cd   : > { %3530 = vmatprep.subr.bf16.mxu1 %v11087_v33  ;;  %v11171_v33 = vld [vmem:[#allocation2 + $0x9fc] ss:$24 sps:$4 sm:$0xff]  }
 0x1cf   : > { %3490 = vmatpush1.bf16.msra.mxu0 %v11082_v34  ;;  %v11166_v34 = vld [vmem:[#allocation2 + $0x6f8] ss:$24 sps:$4 sm:$0xff]  }
 0x1d0   : > { %3531 = vmatpush1.bf16.msra.mxu1 %v11085_v35  ;;  %3491 = vmatprep.subr.bf16.mxu0 %v11090_v38  ;;  %v11169_v35 = vld [vmem:[#allocation2 + $0x9f8] ss:$24 sps:$4 sm:$0xff]   ;;  %v11174_v38 = vld [vmem:[#allocation2 + $0x6cc] ss:$24 sps:$4 sm:$0xff]  }
 0x1d1   : > { %3532 = vmatprep.subr.bf16.mxu1 %v11093_v39  ;;  %v11177_v39 = vld [vmem:[#allocation2 + $0x9cc] ss:$24 sps:$4 sm:$0xff]  }
 0x1d3   : > { %3492 = vmatpush1.bf16.msra.mxu0 %v11088_v40  ;;  %v11172_v40 = vld [vmem:[#allocation2 + $0x6c8] ss:$24 sps:$4 sm:$0xff]  }
 0x1d4   : > { %3533 = vmatpush1.bf16.msra.mxu1 %v11091_v41  ;;  %3493 = vmatprep.subr.bf16.mxu0 %v11096_v42  ;;  %v11175_v41 = vld [vmem:[#allocation2 + $0x9c8] ss:$24 sps:$4 sm:$0xff]   ;;  %v11180_v42 = vld [vmem:[#allocation2 + $0x69c] ss:$24 sps:$4 sm:$0xff]  }
 0x1d5   : > { %3534 = vmatprep.subr.bf16.mxu1 %v11099_v43  ;;  %v11183_v43 = vld [vmem:[#allocation2 + $0x99c] ss:$24 sps:$4 sm:$0xff]  }
 0x1d7   : > { %3494 = vmatpush1.bf16.msra.mxu0 %v11094_v44  ;;  %v11178_v44 = vld [vmem:[#allocation2 + $0x698] ss:$24 sps:$4 sm:$0xff]  }
 0x1d8   : > { %3535 = vmatpush1.bf16.msra.mxu1 %v11097_v45  ;;  %3495 = vmatprep.subr.bf16.mxu0 %v11102_v46  ;;  %v11181_v45 = vld [vmem:[#allocation2 + $0x998] ss:$24 sps:$4 sm:$0xff]   ;;  %v11186_v46 = vld [vmem:[#allocation2 + $0x66c] ss:$24 sps:$4 sm:$0xff]  }
 0x1d9   : > { %3536 = vmatprep.subr.bf16.mxu1 %v11105_v48  ;;  %v11189_v48 = vld [vmem:[#allocation2 + $0x96c] ss:$24 sps:$4 sm:$0xff]  }
 0x1db   : > { %3496 = vmatpush1.bf16.msra.mxu0 %v11100_v49  ;;  %v11184_v49 = vld [vmem:[#allocation2 + $0x668] ss:$24 sps:$4 sm:$0xff]  }
 0x1dc   : > { %3537 = vmatpush1.bf16.msra.mxu1 %v11103_v50  ;;  %3497 = vmatprep.subr.bf16.mxu0 %v11108_v52  ;;  %v11187_v50 = vld [vmem:[#allocation2 + $0x968] ss:$24 sps:$4 sm:$0xff]   ;;  %v11192_v52 = vld [vmem:[#allocation2 + $0x63c] ss:$24 sps:$4 sm:$0xff]  }
 0x1dd   : > { %3538 = vmatprep.subr.bf16.mxu1 %v11111_v53  ;;  %v11195_v53 = vld [vmem:[#allocation2 + $0x93c] ss:$24 sps:$4 sm:$0xff]  }
 0x1df   : > { %3498 = vmatpush2.bf16.msra.mxu0 %v11106_v54  ;;  %v11190_v54 = vld [vmem:[#allocation2 + $0x638] ss:$24 sps:$4 sm:$0xff]  }
 0x1e0   : > { %3539 = vmatpush2.bf16.msra.mxu1 %v11109_v55  ;;  %3499 = vmatprep.subr.bf16.mxu0 %v11114_v56  ;;  %v11193_v55 = vld [vmem:[#allocation2 + $0x938] ss:$24 sps:$4 sm:$0xff]   ;;  %v11198_v56 = vld [vmem:[#allocation2 + $0x60c] ss:$24 sps:$4 sm:$0xff]  }
 0x1e1   : > { %3540 = vmatprep.subr.bf16.mxu1 %v11117_v57  ;;  %v11201_v57 = vld [vmem:[#allocation2 + $0x90c] ss:$24 sps:$4 sm:$0xff]  }
 0x1e3   : > { %3500 = vmatpush2.bf16.msra.mxu0 %v11112_v58  ;;  %v11196_v58 = vld [vmem:[#allocation2 + $0x608] ss:$24 sps:$4 sm:$0xff]  }
 0x1e4   : > { %3541 = vmatpush2.bf16.msra.mxu1 %v11115_v59  ;;  %3501 = vmatprep.subr.bf16.mxu0 %v11120_v60  ;;  %v11199_v59 = vld [vmem:[#allocation2 + $0x908] ss:$24 sps:$4 sm:$0xff]   ;;  %v11204_v60 = vld [vmem:[#allocation2 + $0x8dc] ss:$24 sps:$4 sm:$0xff]  }
 0x1e5   : > { %3542 = vmatprep.subr.bf16.mxu1 %v11123_v61  ;;  %v11207_v61 = vld [vmem:[#allocation2 + $0xbdc] ss:$24 sps:$4 sm:$0xff]  }
 0x1e7   : > { %3502 = vmatpush2.bf16.msra.mxu0 %v11118_v62  ;;  %v11202_v62 = vld [vmem:[#allocation2 + $0x8d8] ss:$24 sps:$4 sm:$0xff]  }
 0x1e8   : > { %3543 = vmatpush2.bf16.msra.mxu1 %v11121_v63  ;;  %3503 = vmatprep.subr.bf16.mxu0 %v11126_v0  ;;  %v11205_v63 = vld [vmem:[#allocation2 + $0xbd8] ss:$24 sps:$4 sm:$0xff]   ;;  %v11210_v0 = vld [vmem:[#allocation2 + $0x8ac] ss:$24 sps:$4 sm:$0xff]  }
 0x1e9   : > { %3544 = vmatprep.subr.bf16.mxu1 %v11129_v1  ;;  %v11213_v1 = vld [vmem:[#allocation2 + $0xbac] ss:$24 sps:$4 sm:$0xff]  }
 0x1eb   : > { %3504 = vmatpush2.bf16.msra.mxu0 %v11124_v2  ;;  %v11208_v2 = vld [vmem:[#allocation2 + $0x8a8] ss:$24 sps:$4 sm:$0xff]  }
 0x1ec   : > { %3545 = vmatpush2.bf16.msra.mxu1 %v11127_v3  ;;  %3505 = vmatprep.subr.bf16.mxu0 %v11132_v4  ;;  %v11211_v3 = vld [vmem:[#allocation2 + $0xba8] ss:$24 sps:$4 sm:$0xff]   ;;  %v11216_v4 = vld [vmem:[#allocation2 + $0x87c] ss:$24 sps:$4 sm:$0xff]  }
 0x1ed   : > { %3546 = vmatprep.subr.bf16.mxu1 %v11135_v5  ;;  %v11219_v5 = vld [vmem:[#allocation2 + $0xb7c] ss:$24 sps:$4 sm:$0xff]  }
 0x1ef   : > { %3506 = vmatpush2.bf16.msra.mxu0 %v11130_v8  ;;  %v11214_v8 = vld [vmem:[#allocation2 + $0x878] ss:$24 sps:$4 sm:$0xff]  }
 0x1f0   : > { %3547 = vmatpush2.bf16.msra.mxu1 %v11133_v9  ;;  %3507 = vmatprep.subr.bf16.mxu0 %v11138_v10  ;;  %v11217_v9 = vld [vmem:[#allocation2 + $0xb78] ss:$24 sps:$4 sm:$0xff]   ;;  %v11222_v10 = vld [vmem:[#allocation2 + $0x84c] ss:$24 sps:$4 sm:$0xff]  }
 0x1f1   : > { %3548 = vmatprep.subr.bf16.mxu1 %v11141_v11  ;;  %v11225_v11 = vld [vmem:[#allocation2 + $0xb4c] ss:$24 sps:$4 sm:$0xff]  }
 0x1f3   : > { %3508 = vmatpush2.bf16.msra.mxu0 %v11136_v12  ;;  %v11220_v12 = vld [vmem:[#allocation2 + $0x848] ss:$24 sps:$4 sm:$0xff]  }
 0x1f4   : > { %3549 = vmatpush2.bf16.msra.mxu1 %v11139_v13  ;;  %3509 = vmatprep.subr.bf16.mxu0 %v11144_v14  ;;  %v11223_v13 = vld [vmem:[#allocation2 + $0xb48] ss:$24 sps:$4 sm:$0xff]   ;;  %v11228_v14 = vld [vmem:[#allocation2 + $0x81c] ss:$24 sps:$4 sm:$0xff]  }
 0x1f5   : > { %3550 = vmatprep.subr.bf16.mxu1 %v11147_v15  ;;  %v11231_v15 = vld [vmem:[#allocation2 + $0xb1c] ss:$24 sps:$4 sm:$0xff]  }
 0x1f7   : > { %3510 = vmatpush2.bf16.msra.mxu0 %v11142_v18  ;;  %v11226_v18 = vld [vmem:[#allocation2 + $0x818] ss:$24 sps:$4 sm:$0xff]  }
 0x1f8   : > { %3551 = vmatpush2.bf16.msra.mxu1 %v11145_v19  ;;  %3511 = vmatprep.subr.bf16.mxu0 %v11150_v20  ;;  %v11229_v19 = vld [vmem:[#allocation2 + $0xb18] ss:$24 sps:$4 sm:$0xff]   ;;  %v11234_v20 = vld [vmem:[#allocation2 + $0x7ec] ss:$24 sps:$4 sm:$0xff]  }
 0x1f9   : > { %3552 = vmatprep.subr.bf16.mxu1 %v11153_v21  ;;  %v11237_v21 = vld [vmem:[#allocation2 + $0xaec] ss:$24 sps:$4 sm:$0xff]  }
 0x1fb   : > { %3512 = vmatpush2.bf16.msra.mxu0 %v11148_v22  ;;  %v11232_v22 = vld [vmem:[#allocation2 + $0x7e8] ss:$24 sps:$4 sm:$0xff]  }
 0x1fc   : > { %3553 = vmatpush2.bf16.msra.mxu1 %v11151_v23  ;;  %3563 = vmatprep.subr.bf16.mxu0 %v11156_v24  ;;  %v11235_v23 = vld [vmem:[#allocation2 + $0xae8] ss:$24 sps:$4 sm:$0xff]   ;;  %v11240_v24 = vld [vmem:[#allocation2 + $0x7bc] ss:$24 sps:$4 sm:$0xff]  }
 0x1fd   : > { %3604 = vmatprep.subr.bf16.mxu1 %v11159_v25  ;;  %v11243_v25 = vld [vmem:[#allocation2 + $0xabc] ss:$24 sps:$4 sm:$0xff]  }
 0x1fe   : > { %3514 = vmatmul.mubr.bf16.vlgmr.msra.gmra.mxu0 %v13403_v6 }
 0x1ff   : > { %3555 = vmatmul.mubr.bf16.vlgmr.msra.gmra.mxu1 %v13405_v7  ;;  %3564 = vmatpush1.bf16.msra.mxu0 %v11154_v26  ;;  %v11238_v26 = vld [vmem:[#allocation2 + $0x7b8] ss:$24 sps:$4 sm:$0xff]  }
 0x200   : > { %3605 = vmatpush1.bf16.msra.mxu1 %v11157_v27  ;;  %3565 = vmatprep.subr.bf16.mxu0 %v11162_v28  ;;  %v11241_v27 = vld [vmem:[#allocation2 + $0xab8] ss:$24 sps:$4 sm:$0xff]   ;;  %v11246_v28 = vld [vmem:[#allocation2 + $0x78c] ss:$24 sps:$4 sm:$0xff]  }
 0x201   : > { %3606 = vmatprep.subr.bf16.mxu1 %v11165_v29  ;;  %3595 = vmatprep.mubr.bf16.mxu0 %v13417_v36  ;;  %v11249_v29 = vld [vmem:[#allocation2 + $0xa8c] ss:$24 sps:$4 sm:$0xff]  }
 0x202   : > { %3636 = vmatprep.mubr.bf16.mxu1 %v13421_v37 }
 0x203   : > { %3566 = vmatpush1.bf16.msra.mxu0 %v11160_v30  ;;  %v11244_v30 = vld [vmem:[#allocation2 + $0x788] ss:$24 sps:$4 sm:$0xff]  }
 0x204   : > { %3607 = vmatpush1.bf16.msra.mxu1 %v11163_v31  ;;  %3567 = vmatprep.subr.bf16.mxu0 %v11168_v32  ;;  %v11247_v31 = vld [vmem:[#allocation2 + $0xa88] ss:$24 sps:$4 sm:$0xff]   ;;  %v11252_v32 = vld [vmem:[#allocation2 + $0x164] ss:$24 sps:$4 sm:$0xff]  }
 0x205   : > { %3608 = vmatprep.subr.bf16.mxu1 %v11171_v33  ;;  %v11255_v33 = vld [vmem:[#allocation2 + $0x464] ss:$24 sps:$4 sm:$0xff]  }
 0x207   : > { %3568 = vmatpush1.bf16.msra.mxu0 %v11166_v34  ;;  %v11250_v34 = vld [vmem:[#allocation2 + $0x160] ss:$24 sps:$4 sm:$0xff]  }
 0x208   : > { %3609 = vmatpush1.bf16.msra.mxu1 %v11169_v35  ;;  %3569 = vmatprep.subr.bf16.mxu0 %v11174_v38  ;;  %v11253_v35 = vld [vmem:[#allocation2 + $0x460] ss:$24 sps:$4 sm:$0xff]   ;;  %v11258_v38 = vld [vmem:[#allocation2 + $0x134] ss:$24 sps:$4 sm:$0xff]  }
 0x209   : > { %3610 = vmatprep.subr.bf16.mxu1 %v11177_v39  ;;  %v11261_v39 = vld [vmem:[#allocation2 + $0x434] ss:$24 sps:$4 sm:$0xff]  }
 0x20b   : > { %3570 = vmatpush1.bf16.msra.mxu0 %v11172_v40  ;;  %v11256_v40 = vld [vmem:[#allocation2 + $0x130] ss:$24 sps:$4 sm:$0xff]  }
 0x20c   : > { %3611 = vmatpush1.bf16.msra.mxu1 %v11175_v41  ;;  %3571 = vmatprep.subr.bf16.mxu0 %v11180_v42 }
 0x20d   : > { %3612 = vmatprep.subr.bf16.mxu1 %v11183_v43  ;;  %v11259_v43 = vld [vmem:[#allocation2 + $0x430] ss:$24 sps:$4 sm:$0xff]  }
 0x20f   : > { %3572 = vmatpush1.bf16.msra.mxu0 %v11178_v44 }
 0x210   : > { %3613 = vmatpush1.bf16.msra.mxu1 %v11181_v45  ;;  %3573 = vmatprep.subr.bf16.mxu0 %v11186_v46  ;;  %v11264_v45 = vld [vmem:[#allocation2 + $0x104] ss:$24 sps:$4 sm:$0xff]  }
 0x211   : > { %3614 = vmatprep.subr.bf16.mxu1 %v11189_v48 }
 0x213   : > { %3574 = vmatpush1.bf16.msra.mxu0 %v11184_v49  ;;  %v11267_v49 = vld [vmem:[#allocation2 + $0x404] ss:$24 sps:$4 sm:$0xff]  }
 0x214   : > { %3615 = vmatpush1.bf16.msra.mxu1 %v11187_v50  ;;  %3575 = vmatprep.subr.bf16.mxu0 %v11192_v52  ;;  %v11262_v52 = vld [vmem:[#allocation2 + $0x100] ss:$24 sps:$4 sm:$0xff]  }
 0x215   : > { %3616 = vmatprep.subr.bf16.mxu1 %v11195_v53 }
 0x217   : > { %3576 = vmatpush1.bf16.msra.mxu0 %v11190_v54 }
 0x218   : > { %3617 = vmatpush1.bf16.msra.mxu1 %v11193_v55  ;;  %3577 = vmatprep.subr.bf16.mxu0 %v11198_v56  ;;  %v11265_v55 = vld [vmem:[#allocation2 + $0x400] ss:$24 sps:$4 sm:$0xff]   ;;  %v11270_v56 = vld [vmem:[#allocation2 + $0xd4] ss:$24 sps:$4 sm:$0xff]  }
 0x219   : > { %3618 = vmatprep.subr.bf16.mxu1 %v11201_v57 }
 0x21b   : > { %3578 = vmatpush1.bf16.msra.mxu0 %v11196_v58 }
 0x21c   : > { %3619 = vmatpush1.bf16.msra.mxu1 %v11199_v59  ;;  %3579 = vmatprep.subr.bf16.mxu0 %v11204_v60  ;;  %v11273_v59 = vld [vmem:[#allocation2 + $0x3d4] ss:$24 sps:$4 sm:$0xff]   ;;  %v11268_v60 = vld [vmem:[#allocation2 + $0xd0] ss:$24 sps:$4 sm:$0xff]  }
 0x21d   : > { %3620 = vmatprep.subr.bf16.mxu1 %v11207_v61  ;;  %v11271_v61 = vld [vmem:[#allocation2 + $0x3d0] ss:$24 sps:$4 sm:$0xff]  }
 0x21f   : > { %3580 = vmatpush2.bf16.msra.mxu0 %v11202_v62  ;;  %v11276_v62 = vld [vmem:[#allocation2 + $0xa4] ss:$24 sps:$4 sm:$0xff]  }
 0x220   : > { %3621 = vmatpush2.bf16.msra.mxu1 %v11205_v63  ;;  %3581 = vmatprep.subr.bf16.mxu0 %v11210_v0  ;;  %v11279_v63 = vld [vmem:[#allocation2 + $0x3a4] ss:$24 sps:$4 sm:$0xff]   ;;  %v11274_v0 = vld [vmem:[#allocation2 + $0xa0] ss:$24 sps:$4 sm:$0xff]  }
 0x221   : > { %3622 = vmatprep.subr.bf16.mxu1 %v11213_v1  ;;  %v11277_v1 = vld [vmem:[#allocation2 + $0x3a0] ss:$24 sps:$4 sm:$0xff]  }
 0x223   : > { %3582 = vmatpush2.bf16.msra.mxu0 %v11208_v2  ;;  %v11282_v2 = vld [vmem:[#allocation2 + $0x74] ss:$24 sps:$4 sm:$0xff]  }
 0x224   : > { %3623 = vmatpush2.bf16.msra.mxu1 %v11211_v3  ;;  %3583 = vmatprep.subr.bf16.mxu0 %v11216_v4  ;;  %v11285_v3 = vld [vmem:[#allocation2 + $0x374] ss:$24 sps:$4 sm:$0xff]   ;;  %v11280_v4 = vld [vmem:[#allocation2 + $0x70] ss:$24 sps:$4 sm:$0xff]  }
 0x225   : > { %3624 = vmatprep.subr.bf16.mxu1 %v11219_v5  ;;  %v11283_v5 = vld [vmem:[#allocation2 + $0x370] ss:$24 sps:$4 sm:$0xff]  }
 0x227   : > { %3584 = vmatpush2.bf16.msra.mxu0 %v11214_v8  ;;  %v11288_v8 = vld [vmem:[#allocation2 + $0x44] ss:$24 sps:$4 sm:$0xff]  }
 0x228   : > { %3625 = vmatpush2.bf16.msra.mxu1 %v11217_v9  ;;  %3585 = vmatprep.subr.bf16.mxu0 %v11222_v10  ;;  %v11291_v9 = vld [vmem:[#allocation2 + $0x344] ss:$24 sps:$4 sm:$0xff]   ;;  %v11286_v10 = vld [vmem:[#allocation2 + $0x40] ss:$24 sps:$4 sm:$0xff]  }
 0x229   : > { %3626 = vmatprep.subr.bf16.mxu1 %v11225_v11  ;;  %v11289_v11 = vld [vmem:[#allocation2 + $0x340] ss:$24 sps:$4 sm:$0xff]  }
 0x22b   : > { %3586 = vmatpush2.bf16.msra.mxu0 %v11220_v12  ;;  %v11294_v12 = vld [vmem:[#allocation2 + $0x14] ss:$24 sps:$4 sm:$0xff]  }
 0x22c   : > { %3627 = vmatpush2.bf16.msra.mxu1 %v11223_v13  ;;  %3587 = vmatprep.subr.bf16.mxu0 %v11228_v14  ;;  %v11297_v13 = vld [vmem:[#allocation2 + $0x314] ss:$24 sps:$4 sm:$0xff]   ;;  %v11292_v14 = vld [vmem:[#allocation2 + $0x10] ss:$24 sps:$4 sm:$0xff]  }
 0x22d   : > { %3628 = vmatprep.subr.bf16.mxu1 %v11231_v15  ;;  %v11295_v15 = vld [vmem:[#allocation2 + $0x310] ss:$24 sps:$4 sm:$0xff]  }
 0x22f   : > { %3588 = vmatpush2.bf16.msra.mxu0 %v11226_v18  ;;  %v11300_v18 = vld [vmem:[#allocation2 + $0x2e4] ss:$24 sps:$4 sm:$0xff]  }
 0x230   : > { %3629 = vmatpush2.bf16.msra.mxu1 %v11229_v19  ;;  %3589 = vmatprep.subr.bf16.mxu0 %v11234_v20  ;;  %v11303_v19 = vld [vmem:[#allocation2 + $0x5e4] ss:$24 sps:$4 sm:$0xff]   ;;  %v11298_v20 = vld [vmem:[#allocation2 + $0x2e0] ss:$24 sps:$4 sm:$0xff]  }
 0x231   : > { %3630 = vmatprep.subr.bf16.mxu1 %v11237_v21  ;;  %v11301_v21 = vld [vmem:[#allocation2 + $0x5e0] ss:$24 sps:$4 sm:$0xff]  }
 0x233   : > { %3590 = vmatpush2.bf16.msra.mxu0 %v11232_v22  ;;  %v11306_v22 = vld [vmem:[#allocation2 + $0x2b4] ss:$24 sps:$4 sm:$0xff]  }
 0x234   : > { %3631 = vmatpush2.bf16.msra.mxu1 %v11235_v23  ;;  %3591 = vmatprep.subr.bf16.mxu0 %v11240_v24  ;;  %v11309_v23 = vld [vmem:[#allocation2 + $0x5b4] ss:$24 sps:$4 sm:$0xff]   ;;  %v11304_v24 = vld [vmem:[#allocation2 + $0x2b0] ss:$24 sps:$4 sm:$0xff]  }
 0x235   : > { %3632 = vmatprep.subr.bf16.mxu1 %v11243_v25  ;;  %v11307_v25 = vld [vmem:[#allocation2 + $0x5b0] ss:$24 sps:$4 sm:$0xff]  }
 0x237   : > { %3592 = vmatpush2.bf16.msra.mxu0 %v11238_v26  ;;  %v11312_v26 = vld [vmem:[#allocation2 + $0x284] ss:$24 sps:$4 sm:$0xff]  }
 0x238   : > { %3633 = vmatpush2.bf16.msra.mxu1 %v11241_v27  ;;  %3593 = vmatprep.subr.bf16.mxu0 %v11246_v28  ;;  %v11315_v27 = vld [vmem:[#allocation2 + $0x584] ss:$24 sps:$4 sm:$0xff]   ;;  %v11310_v28 = vld [vmem:[#allocation2 + $0x280] ss:$24 sps:$4 sm:$0xff]  }
 0x239   : > { %3634 = vmatprep.subr.bf16.mxu1 %v11249_v29  ;;  %v11313_v29 = vld [vmem:[#allocation2 + $0x580] ss:$24 sps:$4 sm:$0xff]  }
 0x23b   : > { %3594 = vmatpush2.bf16.msra.mxu0 %v11244_v30  ;;  %v11318_v30 = vld [vmem:[#allocation2 + $0x254] ss:$24 sps:$4 sm:$0xff]  }
 0x23c   : > { %3635 = vmatpush2.bf16.msra.mxu1 %v11247_v31  ;;  %3645 = vmatprep.subr.bf16.mxu0 %v11252_v32  ;;  %v11321_v31 = vld [vmem:[#allocation2 + $0x554] ss:$24 sps:$4 sm:$0xff]   ;;  %v11316_v32 = vld [vmem:[#allocation2 + $0x250] ss:$24 sps:$4 sm:$0xff]  }
 0x23d   : > { %3686 = vmatprep.subr.bf16.mxu1 %v11255_v33  ;;  %v11319_v33 = vld [vmem:[#allocation2 + $0x550] ss:$24 sps:$4 sm:$0xff]  }
 0x23e   : > { %v3351_v41 = vpop.f32.mrf.mxu0  ;;  %3596 = vmatmul.mubr.bf16.vlgmr.msra.gmra.mxu0 %v13427_v16 }
 0x23f   : > { %v3392_v42 = vpop.f32.mrf.mxu1  ;;  %3637 = vmatmul.mubr.bf16.vlgmr.msra.gmra.mxu1 %v13431_v17  ;;  %3646 = vmatpush1.bf16.msra.mxu0 %v11250_v34  ;;  %v11324_v34 = vld [vmem:[#allocation2 + $0x224] ss:$24 sps:$4 sm:$0xff]  }
 0x240   : > { %v13443_v44 = vadd.f32 %v3392_v42, %v3351_v41  ;;  %3687 = vmatpush1.bf16.msra.mxu1 %v11253_v35  ;;  %v3353_v46 = vpop.f32.mrf.mxu0  ;;  %3647 = vmatprep.subr.bf16.mxu0 %v11258_v38  ;;  %v11327_v35 = vld [vmem:[#allocation2 + $0x524] ss:$24 sps:$4 sm:$0xff]   ;;  %v11322_v38 = vld [vmem:[#allocation2 + $0x220] ss:$24 sps:$4 sm:$0xff]   ;;  %v11333_v41 = vld [vmem:[#allocation2 + $0x4f4] ss:$24 sps:$4 sm:$0xff]  }
 0x241   : > { %v3394_v48 = vpop.f32.mrf.mxu1  ;;  %3688 = vmatprep.subr.bf16.mxu1 %v11261_v39  ;;  %3677 = vmatprep.mubr.bf16.mxu0 %v13396_v47  ;;  %v11325_v39 = vld [vmem:[#allocation2 + $0x520] ss:$24 sps:$4 sm:$0xff]   ;;  %v11328_v42 = vld [vmem:[#allocation2 + $0x1f0] ss:$24 sps:$4 sm:$0xff]  }
 0x242   : > { %v13445_v50 = vadd.f32 %v3394_v48, %v3353_v46  ;;  %3718 = vmatprep.mubr.bf16.mxu1 %v13399_v51  ;;  %v3355_v53 = vpop.f32.mrf.mxu0  ;;  %v11339_v46 = vld [vmem:[#allocation2 + $0x4c4] ss:$24 sps:$4 sm:$0xff]   ;;  %v11334_v48 = vld [vmem:[#allocation2 + $0x1c0] ss:$24 sps:$4 sm:$0xff]  }
 0x243   : > { %v3396_v54 = vpop.f32.mrf.mxu1  ;;  %3648 = vmatpush1.bf16.msra.mxu0 %v11256_v40  ;;  %v11330_v40 = vld [vmem:[#allocation2 + $0x1f4] ss:$24 sps:$4 sm:$0xff]  }
 0x244   : > { %3689 = vmatpush1.bf16.msra.mxu1 %v11259_v43  ;;  %v3356_v57 = vpop.f32.mrf.mxu0  ;;  %3649 = vmatprep.subr.bf16.mxu0 %v11264_v45  ;;  %v11331_v43 = vld [vmem:[#allocation2 + $0x4f0] ss:$24 sps:$4 sm:$0xff]   ;;  %v11336_v45 = vld [vmem:[#allocation2 + $0x1c4] ss:$24 sps:$4 sm:$0xff]   ;;  %v11345_v53 = vld [vmem:[#allocation2 + $0x494] ss:$24 sps:$4 sm:$0xff]  }
 0x245   : > { %v3397_v58 = vpop.f32.mrf.mxu1  ;;  %3690 = vmatprep.subr.bf16.mxu1 %v11267_v49  ;;  %v11337_v49 = vld [vmem:[#allocation2 + $0x4c0] ss:$24 sps:$4 sm:$0xff]   ;;  %v11340_v54 = vld [vmem:[#allocation2 + $0x190] ss:$24 sps:$4 sm:$0xff]   ;;  %v11351_v57 = vld [vmem:[#allocation2 + $0xa64] ss:$24 sps:$4 sm:$0xff]  }
 0x246   : > { %v11346_v58 = vld [vmem:[#allocation2 + $0x760] ss:$24 sps:$4 sm:$0xff]  }
 0x247   : > { %3650 = vmatpush1.bf16.msra.mxu0 %v11262_v52  ;;  %v11342_v52 = vld [vmem:[#allocation2 + $0x194] ss:$24 sps:$4 sm:$0xff]  }
 0x248   : > { %3691 = vmatpush1.bf16.msra.mxu1 %v11265_v55  ;;  %3651 = vmatprep.subr.bf16.mxu0 %v11270_v56  ;;  %v11343_v55 = vld [vmem:[#allocation2 + $0x490] ss:$24 sps:$4 sm:$0xff]   ;;  %v11348_v56 = vld [vmem:[#allocation2 + $0x764] ss:$24 sps:$4 sm:$0xff]  }
 0x249   : > { %3692 = vmatprep.subr.bf16.mxu1 %v11273_v59  ;;  %v11349_v59 = vld [vmem:[#allocation2 + $0xa60] ss:$24 sps:$4 sm:$0xff]  }
 0x24b   : > { %3652 = vmatpush1.bf16.msra.mxu0 %v11268_v60  ;;  %v11354_v60 = vld [vmem:[#allocation2 + $0x734] ss:$24 sps:$4 sm:$0xff]  }
 0x24c   : > { %3693 = vmatpush1.bf16.msra.mxu1 %v11271_v61  ;;  %3653 = vmatprep.subr.bf16.mxu0 %v11276_v62  ;;  %v11357_v61 = vld [vmem:[#allocation2 + $0xa34] ss:$24 sps:$4 sm:$0xff]   ;;  %v11352_v62 = vld [vmem:[#allocation2 + $0x730] ss:$24 sps:$4 sm:$0xff]  }
 0x24d   : > { %3694 = vmatprep.subr.bf16.mxu1 %v11279_v63  ;;  %v11355_v63 = vld [vmem:[#allocation2 + $0xa30] ss:$24 sps:$4 sm:$0xff]  }
 0x24f   : > { %3654 = vmatpush1.bf16.msra.mxu0 %v11274_v0 }
 0x250   : > { %3695 = vmatpush1.bf16.msra.mxu1 %v11277_v1  ;;  %3655 = vmatprep.subr.bf16.mxu0 %v11282_v2  ;;  %v11360_v2 = vld [vmem:[#allocation2 + $0x704] ss:$24 sps:$4 sm:$0xff]  }
 0x251   : > { %3696 = vmatprep.subr.bf16.mxu1 %v11285_v3  ;;  %v11363_v3 = vld [vmem:[#allocation2 + $0xa04] ss:$24 sps:$4 sm:$0xff]  }
 0x253   : > { %3656 = vmatpush1.bf16.msra.mxu0 %v11280_v4 }
 0x254   : > { %3697 = vmatpush1.bf16.msra.mxu1 %v11283_v5  ;;  %3657 = vmatprep.subr.bf16.mxu0 %v11288_v8 }
 0x255   : > { %3698 = vmatprep.subr.bf16.mxu1 %v11291_v9 }
 0x257   : > { %3658 = vmatpush1.bf16.msra.mxu0 %v11286_v10 }
 0x258   : > { %3699 = vmatpush1.bf16.msra.mxu1 %v11289_v11  ;;  %3659 = vmatprep.subr.bf16.mxu0 %v11294_v12  ;;  %v11358_v11 = vld [vmem:[#allocation2 + $0x700] ss:$24 sps:$4 sm:$0xff]  }
 0x259   : > { %3700 = vmatprep.subr.bf16.mxu1 %v11297_v13  ;;  %v11361_v12 = vld [vmem:[#allocation2 + $0xa00] ss:$24 sps:$4 sm:$0xff]  }
 0x25b   : > { %3660 = vmatpush1.bf16.msra.mxu0 %v11292_v14 }
 0x25c   : > { %3701 = vmatpush1.bf16.msra.mxu1 %v11295_v15  ;;  %3661 = vmatprep.subr.bf16.mxu0 %v11300_v18  ;;  %v11366_v15 = vld [vmem:[#allocation2 + $0x6d4] ss:$24 sps:$4 sm:$0xff]  }
 0x25d   : > { %3702 = vmatprep.subr.bf16.mxu1 %v11303_v19 }
 0x25f   : > { %3662 = vmatpush2.bf16.msra.mxu0 %v11298_v20 }
 0x260   : > { %3703 = vmatpush2.bf16.msra.mxu1 %v11301_v21  ;;  %3663 = vmatprep.subr.bf16.mxu0 %v11306_v22  ;;  %v11364_v21 = vld [vmem:[#allocation2 + $0x6d0] ss:$24 sps:$4 sm:$0xff]   ;;  %v11372_v22 = vld [vmem:[#allocation2 + $0x6a4] ss:$24 sps:$4 sm:$0xff]  }
 0x261   : > { %3704 = vmatprep.subr.bf16.mxu1 %v11309_v23  ;;  %v11375_v23 = vld [vmem:[#allocation2 + $0x9a4] ss:$24 sps:$4 sm:$0xff]  }
 0x263   : > { %3664 = vmatpush2.bf16.msra.mxu0 %v11304_v24  ;;  %v11370_v24 = vld [vmem:[#allocation2 + $0x6a0] ss:$24 sps:$4 sm:$0xff]  }
 0x264   : > { %3705 = vmatpush2.bf16.msra.mxu1 %v11307_v25  ;;  %3665 = vmatprep.subr.bf16.mxu0 %v11312_v26  ;;  %v11373_v25 = vld [vmem:[#allocation2 + $0x9a0] ss:$24 sps:$4 sm:$0xff]   ;;  %v11378_v26 = vld [vmem:[#allocation2 + $0x674] ss:$24 sps:$4 sm:$0xff]  }
 0x265   : > { %3706 = vmatprep.subr.bf16.mxu1 %v11315_v27  ;;  %v11381_v27 = vld [vmem:[#allocation2 + $0x974] ss:$24 sps:$4 sm:$0xff]  }
 0x267   : > { %3666 = vmatpush2.bf16.msra.mxu0 %v11310_v28  ;;  %v11376_v28 = vld [vmem:[#allocation2 + $0x670] ss:$24 sps:$4 sm:$0xff]  }
 0x268   : > { %3707 = vmatpush2.bf16.msra.mxu1 %v11313_v29  ;;  %3667 = vmatprep.subr.bf16.mxu0 %v11318_v30  ;;  %v11379_v29 = vld [vmem:[#allocation2 + $0x970] ss:$24 sps:$4 sm:$0xff]   ;;  %v11384_v30 = vld [vmem:[#allocation2 + $0x644] ss:$24 sps:$4 sm:$0xff]  }
 0x269   : > { %3708 = vmatprep.subr.bf16.mxu1 %v11321_v31  ;;  %v11387_v31 = vld [vmem:[#allocation2 + $0x944] ss:$24 sps:$4 sm:$0xff]  }
 0x26b   : > { %3668 = vmatpush2.bf16.msra.mxu0 %v11316_v32  ;;  %v11382_v32 = vld [vmem:[#allocation2 + $0x640] ss:$24 sps:$4 sm:$0xff]  }
 0x26c   : > { %3709 = vmatpush2.bf16.msra.mxu1 %v11319_v33  ;;  %3669 = vmatprep.subr.bf16.mxu0 %v11324_v34  ;;  %v11385_v33 = vld [vmem:[#allocation2 + $0x940] ss:$24 sps:$4 sm:$0xff]   ;;  %v11390_v34 = vld [vmem:[#allocation2 + $0x614] ss:$24 sps:$4 sm:$0xff]  }
 0x26d   : > { %3710 = vmatprep.subr.bf16.mxu1 %v11327_v35  ;;  %v11393_v35 = vld [vmem:[#allocation2 + $0x914] ss:$24 sps:$4 sm:$0xff]  }
 0x26f   : > { %3670 = vmatpush2.bf16.msra.mxu0 %v11322_v38  ;;  %v11388_v38 = vld [vmem:[#allocation2 + $0x610] ss:$24 sps:$4 sm:$0xff]  }
 0x270   : > { %3711 = vmatpush2.bf16.msra.mxu1 %v11325_v39  ;;  %3671 = vmatprep.subr.bf16.mxu0 %v11330_v40  ;;  %v11391_v39 = vld [vmem:[#allocation2 + $0x910] ss:$24 sps:$4 sm:$0xff]   ;;  %v11396_v40 = vld [vmem:[#allocation2 + $0x8e4] ss:$24 sps:$4 sm:$0xff]  }
 0x271   : > { %3712 = vmatprep.subr.bf16.mxu1 %v11333_v41  ;;  %v11399_v41 = vld [vmem:[#allocation2 + $0xbe4] ss:$24 sps:$4 sm:$0xff]  }
 0x273   : > { %3672 = vmatpush2.bf16.msra.mxu0 %v11328_v42  ;;  %v11394_v42 = vld [vmem:[#allocation2 + $0x8e0] ss:$24 sps:$4 sm:$0xff]  }
 0x274   : > { %3713 = vmatpush2.bf16.msra.mxu1 %v11331_v43  ;;  %3673 = vmatprep.subr.bf16.mxu0 %v11336_v45  ;;  %v11397_v43 = vld [vmem:[#allocation2 + $0xbe0] ss:$24 sps:$4 sm:$0xff]   ;;  %v11402_v45 = vld [vmem:[#allocation2 + $0x8b4] ss:$24 sps:$4 sm:$0xff]  }
 0x275   : > { %3714 = vmatprep.subr.bf16.mxu1 %v11339_v46  ;;  %v11405_v46 = vld [vmem:[#allocation2 + $0xbb4] ss:$24 sps:$4 sm:$0xff]  }
 0x277   : > { %3674 = vmatpush2.bf16.msra.mxu0 %v11334_v48  ;;  %v11400_v48 = vld [vmem:[#allocation2 + $0x8b0] ss:$24 sps:$4 sm:$0xff]  }
 0x278   : > { %3715 = vmatpush2.bf16.msra.mxu1 %v11337_v49  ;;  %3675 = vmatprep.subr.bf16.mxu0 %v11342_v52  ;;  %v11403_v49 = vld [vmem:[#allocation2 + $0xbb0] ss:$24 sps:$4 sm:$0xff]   ;;  %v11408_v52 = vld [vmem:[#allocation2 + $0x884] ss:$24 sps:$4 sm:$0xff]  }
 0x279   : > { %3716 = vmatprep.subr.bf16.mxu1 %v11345_v53  ;;  %v11411_v53 = vld [vmem:[#allocation2 + $0xb84] ss:$24 sps:$4 sm:$0xff]  }
 0x27b   : > { %3676 = vmatpush2.bf16.msra.mxu0 %v11340_v54  ;;  %v11406_v54 = vld [vmem:[#allocation2 + $0x880] ss:$24 sps:$4 sm:$0xff]  }
 0x27c   : > { %3717 = vmatpush2.bf16.msra.mxu1 %v11343_v55  ;;  %3727 = vmatprep.subr.bf16.mxu0 %v11348_v56  ;;  %v11409_v55 = vld [vmem:[#allocation2 + $0xb80] ss:$24 sps:$4 sm:$0xff]   ;;  %v11414_v56 = vld [vmem:[#allocation2 + $0x854] ss:$24 sps:$4 sm:$0xff]  }
 0x27d   : > { %3768 = vmatprep.subr.bf16.mxu1 %v11351_v57  ;;  %v11417_v57 = vld [vmem:[#allocation2 + $0xb54] ss:$24 sps:$4 sm:$0xff]  }
 0x27e   : > { %v3433_v0 = vpop.f32.mrf.mxu0  ;;  %3678 = vmatmul.mubr.bf16.vlgmr.msra.gmra.mxu0 %v13403_v6 }
 0x27f   : > { %v3474_v1 = vpop.f32.mrf.mxu1  ;;  %3719 = vmatmul.mubr.bf16.vlgmr.msra.gmra.mxu1 %v13405_v7  ;;  %v3434_v4 = vadd.f32 %v3433_v0, %v13443_v44  ;;  %3728 = vmatpush1.bf16.msra.mxu0 %v11346_v58  ;;  %v11369_v44 = vld [vmem:[#allocation2 + $0x9d4] ss:$24 sps:$4 sm:$0xff]   ;;  %v11412_v58 = vld [vmem:[#allocation2 + $0x850] ss:$24 sps:$4 sm:$0xff]  }
 0x280   : > { %3769 = vmatpush1.bf16.msra.mxu1 %v11349_v59  ;;  %v3435_v5 = vpop.f32.mrf.mxu0  ;;  %3729 = vmatprep.subr.bf16.mxu0 %v11354_v60  ;;  %v11415_v59 = vld [vmem:[#allocation2 + $0xb50] ss:$24 sps:$4 sm:$0xff]   ;;  %v11420_v60 = vld [vmem:[#allocation2 + $0x824] ss:$24 sps:$4 sm:$0xff]   ;;  %v11426_v0 = vld [vmem:[#allocation2 + $0x7f4] ss:$24 sps:$4 sm:$0xff]  }
 0x281   : > { %v3476_v8 = vpop.f32.mrf.mxu1  ;;  %3770 = vmatprep.subr.bf16.mxu1 %v11357_v61  ;;  %v13452_v9 = vadd.f32 %v3474_v1, %v3434_v4  ;;  %v3436_v10 = vadd.f32 %v3435_v5, %v13445_v50  ;;  %3759 = vmatprep.mubr.bf16.mxu0 %v13417_v36  ;;  %v11367_v50 = vld [vmem:[#allocation2 + $0x9d0] ss:$24 sps:$4 sm:$0xff]   ;;  %v11423_v61 = vld [vmem:[#allocation2 + $0xb24] ss:$24 sps:$4 sm:$0xff]   ;;  %v11429_v1 = vld [vmem:[#allocation2 + $0xaf4] ss:$24 sps:$4 sm:$0xff]  }
 0x282   : > { %3800 = vmatprep.mubr.bf16.mxu1 %v13421_v37  ;;  %v3437_v13 = vpop.f32.mrf.mxu0  ;;  %v11432_v4 = vld [vmem:[#allocation2 + $0x7c4] ss:$24 sps:$4 sm:$0xff]  }
 0x283   : > { %v3478_v14 = vpop.f32.mrf.mxu1  ;;  %v13457_v18 = vadd.f32 %v3476_v8, %v3436_v10  ;;  %3730 = vmatpush1.bf16.msra.mxu0 %v11352_v62  ;;  %v11418_v62 = vld [vmem:[#allocation2 + $0x820] ss:$24 sps:$4 sm:$0xff]   ;;  %v11435_v5 = vld [vmem:[#allocation2 + $0xac4] ss:$24 sps:$4 sm:$0xff]   ;;  %v11436_v13 = vld [vmem:[#allocation2 + $0x790] ss:$24 sps:$4 sm:$0xff]  }
 0x284   : > { %3771 = vmatpush1.bf16.msra.mxu1 %v11355_v63  ;;  %v3438_v19 = vpop.f32.mrf.mxu0  ;;  %3731 = vmatprep.subr.bf16.mxu0 %v11360_v2  ;;  %v11421_v63 = vld [vmem:[#allocation2 + $0xb20] ss:$24 sps:$4 sm:$0xff]   ;;  %v11424_v2 = vld [vmem:[#allocation2 + $0x7f0] ss:$24 sps:$4 sm:$0xff]  }
 0x285   : > { %v3479_v20 = vpop.f32.mrf.mxu1  ;;  %3772 = vmatprep.subr.bf16.mxu1 %v11363_v3  ;;  %v11427_v3 = vld [vmem:[#allocation2 + $0xaf0] ss:$24 sps:$4 sm:$0xff]   ;;  %v11430_v8 = vld [vmem:[#allocation2 + $0x7c0] ss:$24 sps:$4 sm:$0xff]  }
 0x286   : > { %v11433_v10 = vld [vmem:[#allocation2 + $0xac0] ss:$24 sps:$4 sm:$0xff]   ;;  %v11439_v14 = vld [vmem:[#allocation2 + $0xa90] ss:$24 sps:$4 sm:$0xff]  }
 0x287   : > { %3732 = vmatpush1.bf16.msra.mxu0 %v11358_v11  ;;  %v11438_v11 = vld [vmem:[#allocation2 + $0x794] ss:$24 sps:$4 sm:$0xff]  }
 0x288   : > { %3773 = vmatpush1.bf16.msra.mxu1 %v11361_v12  ;;  %3733 = vmatprep.subr.bf16.mxu0 %v11366_v15  ;;  %v11441_v12 = vld [vmem:[#allocation2 + $0xa94] ss:$24 sps:$4 sm:$0xff]   ;;  %v12960_v15 = vmov 0.0  }
 0x289   : > { %3774 = vmatprep.subr.bf16.mxu1 %v11369_v44 }
 0x28b   : > { %3734 = vmatpush1.bf16.msra.mxu0 %v11364_v21 }
 0x28c   : > { %3775 = vmatpush1.bf16.msra.mxu1 %v11367_v50  ;;  %3735 = vmatprep.subr.bf16.mxu0 %v11372_v22 }
 0x28d   : > { %3776 = vmatprep.subr.bf16.mxu1 %v11375_v23 }
 0x28f   : > { %3736 = vmatpush1.bf16.msra.mxu0 %v11370_v24 }
 0x290   : > { %3777 = vmatpush1.bf16.msra.mxu1 %v11373_v25  ;;  %3737 = vmatprep.subr.bf16.mxu0 %v11378_v26  ;;  %v3809_v25 = vlaneseq }
 0x291   : > { %3778 = vmatprep.subr.bf16.mxu1 %v11381_v27 }
 0x292   : > { %v13467_v26 = vshrl.u32 %v3809_v25, 7 }
 0x293   : > { %3738 = vmatpush1.bf16.msra.mxu0 %v11376_v28 }
 0x294   : > { %3779 = vmatpush1.bf16.msra.mxu1 %v11379_v29  ;;  %3739 = vmatprep.subr.bf16.mxu0 %v11384_v30  ;;  %v13470_v27 = vsub.s32 0, %v13467_v26  ;;  %v13473_v28 = vsub.s32 1, %v13467_v26  ;;  %v13475_v29 = vld [vmem:[#allocation13] sm:$0xff] }
 0x295   : > { %3780 = vmatprep.subr.bf16.mxu1 %v11387_v31  ;;  %v13477_v31 = vld [vmem:[#allocation13 + $0x8] sm:$0xff] }
 0x297   : > { %3740 = vmatpush1.bf16.msra.mxu0 %v11382_v32 }
 0x298   : > { %3781 = vmatpush1.bf16.msra.mxu1 %v11385_v33  ;;  %3741 = vmatprep.subr.bf16.mxu0 %v11390_v34 }
 0x299   : > { %3782 = vmatprep.subr.bf16.mxu1 %v11393_v35 }
 0x29b   : > { %3742 = vmatpush1.bf16.msra.mxu0 %v11388_v38  ;;  %v3822_v38 = vrot.slane %v13475_v29, %v13473_v28 }
 0x29c   : > { %3783 = vmatpush1.bf16.msra.mxu1 %v11391_v39  ;;  %3743 = vmatprep.subr.bf16.mxu0 %v11396_v40 }
 0x29d   : > { %3784 = vmatprep.subr.bf16.mxu1 %v11399_v41 }
 0x29f   : > { %3744 = vmatpush2.bf16.msra.mxu0 %v11394_v42 }
 0x2a0   : > { %3785 = vmatpush2.bf16.msra.mxu1 %v11397_v43  ;;  %3745 = vmatprep.subr.bf16.mxu0 %v11402_v45  ;;  %v3826_v43 = vrot.slane %v13477_v31, %v13473_v28 }
 0x2a1   : > { %3786 = vmatprep.subr.bf16.mxu1 %v11405_v46 }
 0x2a3   : > { %3746 = vmatpush2.bf16.msra.mxu0 %v11400_v48 }
 0x2a4   : > { %3787 = vmatpush2.bf16.msra.mxu1 %v11403_v49  ;;  %3747 = vmatprep.subr.bf16.mxu0 %v11408_v52  ;;  %v3812_v52 = vrot.slane %v13475_v29, %v13470_v27 }
 0x2a5   : > { %3788 = vmatprep.subr.bf16.mxu1 %v11411_v53 }
 0x2a7   : > { %3748 = vmatpush2.bf16.msra.mxu0 %v11406_v54 }
 0x2a8   : > { %3789 = vmatpush2.bf16.msra.mxu1 %v11409_v55  ;;  %3749 = vmatprep.subr.bf16.mxu0 %v11414_v56 }
 0x2a9   : > { %3790 = vmatprep.subr.bf16.mxu1 %v11417_v57  ;;  %v3816_v57 = vrot.slane %v13477_v31, %v13470_v27 }
 0x2ab   : > { %3750 = vmatpush2.bf16.msra.mxu0 %v11412_v58 }
 0x2ac   : > { %3791 = vmatpush2.bf16.msra.mxu1 %v11415_v59  ;;  %3751 = vmatprep.subr.bf16.mxu0 %v11420_v60  ;;  %v3817_v59 = vadd.f32 %v3812_v52, %v13452_v9  ;;  %v3818_v60 = vadd.f32 %v3816_v57, %v13457_v18 }
 0x2ad   : > { %3792 = vmatprep.subr.bf16.mxu1 %v11423_v61 }
 0x2ae   : > { %v3871_v61 = vpack.c.bf16 %v3817_v59, %v3817_v59 }
 0x2af   : > { %3752 = vmatpush2.bf16.msra.mxu0 %v11418_v62  ;;  %v3975_v62 = vpack.c.bf16 %v3818_v60, %v3818_v60 }
 0x2b0   : > { %3793 = vmatpush2.bf16.msra.mxu1 %v11421_v63  ;;  %3753 = vmatprep.subr.bf16.mxu0 %v11426_v0 }
 0x2b1   : > { %3794 = vmatprep.subr.bf16.mxu1 %v11429_v1 }
 0x2b3   : > { %3754 = vmatpush2.bf16.msra.mxu0 %v11424_v2 }
 0x2b4   : > { %3795 = vmatpush2.bf16.msra.mxu1 %v11427_v3  ;;  %3755 = vmatprep.subr.bf16.mxu0 %v11432_v4 }
 0x2b5   : > { %3796 = vmatprep.subr.bf16.mxu1 %v11435_v5 }
 0x2b7   : > { %3756 = vmatpush2.bf16.msra.mxu0 %v11430_v8 }
 0x2b8   : > { %3797 = vmatpush2.bf16.msra.mxu1 %v11433_v10  ;;  %3757 = vmatprep.subr.bf16.mxu0 %v11438_v11  ;;  %v13493_v11 = vsub.s32 2, %v13467_v26 }
 0x2b9   : > { %3798 = vmatprep.subr.bf16.mxu1 %v11441_v12 }
 0x2bb   : > { %3758 = vmatpush2.bf16.msra.mxu0 %v11436_v13 }
 0x2bc   : > { %3799 = vmatpush2.bf16.msra.mxu1 %v11439_v14  ;;  %10509 = vmatprep.subr.bf16.mxu0 %v12960_v15  ;;  %v3832_v14 = vrot.slane %v13475_v29, %v13493_v11 }
 0x2bd   : > { %10497 = vmatprep.subr.bf16.mxu1 %v12960_v15 }
 0x2be   : > { %v3515_v44 = vpop.f32.mrf.mxu0  ;;  %3760 = vmatmul.mubr.bf16.vlgmr.msra.gmra.mxu0 %v13427_v16 }
 0x2bf   : > { %v3556_v19 = vpop.f32.mrf.mxu1  ;;  %3801 = vmatmul.mubr.bf16.vlgmr.msra.gmra.mxu1 %v13431_v17  ;;  %10511 = vmatprep.mubr.msk.bf16.mxu0 %vm12961_vm0, %v12960_v15 }
 0x2c0   : > { %10499 = vmatprep.mubr.msk.bf16.mxu1 %vm12961_vm0, %v12960_v15  ;;  %v3517_v20 = vpop.f32.mrf.mxu0  ;;  %v3557_v30 = vadd.f32 %v3556_v19, %v3515_v44 }
 0x2c1   : > { %v3558_v21 = vpop.f32.mrf.mxu1 }
 0x2c2   : > { %v3519_v50 = vpop.f32.mrf.mxu0  ;;  %v3559_v34 = vadd.f32 %v3558_v21, %v3517_v20 }
 0x2c3   : > { %v3560_v22 = vpop.f32.mrf.mxu1 }
 0x2c4   : > { %v3520_v23 = vpop.f32.mrf.mxu0 }
 0x2c5   : > { %v3561_v24 = vpop.f32.mrf.mxu1 }
 0x2fe   : > { %v3597_v32 = vpop.f32.mrf.mxu0 }
 0x2ff   : > { %v3638_v33 = vpop.f32.mrf.mxu1  ;;  %v3598_v35 = vadd.f32 %v3597_v32, %v3557_v30 }
 0x300   : > { %v3599_v39 = vpop.f32.mrf.mxu0 }
 0x301   : > { %v3640_v40 = vpop.f32.mrf.mxu1  ;;  %v3639_v41 = vadd.f32 %v3638_v33, %v3598_v35  ;;  %v3600_v42 = vadd.f32 %v3599_v39, %v3559_v34 }
 0x302   : > { %v3601_v45 = vpop.f32.mrf.mxu0 }
 0x303   : > { %v3642_v46 = vpop.f32.mrf.mxu1  ;;  %v3827_v48 = vadd.f32 %v3822_v38, %v3639_v41  ;;  %v3641_v49 = vadd.f32 %v3640_v40, %v3600_v42 }
 0x304   : > { %v3602_v53 = vpop.f32.mrf.mxu0 }
 0x305   : > { %v3643_v54 = vpop.f32.mrf.mxu1  ;;  %v3872_v55 = vpack.c.bf16 %v3827_v48, %v3827_v48  ;;  %v3828_v56 = vadd.f32 %v3826_v43, %v3641_v49 }
 0x307   : > { %v3976_v58 = vpack.c.bf16 %v3828_v56, %v3828_v56  ;;  %10498 = vmatpush3.bf16.xpose.msra.mxu1 %v3872_v55 }
 0x308   : > { %10503 = vmatprep.subr.bf16.mxu1 %v12960_v15 }
 0x309   : > { %10510 = vmatpush3.bf16.xpose.msra.mxu0 %v3976_v58 }
 0x30e   : > { %10500 = vmatmul.mubr.bf16.vlgmr.msra.gmra.mxu1 %v3871_v61 }
 0x30f   : > { %10505 = vmatprep.mubr.msk.bf16.mxu1 %vm12961_vm0, %v12960_v15 }
 0x310   : > { %10512 = vmatmul.mubr.bf16.vlgmr.msra.gmra.mxu0 %v3975_v62  ;;  %v11442_v62 = vld [vmem:[#allocation5 + $0x70] ss:$8 sps:$4 sm:$0xff]  }
 0x33e   : > { %v3679_v63 = vpop.f32.mrf.mxu0 }
 0x33f   : > { %v3720_v0 = vpop.f32.mrf.mxu1 }
 0x340   : > { %v3681_v1 = vpop.f32.mrf.mxu0  ;;  %v3721_v10 = vadd.f32 %v3720_v0, %v3679_v63  ;;  %v11444_v63 = vld [vmem:[#allocation5 + $0x74] ss:$8 sps:$4 sm:$0xff]   ;;  %v11447_v0 = vld [vmem:[#allocation5 + $0x64] ss:$8 sps:$4 sm:$0xff]  }
 0x341   : > { %v3722_v2 = vpop.f32.mrf.mxu1  ;;  %4247 = vmatprep.subr.bf16.mxu0 %v11444_v63 }
 0x342   : > { %v3723_v3 = vadd.f32 %v3722_v2, %v3681_v1  ;;  %v3683_v4 = vpop.f32.mrf.mxu0  ;;  %4248 = vmatpush1.bf16.msra.mxu0 %v11442_v62  ;;  %v11445_v1 = vld [vmem:[#allocation5 + $0x60] ss:$8 sps:$4 sm:$0xff]   ;;  %v11450_v2 = vld [vmem:[#allocation5 + $0x54] ss:$8 sps:$4 sm:$0xff]  }
 0x343   : > { %v3724_v5 = vpop.f32.mrf.mxu1  ;;  %4249 = vmatprep.subr.bf16.mxu0 %v11447_v0  ;;  %v11453_v4 = vld [vmem:[#allocation5 + $0x44] ss:$8 sps:$4 sm:$0xff]  }
 0x344   : > { %v3684_v9 = vpop.f32.mrf.mxu0  ;;  %v11451_v5 = vld [vmem:[#allocation5 + $0x40] ss:$8 sps:$4 sm:$0xff]  }
 0x345   : > { %v3725_v8 = vpop.f32.mrf.mxu1  ;;  %v11456_v9 = vld [vmem:[#allocation5 + $0x34] ss:$8 sps:$4 sm:$0xff]  }
 0x346   : > { %4250 = vmatpush1.bf16.msra.mxu0 %v11445_v1  ;;  %v11454_v8 = vld [vmem:[#allocation5 + $0x30] ss:$8 sps:$4 sm:$0xff]  }
 0x347   : > { %4251 = vmatprep.subr.bf16.mxu0 %v11450_v2 }
 0x37e   : > { %v3761_v18 = vpop.f32.mrf.mxu0 }
 0x37f   : > { %v3802_v12 = vpop.f32.mrf.mxu1  ;;  %v3762_v13 = vadd.f32 %v3761_v18, %v3721_v10  ;;  %v11459_v10 = vld [vmem:[#allocation5 + $0x24] ss:$8 sps:$4 sm:$0xff]   ;;  %v11457_v18 = vld [vmem:[#allocation5 + $0x20] ss:$8 sps:$4 sm:$0xff]  }
 0x380   : > { %v3763_v44 = vpop.f32.mrf.mxu0 }
 0x381   : > { %v3804_v19 = vpop.f32.mrf.mxu1  ;;  %v3764_v20 = vadd.f32 %v3763_v44, %v3723_v3  ;;  %v3803_v21 = vadd.f32 %v3802_v12, %v3762_v13  ;;  %v11448_v3 = vld [vmem:[#allocation5 + $0x50] ss:$8 sps:$4 sm:$0xff]   ;;  %v11462_v12 = vld [vmem:[#allocation5 + $0x14] ss:$8 sps:$4 sm:$0xff]   ;;  %v11463_v44 = vld [vmem:[#allocation5] ss:$8 sps:$4 sm:$0xff]  }
 0x382   : > { %v3765_v22 = vpop.f32.mrf.mxu0  ;;  %4252 = vmatpush1.bf16.msra.mxu0 %v11448_v3  ;;  %v11460_v13 = vld [vmem:[#allocation5 + $0x10] ss:$8 sps:$4 sm:$0xff]  }
 0x383   : > { %v3806_v50 = vpop.f32.mrf.mxu1  ;;  %v13497_v23 = vadd.f32 %v3832_v14, %v3803_v21  ;;  %v13499_v24 = vadd.f32 %v3804_v19, %v3764_v20  ;;  %4253 = vmatprep.subr.bf16.mxu0 %v11453_v4  ;;  %v11465_v14 = vld [vmem:[#allocation5 + $0x4] ss:$8 sps:$4 sm:$0xff]   ;;  %v11468_v19 = vld [vmem:[#allocation5 + $0xf4] ss:$8 sps:$4 sm:$0xff]   ;;  %v11466_v20 = vld [vmem:[#allocation5 + $0xf0] ss:$8 sps:$4 sm:$0xff]  }
 0x384   : > { %v3766_v30 = vpop.f32.mrf.mxu0  ;;  %v11471_v21 = vld [vmem:[#allocation5 + $0xe4] ss:$8 sps:$4 sm:$0xff]   ;;  %v11469_v50 = vld [vmem:[#allocation5 + $0xe0] ss:$8 sps:$4 sm:$0xff]   ;;  %v11474_v22 = vld [vmem:[#allocation5 + $0xd4] ss:$8 sps:$4 sm:$0xff]  }
 0x385   : > { %v3807_v25 = vpop.f32.mrf.mxu1  ;;  %v3873_v32 = vpack.c.bf16 %v13497_v23, %v13497_v23  ;;  %v11477_v30 = vld [vmem:[#allocation5 + $0xc4] ss:$8 sps:$4 sm:$0xff]   ;;  %v11490_v4 = vld [vmem:[#allocation7 + $0x70] ss:$8 sps:$4 sm:$0xff]  }
 0x386   : > { %4254 = vmatpush1.bf16.msra.mxu0 %v11451_v5  ;;  %v11472_v25 = vld [vmem:[#allocation5 + $0xd0] ss:$8 sps:$4 sm:$0xff]   ;;  %v11492_v5 = vld [vmem:[#allocation7 + $0x74] ss:$8 sps:$4 sm:$0xff]  }
 0x387   : > { %v3933_v33 = vsel %vm3931_vm1, %v3873_v32, 0  ;;  %4255 = vmatprep.subr.bf16.mxu0 %v11456_v9  ;;  %v11475_v32 = vld [vmem:[#allocation5 + $0xc0] ss:$8 sps:$4 sm:$0xff]   ;;  %v11495_v9 = vld [vmem:[#allocation7 + $0x64] ss:$8 sps:$4 sm:$0xff]  }
 0x388   : > { %10504 = vmatpush3.bf16.msra.mxu1 %v3933_v33  ;;  %v11480_v33 = vld [vmem:[#allocation5 + $0xb4] ss:$8 sps:$4 sm:$0xff]  }
 0x389   : > { %10515 = vmatprep.subr.bf16.mxu1 %v12960_v15 }
 0x38a   : > { %4256 = vmatpush1.bf16.msra.mxu0 %v11454_v8  ;;  %v11493_v8 = vld [vmem:[#allocation7 + $0x60] ss:$8 sps:$4 sm:$0xff]  }
 0x38b   : > { %4257 = vmatprep.subr.bf16.mxu0 %v11459_v10  ;;  %v11498_v10 = vld [vmem:[#allocation7 + $0x54] ss:$8 sps:$4 sm:$0xff]  }
 0x38e   : > { %4258 = vmatpush1.bf16.msra.mxu0 %v11457_v18  ;;  %v11496_v18 = vld [vmem:[#allocation7 + $0x50] ss:$8 sps:$4 sm:$0xff]  }
 0x38f   : > { %4259 = vmatprep.subr.bf16.mxu0 %v11462_v12  ;;  %v11501_v12 = vld [vmem:[#allocation7 + $0x44] ss:$8 sps:$4 sm:$0xff]  }
 0x392   : > { %4260 = vmatpush1.bf16.msra.mxu0 %v11460_v13  ;;  %v11499_v13 = vld [vmem:[#allocation7 + $0x40] ss:$8 sps:$4 sm:$0xff]  }
 0x393   : > { %4261 = vmatprep.subr.bf16.mxu0 %v11465_v14  ;;  %v11504_v14 = vld [vmem:[#allocation7 + $0x34] ss:$8 sps:$4 sm:$0xff]  }
 0x396   : > { %4262 = vmatpush1.bf16.msra.mxu0 %v11463_v44  ;;  %v11502_v44 = vld [vmem:[#allocation7 + $0x30] ss:$8 sps:$4 sm:$0xff]  }
 0x397   : > { %4263 = vmatprep.subr.bf16.mxu0 %v11468_v19  ;;  %v11507_v19 = vld [vmem:[#allocation7 + $0x24] ss:$8 sps:$4 sm:$0xff]  }
 0x39a   : > { %4264 = vmatpush2.bf16.msra.mxu0 %v11466_v20  ;;  %v11505_v20 = vld [vmem:[#allocation7 + $0x20] ss:$8 sps:$4 sm:$0xff]  }
 0x39b   : > { %4265 = vmatprep.subr.bf16.mxu0 %v11471_v21  ;;  %v11510_v21 = vld [vmem:[#allocation7 + $0x14] ss:$8 sps:$4 sm:$0xff]  }
 0x39e   : > { %4266 = vmatpush2.bf16.msra.mxu0 %v11469_v50  ;;  %v11508_v50 = vld [vmem:[#allocation7 + $0x10] ss:$8 sps:$4 sm:$0xff]  }
 0x39f   : > { %4267 = vmatprep.subr.bf16.mxu0 %v11474_v22  ;;  %v11513_v22 = vld [vmem:[#allocation7 + $0x4] ss:$8 sps:$4 sm:$0xff]  }
 0x3a2   : > { %4268 = vmatpush2.bf16.msra.mxu0 %v11472_v25  ;;  %v11511_v25 = vld [vmem:[#allocation7] ss:$8 sps:$4 sm:$0xff]  }
 0x3a3   : > { %4269 = vmatprep.subr.bf16.mxu0 %v11477_v30  ;;  %v11516_v30 = vld [vmem:[#allocation7 + $0xf4] ss:$8 sps:$4 sm:$0xff]  }
 0x3a6   : > { %4270 = vmatpush2.bf16.msra.mxu0 %v11475_v32  ;;  %v11514_v32 = vld [vmem:[#allocation7 + $0xf0] ss:$8 sps:$4 sm:$0xff]  }
 0x3a7   : > { %4271 = vmatprep.subr.bf16.mxu0 %v11480_v33  ;;  %v13530_v33 = vsub.s32 3, %v13467_v26 }
 0x3ce   : > { %v3908_v34 = vpop.f32.mrf.mxu1 }
 0x3cf   : > { %v3914_v35 = vmul.f32 0.088388346, %v3908_v34  ;;  %v11478_v34 = vld [vmem:[#allocation5 + $0xb0] ss:$8 sps:$4 sm:$0xff]  }
 0x3d0   : > { %v10501_v38 = vpop.f32.mrf.mxu1  ;;  %v4012_v39 = vpop.f32.mrf.mxu0  ;;  %4272 = vmatpush2.bf16.msra.mxu0 %v11478_v34  ;;  %v4082_v34 = vrot.slane %v13475_v29, %v13530_v33 }
 0x3d1   : > { %v4018_v40 = vmul.f32 0.088388346, %v4012_v39  ;;  %v3916_v41 = vsel %vm3915_vm2, %v3914_v35, -inf  ;;  %v3836_v39 = vrot.slane %v13477_v31, %v13493_v11 }
 0x3d2   : > { %v10513_v42 = vpop.f32.mrf.mxu0  ;;  %3917 = vmax.xlane.f32.xlu0 %v3916_v41  ;;  %v3911_v43 = vpop.f32.mrf.mxu1 }
 0x3d3   : > { %v4019_v48 = vsel %vm3915_vm2, %v4018_v40, -inf }
 0x3d4   : > { %v10502_v45 = vpop.f32.mrf.mxu1  ;;  %v4015_v46 = vpop.f32.mrf.mxu0 }
 0x3d6   : > { %v10514_v49 = vpop.f32.mrf.mxu0  ;;  %4020 = vmax.xlane.f32.xlu0 %v4019_v48 }
 0x45b   : > { %v3918_v52 = vpop.xlane.xlu0 %3917 }
 0x45c   : > { %v3919_v53 = vsub.f32 %v3914_v35, %v3918_v52  ;;  %v11483_v52 = vld [vmem:[#allocation5 + $0xa4] ss:$8 sps:$4 sm:$0xff]  }
 0x45d   : > { %4273 = vmatprep.subr.bf16.mxu0 %v11483_v52 }
 0x45e   : > { %v3920_v54 = vmul.f32 1.442695, %v3919_v53  ;;  %v11481_v53 = vld [vmem:[#allocation5 + $0xa0] ss:$8 sps:$4 sm:$0xff]  }
 0x45f   : > { %v4021_v55 = vpop.xlane.xlu0 %4020  ;;  %4274 = vmatpush2.bf16.msra.mxu0 %v11481_v53 }
 0x460   : > { %12254 = vpow2.f32 %v3920_v54  ;;  %v4022_v56 = vsub.f32 %v4018_v40, %v4021_v55  ;;  %v13518_v40 = vadd.f32 %v3836_v39, %v13499_v24  ;;  %v11486_v54 = vld [vmem:[#allocation5 + $0x94] ss:$8 sps:$4 sm:$0xff]   ;;  %v11484_v55 = vld [vmem:[#allocation5 + $0x90] ss:$8 sps:$4 sm:$0xff]  }
 0x461   : > { %4275 = vmatprep.subr.bf16.mxu0 %v11486_v54  ;;  %v11517_v54 = vld [vmem:[#allocation7 + $0xe0] ss:$8 sps:$4 sm:$0xff]  }
 0x462   : > { %v4023_v57 = vmul.f32 1.442695, %v4022_v56  ;;  %v3977_v42 = vpack.c.bf16 %v13518_v40, %v13518_v40  ;;  %v11489_v56 = vld [vmem:[#allocation5 + $0x84] ss:$8 sps:$4 sm:$0xff]  }
 0x463   : > { %4276 = vmatpush2.bf16.msra.mxu0 %v11484_v55  ;;  %v11522_v55 = vld [vmem:[#allocation7 + $0xd4] ss:$8 sps:$4 sm:$0xff]  }
 0x464   : > { %12256 = vpow2.f32 %v4023_v57  ;;  %v4035_v48 = vsel %vm3931_vm1, %v3977_v42, 0  ;;  %v11487_v57 = vld [vmem:[#allocation5 + $0x80] ss:$8 sps:$4 sm:$0xff]   ;;  %4277 = vmatprep.subr.bf16.mxu0 %v11489_v56  ;;  %v11525_v56 = vld [vmem:[#allocation7 + $0xc4] ss:$8 sps:$4 sm:$0xff]  }
 0x467   : > { %4278 = vmatpush2.bf16.msra.mxu0 %v11487_v57  ;;  %v11523_v57 = vld [vmem:[#allocation7 + $0xc0] ss:$8 sps:$4 sm:$0xff]  }
 0x46d   : > { %v13507_v58 = vpop.eup %12254 }
 0x46e   : > { %v3922_v59 = vsel %vm3915_vm2, %v13507_v58, 0.0 }
 0x46f   : > { %3923 = vadd.xlane.f32.xlu1 %v3922_v59 }
 0x471   : > { %v13511_v60 = vpop.eup %12256 }
 0x472   : > { %v4025_v61 = vsel %vm3915_vm2, %v13511_v60, 0.0 }
 0x473   : > { %4026 = vadd.xlane.f32.xlu1 %v4025_v61 }
 0x4f8   : > { %v3924_v35 = vpop.xlane.xlu1 %3923 }
 0x4f9   : > { %12258 = vrcp.f32 %v3924_v35  ;;  %v4086_v35 = vrot.slane %v13477_v31, %v13530_v33 }
 0x4fc   : > { %v4027_v38 = vpop.xlane.xlu1 %4026 }
 0x4fd   : > { %12260 = vrcp.f32 %v4027_v38 }
 0x506   : > { %v12259_v41 = vpop.eup %12258 }
 0x507   : > { %v3926_v43 = vmul.f32 %v12259_v41, %v13507_v58 }
 0x509   : > { %v3927_v45 = vpack.c.bf16 %v3926_v43, %v3926_v43 }
 0x50a   : > { %v12261_v46 = vpop.eup %12260 }
 0x50b   : > { %10506 = vmatmul.mubr.msk.bf16.vlgmr.msra.gmra.mxu1 %vm3915_vm2, %v3927_v45  ;;  %v4029_v49 = vmul.f32 %v12261_v46, %v13511_v60 }
 0x50c   : > { %10516 = vmatpush3.bf16.msra.mxu1 %v4035_v48  ;;  %10517 = vmatprep.mubr.msk.bf16.mxu1 %vm12961_vm0, %v12960_v15 }
 0x50d   : > { %v4030_v24 = vpack.c.bf16 %v4029_v49, %v4029_v49  ;;  %4563 = vmatprep.subr.bf16.mxu1 %v11492_v5  ;;  %v11541_v5 = vld [vmem:[#allocation8 + $0x60] ss:$8 sps:$4 sm:$0xff]  }
 0x513   : > { %10518 = vmatmul.mubr.msk.bf16.vlgmr.msra.gmra.mxu1 %vm3915_vm2, %v4030_v24 }
 0x514   : > { %4564 = vmatpush1.bf16.msra.mxu1 %v11490_v4  ;;  %v11543_v4 = vld [vmem:[#allocation8 + $0x64] ss:$8 sps:$4 sm:$0xff]  }
 0x515   : > { %4565 = vmatprep.subr.bf16.mxu1 %v11495_v9  ;;  %v11546_v9 = vld [vmem:[#allocation8 + $0x54] ss:$8 sps:$4 sm:$0xff]  }
 0x518   : > { %4566 = vmatpush1.bf16.msra.mxu1 %v11493_v8  ;;  %v11544_v8 = vld [vmem:[#allocation8 + $0x50] ss:$8 sps:$4 sm:$0xff]  }
 0x519   : > { %4567 = vmatprep.subr.bf16.mxu1 %v11498_v10  ;;  %v11549_v10 = vld [vmem:[#allocation8 + $0x44] ss:$8 sps:$4 sm:$0xff]  }
 0x51c   : > { %4568 = vmatpush1.bf16.msra.mxu1 %v11496_v18  ;;  %v11547_v18 = vld [vmem:[#allocation8 + $0x40] ss:$8 sps:$4 sm:$0xff]  }
 0x51d   : > { %4569 = vmatprep.subr.bf16.mxu1 %v11501_v12  ;;  %v11552_v12 = vld [vmem:[#allocation8 + $0x34] ss:$8 sps:$4 sm:$0xff]  }
 0x520   : > { %4570 = vmatpush1.bf16.msra.mxu1 %v11499_v13  ;;  %v11550_v13 = vld [vmem:[#allocation8 + $0x30] ss:$8 sps:$4 sm:$0xff]  }
 0x521   : > { %4571 = vmatprep.subr.bf16.mxu1 %v11504_v14  ;;  %v11555_v14 = vld [vmem:[#allocation8 + $0x24] ss:$8 sps:$4 sm:$0xff]  }
 0x524   : > { %4572 = vmatpush1.bf16.msra.mxu1 %v11502_v44  ;;  %v11553_v44 = vld [vmem:[#allocation8 + $0x20] ss:$8 sps:$4 sm:$0xff]  }
 0x525   : > { %4573 = vmatprep.subr.bf16.mxu1 %v11507_v19  ;;  %v11558_v19 = vld [vmem:[#allocation8 + $0x14] ss:$8 sps:$4 sm:$0xff]  }
 0x528   : > { %4574 = vmatpush1.bf16.msra.mxu1 %v11505_v20  ;;  %v11556_v20 = vld [vmem:[#allocation8 + $0x10] ss:$8 sps:$4 sm:$0xff]  }
 0x529   : > { %4575 = vmatprep.subr.bf16.mxu1 %v11510_v21  ;;  %v11561_v21 = vld [vmem:[#allocation8 + $0x4] ss:$8 sps:$4 sm:$0xff]  }
 0x52c   : > { %4576 = vmatpush1.bf16.msra.mxu1 %v11508_v50  ;;  %v11559_v50 = vld [vmem:[#allocation8] ss:$8 sps:$4 sm:$0xff]  }
 0x52d   : > { %4577 = vmatprep.subr.bf16.mxu1 %v11513_v22  ;;  %v11564_v22 = vld [vmem:[#allocation8 + $0xf4] ss:$8 sps:$4 sm:$0xff]  }
 0x530   : > { %4578 = vmatpush1.bf16.msra.mxu1 %v11511_v25  ;;  %v11562_v25 = vld [vmem:[#allocation8 + $0xf0] ss:$8 sps:$4 sm:$0xff]  }
 0x531   : > { %4579 = vmatprep.subr.bf16.mxu1 %v11516_v30  ;;  %v11567_v30 = vld [vmem:[#allocation8 + $0xe4] ss:$8 sps:$4 sm:$0xff]  }
 0x534   : > { %4580 = vmatpush2.bf16.msra.mxu1 %v11514_v32  ;;  %v11565_v32 = vld [vmem:[#allocation8 + $0xe0] ss:$8 sps:$4 sm:$0xff]  }
 0x5cb   : > { %v3969_v58 = vpop.f32.mrf.mxu1 }
 0x5cc   : > { %v4077_v0 = vpack.c.bf16 %v3969_v58, %v3969_v58  ;;  %v11528_v58 = vld [vmem:[#allocation7 + $0xb4] ss:$8 sps:$4 sm:$0xff]  }
 0x5cd   : > { %v10507_v59 = vpop.f32.mrf.mxu1 }
 0x5ce   : > { %v11526_v59 = vld [vmem:[#allocation7 + $0xb0] ss:$8 sps:$4 sm:$0xff]  }
 0x5cf   : > { %v3972_v61 = vpop.f32.mrf.mxu1 }
 0x5d0   : > { %v11531_v61 = vld [vmem:[#allocation7 + $0xa4] ss:$8 sps:$4 sm:$0xff]  }
 0x5d1   : > { %v10508_v62 = vpop.f32.mrf.mxu1 }
 0x5d2   : > { %v11529_v62 = vld [vmem:[#allocation7 + $0xa0] ss:$8 sps:$4 sm:$0xff]  }
 0x5d3   : > { %v4071_v60 = vpop.f32.mrf.mxu1 }
 0x5d4   : > { %v4078_v63 = vpack.c.bf16 %v4071_v60, %v4071_v60  ;;  %v11534_v60 = vld [vmem:[#allocation7 + $0x94] ss:$8 sps:$4 sm:$0xff]  }
 0x5d5   : > { %v10519_v1 = vpop.f32.mrf.mxu1 }
 0x5d6   : > { %4279 = vmatprep.mubr.bf16.mxu0 %v4078_v63  ;;  %v11532_v63 = vld [vmem:[#allocation7 + $0x90] ss:$8 sps:$4 sm:$0xff]   ;;  %v11535_v1 = vld [vmem:[#allocation7 + $0x80] ss:$8 sps:$4 sm:$0xff]  }
 0x5d7   : > { %v4074_v2 = vpop.f32.mrf.mxu1  ;;  %4280 = vmatmul.mubr.bf16.vlgmr.msra.gmra.mxu0 %v4077_v0  ;;  %v11537_v0 = vld [vmem:[#allocation7 + $0x84] ss:$8 sps:$4 sm:$0xff]  }
 0x5d8   : > { %v11538_v2 = vld [vmem:[#allocation8 + $0x70] ss:$8 sps:$4 sm:$0xff]  }
 0x5d9   : > { %v10520_v3 = vpop.f32.mrf.mxu1 }
 0x5da   : > { %v11540_v3 = vld [vmem:[#allocation8 + $0x74] ss:$8 sps:$4 sm:$0xff]  }
 0x5db   : > { %4776 = vmatprep.subr.bf16.mxu0 %v11540_v3 }
 0x5dc   : > { %4777 = vmatpush1.bf16.msra.mxu0 %v11538_v2 }
 0x5dd   : > { %4778 = vmatprep.subr.bf16.mxu0 %v11543_v4 }
 0x5e0   : > { %4779 = vmatpush1.bf16.msra.mxu0 %v11541_v5 }
 0x5e1   : > { %4780 = vmatprep.subr.bf16.mxu0 %v11546_v9  ;;  %v11582_v9 = vld [vmem:[#allocation8 + $0x94] ss:$8 sps:$4 sm:$0xff]  }
 0x5e4   : > { %4781 = vmatpush1.bf16.msra.mxu0 %v11544_v8  ;;  %v11580_v8 = vld [vmem:[#allocation8 + $0x90] ss:$8 sps:$4 sm:$0xff]  }
 0x5e5   : > { %4782 = vmatprep.subr.bf16.mxu0 %v11549_v10  ;;  %v11585_v10 = vld [vmem:[#allocation8 + $0x84] ss:$8 sps:$4 sm:$0xff]  }
 0x5e8   : > { %4783 = vmatpush1.bf16.msra.mxu0 %v11547_v18  ;;  %v11583_v18 = vld [vmem:[#allocation8 + $0x80] ss:$8 sps:$4 sm:$0xff]  }
 0x5e9   : > { %4784 = vmatprep.subr.bf16.mxu0 %v11552_v12  ;;  %v11586_v12 = vld [vmem:[#allocation11 + $0x70] ss:$8 sps:$4 sm:$0xff]  }
 0x5ec   : > { %4785 = vmatpush1.bf16.msra.mxu0 %v11550_v13  ;;  %v11588_v13 = vld [vmem:[#allocation11 + $0x74] ss:$8 sps:$4 sm:$0xff]  }
 0x5ed   : > { %4786 = vmatprep.subr.bf16.mxu0 %v11555_v14  ;;  %v11591_v14 = vld [vmem:[#allocation11 + $0x174] ss:$8 sps:$4 sm:$0xff]  }
 0x5f0   : > { %4787 = vmatpush1.bf16.msra.mxu0 %v11553_v44  ;;  %v11594_v44 = vld [vmem:[#allocation11 + $0x64] ss:$8 sps:$4 sm:$0xff]  }
 0x5f1   : > { %4788 = vmatprep.subr.bf16.mxu0 %v11558_v19  ;;  %v11592_v19 = vld [vmem:[#allocation11 + $0x60] ss:$8 sps:$4 sm:$0xff]  }
 0x5f4   : > { %4789 = vmatpush1.bf16.msra.mxu0 %v11556_v20  ;;  %v11600_v20 = vld [vmem:[#allocation11 + $0x54] ss:$8 sps:$4 sm:$0xff]  }
 0x5f5   : > { %4790 = vmatprep.subr.bf16.mxu0 %v11561_v21  ;;  %v11606_v21 = vld [vmem:[#allocation11 + $0x44] ss:$8 sps:$4 sm:$0xff]  }
 0x5f8   : > { %4791 = vmatpush1.bf16.msra.mxu0 %v11559_v50  ;;  %v11604_v50 = vld [vmem:[#allocation11 + $0x40] ss:$8 sps:$4 sm:$0xff]  }
 0x5f9   : > { %4792 = vmatprep.subr.bf16.mxu0 %v11564_v22  ;;  %v11612_v22 = vld [vmem:[#allocation11 + $0x34] ss:$8 sps:$4 sm:$0xff]  }
 0x5fc   : > { %4793 = vmatpush2.bf16.msra.mxu0 %v11562_v25  ;;  %v11610_v25 = vld [vmem:[#allocation11 + $0x30] ss:$8 sps:$4 sm:$0xff]  }
 0x5fd   : > { %4794 = vmatprep.subr.bf16.mxu0 %v11567_v30  ;;  %v11618_v30 = vld [vmem:[#allocation11 + $0x24] ss:$8 sps:$4 sm:$0xff]  }
 0x600   : > { %4795 = vmatpush2.bf16.msra.mxu0 %v11565_v32  ;;  %v11616_v32 = vld [vmem:[#allocation11 + $0x20] ss:$8 sps:$4 sm:$0xff]  }
 0x697   : > { %v4281_v38 = vpop.f32.mrf.mxu0 }
 0x698   : > { %v4282_v39 = vadd.f32 %v4281_v38, %v4082_v34  ;;  %v11570_v34 = vld [vmem:[#allocation8 + $0xd4] ss:$8 sps:$4 sm:$0xff]   ;;  %v11573_v38 = vld [vmem:[#allocation8 + $0xc4] ss:$8 sps:$4 sm:$0xff]  }
 0x699   : > { %v4283_v41 = vpop.f32.mrf.mxu0  ;;  %4796 = vmatprep.subr.bf16.mxu0 %v11570_v34  ;;  %v11624_v34 = vld [vmem:[#allocation11 + $0x14] ss:$8 sps:$4 sm:$0xff]  }
 0x69a   : > { %v13537_v42 = vadd.f32 %v4282_v39, %v13497_v23  ;;  %v4284_v43 = vadd.f32 %v4283_v41, %v4086_v35  ;;  %v11519_v23 = vld [vmem:[#allocation7 + $0xe4] ss:$8 sps:$4 sm:$0xff]   ;;  %v11568_v35 = vld [vmem:[#allocation8 + $0xd0] ss:$8 sps:$4 sm:$0xff]   ;;  %v11571_v39 = vld [vmem:[#allocation8 + $0xc0] ss:$8 sps:$4 sm:$0xff]  }
 0x69b   : > { %v4285_v45 = vpop.f32.mrf.mxu0  ;;  %4581 = vmatprep.subr.bf16.mxu1 %v11519_v23  ;;  %4797 = vmatpush2.bf16.msra.mxu0 %v11568_v35  ;;  %v11576_v41 = vld [vmem:[#allocation8 + $0xb4] ss:$8 sps:$4 sm:$0xff]   ;;  %v11622_v35 = vld [vmem:[#allocation11 + $0x10] ss:$8 sps:$4 sm:$0xff]  }
 0x69c   : > { %v13540_v46 = vadd.f32 %v4284_v43, %v13518_v40  ;;  %v4295_v24 = vmul.f32 %v13537_v42, %v13537_v42  ;;  %4582 = vmatpush2.bf16.msra.mxu1 %v11517_v54  ;;  %v11520_v40 = vld [vmem:[#allocation7 + $0xd0] ss:$8 sps:$4 sm:$0xff]   ;;  %4798 = vmatprep.subr.bf16.mxu0 %v11573_v38  ;;  %v11579_v45 = vld [vmem:[#allocation8 + $0xa4] ss:$8 sps:$4 sm:$0xff]  }
 0x69d   : > { %v4286_v48 = vpop.f32.mrf.mxu0  ;;  %4583 = vmatprep.subr.bf16.mxu1 %v11522_v55  ;;  %v11574_v43 = vld [vmem:[#allocation8 + $0xb0] ss:$8 sps:$4 sm:$0xff]   ;;  %v11630_v38 = vld [vmem:[#allocation11 + $0x4] ss:$8 sps:$4 sm:$0xff]  }
 0x69e   : > { %v4290_v49 = vadd.f32 %v13540_v46, %v13537_v42  ;;  %v4296_v52 = vmul.f32 %v13540_v46, %v13540_v46  ;;  %v11577_v48 = vld [vmem:[#allocation8 + $0xa0] ss:$8 sps:$4 sm:$0xff]  }
 0x69f   : > { %4799 = vmatpush2.bf16.msra.mxu0 %v11571_v39  ;;  %v11628_v39 = vld [vmem:[#allocation11] ss:$8 sps:$4 sm:$0xff]  }
 0x6a0   : > { %4291 = vadd.xlane.f32.xlu0 %v4290_v49  ;;  %v4297_v53 = vadd.f32 %v4296_v52, %v4295_v24  ;;  %4584 = vmatpush2.bf16.msra.mxu1 %v11520_v40  ;;  %v13549_v40 = vsub.s32 4, %v13467_v26 }
 0x6a1   : > { %4585 = vmatprep.subr.bf16.mxu1 %v11525_v56  ;;  %4800 = vmatprep.subr.bf16.mxu0 %v11576_v41  ;;  %v13552_v56 = vsub.s32 5, %v13467_v26  ;;  %v11636_v41 = vld [vmem:[#allocation11 + $0xf4] ss:$8 sps:$4 sm:$0xff]  }
 0x6a2   : > { %4298 = vadd.xlane.f32.xlu1 %v4297_v53 }
 0x6a3   : > { %4801 = vmatpush2.bf16.msra.mxu0 %v11574_v43  ;;  %v11634_v43 = vld [vmem:[#allocation11 + $0xf0] ss:$8 sps:$4 sm:$0xff]  }
 0x6a4   : > { %4586 = vmatpush2.bf16.msra.mxu1 %v11523_v57  ;;  %4802 = vmatprep.subr.bf16.mxu0 %v11579_v45  ;;  %v11642_v45 = vld [vmem:[#allocation11 + $0xe4] ss:$8 sps:$4 sm:$0xff]  }
 0x6a5   : > { %4587 = vmatprep.subr.bf16.mxu1 %v11528_v58 }
 0x6a7   : > { %4803 = vmatpush2.bf16.msra.mxu0 %v11577_v48  ;;  %v11640_v48 = vld [vmem:[#allocation11 + $0xe0] ss:$8 sps:$4 sm:$0xff]  }
 0x6a8   : > { %4588 = vmatpush2.bf16.msra.mxu1 %v11526_v59  ;;  %v4316_v59 = vrot.slane %v13477_v31, %v13549_v40  ;;  %4804 = vmatprep.subr.bf16.mxu0 %v11582_v9  ;;  %v13576_v9 = vsub.s32 6, %v13467_v26 }
 0x6a9   : > { %4589 = vmatprep.subr.bf16.mxu1 %v11531_v61  ;;  %v4312_v61 = vrot.slane %v13475_v29, %v13549_v40 }
 0x6ab   : > { %4805 = vmatpush2.bf16.msra.mxu0 %v11580_v8  ;;  %v4402_v8 = vrot.slane %v13477_v31, %v13576_v9 }
 0x6ac   : > { %4590 = vmatpush2.bf16.msra.mxu1 %v11529_v62  ;;  %4806 = vmatprep.subr.bf16.mxu0 %v11585_v10 }
 0x6ad   : > { %4591 = vmatprep.subr.bf16.mxu1 %v11534_v60 }
 0x6af   : > { %4807 = vmatpush2.bf16.msra.mxu0 %v11583_v18 }
 0x6b0   : > { %4592 = vmatpush2.bf16.msra.mxu1 %v11532_v63  ;;  %v4326_v63 = vrot.slane %v13477_v31, %v13552_v56  ;;  %5700 = vmatprep.subr.bf16.mxu0 %v11591_v14  ;;  %v11601_v31 = vld [vmem:[#allocation11 + $0x150] ss:$8 sps:$4 sm:$0xff]  }
 0x6b1   : > { %4593 = vmatprep.subr.bf16.mxu1 %v11537_v0 }
 0x6b4   : > { %4594 = vmatpush2.bf16.msra.mxu1 %v11535_v1  ;;  %v4322_v1 = vrot.slane %v13475_v29, %v13552_v56 }
 0x6b5   : > { %5659 = vmatprep.subr.bf16.mxu1 %v11588_v13 }
 0x729   : > { %v4292_v49 = vpop.xlane.xlu0 %4291 }
 0x72a   : > { %v4294_v24 = vmul.f32 0.00390625, %v4292_v49  ;;  %v11648_v49 = vld [vmem:[#allocation11 + $0xd4] ss:$8 sps:$4 sm:$0xff]  }
 0x72b   : > { %v4299_v52 = vpop.xlane.xlu1 %4298 }
 0x72c   : > { %v4300_v53 = vmul.f32 0.00390625, %v4299_v52  ;;  %v4301_v23 = vmul.f32 %v4294_v24, %v4294_v24  ;;  %v4303_v57 = vsub.f32 %v13537_v42, %v4294_v24  ;;  %v4304_v58 = vsub.f32 %v13540_v46, %v4294_v24  ;;  %v11646_v24 = vld [vmem:[#allocation11 + $0xd0] ss:$8 sps:$4 sm:$0xff]   ;;  %v11654_v52 = vld [vmem:[#allocation11 + $0xc4] ss:$8 sps:$4 sm:$0xff]  }
 0x72e   : > { %v4302_v54 = vsub.f32 %v4300_v53, %v4301_v23  ;;  %v11652_v53 = vld [vmem:[#allocation11 + $0xc0] ss:$8 sps:$4 sm:$0xff]   ;;  %v11660_v23 = vld [vmem:[#allocation11 + $0xb4] ss:$8 sps:$4 sm:$0xff]  }
 0x730   : > { %v4305_v55 = vadd.f32 1e-05, %v4302_v54  ;;  %v11658_v54 = vld [vmem:[#allocation11 + $0xb0] ss:$8 sps:$4 sm:$0xff]  }
 0x732   : > { %12262 = vrsqrt.f32 %v4305_v55  ;;  %v11666_v55 = vld [vmem:[#allocation11 + $0xa4] ss:$8 sps:$4 sm:$0xff]  }
 0x73f   : > { %v12263_v62 = vpop.eup %12262 }
 0x740   : > { %v4308_v60 = vmul.f32 %v12263_v62, %v4304_v58  ;;  %v4307_v0 = vmul.f32 %v12263_v62, %v4303_v57  ;;  %v11664_v57 = vld [vmem:[#allocation11 + $0xa0] ss:$8 sps:$4 sm:$0xff]   ;;  %v11672_v58 = vld [vmem:[#allocation11 + $0x94] ss:$8 sps:$4 sm:$0xff]  }
 0x741   : > { %v11676_v62 = vld [vmem:[#allocation11 + $0x80] ss:$8 sps:$4 sm:$0xff]  }
 0x742   : > { %v4318_v2 = vmul.f32 %v4316_v59, %v4308_v60  ;;  %v4317_v3 = vmul.f32 %v4312_v61, %v4307_v0  ;;  %v11670_v59 = vld [vmem:[#allocation11 + $0x90] ss:$8 sps:$4 sm:$0xff]   ;;  %v11678_v61 = vld [vmem:[#allocation11 + $0x84] ss:$8 sps:$4 sm:$0xff]   ;;  %v11684_v60 = vld [vmem:[#allocation11 + $0x274] ss:$8 sps:$4 sm:$0xff]  }
 0x743   : > { %v11690_v0 = vld [vmem:[#allocation11 + $0x264] ss:$8 sps:$4 sm:$0xff]  }
 0x744   : > { %v13564_v42 = vadd.f32 %v4326_v63, %v4318_v2  ;;  %v13566_v46 = vadd.f32 %v4322_v1, %v4317_v3  ;;  %v11682_v63 = vld [vmem:[#allocation11 + $0x270] ss:$8 sps:$4 sm:$0xff]   ;;  %v11688_v1 = vld [vmem:[#allocation11 + $0x260] ss:$8 sps:$4 sm:$0xff]   ;;  %v11696_v2 = vld [vmem:[#allocation11 + $0x254] ss:$8 sps:$4 sm:$0xff]  }
 0x745   : > { %v11694_v3 = vld [vmem:[#allocation11 + $0x250] ss:$8 sps:$4 sm:$0xff]  }
 0x746   : > { %v4394_v4 = vpack.c.bf16 %v13564_v42, %v13564_v42  ;;  %v4393_v5 = vpack.c.bf16 %v13566_v46, %v13566_v46 }
 0x748   : > { %4595 = vmatprep.mubr.bf16.mxu1 %v4394_v4  ;;  %v11702_v4 = vld [vmem:[#allocation11 + $0x244] ss:$8 sps:$4 sm:$0xff]  }
 0x749   : > { %4596 = vmatmul.mubr.bf16.vlgmr.msra.gmra.mxu1 %v4393_v5  ;;  %v11700_v5 = vld [vmem:[#allocation11 + $0x240] ss:$8 sps:$4 sm:$0xff]  }
 0x74a   : > { %5691 = vmatprep.mubr.bf16.mxu1 %v13396_v47  ;;  %5660 = vmatpush1.bf16.msra.mxu1 %v11586_v12  ;;  %v11598_v47 = vld [vmem:[#allocation11 + $0x50] ss:$8 sps:$4 sm:$0xff]  }
 0x74b   : > { %5661 = vmatprep.subr.bf16.mxu1 %v11594_v44 }
 0x74e   : > { %5662 = vmatpush1.bf16.msra.mxu1 %v11592_v19 }
 0x74f   : > { %5663 = vmatprep.subr.bf16.mxu1 %v11600_v20 }
 0x752   : > { %5664 = vmatpush1.bf16.msra.mxu1 %v11598_v47  ;;  %v11589_v47 = vld [vmem:[#allocation11 + $0x170] ss:$8 sps:$4 sm:$0xff]  }
 0x753   : > { %5665 = vmatprep.subr.bf16.mxu1 %v11606_v21 }
 0x756   : > { %5666 = vmatpush1.bf16.msra.mxu1 %v11604_v50  ;;  %v11597_v50 = vld [vmem:[#allocation11 + $0x164] ss:$8 sps:$4 sm:$0xff]  }
 0x757   : > { %5667 = vmatprep.subr.bf16.mxu1 %v11612_v22  ;;  %v11595_v22 = vld [vmem:[#allocation11 + $0x160] ss:$8 sps:$4 sm:$0xff]  }
 0x75a   : > { %5668 = vmatpush1.bf16.msra.mxu1 %v11610_v25  ;;  %v11609_v25 = vld [vmem:[#allocation11 + $0x144] ss:$8 sps:$4 sm:$0xff]  }
 0x75b   : > { %5669 = vmatprep.subr.bf16.mxu1 %v11618_v30  ;;  %v11607_v30 = vld [vmem:[#allocation11 + $0x140] ss:$8 sps:$4 sm:$0xff]  }
 0x75e   : > { %5670 = vmatpush1.bf16.msra.mxu1 %v11616_v32  ;;  %v11615_v32 = vld [vmem:[#allocation11 + $0x134] ss:$8 sps:$4 sm:$0xff]  }
 0x75f   : > { %5671 = vmatprep.subr.bf16.mxu1 %v11624_v34  ;;  %v11613_v34 = vld [vmem:[#allocation11 + $0x130] ss:$8 sps:$4 sm:$0xff]  }
 0x762   : > { %5672 = vmatpush1.bf16.msra.mxu1 %v11622_v35  ;;  %v11621_v35 = vld [vmem:[#allocation11 + $0x124] ss:$8 sps:$4 sm:$0xff]  }
 0x763   : > { %5673 = vmatprep.subr.bf16.mxu1 %v11630_v38  ;;  %v11619_v38 = vld [vmem:[#allocation11 + $0x120] ss:$8 sps:$4 sm:$0xff]  }
 0x766   : > { %5674 = vmatpush1.bf16.msra.mxu1 %v11628_v39  ;;  %v11627_v39 = vld [vmem:[#allocation11 + $0x114] ss:$8 sps:$4 sm:$0xff]  }
 0x767   : > { %5675 = vmatprep.subr.bf16.mxu1 %v11636_v41  ;;  %v11633_v41 = vld [vmem:[#allocation11 + $0x104] ss:$8 sps:$4 sm:$0xff]  }
 0x76a   : > { %5676 = vmatpush2.bf16.msra.mxu1 %v11634_v43  ;;  %v11631_v43 = vld [vmem:[#allocation11 + $0x100] ss:$8 sps:$4 sm:$0xff]  }
 0x76b   : > { %5677 = vmatprep.subr.bf16.mxu1 %v11642_v45  ;;  %v11639_v45 = vld [vmem:[#allocation11 + $0x1f4] ss:$8 sps:$4 sm:$0xff]  }
 0x76e   : > { %5678 = vmatpush2.bf16.msra.mxu1 %v11640_v48  ;;  %v11637_v48 = vld [vmem:[#allocation11 + $0x1f0] ss:$8 sps:$4 sm:$0xff]  }
 0x76f   : > { %5679 = vmatprep.subr.bf16.mxu1 %v11648_v49  ;;  %v11645_v49 = vld [vmem:[#allocation11 + $0x1e4] ss:$8 sps:$4 sm:$0xff]  }
 0x772   : > { %5680 = vmatpush2.bf16.msra.mxu1 %v11646_v24  ;;  %v11643_v24 = vld [vmem:[#allocation11 + $0x1e0] ss:$8 sps:$4 sm:$0xff]  }
 0x773   : > { %5681 = vmatprep.subr.bf16.mxu1 %v11654_v52  ;;  %v11651_v52 = vld [vmem:[#allocation11 + $0x1d4] ss:$8 sps:$4 sm:$0xff]  }
 0x776   : > { %5682 = vmatpush2.bf16.msra.mxu1 %v11652_v53  ;;  %v11649_v53 = vld [vmem:[#allocation11 + $0x1d0] ss:$8 sps:$4 sm:$0xff]  }
 0x777   : > { %5683 = vmatprep.subr.bf16.mxu1 %v11660_v23  ;;  %v11657_v23 = vld [vmem:[#allocation11 + $0x1c4] ss:$8 sps:$4 sm:$0xff]  }
 0x77a   : > { %5684 = vmatpush2.bf16.msra.mxu1 %v11658_v54  ;;  %v11655_v54 = vld [vmem:[#allocation11 + $0x1c0] ss:$8 sps:$4 sm:$0xff]  }
 0x77b   : > { %5685 = vmatprep.subr.bf16.mxu1 %v11666_v55  ;;  %v11663_v55 = vld [vmem:[#allocation11 + $0x1b4] ss:$8 sps:$4 sm:$0xff]  }
 0x77e   : > { %5686 = vmatpush2.bf16.msra.mxu1 %v11664_v57  ;;  %v11661_v57 = vld [vmem:[#allocation11 + $0x1b0] ss:$8 sps:$4 sm:$0xff]  }
 0x77f   : > { %5687 = vmatprep.subr.bf16.mxu1 %v11672_v58  ;;  %v11669_v58 = vld [vmem:[#allocation11 + $0x1a4] ss:$8 sps:$4 sm:$0xff]  }
 0x782   : > { %5688 = vmatpush2.bf16.msra.mxu1 %v11670_v59  ;;  %v11667_v59 = vld [vmem:[#allocation11 + $0x1a0] ss:$8 sps:$4 sm:$0xff]  }
 0x783   : > { %5689 = vmatprep.subr.bf16.mxu1 %v11678_v61  ;;  %v11675_v61 = vld [vmem:[#allocation11 + $0x194] ss:$8 sps:$4 sm:$0xff]  }
 0x786   : > { %5690 = vmatpush2.bf16.msra.mxu1 %v11676_v62  ;;  %v11673_v62 = vld [vmem:[#allocation11 + $0x190] ss:$8 sps:$4 sm:$0xff]  }
 0x787   : > { %5741 = vmatprep.subr.bf16.mxu1 %v11684_v60  ;;  %v11681_v60 = vld [vmem:[#allocation11 + $0x184] ss:$8 sps:$4 sm:$0xff]  }
 0x789   : > { %5692 = vmatmul.mubr.bf16.vlgmr.msra.gmra.mxu1 %v13403_v6  ;;  %v4398_v6 = vrot.slane %v13475_v29, %v13576_v9  ;;  %v11603_v29 = vld [vmem:[#allocation11 + $0x154] ss:$8 sps:$4 sm:$0xff]  }
 0x78a   : > { %5742 = vmatpush1.bf16.msra.mxu1 %v11682_v63  ;;  %5773 = vmatprep.mubr.bf16.mxu1 %v13417_v36  ;;  %v11679_v63 = vld [vmem:[#allocation11 + $0x180] ss:$8 sps:$4 sm:$0xff]  }
 0x78b   : > { %5743 = vmatprep.subr.bf16.mxu1 %v11690_v0  ;;  %v11687_v0 = vld [vmem:[#allocation11 + $0x374] ss:$8 sps:$4 sm:$0xff]  }
 0x78e   : > { %5744 = vmatpush1.bf16.msra.mxu1 %v11688_v1  ;;  %v11685_v1 = vld [vmem:[#allocation11 + $0x370] ss:$8 sps:$4 sm:$0xff]  }
 0x78f   : > { %5745 = vmatprep.subr.bf16.mxu1 %v11696_v2  ;;  %v11693_v2 = vld [vmem:[#allocation11 + $0x364] ss:$8 sps:$4 sm:$0xff]  }
 0x792   : > { %5746 = vmatpush1.bf16.msra.mxu1 %v11694_v3  ;;  %v11691_v3 = vld [vmem:[#allocation11 + $0x360] ss:$8 sps:$4 sm:$0xff]  }
 0x793   : > { %5747 = vmatprep.subr.bf16.mxu1 %v11702_v4  ;;  %v11708_v4 = vld [vmem:[#allocation11 + $0x234] ss:$8 sps:$4 sm:$0xff]  }
 0x796   : > { %5748 = vmatpush1.bf16.msra.mxu1 %v11700_v5  ;;  %v11699_v5 = vld [vmem:[#allocation11 + $0x354] ss:$8 sps:$4 sm:$0xff]  }
 0x797   : > { %5749 = vmatprep.subr.bf16.mxu1 %v11708_v4  ;;  %v11771_v4 = vld [vmem:[#allocation11 + $0x394] ss:$8 sps:$4 sm:$0xff]  }
 0x809   : > { %v4597_v36 = vpop.f32.mrf.mxu1 }
 0x80a   : > { %v4598_v10 = vadd.f32 %v4597_v36, %v4398_v6  ;;  %v11706_v6 = vld [vmem:[#allocation11 + $0x230] ss:$8 sps:$4 sm:$0xff]   ;;  %v11714_v36 = vld [vmem:[#allocation11 + $0x224] ss:$8 sps:$4 sm:$0xff]  }
 0x80b   : > { %v4599_v18 = vpop.f32.mrf.mxu1  ;;  %5750 = vmatpush1.bf16.msra.mxu1 %v11706_v6  ;;  %v11769_v6 = vld [vmem:[#allocation11 + $0x390] ss:$8 sps:$4 sm:$0xff]  }
 0x80c   : > { %v4600_v12 = vadd.f32 %v4599_v18, %v4402_v8  ;;  %v4604_v13 = vmax.f32 %v4598_v10, 0.0  ;;  %v11697_v8 = vld [vmem:[#allocation11 + $0x350] ss:$8 sps:$4 sm:$0xff]   ;;  %v11705_v10 = vld [vmem:[#allocation11 + $0x344] ss:$8 sps:$4 sm:$0xff]   ;;  %5751 = vmatprep.subr.bf16.mxu1 %v11714_v36 }
 0x80d   : > { %v4601_v14 = vpop.f32.mrf.mxu1  ;;  %v11712_v18 = vld [vmem:[#allocation11 + $0x220] ss:$8 sps:$4 sm:$0xff]   ;;  %v11777_v36 = vld [vmem:[#allocation11 + $0x384] ss:$8 sps:$4 sm:$0xff]  }
 0x80e   : > { %v4605_v44 = vmax.f32 %v4600_v12, 0.0  ;;  %v4606_v21 = vpack.c.bf16 %v4604_v13, %v4604_v13  ;;  %v11718_v12 = vld [vmem:[#allocation11 + $0x210] ss:$8 sps:$4 sm:$0xff]   ;;  %v11720_v13 = vld [vmem:[#allocation11 + $0x214] ss:$8 sps:$4 sm:$0xff]  }
 0x80f   : > { %v4602_v19 = vpop.f32.mrf.mxu1  ;;  %5752 = vmatpush1.bf16.msra.mxu1 %v11712_v18  ;;  %v11711_v14 = vld [vmem:[#allocation11 + $0x334] ss:$8 sps:$4 sm:$0xff]   ;;  %v11775_v18 = vld [vmem:[#allocation11 + $0x380] ss:$8 sps:$4 sm:$0xff]  }
 0x810   : > { %v4607_v20 = vpack.c.bf16 %v4605_v44, %v4605_v44  ;;  %5753 = vmatprep.subr.bf16.mxu1 %v11720_v13  ;;  %v11726_v44 = vld [vmem:[#allocation11 + $0x204] ss:$8 sps:$4 sm:$0xff]   ;;  %v11709_v19 = vld [vmem:[#allocation11 + $0x330] ss:$8 sps:$4 sm:$0xff]   ;;  %v11796_v13 = vld [vmem:[#allocation10 + $0x40] ss:$8 sps:$4 sm:$0xff]  }
 0x812   : > { %4808 = vmatprep.mubr.bf16.mxu0 %v4607_v20  ;;  %v11732_v20 = vld [vmem:[#allocation11 + $0x2f4] ss:$8 sps:$4 sm:$0xff]  }
 0x813   : > { %4809 = vmatmul.mubr.bf16.vlgmr.msra.gmra.mxu0 %v4606_v21  ;;  %5754 = vmatpush1.bf16.msra.mxu1 %v11718_v12  ;;  %v11730_v21 = vld [vmem:[#allocation11 + $0x2f0] ss:$8 sps:$4 sm:$0xff]   ;;  %v11783_v12 = vld [vmem:[#allocation14 + $0xe4] ss:$16 sps:$4 sm:$0xff]  }
 0x814   : > { %5701 = vmatpush1.bf16.msra.mxu0 %v11589_v47  ;;  %5732 = vmatprep.mubr.bf16.mxu0 %v13399_v51  ;;  %v11625_v51 = vld [vmem:[#allocation11 + $0x110] ss:$8 sps:$4 sm:$0xff]   ;;  %v11717_v47 = vld [vmem:[#allocation11 + $0x324] ss:$8 sps:$4 sm:$0xff]  }
 0x815   : > { %5702 = vmatprep.subr.bf16.mxu0 %v11597_v50  ;;  %5755 = vmatprep.subr.bf16.mxu1 %v11726_v44  ;;  %v11715_v50 = vld [vmem:[#allocation11 + $0x320] ss:$8 sps:$4 sm:$0xff]   ;;  %v11802_v44 = vld [vmem:[#allocation10 + $0x30] ss:$8 sps:$4 sm:$0xff]  }
 0x818   : > { %5703 = vmatpush1.bf16.msra.mxu0 %v11595_v22  ;;  %v11738_v22 = vld [vmem:[#allocation11 + $0x2e4] ss:$8 sps:$4 sm:$0xff]  }
 0x819   : > { %5704 = vmatprep.subr.bf16.mxu0 %v11603_v29  ;;  %v11723_v29 = vld [vmem:[#allocation11 + $0x314] ss:$8 sps:$4 sm:$0xff]  }
 0x81c   : > { %5705 = vmatpush1.bf16.msra.mxu0 %v11601_v31  ;;  %v11736_v31 = vld [vmem:[#allocation11 + $0x2e0] ss:$8 sps:$4 sm:$0xff]  }
 0x81d   : > { %5706 = vmatprep.subr.bf16.mxu0 %v11609_v25  ;;  %v11721_v25 = vld [vmem:[#allocation11 + $0x310] ss:$8 sps:$4 sm:$0xff]  }
 0x820   : > { %5707 = vmatpush1.bf16.msra.mxu0 %v11607_v30  ;;  %v11744_v30 = vld [vmem:[#allocation11 + $0x2d4] ss:$8 sps:$4 sm:$0xff]  }
 0x821   : > { %5708 = vmatprep.subr.bf16.mxu0 %v11615_v32  ;;  %v11729_v32 = vld [vmem:[#allocation11 + $0x304] ss:$8 sps:$4 sm:$0xff]  }
 0x824   : > { %5709 = vmatpush1.bf16.msra.mxu0 %v11613_v34  ;;  %v11742_v34 = vld [vmem:[#allocation11 + $0x2d0] ss:$8 sps:$4 sm:$0xff]  }
 0x825   : > { %5710 = vmatprep.subr.bf16.mxu0 %v11621_v35  ;;  %v11727_v35 = vld [vmem:[#allocation11 + $0x300] ss:$8 sps:$4 sm:$0xff]  }
 0x828   : > { %5711 = vmatpush1.bf16.msra.mxu0 %v11619_v38  ;;  %v11750_v38 = vld [vmem:[#allocation11 + $0x2c4] ss:$8 sps:$4 sm:$0xff]  }
 0x829   : > { %5712 = vmatprep.subr.bf16.mxu0 %v11627_v39  ;;  %v11735_v39 = vld [vmem:[#allocation11 + $0x3f4] ss:$8 sps:$4 sm:$0xff]  }
 0x82c   : > { %5713 = vmatpush1.bf16.msra.mxu0 %v11625_v51  ;;  %v11748_v51 = vld [vmem:[#allocation11 + $0x2c0] ss:$8 sps:$4 sm:$0xff]  }
 0x82d   : > { %5714 = vmatprep.subr.bf16.mxu0 %v11633_v41  ;;  %v11733_v41 = vld [vmem:[#allocation11 + $0x3f0] ss:$8 sps:$4 sm:$0xff]  }
 0x830   : > { %5715 = vmatpush1.bf16.msra.mxu0 %v11631_v43  ;;  %v11756_v43 = vld [vmem:[#allocation11 + $0x2b4] ss:$8 sps:$4 sm:$0xff]  }
 0x831   : > { %5716 = vmatprep.subr.bf16.mxu0 %v11639_v45  ;;  %v11741_v45 = vld [vmem:[#allocation11 + $0x3e4] ss:$8 sps:$4 sm:$0xff]  }
 0x834   : > { %5717 = vmatpush2.bf16.msra.mxu0 %v11637_v48  ;;  %v11754_v48 = vld [vmem:[#allocation11 + $0x2b0] ss:$8 sps:$4 sm:$0xff]  }
 0x835   : > { %5718 = vmatprep.subr.bf16.mxu0 %v11645_v49  ;;  %v11739_v49 = vld [vmem:[#allocation11 + $0x3e0] ss:$8 sps:$4 sm:$0xff]  }
 0x838   : > { %5719 = vmatpush2.bf16.msra.mxu0 %v11643_v24  ;;  %v11762_v24 = vld [vmem:[#allocation11 + $0x2a4] ss:$8 sps:$4 sm:$0xff]  }
 0x839   : > { %5720 = vmatprep.subr.bf16.mxu0 %v11651_v52  ;;  %v11747_v52 = vld [vmem:[#allocation11 + $0x3d4] ss:$8 sps:$4 sm:$0xff]  }
 0x83c   : > { %5721 = vmatpush2.bf16.msra.mxu0 %v11649_v53  ;;  %v11760_v53 = vld [vmem:[#allocation11 + $0x2a0] ss:$8 sps:$4 sm:$0xff]  }
 0x83d   : > { %5722 = vmatprep.subr.bf16.mxu0 %v11657_v23  ;;  %v11745_v23 = vld [vmem:[#allocation11 + $0x3d0] ss:$8 sps:$4 sm:$0xff]  }
 0x840   : > { %5723 = vmatpush2.bf16.msra.mxu0 %v11655_v54  ;;  %v11768_v54 = vld [vmem:[#allocation11 + $0x294] ss:$8 sps:$4 sm:$0xff]  }
 0x841   : > { %5724 = vmatprep.subr.bf16.mxu0 %v11663_v55  ;;  %v11753_v55 = vld [vmem:[#allocation11 + $0x3c4] ss:$8 sps:$4 sm:$0xff]  }
 0x844   : > { %5725 = vmatpush2.bf16.msra.mxu0 %v11661_v57  ;;  %v11766_v57 = vld [vmem:[#allocation11 + $0x290] ss:$8 sps:$4 sm:$0xff]  }
 0x845   : > { %5726 = vmatprep.subr.bf16.mxu0 %v11669_v58  ;;  %v11751_v58 = vld [vmem:[#allocation11 + $0x3c0] ss:$8 sps:$4 sm:$0xff]  }
 0x848   : > { %5727 = vmatpush2.bf16.msra.mxu0 %v11667_v59  ;;  %v11774_v59 = vld [vmem:[#allocation11 + $0x284] ss:$8 sps:$4 sm:$0xff]  }
 0x849   : > { %5728 = vmatprep.subr.bf16.mxu0 %v11675_v61  ;;  %v11759_v61 = vld [vmem:[#allocation11 + $0x3b4] ss:$8 sps:$4 sm:$0xff]  }
 0x84c   : > { %5729 = vmatpush2.bf16.msra.mxu0 %v11673_v62  ;;  %v11772_v62 = vld [vmem:[#allocation11 + $0x280] ss:$8 sps:$4 sm:$0xff]  }
 0x84d   : > { %5730 = vmatprep.subr.bf16.mxu0 %v11681_v60  ;;  %v11757_v60 = vld [vmem:[#allocation11 + $0x3b0] ss:$8 sps:$4 sm:$0xff]  }
 0x850   : > { %5731 = vmatpush2.bf16.msra.mxu0 %v11679_v63  ;;  %v11780_v63 = vld [vmem:[#allocation10 + $0x74] ss:$8 sps:$4 sm:$0xff]  }
 0x851   : > { %5782 = vmatprep.subr.bf16.mxu0 %v11687_v0  ;;  %v11765_v0 = vld [vmem:[#allocation11 + $0x3a4] ss:$8 sps:$4 sm:$0xff]  }
 0x853   : > { %5733 = vmatmul.mubr.bf16.vlgmr.msra.gmra.mxu0 %v13405_v7  ;;  %v11703_v7 = vld [vmem:[#allocation11 + $0x340] ss:$8 sps:$4 sm:$0xff]  }
 0x854   : > { %5783 = vmatpush1.bf16.msra.mxu0 %v11685_v1  ;;  %5814 = vmatprep.mubr.bf16.mxu0 %v13421_v37  ;;  %v11724_v37 = vld [vmem:[#allocation11 + $0x200] ss:$8 sps:$4 sm:$0xff]   ;;  %v11778_v1 = vld [vmem:[#allocation10 + $0x70] ss:$8 sps:$4 sm:$0xff]  }
 0x855   : > { %5784 = vmatprep.subr.bf16.mxu0 %v11693_v2  ;;  %5756 = vmatpush1.bf16.msra.mxu1 %v11724_v37  ;;  %v11763_v2 = vld [vmem:[#allocation11 + $0x3a0] ss:$8 sps:$4 sm:$0xff]   ;;  %v11789_v37 = vld [vmem:[#allocation14 + $0xc4] ss:$16 sps:$4 sm:$0xff]  }
 0x856   : > { %5757 = vmatprep.subr.bf16.mxu1 %v11732_v20  ;;  %v11810_v20 = vld [vmem:[#allocation10 + $0x24] ss:$8 sps:$4 sm:$0xff]  }
 0x858   : > { %5785 = vmatpush1.bf16.msra.mxu0 %v11691_v3  ;;  %v11786_v3 = vld [vmem:[#allocation10 + $0x64] ss:$8 sps:$4 sm:$0xff]  }
 0x859   : > { %5786 = vmatprep.subr.bf16.mxu0 %v11699_v5  ;;  %5758 = vmatpush2.bf16.msra.mxu1 %v11730_v21  ;;  %v11784_v5 = vld [vmem:[#allocation10 + $0x60] ss:$8 sps:$4 sm:$0xff]  }
 0x85a   : > { %5759 = vmatprep.subr.bf16.mxu1 %v11738_v22  ;;  %v11808_v21 = vld [vmem:[#allocation10 + $0x20] ss:$8 sps:$4 sm:$0xff]   ;;  %v11816_v22 = vld [vmem:[#allocation10 + $0x14] ss:$8 sps:$4 sm:$0xff]  }
 0x85c   : > { %5787 = vmatpush1.bf16.msra.mxu0 %v11697_v8  ;;  %v11792_v8 = vld [vmem:[#allocation10 + $0x54] ss:$8 sps:$4 sm:$0xff]  }
 0x85d   : > { %5788 = vmatprep.subr.bf16.mxu0 %v11705_v10  ;;  %5760 = vmatpush2.bf16.msra.mxu1 %v11736_v31  ;;  %v11790_v10 = vld [vmem:[#allocation10 + $0x50] ss:$8 sps:$4 sm:$0xff]  }
 0x85e   : > { %5761 = vmatprep.subr.bf16.mxu1 %v11744_v30  ;;  %v11814_v31 = vld [vmem:[#allocation10 + $0x10] ss:$8 sps:$4 sm:$0xff]   ;;  %v11807_v30 = vld [vmem:[#allocation14 + $0x64] ss:$16 sps:$4 sm:$0xff]  }
 0x860   : > { %5789 = vmatpush1.bf16.msra.mxu0 %v11703_v7  ;;  %v11798_v7 = vld [vmem:[#allocation10 + $0x44] ss:$8 sps:$4 sm:$0xff]  }
 0x861   : > { %5790 = vmatprep.subr.bf16.mxu0 %v11711_v14  ;;  %5762 = vmatpush2.bf16.msra.mxu1 %v11742_v34  ;;  %v11804_v14 = vld [vmem:[#allocation10 + $0x34] ss:$8 sps:$4 sm:$0xff]   ;;  %v11805_v34 = vld [vmem:[#allocation14 + $0x60] ss:$16 sps:$4 sm:$0xff]  }
 0x862   : > { %5763 = vmatprep.subr.bf16.mxu1 %v11750_v38  ;;  %v11813_v38 = vld [vmem:[#allocation14 + $0x44] ss:$16 sps:$4 sm:$0xff]  }
 0x864   : > { %5791 = vmatpush1.bf16.msra.mxu0 %v11709_v19  ;;  %v11787_v19 = vld [vmem:[#allocation14 + $0xc0] ss:$16 sps:$4 sm:$0xff]  }
 0x865   : > { %5792 = vmatprep.subr.bf16.mxu0 %v11717_v47  ;;  %5764 = vmatpush2.bf16.msra.mxu1 %v11748_v51  ;;  %v11795_v47 = vld [vmem:[#allocation14 + $0xa4] ss:$16 sps:$4 sm:$0xff]   ;;  %v11811_v51 = vld [vmem:[#allocation14 + $0x40] ss:$16 sps:$4 sm:$0xff]  }
 0x866   : > { %5765 = vmatprep.subr.bf16.mxu1 %v11756_v43  ;;  %v11817_v43 = vld [vmem:[#allocation14 + $0x20] ss:$16 sps:$4 sm:$0xff]  }
 0x868   : > { %5793 = vmatpush1.bf16.msra.mxu0 %v11715_v50  ;;  %v11793_v50 = vld [vmem:[#allocation14 + $0xa0] ss:$16 sps:$4 sm:$0xff]  }
 0x869   : > { %5794 = vmatprep.subr.bf16.mxu0 %v11723_v29  ;;  %5766 = vmatpush2.bf16.msra.mxu1 %v11754_v48  ;;  %v11801_v29 = vld [vmem:[#allocation14 + $0x84] ss:$16 sps:$4 sm:$0xff]   ;;  %v11823_v48 = vld [vmem:[#allocation14] ss:$16 sps:$4 sm:$0xff]  }
 0x86a   : > { %5767 = vmatprep.subr.bf16.mxu1 %v11762_v24  ;;  %v11829_v24 = vld [vmem:[#allocation14 + $0x1e0] ss:$16 sps:$4 sm:$0xff]  }
 0x86c   : > { %5795 = vmatpush1.bf16.msra.mxu0 %v11721_v25  ;;  %v11822_v25 = vld [vmem:[#allocation10 + $0x4] ss:$8 sps:$4 sm:$0xff]  }
 0x86d   : > { %5796 = vmatprep.subr.bf16.mxu0 %v11729_v32  ;;  %5768 = vmatpush2.bf16.msra.mxu1 %v11760_v53  ;;  %v11820_v32 = vld [vmem:[#allocation10] ss:$8 sps:$4 sm:$0xff]  }
 0x86e   : > { %5769 = vmatprep.subr.bf16.mxu1 %v11768_v54  ;;  %v12304_v53 = vld [vmem:[#allocation13] sm:$0xff]  ;;  %v12305_v54 = vld [vmem:[#allocation13 + $0x8] sm:$0xff] }
 0x870   : > { %5797 = vmatpush1.bf16.msra.mxu0 %v11727_v35  ;;  %v11828_v35 = vld [vmem:[#allocation10 + $0xf4] ss:$8 sps:$4 sm:$0xff]  }
 0x871   : > { %5798 = vmatprep.subr.bf16.mxu0 %v11735_v39  ;;  %5770 = vmatpush2.bf16.msra.mxu1 %v11766_v57  ;;  %v11826_v39 = vld [vmem:[#allocation10 + $0xf0] ss:$8 sps:$4 sm:$0xff]  }
 0x872   : > { %5771 = vmatprep.subr.bf16.mxu1 %v11774_v59 }
 0x874   : > { %5799 = vmatpush2.bf16.msra.mxu0 %v11733_v41  ;;  %v11819_v41 = vld [vmem:[#allocation14 + $0x24] ss:$16 sps:$4 sm:$0xff]  }
 0x875   : > { %5800 = vmatprep.subr.bf16.mxu0 %v11741_v45  ;;  %5772 = vmatpush2.bf16.msra.mxu1 %v11772_v62  ;;  %v11825_v45 = vld [vmem:[#allocation14 + $0x4] ss:$16 sps:$4 sm:$0xff]  }
 0x876   : > { %5983 = vmatprep.subr.bf16.mxu1 %v11780_v63 }
 0x878   : > { %5801 = vmatpush2.bf16.msra.mxu0 %v11739_v49  ;;  %5774 = vmatmul.mubr.bf16.vlgmr.msra.gmra.mxu1 %v13427_v16  ;;  %v11781_v16 = vld [vmem:[#allocation14 + $0xe0] ss:$16 sps:$4 sm:$0xff]   ;;  %v11831_v49 = vld [vmem:[#allocation14 + $0x1e4] ss:$16 sps:$4 sm:$0xff]  }
 0x879   : > { %5802 = vmatprep.subr.bf16.mxu0 %v11747_v52  ;;  %5984 = vmatpush1.bf16.msra.mxu1 %v11778_v1  ;;  %v13588_v52 = vsub.s32 7, %v13467_v26 }
 0x87a   : > { %5985 = vmatprep.subr.bf16.mxu1 %v11786_v3 }
 0x87c   : > { %5803 = vmatpush2.bf16.msra.mxu0 %v11745_v23  ;;  %v4611_v23 = vrot.slane %v12304_v53, %v13588_v52  ;;  %v11924_v53 = vld [vmem:[#allocation16 + $0x74] ss:$8 sps:$4 sm:$0xff]  }
 0x87d   : > { %5804 = vmatprep.subr.bf16.mxu0 %v11753_v55  ;;  %5986 = vmatpush1.bf16.msra.mxu1 %v11784_v5  ;;  %v4615_v55 = vrot.slane %v12305_v54, %v13588_v52  ;;  %v11837_v5 = vld [vmem:[#allocation14 + $0x1c4] ss:$16 sps:$4 sm:$0xff]  }
 0x87e   : > { %5987 = vmatprep.subr.bf16.mxu1 %v11792_v8  ;;  %v11838_v8 = vld [vmem:[#allocation10 + $0xd0] ss:$8 sps:$4 sm:$0xff]  }
 0x880   : > { %5805 = vmatpush2.bf16.msra.mxu0 %v11751_v58 }
 0x881   : > { %5806 = vmatprep.subr.bf16.mxu0 %v11759_v61  ;;  %5988 = vmatpush1.bf16.msra.mxu1 %v11790_v10  ;;  %v11841_v10 = vld [vmem:[#allocation14 + $0x1a0] ss:$16 sps:$4 sm:$0xff]  }
 0x882   : > { %5989 = vmatprep.subr.bf16.mxu1 %v11798_v7  ;;  %v11846_v7 = vld [vmem:[#allocation10 + $0xc4] ss:$8 sps:$4 sm:$0xff]  }
 0x884   : > { %5807 = vmatpush2.bf16.msra.mxu0 %v11757_v60 }
 0x885   : > { %5808 = vmatprep.subr.bf16.mxu0 %v11765_v0  ;;  %5990 = vmatpush1.bf16.msra.mxu1 %v11796_v13  ;;  %v11849_v13 = vld [vmem:[#allocation14 + $0x184] ss:$16 sps:$4 sm:$0xff]  }
 0x886   : > { %5991 = vmatprep.subr.bf16.mxu1 %v11804_v14  ;;  %v11855_v14 = vld [vmem:[#allocation14 + $0x164] ss:$16 sps:$4 sm:$0xff]  }
 0x888   : > { %5809 = vmatpush2.bf16.msra.mxu0 %v11763_v2 }
 0x889   : > { %5810 = vmatprep.subr.bf16.mxu0 %v11771_v4  ;;  %5992 = vmatpush1.bf16.msra.mxu1 %v11802_v44  ;;  %v11832_v4 = vld [vmem:[#allocation10 + $0xe0] ss:$8 sps:$4 sm:$0xff]  }
 0x88a   : > { %5993 = vmatprep.subr.bf16.mxu1 %v11810_v20  ;;  %v11853_v44 = vld [vmem:[#allocation14 + $0x160] ss:$16 sps:$4 sm:$0xff]   ;;  %v11861_v20 = vld [vmem:[#allocation14 + $0x144] ss:$16 sps:$4 sm:$0xff]  }
 0x88c   : > { %5811 = vmatpush2.bf16.msra.mxu0 %v11769_v6  ;;  %v11835_v6 = vld [vmem:[#allocation14 + $0x1c0] ss:$16 sps:$4 sm:$0xff]  }
 0x88d   : > { %5812 = vmatprep.subr.bf16.mxu0 %v11777_v36  ;;  %5994 = vmatpush1.bf16.msra.mxu1 %v11808_v21  ;;  %v11843_v36 = vld [vmem:[#allocation14 + $0x1a4] ss:$16 sps:$4 sm:$0xff]   ;;  %v11859_v21 = vld [vmem:[#allocation14 + $0x140] ss:$16 sps:$4 sm:$0xff]  }
 0x88e   : > { %5995 = vmatprep.subr.bf16.mxu1 %v11816_v22  ;;  %v11867_v22 = vld [vmem:[#allocation14 + $0x124] ss:$16 sps:$4 sm:$0xff]  }
 0x890   : > { %5813 = vmatpush2.bf16.msra.mxu0 %v11775_v18  ;;  %v11844_v18 = vld [vmem:[#allocation10 + $0xc0] ss:$8 sps:$4 sm:$0xff]  }
 0x891   : > { %6430 = vmatprep.subr.bf16.mxu0 %v11783_v12  ;;  %5996 = vmatpush1.bf16.msra.mxu1 %v11814_v31  ;;  %v11847_v12 = vld [vmem:[#allocation14 + $0x180] ss:$16 sps:$4 sm:$0xff]  }
 0x892   : > { %5997 = vmatprep.subr.bf16.mxu1 %v11822_v25  ;;  %v11865_v31 = vld [vmem:[#allocation14 + $0x120] ss:$16 sps:$4 sm:$0xff]   ;;  %v11873_v25 = vld [vmem:[#allocation14 + $0x104] ss:$16 sps:$4 sm:$0xff]  }
 0x893   : > { %5815 = vmatmul.mubr.bf16.vlgmr.msra.gmra.mxu0 %v13431_v17  ;;  %v11799_v17 = vld [vmem:[#allocation14 + $0x80] ss:$16 sps:$4 sm:$0xff]  }
 0x894   : > { %6431 = vmatpush1.bf16.msra.mxu0 %v11781_v16  ;;  %v11852_v16 = vld [vmem:[#allocation10 + $0xb4] ss:$8 sps:$4 sm:$0xff]  }
 0x895   : > { %6432 = vmatprep.subr.bf16.mxu0 %v11789_v37  ;;  %5998 = vmatpush1.bf16.msra.mxu1 %v11820_v32  ;;  %v11850_v37 = vld [vmem:[#allocation10 + $0xb0] ss:$8 sps:$4 sm:$0xff]  }
 0x896   : > { %5999 = vmatprep.subr.bf16.mxu1 %v11828_v35  ;;  %v11871_v32 = vld [vmem:[#allocation14 + $0x100] ss:$16 sps:$4 sm:$0xff]   ;;  %v5693_v35 = vpop.f32.mrf.mxu1 }
 0x898   : > { %6433 = vmatpush1.bf16.msra.mxu0 %v11787_v19  ;;  %v11858_v19 = vld [vmem:[#allocation10 + $0xa4] ss:$8 sps:$4 sm:$0xff]  }
 0x899   : > { %6434 = vmatprep.subr.bf16.mxu0 %v11795_v47  ;;  %6000 = vmatpush2.bf16.msra.mxu1 %v11826_v39  ;;  %v11856_v47 = vld [vmem:[#allocation10 + $0xa0] ss:$8 sps:$4 sm:$0xff]  }
 0x89c   : > { %6435 = vmatpush1.bf16.msra.mxu0 %v11793_v50  ;;  %v11864_v50 = vld [vmem:[#allocation10 + $0x94] ss:$8 sps:$4 sm:$0xff]  }
 0x89d   : > { %6436 = vmatprep.subr.bf16.mxu0 %v11801_v29  ;;  %v11862_v29 = vld [vmem:[#allocation10 + $0x90] ss:$8 sps:$4 sm:$0xff]  }
 0x8a0   : > { %6437 = vmatpush1.bf16.msra.mxu0 %v11799_v17  ;;  %v11870_v17 = vld [vmem:[#allocation10 + $0x84] ss:$8 sps:$4 sm:$0xff]  }
 0x8a1   : > { %6438 = vmatprep.subr.bf16.mxu0 %v11807_v30  ;;  %v11868_v30 = vld [vmem:[#allocation10 + $0x80] ss:$8 sps:$4 sm:$0xff]  }
 0x8a4   : > { %6439 = vmatpush1.bf16.msra.mxu0 %v11805_v34  ;;  %v11876_v34 = vld [vmem:[#allocation14 + $0xec] ss:$16 sps:$4 sm:$0xff]  }
 0x8a5   : > { %6440 = vmatprep.subr.bf16.mxu0 %v11813_v38  ;;  %v5695_v38 = vpop.f32.mrf.mxu1 }
 0x8a8   : > { %6441 = vmatpush1.bf16.msra.mxu0 %v11811_v51 }
 0x8a9   : > { %6442 = vmatprep.subr.bf16.mxu0 %v11819_v41  ;;  %v5697_v41 = vpop.f32.mrf.mxu1 }
 0x8aa   : > { %v11883_v41 = vld [vmem:[#allocation14 + $0x88] ss:$16 sps:$4 sm:$0xff]  }
 0x8ac   : > { %6443 = vmatpush1.bf16.msra.mxu0 %v11817_v43 }
 0x8ad   : > { %6444 = vmatprep.subr.bf16.mxu0 %v11825_v45 }
 0x8b0   : > { %6445 = vmatpush1.bf16.msra.mxu0 %v11823_v48  ;;  %v5698_v48 = vpop.f32.mrf.mxu1 }
 0x8b1   : > { %6446 = vmatprep.subr.bf16.mxu0 %v11831_v49  ;;  %v11936_v48 = vld [vmem:[#allocation16 + $0x34] ss:$8 sps:$4 sm:$0xff]  }
 0x8b4   : > { %6447 = vmatpush2.bf16.msra.mxu0 %v11829_v24 }
 0x8b5   : > { %6448 = vmatprep.subr.bf16.mxu0 %v11837_v5 }
 0x8b8   : > { %6449 = vmatpush2.bf16.msra.mxu0 %v11835_v6 }
 0x8b9   : > { %6450 = vmatprep.subr.bf16.mxu0 %v11843_v36  ;;  %v13608_v36 = vld [vmem:[#allocation13 + $0x18] sm:$0x7] }
 0x8bc   : > { %6451 = vmatpush2.bf16.msra.mxu0 %v11841_v10  ;;  %v13610_v10 = vld [vmem:[#allocation13 + $0x10] sm:$0x7] }
 0x8bd   : > { %6452 = vmatprep.subr.bf16.mxu0 %v11849_v13  ;;  %v4840_v13 = vrot.slane %v13610_v10, %v13470_v27 }
 0x8c0   : > { %6453 = vmatpush2.bf16.msra.mxu0 %v11847_v12  ;;  %v4844_v12 = vrot.slane %v13608_v36, %v13470_v27 }
 0x8c1   : > { %6454 = vmatprep.subr.bf16.mxu0 %v11855_v14 }
 0x8c4   : > { %6455 = vmatpush2.bf16.msra.mxu0 %v11853_v44 }
 0x8c5   : > { %6456 = vmatprep.subr.bf16.mxu0 %v11861_v20 }
 0x8c8   : > { %6457 = vmatpush2.bf16.msra.mxu0 %v11859_v21 }
 0x8c9   : > { %6458 = vmatprep.subr.bf16.mxu0 %v11867_v22 }
 0x8cc   : > { %6459 = vmatpush2.bf16.msra.mxu0 %v11865_v31  ;;  %v11922_v31 = vld [vmem:[#allocation16 + $0x70] ss:$8 sps:$4 sm:$0xff]  }
 0x8cd   : > { %6460 = vmatprep.subr.bf16.mxu0 %v11873_v25  ;;  %v11877_v25 = vld [vmem:[#allocation14 + $0xc8] ss:$16 sps:$4 sm:$0xff]  }
 0x8d0   : > { %6461 = vmatpush2.bf16.msra.mxu0 %v11871_v32  ;;  %v11925_v32 = vld [vmem:[#allocation16 + $0x60] ss:$8 sps:$4 sm:$0xff]  }
 0x8d1   : > { %6734 = vmatprep.subr.bf16.mxu0 %v11924_v53  ;;  %v11934_v53 = vld [vmem:[#allocation16 + $0x30] ss:$8 sps:$4 sm:$0xff]  }
 0x8d3   : > { %v4810_v57 = vpop.f32.mrf.mxu0 }
 0x8d4   : > { %v4811_v58 = vadd.f32 %v4810_v57, %v4611_v23 }
 0x8d5   : > { %v4812_v59 = vpop.f32.mrf.mxu0 }
 0x8d6   : > { %v13593_v61 = vadd.f32 %v4811_v58, %v13566_v46  ;;  %v4813_v62 = vadd.f32 %v4812_v59, %v4615_v55  ;;  %v11834_v46 = vld [vmem:[#allocation10 + $0xe4] ss:$8 sps:$4 sm:$0xff]  }
 0x8d7   : > { %v4814_v60 = vpop.f32.mrf.mxu0  ;;  %6001 = vmatprep.subr.bf16.mxu1 %v11834_v46 }
 0x8d8   : > { %v13596_v63 = vadd.f32 %v4813_v62, %v13564_v42  ;;  %v4823_v1 = vmul.f32 %v13593_v61, %v13593_v61  ;;  %6002 = vmatpush2.bf16.msra.mxu1 %v11832_v4  ;;  %v11840_v42 = vld [vmem:[#allocation10 + $0xd4] ss:$8 sps:$4 sm:$0xff]  }
 0x8d9   : > { %v4815_v0 = vpop.f32.mrf.mxu0  ;;  %6003 = vmatprep.subr.bf16.mxu1 %v11840_v42 }
 0x8da   : > { %v4819_v26 = vadd.f32 %v13596_v63, %v13593_v61  ;;  %v4824_v2 = vmul.f32 %v13596_v63, %v13596_v63 }
 0x8dc   : > { %4820 = vadd.xlane.f32.xlu0 %v4819_v26  ;;  %v4825_v3 = vadd.f32 %v4824_v2, %v4823_v1  ;;  %6004 = vmatpush2.bf16.msra.mxu1 %v11838_v8 }
 0x8dd   : > { %6005 = vmatprep.subr.bf16.mxu1 %v11846_v7 }
 0x8de   : > { %4826 = vadd.xlane.f32.xlu1 %v4825_v3 }
 0x8e0   : > { %6006 = vmatpush2.bf16.msra.mxu1 %v11844_v18 }
 0x8e1   : > { %6007 = vmatprep.subr.bf16.mxu1 %v11852_v16 }
 0x8e4   : > { %6008 = vmatpush2.bf16.msra.mxu1 %v11850_v37  ;;  %v4854_v37 = vrot.slane %v13608_v36, %v13473_v28 }
 0x8e5   : > { %6009 = vmatprep.subr.bf16.mxu1 %v11858_v19  ;;  %v4850_v19 = vrot.slane %v13610_v10, %v13473_v28 }
 0x8e8   : > { %6010 = vmatpush2.bf16.msra.mxu1 %v11856_v47 }
 0x8e9   : > { %6011 = vmatprep.subr.bf16.mxu1 %v11864_v50  ;;  %v11874_v50 = vld [vmem:[#allocation14 + $0xe8] ss:$16 sps:$4 sm:$0xff]  }
 0x8ec   : > { %6012 = vmatpush2.bf16.msra.mxu1 %v11862_v29  ;;  %v11879_v29 = vld [vmem:[#allocation14 + $0xcc] ss:$16 sps:$4 sm:$0xff]  }
 0x8ed   : > { %6013 = vmatprep.subr.bf16.mxu1 %v11870_v17  ;;  %v11927_v17 = vld [vmem:[#allocation16 + $0x64] ss:$8 sps:$4 sm:$0xff]  }
 0x8f0   : > { %6014 = vmatpush2.bf16.msra.mxu1 %v11868_v30  ;;  %v11882_v30 = vld [vmem:[#allocation14 + $0xac] ss:$16 sps:$4 sm:$0xff]  }
 0x8f1   : > { %6471 = vmatprep.subr.bf16.mxu1 %v11876_v34  ;;  %v11930_v34 = vld [vmem:[#allocation16 + $0x54] ss:$8 sps:$4 sm:$0xff]  }
 0x913   : > { %v5734_v39 = vpop.f32.mrf.mxu0 }
 0x914   : > { %v5735_v51 = vadd.f32 %v5734_v39, %v5693_v35  ;;  %v11880_v35 = vld [vmem:[#allocation14 + $0xa8] ss:$16 sps:$4 sm:$0xff]  }
 0x915   : > { %v5736_v43 = vpop.f32.mrf.mxu0  ;;  %v11928_v39 = vld [vmem:[#allocation16 + $0x50] ss:$8 sps:$4 sm:$0xff]  }
 0x916   : > { %v5737_v45 = vadd.f32 %v5736_v43, %v5695_v38  ;;  %v11885_v38 = vld [vmem:[#allocation14 + $0x8c] ss:$16 sps:$4 sm:$0xff]  }
 0x917   : > { %v5738_v49 = vpop.f32.mrf.mxu0  ;;  %v11888_v43 = vld [vmem:[#allocation14 + $0x6c] ss:$16 sps:$4 sm:$0xff]  }
 0x918   : > { %v11886_v49 = vld [vmem:[#allocation14 + $0x68] ss:$16 sps:$4 sm:$0xff]  }
 0x919   : > { %v5739_v24 = vpop.f32.mrf.mxu0 }
 0x91a   : > { %v11891_v24 = vld [vmem:[#allocation14 + $0x4c] ss:$16 sps:$4 sm:$0xff]  }
 0x938   : > { %v5775_v23 = vpop.f32.mrf.mxu1 }
 0x939   : > { %v5776_v54 = vadd.f32 %v5775_v23, %v5735_v51  ;;  %v11933_v51 = vld [vmem:[#allocation16 + $0x44] ss:$8 sps:$4 sm:$0xff]   ;;  %v11889_v23 = vld [vmem:[#allocation14 + $0x48] ss:$16 sps:$4 sm:$0xff]  }
 0x93a   : > { %v5777_v55 = vpop.f32.mrf.mxu1 }
 0x93b   : > { %v5778_v57 = vadd.f32 %v5777_v55, %v5737_v45  ;;  %v11931_v45 = vld [vmem:[#allocation16 + $0x40] ss:$8 sps:$4 sm:$0xff]  }
 0x93c   : > { %v5779_v58 = vpop.f32.mrf.mxu1  ;;  %v11892_v55 = vld [vmem:[#allocation14 + $0x28] ss:$16 sps:$4 sm:$0xff]  }
 0x93d   : > { %v11895_v58 = vld [vmem:[#allocation14 + $0x8] ss:$16 sps:$4 sm:$0xff]  }
 0x93e   : > { %v5780_v59 = vpop.f32.mrf.mxu1 }
 0x93f   : > { %v11900_v59 = vld [vmem:[#allocation14 + $0x1ec] ss:$16 sps:$4 sm:$0xff]  }
 0x953   : > { %v5816_v62 = vpop.f32.mrf.mxu0 }
 0x954   : > { %v13604_v60 = vadd.f32 %v5816_v62, %v5776_v54  ;;  %v11894_v54 = vld [vmem:[#allocation14 + $0x2c] ss:$16 sps:$4 sm:$0xff]   ;;  %v11898_v62 = vld [vmem:[#allocation14 + $0x1e8] ss:$16 sps:$4 sm:$0xff]  }
 0x955   : > { %v5818_v0 = vpop.f32.mrf.mxu0 }
 0x956   : > { %v13606_v26 = vadd.f32 %v5818_v0, %v5778_v57  ;;  %v11897_v57 = vld [vmem:[#allocation14 + $0xc] ss:$16 sps:$4 sm:$0xff]  }
 0x957   : > { %v5820_v1 = vpop.f32.mrf.mxu0  ;;  %v11903_v0 = vld [vmem:[#allocation14 + $0x1cc] ss:$16 sps:$4 sm:$0xff]  }
 0x958   : > { %v11901_v1 = vld [vmem:[#allocation14 + $0x1c8] ss:$16 sps:$4 sm:$0xff]  }
 0x959   : > { %v5821_v2 = vpop.f32.mrf.mxu0 }
 0x95a   : > { %v11906_v2 = vld [vmem:[#allocation14 + $0x1ac] ss:$16 sps:$4 sm:$0xff]  }
 0x965   : > { %v4821_v3 = vpop.xlane.xlu0 %4820 }
 0x966   : > { %v4822_v46 = vmul.f32 0.00390625, %v4821_v3  ;;  %v11904_v3 = vld [vmem:[#allocation14 + $0x1a8] ss:$16 sps:$4 sm:$0xff]  }
 0x967   : > { %v4827_v4 = vpop.xlane.xlu1 %4826 }
 0x968   : > { %v4828_v5 = vmul.f32 0.00390625, %v4827_v4  ;;  %v4829_v6 = vmul.f32 %v4822_v46, %v4822_v46  ;;  %v4831_v18 = vsub.f32 %v13593_v61, %v4822_v46  ;;  %v4832_v7 = vsub.f32 %v13596_v63, %v4822_v46  ;;  %v11909_v46 = vld [vmem:[#allocation14 + $0x18c] ss:$16 sps:$4 sm:$0xff]   ;;  %v11907_v4 = vld [vmem:[#allocation14 + $0x188] ss:$16 sps:$4 sm:$0xff]  }
 0x96a   : > { %v4830_v42 = vsub.f32 %v4828_v5, %v4829_v6  ;;  %v11912_v5 = vld [vmem:[#allocation14 + $0x16c] ss:$16 sps:$4 sm:$0xff]   ;;  %v11910_v6 = vld [vmem:[#allocation14 + $0x168] ss:$16 sps:$4 sm:$0xff]  }
 0x96c   : > { %v4833_v8 = vadd.f32 1e-05, %v4830_v42  ;;  %v11915_v42 = vld [vmem:[#allocation14 + $0x14c] ss:$16 sps:$4 sm:$0xff]  }
 0x96e   : > { %12264 = vrsqrt.f32 %v4833_v8  ;;  %v11913_v8 = vld [vmem:[#allocation14 + $0x148] ss:$16 sps:$4 sm:$0xff]  }
 0x97b   : > { %v12265_v16 = vpop.eup %12264 }
 0x97c   : > { %v4836_v14 = vmul.f32 %v12265_v16, %v4832_v7  ;;  %v4835_v44 = vmul.f32 %v12265_v16, %v4831_v18  ;;  %v11918_v18 = vld [vmem:[#allocation14 + $0x12c] ss:$16 sps:$4 sm:$0xff]   ;;  %v11916_v7 = vld [vmem:[#allocation14 + $0x128] ss:$16 sps:$4 sm:$0xff]  }
 0x97d   : > { %v11939_v16 = vld [vmem:[#allocation16 + $0x24] ss:$8 sps:$4 sm:$0xff]  }
 0x97e   : > { %v4846_v20 = vmul.f32 %v4844_v12, %v4836_v14  ;;  %v4845_v47 = vmul.f32 %v4840_v13, %v4835_v44  ;;  %v11921_v12 = vld [vmem:[#allocation14 + $0x10c] ss:$16 sps:$4 sm:$0xff]   ;;  %v11919_v13 = vld [vmem:[#allocation14 + $0x108] ss:$16 sps:$4 sm:$0xff]  }
 0x97f   : > { %v11937_v14 = vld [vmem:[#allocation16 + $0x20] ss:$8 sps:$4 sm:$0xff]   ;;  %v11940_v44 = vld [vmem:[#allocation16 + $0x10] ss:$8 sps:$4 sm:$0xff]  }
 0x980   : > { %v13622_v61 = vadd.f32 %v4854_v37, %v4846_v20  ;;  %v13624_v63 = vadd.f32 %v4850_v19, %v4845_v47  ;;  %v11942_v37 = vld [vmem:[#allocation16 + $0x14] ss:$8 sps:$4 sm:$0xff]   ;;  %v11945_v19 = vld [vmem:[#allocation16 + $0x4] ss:$8 sps:$4 sm:$0xff]   ;;  %v11943_v20 = vld [vmem:[#allocation16] ss:$8 sps:$4 sm:$0xff]  }
 0x981   : > { %v11948_v47 = vld [vmem:[#allocation16 + $0xf4] ss:$8 sps:$4 sm:$0xff]  }
 0x982   : > { %v5018_v21 = vpack.c.bf16 %v13622_v61, %v13622_v61  ;;  %v13630_v22 = vpack.c.bf16 %v13624_v63, %v13624_v63 }
 0x984   : > { %6015 = vmatprep.mubr.bf16.mxu1 %v5018_v21  ;;  %6462 = vmatprep.mubr.bf16.mxu0 %v5018_v21 }
 0x985   : > { %6016 = vmatmul.mubr.bf16.vlgmr.msra.gmra.mxu1 %v13630_v22  ;;  %6463 = vmatmul.mubr.bf16.vlgmr.msra.gmra.mxu0 %v13630_v22 }
 0x986   : > { %6472 = vmatpush1.bf16.msra.mxu1 %v11874_v50  ;;  %6503 = vmatprep.mubr.bf16.mxu1 %v5018_v21  ;;  %v11946_v21 = vld [vmem:[#allocation16 + $0xf0] ss:$8 sps:$4 sm:$0xff]   ;;  %v11951_v50 = vld [vmem:[#allocation16 + $0xe4] ss:$8 sps:$4 sm:$0xff]  }
 0x987   : > { %6473 = vmatprep.subr.bf16.mxu1 %v11879_v29  ;;  %6735 = vmatpush1.bf16.msra.mxu0 %v11922_v31  ;;  %v11954_v29 = vld [vmem:[#allocation16 + $0xd4] ss:$8 sps:$4 sm:$0xff]   ;;  %v11952_v31 = vld [vmem:[#allocation16 + $0xd0] ss:$8 sps:$4 sm:$0xff]  }
 0x988   : > { %6736 = vmatprep.subr.bf16.mxu0 %v11927_v17  ;;  %v11957_v17 = vld [vmem:[#allocation16 + $0xc4] ss:$8 sps:$4 sm:$0xff]  }
 0x98a   : > { %6474 = vmatpush1.bf16.msra.mxu1 %v11877_v25  ;;  %v11955_v25 = vld [vmem:[#allocation16 + $0xc0] ss:$8 sps:$4 sm:$0xff]  }
 0x98b   : > { %6475 = vmatprep.subr.bf16.mxu1 %v11882_v30  ;;  %6737 = vmatpush1.bf16.msra.mxu0 %v11925_v32  ;;  %v11960_v30 = vld [vmem:[#allocation16 + $0xb4] ss:$8 sps:$4 sm:$0xff]   ;;  %v11958_v32 = vld [vmem:[#allocation16 + $0xb0] ss:$8 sps:$4 sm:$0xff]  }
 0x98c   : > { %6738 = vmatprep.subr.bf16.mxu0 %v11930_v34  ;;  %v11963_v34 = vld [vmem:[#allocation16 + $0xa4] ss:$8 sps:$4 sm:$0xff]  }
 0x98e   : > { %6476 = vmatpush1.bf16.msra.mxu1 %v11880_v35  ;;  %v11961_v35 = vld [vmem:[#allocation16 + $0xa0] ss:$8 sps:$4 sm:$0xff]  }
 0x98f   : > { %6477 = vmatprep.subr.bf16.mxu1 %v11885_v38  ;;  %6739 = vmatpush1.bf16.msra.mxu0 %v11928_v39  ;;  %v11966_v38 = vld [vmem:[#allocation16 + $0x94] ss:$8 sps:$4 sm:$0xff]   ;;  %v11964_v39 = vld [vmem:[#allocation16 + $0x90] ss:$8 sps:$4 sm:$0xff]  }
 0x990   : > { %6740 = vmatprep.subr.bf16.mxu0 %v11933_v51  ;;  %v11969_v51 = vld [vmem:[#allocation16 + $0x84] ss:$8 sps:$4 sm:$0xff]  }
 0x992   : > { %6478 = vmatpush1.bf16.msra.mxu1 %v11883_v41  ;;  %v11967_v41 = vld [vmem:[#allocation16 + $0x80] ss:$8 sps:$4 sm:$0xff]  }
 0x993   : > { %6479 = vmatprep.subr.bf16.mxu1 %v11888_v43  ;;  %6741 = vmatpush1.bf16.msra.mxu0 %v11931_v45  ;;  %v6027_v43 = vrot.slane %v13610_v10, %v13493_v11 }
 0x994   : > { %6742 = vmatprep.subr.bf16.mxu0 %v11936_v48 }
 0x996   : > { %6480 = vmatpush1.bf16.msra.mxu1 %v11886_v49 }
 0x997   : > { %6481 = vmatprep.subr.bf16.mxu1 %v11891_v24  ;;  %6743 = vmatpush1.bf16.msra.mxu0 %v11934_v53  ;;  %v6031_v24 = vrot.slane %v13608_v36, %v13493_v11 }
 0x998   : > { %6744 = vmatprep.subr.bf16.mxu0 %v11939_v16 }
 0x99a   : > { %6482 = vmatpush1.bf16.msra.mxu1 %v11889_v23 }
 0x99b   : > { %6483 = vmatprep.subr.bf16.mxu1 %v11894_v54  ;;  %6745 = vmatpush1.bf16.msra.mxu0 %v11937_v14 }
 0x99c   : > { %6746 = vmatprep.subr.bf16.mxu0 %v11942_v37 }
 0x99e   : > { %6484 = vmatpush1.bf16.msra.mxu1 %v11892_v55 }
 0x99f   : > { %6485 = vmatprep.subr.bf16.mxu1 %v11897_v57  ;;  %6747 = vmatpush1.bf16.msra.mxu0 %v11940_v44 }
 0x9a0   : > { %6748 = vmatprep.subr.bf16.mxu0 %v11945_v19 }
 0x9a2   : > { %6486 = vmatpush1.bf16.msra.mxu1 %v11895_v58 }
 0x9a3   : > { %6487 = vmatprep.subr.bf16.mxu1 %v11900_v59  ;;  %6749 = vmatpush1.bf16.msra.mxu0 %v11943_v20 }
 0x9a4   : > { %6750 = vmatprep.subr.bf16.mxu0 %v11948_v47 }
 0x9a6   : > { %6488 = vmatpush2.bf16.msra.mxu1 %v11898_v62 }
 0x9a7   : > { %6489 = vmatprep.subr.bf16.mxu1 %v11903_v0  ;;  %6751 = vmatpush2.bf16.msra.mxu0 %v11946_v21 }
 0x9a8   : > { %6752 = vmatprep.subr.bf16.mxu0 %v11951_v50 }
 0x9aa   : > { %6490 = vmatpush2.bf16.msra.mxu1 %v11901_v1 }
 0x9ab   : > { %6491 = vmatprep.subr.bf16.mxu1 %v11906_v2 }
 0x9ae   : > { %6492 = vmatpush2.bf16.msra.mxu1 %v11904_v3 }
 0x9af   : > { %6493 = vmatprep.subr.bf16.mxu1 %v11909_v46 }
 0x9b2   : > { %6494 = vmatpush2.bf16.msra.mxu1 %v11907_v4 }
 0x9b3   : > { %6495 = vmatprep.subr.bf16.mxu1 %v11912_v5 }
 0x9b6   : > { %6496 = vmatpush2.bf16.msra.mxu1 %v11910_v6 }
 0x9b7   : > { %6497 = vmatprep.subr.bf16.mxu1 %v11915_v42 }
 0x9ba   : > { %6498 = vmatpush2.bf16.msra.mxu1 %v11913_v8 }
 0x9bb   : > { %6499 = vmatprep.subr.bf16.mxu1 %v11918_v18 }
 0x9be   : > { %6500 = vmatpush2.bf16.msra.mxu1 %v11916_v7  ;;  %v13654_v7 = vld [vmem:[#allocation25] sm:$0xff] }
 0x9bf   : > { %6501 = vmatprep.subr.bf16.mxu1 %v11921_v12  ;;  %v6525_v12 = vrot.slane %v13654_v7, %v13473_v28  ;;  %v6569_v47 = vrot.slane %v13654_v7, %v13493_v11 }
 0x9c2   : > { %6502 = vmatpush2.bf16.msra.mxu1 %v11919_v13 }
 0x9c3   : > { %10521 = vmatprep.subr.bf16.mxu1 %v12960_v15 }
 0x9c5   : > { %6504 = vmatmul.mubr.bf16.vlgmr.msra.gmra.mxu1 %v13630_v22  ;;  %v11949_v22 = vld [vmem:[#allocation16 + $0xe0] ss:$8 sps:$4 sm:$0xff]  }
 0x9c6   : > { %10523 = vmatprep.mubr.msk.bf16.mxu1 %vm12961_vm0, %v12960_v15  ;;  %6753 = vmatpush2.bf16.msra.mxu0 %v11949_v22 }
 0x9c7   : > { %6754 = vmatprep.subr.bf16.mxu0 %v11954_v29 }
 0x9ca   : > { %6755 = vmatpush2.bf16.msra.mxu0 %v11952_v31 }
 0x9cb   : > { %6756 = vmatprep.subr.bf16.mxu0 %v11957_v17 }
 0x9ce   : > { %6757 = vmatpush2.bf16.msra.mxu0 %v11955_v25 }
 0x9cf   : > { %6758 = vmatprep.subr.bf16.mxu0 %v11960_v30 }
 0x9d2   : > { %6759 = vmatpush2.bf16.msra.mxu0 %v11958_v32 }
 0x9d3   : > { %6760 = vmatprep.subr.bf16.mxu0 %v11963_v34 }
 0x9d6   : > { %6761 = vmatpush2.bf16.msra.mxu0 %v11961_v35 }
 0x9d7   : > { %6762 = vmatprep.subr.bf16.mxu0 %v11966_v38 }
 0x9da   : > { %6763 = vmatpush2.bf16.msra.mxu0 %v11964_v39 }
 0x9db   : > { %6764 = vmatprep.subr.bf16.mxu0 %v11969_v51 }
 0x9de   : > { %6765 = vmatpush2.bf16.msra.mxu0 %v11967_v41 }
 0xa45   : > { %v6017_v45 = vpop.f32.mrf.mxu1  ;;  %v6464_v48 = vpop.f32.mrf.mxu0 }
 0xa46   : > { %v6018_v49 = vadd.f32 %v6017_v45, %v13604_v60 }
 0xa47   : > { %v6019_v53 = vpop.f32.mrf.mxu1  ;;  %v13643_v23 = vpop.f32.mrf.mxu0 }
 0xa48   : > { %v6032_v54 = vadd.f32 %v6027_v43, %v6018_v49  ;;  %v6020_v55 = vadd.f32 %v6019_v53, %v13606_v26 }
 0xa49   : > { %v6021_v57 = vpop.f32.mrf.mxu1  ;;  %v6468_v58 = vpop.f32.mrf.mxu0 }
 0xa4a   : > { %v6034_v59 = vsub.f32 0.0, %v6032_v54  ;;  %v6033_v62 = vadd.f32 %v6031_v24, %v6020_v55  ;;  %v13673_v24 = vld [vmem:[#allocation25 + $0x8] sm:$0xff] }
 0xa4b   : > { %v6022_v0 = vpop.f32.mrf.mxu1  ;;  %v6469_v1 = vpop.f32.mrf.mxu0  ;;  %v6529_v53 = vrot.slane %v13673_v24, %v13473_v28  ;;  %v6573_v57 = vrot.slane %v13673_v24, %v13493_v11 }
 0xa4c   : > { %v6036_v10 = vmul.f32 1.442695, %v6034_v59  ;;  %v6035_v2 = vsub.f32 0.0, %v6033_v62  ;;  %v6519_v59 = vrot.slane %v13673_v24, %v13470_v27 }
 0xa4e   : > { %12266 = vpow2.f32 %v6036_v10  ;;  %v6038_v3 = vmul.f32 1.442695, %v6035_v2  ;;  %v6521_v10 = vadd.f32 %v6519_v59, %v13643_v23  ;;  %v12003_v59 = vld [vmem:[#allocation17 + $0xc0] ss:$8 sps:$4 sm:$0xff]  }
 0xa50   : > { %12268 = vpow2.f32 %v6038_v3  ;;  %v6909_v3 = vpack.c.bf16 %v6521_v10, %v6521_v10  ;;  %v12011_v10 = vld [vmem:[#allocation17 + $0xa4] ss:$8 sps:$4 sm:$0xff]  }
 0xa5b   : > { %v12267_v60 = vpop.eup %12266 }
 0xa5c   : > { %v6040_v46 = vadd.f32 1.0, %v12267_v60 }
 0xa5d   : > { %v12269_v36 = vpop.eup %12268 }
 0xa5e   : > { %12270 = vrcp.f32 %v6040_v46  ;;  %v6041_v4 = vadd.f32 1.0, %v12269_v36 }
 0xa60   : > { %12272 = vrcp.f32 %v6041_v4 }
 0xa6b   : > { %v12271_v5 = vpop.eup %12270 }
 0xa6c   : > { %v6044_v26 = vmul.f32 %v12271_v5, %v13624_v63  ;;  %v6515_v63 = vrot.slane %v13654_v7, %v13470_v27 }
 0xa6d   : > { %v12273_v6 = vpop.eup %12272 }
 0xa6e   : > { %v6045_v42 = vmul.f32 %v12273_v6, %v13622_v61  ;;  %v13650_v18 = vpack.c.bf16 %v6044_v26, %v6044_v26  ;;  %v6520_v44 = vadd.f32 %v6515_v63, %v6464_v48 }
 0xa70   : > { %v13648_v8 = vpack.c.bf16 %v6045_v42, %v6045_v42  ;;  %v6807_v20 = vpack.c.bf16 %v6520_v44, %v6520_v44  ;;  %v11972_v44 = vld [vmem:[#allocation17 + $0x74] ss:$8 sps:$4 sm:$0xff]  }
 0xa72   : > { %6766 = vmatprep.mubr.bf16.mxu0 %v13648_v8 }
 0xa73   : > { %6767 = vmatmul.mubr.bf16.vlgmr.msra.gmra.mxu0 %v13650_v18 }
 0xa85   : > { %v6505_v13 = vpop.f32.mrf.mxu1 }
 0xa86   : > { %v6530_v16 = vadd.f32 %v6525_v12, %v6505_v13 }
 0xa87   : > { %v6507_v14 = vpop.f32.mrf.mxu1 }
 0xa88   : > { %v6808_v61 = vpack.c.bf16 %v6530_v16, %v6530_v16  ;;  %v6531_v55 = vadd.f32 %v6529_v53, %v6507_v14  ;;  %v11999_v53 = vld [vmem:[#allocation17 + $0xe4] ss:$8 sps:$4 sm:$0xff]  }
 0xa89   : > { %v6509_v37 = vpop.f32.mrf.mxu1 }
 0xa8a   : > { %10522 = vmatpush3.bf16.xpose.msra.mxu1 %v6808_v61  ;;  %v6910_v0 = vpack.c.bf16 %v6531_v55, %v6531_v55  ;;  %v12002_v55 = vld [vmem:[#allocation17 + $0xd4] ss:$8 sps:$4 sm:$0xff]  }
 0xa8b   : > { %v6510_v19 = vpop.f32.mrf.mxu1  ;;  %10527 = vmatprep.subr.bf16.mxu1 %v12960_v15 }
 0xa91   : > { %10524 = vmatmul.mubr.bf16.vlgmr.msra.gmra.mxu1 %v6807_v20 }
 0xa92   : > { %10529 = vmatprep.mubr.msk.bf16.mxu1 %vm12961_vm0, %v12960_v15 }
 0xb33   : > { %v6768_v21 = vpop.f32.mrf.mxu0 }
 0xb34   : > { %v13665_v50 = vadd.f32 %v6768_v21, %v6569_v47  ;;  %v11970_v21 = vld [vmem:[#allocation17 + $0x70] ss:$8 sps:$4 sm:$0xff]  }
 0xb35   : > { %v6770_v22 = vpop.f32.mrf.mxu0 }
 0xb36   : > { %v6809_v29 = vpack.c.bf16 %v13665_v50, %v13665_v50  ;;  %v13681_v1 = vadd.f32 %v6770_v22, %v6573_v57  ;;  %v12000_v57 = vld [vmem:[#allocation17 + $0xd0] ss:$8 sps:$4 sm:$0xff]  }
 0xb37   : > { %v6772_v31 = vpop.f32.mrf.mxu0 }
 0xb38   : > { %v6867_v17 = vsel %vm3931_vm1, %v6809_v29, 0  ;;  %v6911_v2 = vpack.c.bf16 %v13681_v1, %v13681_v1  ;;  %v11975_v29 = vld [vmem:[#allocation17 + $0x64] ss:$8 sps:$4 sm:$0xff]   ;;  %v11973_v31 = vld [vmem:[#allocation17 + $0x60] ss:$8 sps:$4 sm:$0xff]  }
 0xb39   : > { %v6773_v25 = vpop.f32.mrf.mxu0  ;;  %10528 = vmatpush3.bf16.msra.mxu1 %v6867_v17  ;;  %v11978_v17 = vld [vmem:[#allocation17 + $0x54] ss:$8 sps:$4 sm:$0xff]  }
 0xb3a   : > { %10533 = vmatprep.subr.bf16.mxu1 %v12960_v15  ;;  %v6969_v60 = vsel %vm3931_vm1, %v6911_v2, 0  ;;  %v11976_v25 = vld [vmem:[#allocation17 + $0x50] ss:$8 sps:$4 sm:$0xff]   ;;  %v12009_v2 = vld [vmem:[#allocation17 + $0xa0] ss:$8 sps:$4 sm:$0xff]  }
 0xb51   : > { %v6844_v30 = vpop.f32.mrf.mxu1 }
 0xb52   : > { %v6850_v32 = vmul.f32 0.088388346, %v6844_v30  ;;  %v11981_v30 = vld [vmem:[#allocation17 + $0x44] ss:$8 sps:$4 sm:$0xff]  }
 0xb53   : > { %v10525_v34 = vpop.f32.mrf.mxu1 }
 0xb54   : > { %v6851_v35 = vsel %vm3915_vm2, %v6850_v32, -inf  ;;  %v11984_v34 = vld [vmem:[#allocation17 + $0x34] ss:$8 sps:$4 sm:$0xff]  }
 0xb55   : > { %6852 = vmax.xlane.f32.xlu0 %v6851_v35  ;;  %v6847_v38 = vpop.f32.mrf.mxu1  ;;  %v11982_v35 = vld [vmem:[#allocation17 + $0x30] ss:$8 sps:$4 sm:$0xff]  }
 0xb56   : > { %v11987_v38 = vld [vmem:[#allocation17 + $0x24] ss:$8 sps:$4 sm:$0xff]  }
 0xb57   : > { %v10526_v39 = vpop.f32.mrf.mxu1 }
 0xb58   : > { %v11985_v39 = vld [vmem:[#allocation17 + $0x20] ss:$8 sps:$4 sm:$0xff]  }
 0xbde   : > { %v6853_v51 = vpop.xlane.xlu0 %6852 }
 0xbdf   : > { %v6854_v41 = vsub.f32 %v6850_v32, %v6853_v51  ;;  %v11979_v32 = vld [vmem:[#allocation17 + $0x40] ss:$8 sps:$4 sm:$0xff]   ;;  %v11990_v51 = vld [vmem:[#allocation17 + $0x14] ss:$8 sps:$4 sm:$0xff]  }
 0xbe1   : > { %v6855_v43 = vmul.f32 1.442695, %v6854_v41  ;;  %v11988_v41 = vld [vmem:[#allocation17 + $0x10] ss:$8 sps:$4 sm:$0xff]  }
 0xbe3   : > { %12274 = vpow2.f32 %v6855_v43  ;;  %v11993_v43 = vld [vmem:[#allocation17 + $0x4] ss:$8 sps:$4 sm:$0xff]  }
 0xbf0   : > { %v12275_v45 = vpop.eup %12274 }
 0xbf1   : > { %v6857_v48 = vsel %vm3915_vm2, %v12275_v45, 0.0 }
 0xbf2   : > { %6858 = vadd.xlane.f32.xlu1 %v6857_v48  ;;  %v11996_v48 = vld [vmem:[#allocation17 + $0xf4] ss:$8 sps:$4 sm:$0xff]  }
 0xc7b   : > { %v6859_v49 = vpop.xlane.xlu1 %6858 }
 0xc7c   : > { %12276 = vrcp.f32 %v6859_v49  ;;  %v11994_v49 = vld [vmem:[#allocation17 + $0xf0] ss:$8 sps:$4 sm:$0xff]  }
 0xc89   : > { %v12277_v54 = vpop.eup %12276 }
 0xc8a   : > { %v6861_v58 = vmul.f32 %v12277_v54, %v12275_v45  ;;  %v11991_v45 = vld [vmem:[#allocation17] ss:$8 sps:$4 sm:$0xff]  }
 0xc8b   : > { %v11997_v54 = vld [vmem:[#allocation17 + $0xe0] ss:$8 sps:$4 sm:$0xff]  }
 0xc8c   : > { %v6862_v62 = vpack.c.bf16 %v6861_v58, %v6861_v58  ;;  %v12005_v58 = vld [vmem:[#allocation17 + $0xc4] ss:$8 sps:$4 sm:$0xff]  }
 0xc8e   : > { %10530 = vmatmul.mubr.msk.bf16.vlgmr.msra.gmra.mxu1 %vm3915_vm2, %v6862_v62  ;;  %v12008_v62 = vld [vmem:[#allocation17 + $0xb4] ss:$8 sps:$4 sm:$0xff]  }
 0xc8f   : > { %10534 = vmatpush3.bf16.xpose.msra.mxu1 %v6910_v0  ;;  %10535 = vmatprep.mubr.msk.bf16.mxu1 %vm12961_vm0, %v12960_v15  ;;  %v12006_v0 = vld [vmem:[#allocation17 + $0xb0] ss:$8 sps:$4 sm:$0xff]  }
 0xc90   : > { %10539 = vmatprep.subr.bf16.mxu1 %v12960_v15 }
 0xc96   : > { %10536 = vmatmul.mubr.bf16.vlgmr.msra.gmra.mxu1 %v6909_v3  ;;  %v12014_v3 = vld [vmem:[#allocation17 + $0x94] ss:$8 sps:$4 sm:$0xff]  }
 0xc97   : > { %10540 = vmatpush3.bf16.msra.mxu1 %v6969_v60  ;;  %10541 = vmatprep.mubr.msk.bf16.mxu1 %vm12961_vm0, %v12960_v15  ;;  %v12012_v60 = vld [vmem:[#allocation17 + $0x90] ss:$8 sps:$4 sm:$0xff]  }
 0xc98   : > { %7181 = vmatprep.subr.bf16.mxu1 %v11972_v44  ;;  %v12029_v44 = vld [vmem:[#allocation19 + $0x44] ss:$8 sps:$4 sm:$0xff]  }
 0xd4e   : > { %v13693_v46 = vpop.f32.mrf.mxu1 }
 0xd50   : > { %v10531_v36 = vpop.f32.mrf.mxu1 }
 0xd51   : > { %v12017_v36 = vld [vmem:[#allocation17 + $0x84] ss:$8 sps:$4 sm:$0xff]  }
 0xd52   : > { %v6906_v4 = vpop.f32.mrf.mxu1 }
 0xd53   : > { %v12015_v4 = vld [vmem:[#allocation17 + $0x80] ss:$8 sps:$4 sm:$0xff]  }
 0xd54   : > { %v10532_v5 = vpop.f32.mrf.mxu1 }
 0xd56   : > { %v6946_v6 = vpop.f32.mrf.mxu1 }
 0xd57   : > { %v6952_v23 = vmul.f32 0.088388346, %v6946_v6 }
 0xd58   : > { %v10537_v26 = vpop.f32.mrf.mxu1 }
 0xd59   : > { %v6953_v42 = vsel %vm3915_vm2, %v6952_v23, -inf }
 0xd5a   : > { %6954 = vmax.xlane.f32.xlu0 %v6953_v42  ;;  %v6949_v12 = vpop.f32.mrf.mxu1 }
 0xd5c   : > { %v10538_v13 = vpop.f32.mrf.mxu1 }
 0xd5d   : > { %v12018_v13 = vld [vmem:[#allocation19 + $0x70] ss:$8 sps:$4 sm:$0xff]  }
 0xde3   : > { %v6955_v16 = vpop.xlane.xlu0 %6954 }
 0xde4   : > { %v6956_v63 = vsub.f32 %v6952_v23, %v6955_v16  ;;  %v7011_v23 = vpack.c.bf16 %v13693_v46, %v13693_v46  ;;  %v12020_v16 = vld [vmem:[#allocation19 + $0x74] ss:$8 sps:$4 sm:$0xff]  }
 0xde5   : > { %7496 = vmatprep.subr.bf16.mxu0 %v12020_v16  ;;  %v12032_v46 = vld [vmem:[#allocation19 + $0x34] ss:$8 sps:$4 sm:$0xff]   ;;  %v12120_v16 = vld [vmem:[#allocation20 + $0x50] ss:$8 sps:$4 sm:$0xff]  }
 0xde6   : > { %v6957_v14 = vmul.f32 1.442695, %v6956_v63  ;;  %v12023_v63 = vld [vmem:[#allocation19 + $0x64] ss:$8 sps:$4 sm:$0xff]   ;;  %7497 = vmatpush1.bf16.msra.mxu0 %v12018_v13  ;;  %v12122_v13 = vld [vmem:[#allocation20 + $0x54] ss:$8 sps:$4 sm:$0xff]  }
 0xde7   : > { %7498 = vmatprep.subr.bf16.mxu0 %v12023_v63  ;;  %v12125_v63 = vld [vmem:[#allocation20 + $0x44] ss:$8 sps:$4 sm:$0xff]  }
 0xde8   : > { %12278 = vpow2.f32 %v6957_v14  ;;  %v12021_v14 = vld [vmem:[#allocation19 + $0x60] ss:$8 sps:$4 sm:$0xff]  }
 0xdea   : > { %7499 = vmatpush1.bf16.msra.mxu0 %v12021_v14  ;;  %v12123_v14 = vld [vmem:[#allocation20 + $0x40] ss:$8 sps:$4 sm:$0xff]  }
 0xdf5   : > { %v12279_v61 = vpop.eup %12278 }
 0xdf6   : > { %v6959_v37 = vsel %vm3915_vm2, %v12279_v61, 0.0 }
 0xdf7   : > { %6960 = vadd.xlane.f32.xlu1 %v6959_v37  ;;  %v12024_v37 = vld [vmem:[#allocation19 + $0x50] ss:$8 sps:$4 sm:$0xff]  }
 0xe80   : > { %v6961_v19 = vpop.xlane.xlu1 %6960 }
 0xe81   : > { %12280 = vrcp.f32 %v6961_v19  ;;  %v12027_v19 = vld [vmem:[#allocation19 + $0x40] ss:$8 sps:$4 sm:$0xff]  }
 0xe8e   : > { %v12281_v20 = vpop.eup %12280 }
 0xe8f   : > { %v6963_v47 = vmul.f32 %v12281_v20, %v12279_v61  ;;  %v12026_v61 = vld [vmem:[#allocation19 + $0x54] ss:$8 sps:$4 sm:$0xff]   ;;  %v12030_v20 = vld [vmem:[#allocation19 + $0x30] ss:$8 sps:$4 sm:$0xff]  }
 0xe90   : > { %7500 = vmatprep.subr.bf16.mxu0 %v12026_v61  ;;  %v12128_v61 = vld [vmem:[#allocation20 + $0x34] ss:$8 sps:$4 sm:$0xff]  }
 0xe91   : > { %v6964_v22 = vpack.c.bf16 %v6963_v47, %v6963_v47  ;;  %7501 = vmatpush1.bf16.msra.mxu0 %v12024_v37  ;;  %v12035_v47 = vld [vmem:[#allocation19 + $0x24] ss:$8 sps:$4 sm:$0xff]   ;;  %v12126_v37 = vld [vmem:[#allocation20 + $0x30] ss:$8 sps:$4 sm:$0xff]  }
 0xe92   : > { %7502 = vmatprep.subr.bf16.mxu0 %v12029_v44  ;;  %v12131_v44 = vld [vmem:[#allocation20 + $0x24] ss:$8 sps:$4 sm:$0xff]  }
 0xe93   : > { %10542 = vmatmul.mubr.msk.bf16.vlgmr.msra.gmra.mxu1 %vm3915_vm2, %v6964_v22  ;;  %v12038_v22 = vld [vmem:[#allocation19 + $0x14] ss:$8 sps:$4 sm:$0xff]  }
 0xe94   : > { %7182 = vmatpush1.bf16.msra.mxu1 %v11970_v21  ;;  %v12033_v21 = vld [vmem:[#allocation19 + $0x20] ss:$8 sps:$4 sm:$0xff]  }
 0xe95   : > { %7183 = vmatprep.subr.bf16.mxu1 %v11975_v29  ;;  %7503 = vmatpush1.bf16.msra.mxu0 %v12027_v19  ;;  %v12036_v29 = vld [vmem:[#allocation19 + $0x10] ss:$8 sps:$4 sm:$0xff]   ;;  %v12129_v19 = vld [vmem:[#allocation20 + $0x20] ss:$8 sps:$4 sm:$0xff]  }
 0xe96   : > { %7504 = vmatprep.subr.bf16.mxu0 %v12032_v46  ;;  %v12134_v46 = vld [vmem:[#allocation20 + $0x14] ss:$8 sps:$4 sm:$0xff]  }
 0xe98   : > { %7184 = vmatpush1.bf16.msra.mxu1 %v11973_v31  ;;  %v12041_v31 = vld [vmem:[#allocation19 + $0x4] ss:$8 sps:$4 sm:$0xff]  }
 0xe99   : > { %7185 = vmatprep.subr.bf16.mxu1 %v11978_v17  ;;  %7505 = vmatpush1.bf16.msra.mxu0 %v12030_v20  ;;  %v12039_v17 = vld [vmem:[#allocation19] ss:$8 sps:$4 sm:$0xff]   ;;  %v12132_v20 = vld [vmem:[#allocation20 + $0x10] ss:$8 sps:$4 sm:$0xff]  }
 0xe9a   : > { %7506 = vmatprep.subr.bf16.mxu0 %v12035_v47  ;;  %v12137_v47 = vld [vmem:[#allocation20 + $0x4] ss:$8 sps:$4 sm:$0xff]  }
 0xe9c   : > { %7186 = vmatpush1.bf16.msra.mxu1 %v11976_v25  ;;  %v12044_v25 = vld [vmem:[#allocation19 + $0xf4] ss:$8 sps:$4 sm:$0xff]  }
 0xe9d   : > { %7187 = vmatprep.subr.bf16.mxu1 %v11981_v30  ;;  %7507 = vmatpush1.bf16.msra.mxu0 %v12033_v21  ;;  %v12042_v30 = vld [vmem:[#allocation19 + $0xf0] ss:$8 sps:$4 sm:$0xff]   ;;  %v12135_v21 = vld [vmem:[#allocation20] ss:$8 sps:$4 sm:$0xff]  }
 0xe9e   : > { %7508 = vmatprep.subr.bf16.mxu0 %v12038_v22  ;;  %v12140_v22 = vld [vmem:[#allocation20 + $0xf4] ss:$8 sps:$4 sm:$0xff]  }
 0xea0   : > { %7188 = vmatpush1.bf16.msra.mxu1 %v11979_v32  ;;  %v7016_v32 = vrot.slane %v13654_v7, %v13530_v33 }
 0xea1   : > { %7189 = vmatprep.subr.bf16.mxu1 %v11984_v34  ;;  %7509 = vmatpush1.bf16.msra.mxu0 %v12036_v29  ;;  %v7020_v34 = vrot.slane %v13673_v24, %v13530_v33  ;;  %v12138_v29 = vld [vmem:[#allocation20 + $0xf0] ss:$8 sps:$4 sm:$0xff]  }
 0xea2   : > { %7510 = vmatprep.subr.bf16.mxu0 %v12041_v31 }
 0xea4   : > { %7190 = vmatpush1.bf16.msra.mxu1 %v11982_v35 }
 0xea5   : > { %7191 = vmatprep.subr.bf16.mxu1 %v11987_v38  ;;  %7511 = vmatpush1.bf16.msra.mxu0 %v12039_v17  ;;  %v12143_v17 = vld [vmem:[#allocation20 + $0xe4] ss:$8 sps:$4 sm:$0xff]  }
 0xea6   : > { %7512 = vmatprep.subr.bf16.mxu0 %v12044_v25 }
 0xea8   : > { %7192 = vmatpush1.bf16.msra.mxu1 %v11985_v39 }
 0xea9   : > { %7193 = vmatprep.subr.bf16.mxu1 %v11990_v51  ;;  %7513 = vmatpush2.bf16.msra.mxu0 %v12042_v30 }
 0xeac   : > { %7194 = vmatpush1.bf16.msra.mxu1 %v11988_v41 }
 0xead   : > { %7195 = vmatprep.subr.bf16.mxu1 %v11993_v43 }
 0xeb0   : > { %7196 = vmatpush1.bf16.msra.mxu1 %v11991_v45 }
 0xeb1   : > { %7197 = vmatprep.subr.bf16.mxu1 %v11996_v48 }
 0xeb4   : > { %7198 = vmatpush2.bf16.msra.mxu1 %v11994_v49 }
 0xeb5   : > { %7199 = vmatprep.subr.bf16.mxu1 %v11999_v53 }
 0xeb8   : > { %7200 = vmatpush2.bf16.msra.mxu1 %v11997_v54 }
 0xeb9   : > { %7201 = vmatprep.subr.bf16.mxu1 %v12002_v55 }
 0xebc   : > { %7202 = vmatpush2.bf16.msra.mxu1 %v12000_v57  ;;  %v12045_v57 = vld [vmem:[#allocation19 + $0xe0] ss:$8 sps:$4 sm:$0xff]  }
 0xebd   : > { %7203 = vmatprep.subr.bf16.mxu1 %v12005_v58  ;;  %v12050_v58 = vld [vmem:[#allocation19 + $0xd4] ss:$8 sps:$4 sm:$0xff]  }
 0xec0   : > { %7204 = vmatpush2.bf16.msra.mxu1 %v12003_v59  ;;  %v12051_v59 = vld [vmem:[#allocation19 + $0xc0] ss:$8 sps:$4 sm:$0xff]  }
 0xec1   : > { %7205 = vmatprep.subr.bf16.mxu1 %v12008_v62  ;;  %v12053_v62 = vld [vmem:[#allocation19 + $0xc4] ss:$8 sps:$4 sm:$0xff]  }
 0xec4   : > { %7206 = vmatpush2.bf16.msra.mxu1 %v12006_v0  ;;  %v12056_v0 = vld [vmem:[#allocation19 + $0xb4] ss:$8 sps:$4 sm:$0xff]  }
 0xec5   : > { %7207 = vmatprep.subr.bf16.mxu1 %v12011_v10  ;;  %v12054_v10 = vld [vmem:[#allocation19 + $0xb0] ss:$8 sps:$4 sm:$0xff]  }
 0xec8   : > { %7208 = vmatpush2.bf16.msra.mxu1 %v12009_v2  ;;  %v12059_v2 = vld [vmem:[#allocation19 + $0xa4] ss:$8 sps:$4 sm:$0xff]  }
 0xec9   : > { %7209 = vmatprep.subr.bf16.mxu1 %v12014_v3  ;;  %v12057_v3 = vld [vmem:[#allocation19 + $0xa0] ss:$8 sps:$4 sm:$0xff]  }
 0xecc   : > { %7210 = vmatpush2.bf16.msra.mxu1 %v12012_v60  ;;  %v12062_v60 = vld [vmem:[#allocation19 + $0x94] ss:$8 sps:$4 sm:$0xff]  }
 0xecd   : > { %7211 = vmatprep.subr.bf16.mxu1 %v12017_v36  ;;  %v12060_v36 = vld [vmem:[#allocation19 + $0x90] ss:$8 sps:$4 sm:$0xff]  }
 0xed0   : > { %7212 = vmatpush2.bf16.msra.mxu1 %v12015_v4  ;;  %v12065_v4 = vld [vmem:[#allocation19 + $0x84] ss:$8 sps:$4 sm:$0xff]  }
 0xf53   : > { %v7005_v5 = vpop.f32.mrf.mxu1 }
 0xf54   : > { %v7012_v6 = vpack.c.bf16 %v7005_v5, %v7005_v5  ;;  %v12063_v5 = vld [vmem:[#allocation19 + $0x80] ss:$8 sps:$4 sm:$0xff]  }
 0xf55   : > { %v10543_v26 = vpop.f32.mrf.mxu1 }
 0xf56   : > { %7213 = vmatprep.mubr.bf16.mxu1 %v7012_v6  ;;  %v12068_v6 = vld [vmem:[#allocation23 + $0x74] ss:$8 sps:$4 sm:$0xff]  }
 0xf57   : > { %v7008_v42 = vpop.f32.mrf.mxu1  ;;  %7214 = vmatmul.mubr.bf16.vlgmr.msra.gmra.mxu1 %v7011_v23  ;;  %v12114_v23 = vld [vmem:[#allocation20 + $0x70] ss:$8 sps:$4 sm:$0xff]   ;;  %v12116_v26 = vld [vmem:[#allocation20 + $0x74] ss:$8 sps:$4 sm:$0xff]  }
 0xf58   : > { %v12119_v42 = vld [vmem:[#allocation20 + $0x64] ss:$8 sps:$4 sm:$0xff]   ;;  %7709 = vmatprep.subr.bf16.mxu1 %v12116_v26  ;;  %v12069_v26 = vld [vmem:[#allocation23 + $0x60] ss:$8 sps:$4 sm:$0xff]  }
 0xf59   : > { %v10544_v12 = vpop.f32.mrf.mxu1  ;;  %7710 = vmatpush1.bf16.msra.mxu1 %v12114_v23  ;;  %v12071_v23 = vld [vmem:[#allocation23 + $0x64] ss:$8 sps:$4 sm:$0xff]  }
 0xf5a   : > { %v12117_v12 = vld [vmem:[#allocation20 + $0x60] ss:$8 sps:$4 sm:$0xff]   ;;  %7711 = vmatprep.subr.bf16.mxu1 %v12119_v42  ;;  %v12074_v42 = vld [vmem:[#allocation23 + $0x54] ss:$8 sps:$4 sm:$0xff]  }
 0xf5d   : > { %7712 = vmatpush1.bf16.msra.mxu1 %v12117_v12  ;;  %v12072_v12 = vld [vmem:[#allocation23 + $0x50] ss:$8 sps:$4 sm:$0xff]  }
 0xf5e   : > { %7713 = vmatprep.subr.bf16.mxu1 %v12122_v13  ;;  %v12077_v13 = vld [vmem:[#allocation23 + $0x44] ss:$8 sps:$4 sm:$0xff]  }
 0xf61   : > { %7714 = vmatpush1.bf16.msra.mxu1 %v12120_v16  ;;  %v12075_v16 = vld [vmem:[#allocation23 + $0x40] ss:$8 sps:$4 sm:$0xff]  }
 0xf62   : > { %7715 = vmatprep.subr.bf16.mxu1 %v12125_v63  ;;  %v12080_v63 = vld [vmem:[#allocation23 + $0x34] ss:$8 sps:$4 sm:$0xff]  }
 0xf65   : > { %7716 = vmatpush1.bf16.msra.mxu1 %v12123_v14  ;;  %v12078_v14 = vld [vmem:[#allocation23 + $0x30] ss:$8 sps:$4 sm:$0xff]  }
 0xf66   : > { %7717 = vmatprep.subr.bf16.mxu1 %v12128_v61  ;;  %v12083_v61 = vld [vmem:[#allocation23 + $0x24] ss:$8 sps:$4 sm:$0xff]  }
 0xf69   : > { %7718 = vmatpush1.bf16.msra.mxu1 %v12126_v37  ;;  %v12081_v37 = vld [vmem:[#allocation23 + $0x20] ss:$8 sps:$4 sm:$0xff]  }
 0xf6a   : > { %7719 = vmatprep.subr.bf16.mxu1 %v12131_v44  ;;  %v12086_v44 = vld [vmem:[#allocation23 + $0x14] ss:$8 sps:$4 sm:$0xff]  }
 0xf6d   : > { %7720 = vmatpush1.bf16.msra.mxu1 %v12129_v19  ;;  %v12089_v19 = vld [vmem:[#allocation23 + $0x4] ss:$8 sps:$4 sm:$0xff]  }
 0xf6e   : > { %7721 = vmatprep.subr.bf16.mxu1 %v12134_v46  ;;  %v12087_v46 = vld [vmem:[#allocation23] ss:$8 sps:$4 sm:$0xff]  }
 0xf71   : > { %7722 = vmatpush1.bf16.msra.mxu1 %v12132_v20  ;;  %v12092_v20 = vld [vmem:[#allocation23 + $0xf4] ss:$8 sps:$4 sm:$0xff]  }
 0xf72   : > { %7723 = vmatprep.subr.bf16.mxu1 %v12137_v47  ;;  %v12090_v47 = vld [vmem:[#allocation23 + $0xf0] ss:$8 sps:$4 sm:$0xff]  }
 0xf75   : > { %7724 = vmatpush1.bf16.msra.mxu1 %v12135_v21  ;;  %v12095_v21 = vld [vmem:[#allocation23 + $0xe4] ss:$8 sps:$4 sm:$0xff]  }
 0xf76   : > { %7725 = vmatprep.subr.bf16.mxu1 %v12140_v22  ;;  %v12093_v22 = vld [vmem:[#allocation23 + $0xe0] ss:$8 sps:$4 sm:$0xff]  }
 0xf79   : > { %7726 = vmatpush2.bf16.msra.mxu1 %v12138_v29  ;;  %v12098_v29 = vld [vmem:[#allocation23 + $0xd4] ss:$8 sps:$4 sm:$0xff]  }
 0xf7a   : > { %7727 = vmatprep.subr.bf16.mxu1 %v12143_v17  ;;  %v12101_v17 = vld [vmem:[#allocation23 + $0xc4] ss:$8 sps:$4 sm:$0xff]  }
0x1017   : > { %v7215_v35 = vpop.f32.mrf.mxu1 }
0x1018   : > { %v7216_v38 = vadd.f32 %v7215_v35, %v7016_v32  ;;  %v12141_v35 = vld [vmem:[#allocation20 + $0xe0] ss:$8 sps:$4 sm:$0xff]  }
0x1019   : > { %v7217_v39 = vpop.f32.mrf.mxu1  ;;  %7728 = vmatpush2.bf16.msra.mxu1 %v12141_v35  ;;  %v12105_v35 = vld [vmem:[#allocation23 + $0xa0] ss:$8 sps:$4 sm:$0xff]  }
0x101a   : > { %v13705_v51 = vadd.f32 %v7216_v38, %v13665_v50  ;;  %v7218_v41 = vadd.f32 %v7217_v39, %v7020_v34  ;;  %v12047_v50 = vld [vmem:[#allocation19 + $0xe4] ss:$8 sps:$4 sm:$0xff]   ;;  %v12146_v38 = vld [vmem:[#allocation20 + $0xd4] ss:$8 sps:$4 sm:$0xff]  }
0x101b   : > { %v7219_v43 = vpop.f32.mrf.mxu1  ;;  %7514 = vmatprep.subr.bf16.mxu0 %v12047_v50  ;;  %7729 = vmatprep.subr.bf16.mxu1 %v12146_v38  ;;  %v12153_v50 = vld [vmem:[#allocation20 + $0xa0] ss:$8 sps:$4 sm:$0xff]   ;;  %v12110_v38 = vld [vmem:[#allocation23 + $0x94] ss:$8 sps:$4 sm:$0xff]  }
0x101c   : > { %v13708_v45 = vadd.f32 %v7218_v41, %v13681_v1  ;;  %v7228_v53 = vmul.f32 %v13705_v51, %v13705_v51  ;;  %7515 = vmatpush2.bf16.msra.mxu0 %v12045_v57  ;;  %v12048_v1 = vld [vmem:[#allocation19 + $0xd0] ss:$8 sps:$4 sm:$0xff]  }
0x101d   : > { %v7220_v48 = vpop.f32.mrf.mxu1  ;;  %7516 = vmatprep.subr.bf16.mxu0 %v12050_v58  ;;  %v12144_v43 = vld [vmem:[#allocation20 + $0xd0] ss:$8 sps:$4 sm:$0xff]  }
0x101e   : > { %v7224_v49 = vadd.f32 %v13708_v45, %v13705_v51  ;;  %v7229_v54 = vmul.f32 %v13708_v45, %v13708_v45  ;;  %v12149_v48 = vld [vmem:[#allocation20 + $0xc4] ss:$8 sps:$4 sm:$0xff]   ;;  %7730 = vmatpush2.bf16.msra.mxu1 %v12144_v43  ;;  %v12111_v43 = vld [vmem:[#allocation23 + $0x80] ss:$8 sps:$4 sm:$0xff]  }
0x101f   : > { %7731 = vmatprep.subr.bf16.mxu1 %v12149_v48  ;;  %v12158_v48 = vld [vmem:[#allocation20 + $0x94] ss:$8 sps:$4 sm:$0xff]  }
0x1020   : > { %7225 = vadd.xlane.f32.xlu0 %v7224_v49  ;;  %v7230_v55 = vadd.f32 %v7229_v54, %v7228_v53  ;;  %7517 = vmatpush2.bf16.msra.mxu0 %v12048_v1  ;;  %v12147_v49 = vld [vmem:[#allocation20 + $0xc0] ss:$8 sps:$4 sm:$0xff]   ;;  %v12152_v53 = vld [vmem:[#allocation20 + $0xb4] ss:$8 sps:$4 sm:$0xff]   ;;  %v12150_v54 = vld [vmem:[#allocation20 + $0xb0] ss:$8 sps:$4 sm:$0xff]   ;;  %v7249_v1 = vrot.slane %v13673_v24, %v13549_v40 }
0x1021   : > { %7518 = vmatprep.subr.bf16.mxu0 %v12053_v62 }
0x1022   : > { %7231 = vadd.xlane.f32.xlu1 %v7230_v55  ;;  %7732 = vmatpush2.bf16.msra.mxu1 %v12147_v49  ;;  %v12155_v55 = vld [vmem:[#allocation20 + $0xa4] ss:$8 sps:$4 sm:$0xff]   ;;  %v12156_v49 = vld [vmem:[#allocation20 + $0x90] ss:$8 sps:$4 sm:$0xff]  }
0x1023   : > { %7733 = vmatprep.subr.bf16.mxu1 %v12152_v53  ;;  %v12161_v53 = vld [vmem:[#allocation20 + $0x84] ss:$8 sps:$4 sm:$0xff]  }
0x1024   : > { %7519 = vmatpush2.bf16.msra.mxu0 %v12051_v59  ;;  %v7245_v59 = vrot.slane %v13654_v7, %v13549_v40 }
0x1025   : > { %7520 = vmatprep.subr.bf16.mxu0 %v12056_v0 }
0x1026   : > { %7734 = vmatpush2.bf16.msra.mxu1 %v12150_v54  ;;  %v12159_v54 = vld [vmem:[#allocation20 + $0x80] ss:$8 sps:$4 sm:$0xff]  }
0x1027   : > { %7735 = vmatprep.subr.bf16.mxu1 %v12155_v55  ;;  %v7331_v55 = vrot.slane %v13654_v7, %v13576_v9 }
0x1028   : > { %7521 = vmatpush2.bf16.msra.mxu0 %v12054_v10  ;;  %v7259_v10 = vrot.slane %v13673_v24, %v13552_v56 }
0x1029   : > { %7522 = vmatprep.subr.bf16.mxu0 %v12059_v2 }
0x102a   : > { %7736 = vmatpush2.bf16.msra.mxu1 %v12153_v50  ;;  %v7335_v50 = vrot.slane %v13673_v24, %v13576_v9 }
0x102b   : > { %7737 = vmatprep.subr.bf16.mxu1 %v12158_v48  ;;  %v12193_v48 = vld [vmem:[#allocation22 + $0xe4] ss:$8 sps:$4 sm:$0xff]  }
0x102c   : > { %7523 = vmatpush2.bf16.msra.mxu0 %v12057_v3  ;;  %v7255_v3 = vrot.slane %v13654_v7, %v13552_v56 }
0x102d   : > { %7524 = vmatprep.subr.bf16.mxu0 %v12062_v60 }
0x102e   : > { %7738 = vmatpush2.bf16.msra.mxu1 %v12156_v49  ;;  %v12194_v49 = vld [vmem:[#allocation26 + $0x70] sm:$0xff]  }
0x102f   : > { %7739 = vmatprep.subr.bf16.mxu1 %v12161_v53  ;;  %v12191_v53 = vld [vmem:[#allocation22 + $0xe0] ss:$8 sps:$4 sm:$0xff]  }
0x1030   : > { %7525 = vmatpush2.bf16.msra.mxu0 %v12060_v36 }
0x1031   : > { %7526 = vmatprep.subr.bf16.mxu0 %v12065_v4 }
0x1032   : > { %7740 = vmatpush2.bf16.msra.mxu1 %v12159_v54  ;;  %v12198_v54 = vld [vmem:[#allocation22 + $0xd4] ss:$8 sps:$4 sm:$0xff]  }
0x1034   : > { %7527 = vmatpush2.bf16.msra.mxu0 %v12063_v5  ;;  %v12066_v5 = vld [vmem:[#allocation23 + $0x70] ss:$8 sps:$4 sm:$0xff]  }
0x1035   : > { %8016 = vmatprep.subr.bf16.mxu0 %v12068_v6 }
0x10a9   : > { %v7226_v31 = vpop.xlane.xlu0 %7225 }
0x10aa   : > { %v7227_v25 = vmul.f32 0.00390625, %v7226_v31  ;;  %v12096_v31 = vld [vmem:[#allocation23 + $0xd0] ss:$8 sps:$4 sm:$0xff]  }
0x10ab   : > { %v7232_v30 = vpop.xlane.xlu1 %7231 }
0x10ac   : > { %v7233_v32 = vmul.f32 0.00390625, %v7232_v30  ;;  %v7234_v34 = vmul.f32 %v7227_v25, %v7227_v25  ;;  %v7236_v57 = vsub.f32 %v13705_v51, %v7227_v25  ;;  %v7237_v58 = vsub.f32 %v13708_v45, %v7227_v25  ;;  %v12099_v25 = vld [vmem:[#allocation23 + $0xc0] ss:$8 sps:$4 sm:$0xff]   ;;  %v12104_v30 = vld [vmem:[#allocation23 + $0xb4] ss:$8 sps:$4 sm:$0xff]  }
0x10ae   : > { %v7235_v39 = vsub.f32 %v7233_v32, %v7234_v34  ;;  %v12102_v32 = vld [vmem:[#allocation23 + $0xb0] ss:$8 sps:$4 sm:$0xff]   ;;  %v12107_v34 = vld [vmem:[#allocation23 + $0xa4] ss:$8 sps:$4 sm:$0xff]  }
0x10b0   : > { %v7238_v41 = vadd.f32 1e-05, %v7235_v39  ;;  %v12108_v39 = vld [vmem:[#allocation23 + $0x90] ss:$8 sps:$4 sm:$0xff]  }
0x10b2   : > { %12282 = vrsqrt.f32 %v7238_v41  ;;  %v12113_v41 = vld [vmem:[#allocation23 + $0x84] ss:$8 sps:$4 sm:$0xff]  }
0x10bf   : > { %v12283_v62 = vpop.eup %12282 }
0x10c0   : > { %v7241_v0 = vmul.f32 %v12283_v62, %v7237_v58  ;;  %v7240_v2 = vmul.f32 %v12283_v62, %v7236_v57 }
0x10c2   : > { %v7251_v60 = vmul.f32 %v7249_v1, %v7241_v0  ;;  %v7250_v51 = vmul.f32 %v7245_v59, %v7240_v2 }
0x10c4   : > { %v13726_v36 = vadd.f32 %v7259_v10, %v7251_v60  ;;  %v13728_v45 = vadd.f32 %v7255_v3, %v7250_v51 }
0x10c6   : > { %v7327_v4 = vpack.c.bf16 %v13726_v36, %v13726_v36  ;;  %v7326_v6 = vpack.c.bf16 %v13728_v45, %v13728_v45 }
0x10c8   : > { %7528 = vmatprep.mubr.bf16.mxu0 %v7327_v4 }
0x10c9   : > { %7529 = vmatmul.mubr.bf16.vlgmr.msra.gmra.mxu0 %v7326_v6  ;;  %v12162_v6 = vld [vmem:[#allocation22 + $0x70] ss:$8 sps:$4 sm:$0xff]  }
0x10ca   : > { %8017 = vmatpush1.bf16.msra.mxu0 %v12066_v5  ;;  %8048 = vmatprep.mubr.bf16.mxu0 %v13648_v8  ;;  %v12084_v8 = vld [vmem:[#allocation23 + $0x10] ss:$8 sps:$4 sm:$0xff]  }
0x10cb   : > { %8018 = vmatprep.subr.bf16.mxu0 %v12071_v23  ;;  %v12164_v23 = vld [vmem:[#allocation22 + $0x74] ss:$8 sps:$4 sm:$0xff]  }
0x10cc   : > { %8217 = vmatprep.subr.bf16.mxu1 %v12164_v23  ;;  %v12218_v23 = vld [vmem:[#allocation22 + $0x94] ss:$8 sps:$4 sm:$0xff]  }
0x10ce   : > { %8019 = vmatpush1.bf16.msra.mxu0 %v12069_v26  ;;  %v12167_v26 = vld [vmem:[#allocation22 + $0x64] ss:$8 sps:$4 sm:$0xff]  }
0x10cf   : > { %8020 = vmatprep.subr.bf16.mxu0 %v12074_v42  ;;  %v12165_v42 = vld [vmem:[#allocation22 + $0x60] ss:$8 sps:$4 sm:$0xff]  }
0x10d2   : > { %8021 = vmatpush1.bf16.msra.mxu0 %v12072_v12  ;;  %v12170_v12 = vld [vmem:[#allocation22 + $0x54] ss:$8 sps:$4 sm:$0xff]  }
0x10d3   : > { %8022 = vmatprep.subr.bf16.mxu0 %v12077_v13  ;;  %v12189_v13 = vld [vmem:[#allocation26 + $0x78] sm:$0xff]  }
0x10d6   : > { %8023 = vmatpush1.bf16.msra.mxu0 %v12075_v16  ;;  %v12168_v16 = vld [vmem:[#allocation22 + $0x50] ss:$8 sps:$4 sm:$0xff]  }
0x10d7   : > { %8024 = vmatprep.subr.bf16.mxu0 %v12080_v63  ;;  %v12173_v63 = vld [vmem:[#allocation22 + $0x44] ss:$8 sps:$4 sm:$0xff]  }
0x10da   : > { %8025 = vmatpush1.bf16.msra.mxu0 %v12078_v14  ;;  %v12171_v14 = vld [vmem:[#allocation22 + $0x40] ss:$8 sps:$4 sm:$0xff]  }
0x10db   : > { %8026 = vmatprep.subr.bf16.mxu0 %v12083_v61  ;;  %v12176_v61 = vld [vmem:[#allocation22 + $0x34] ss:$8 sps:$4 sm:$0xff]  }
0x10de   : > { %8027 = vmatpush1.bf16.msra.mxu0 %v12081_v37  ;;  %v12174_v37 = vld [vmem:[#allocation22 + $0x30] ss:$8 sps:$4 sm:$0xff]  }
0x10df   : > { %8028 = vmatprep.subr.bf16.mxu0 %v12086_v44  ;;  %v12179_v44 = vld [vmem:[#allocation22 + $0x24] ss:$8 sps:$4 sm:$0xff]  }
0x10e2   : > { %8029 = vmatpush1.bf16.msra.mxu0 %v12084_v8  ;;  %v12177_v8 = vld [vmem:[#allocation22 + $0x20] ss:$8 sps:$4 sm:$0xff]  }
0x10e3   : > { %8030 = vmatprep.subr.bf16.mxu0 %v12089_v19  ;;  %v12182_v19 = vld [vmem:[#allocation22 + $0x14] ss:$8 sps:$4 sm:$0xff]  }
0x10e6   : > { %8031 = vmatpush1.bf16.msra.mxu0 %v12087_v46  ;;  %v12180_v46 = vld [vmem:[#allocation22 + $0x10] ss:$8 sps:$4 sm:$0xff]  }
0x10e7   : > { %8032 = vmatprep.subr.bf16.mxu0 %v12092_v20  ;;  %v12185_v20 = vld [vmem:[#allocation22 + $0x4] ss:$8 sps:$4 sm:$0xff]  }
0x10ea   : > { %8033 = vmatpush2.bf16.msra.mxu0 %v12090_v47  ;;  %v12183_v47 = vld [vmem:[#allocation22] ss:$8 sps:$4 sm:$0xff]  }
0x10eb   : > { %8034 = vmatprep.subr.bf16.mxu0 %v12095_v21  ;;  %v12188_v21 = vld [vmem:[#allocation22 + $0xf4] ss:$8 sps:$4 sm:$0xff]  }
0x10ee   : > { %8035 = vmatpush2.bf16.msra.mxu0 %v12093_v22  ;;  %v12186_v22 = vld [vmem:[#allocation22 + $0xf0] ss:$8 sps:$4 sm:$0xff]  }
0x10ef   : > { %8036 = vmatprep.subr.bf16.mxu0 %v12098_v29  ;;  %v7544_v29 = vrot.slane %v13654_v7, %v13588_v52 }
0x10f2   : > { %8037 = vmatpush2.bf16.msra.mxu0 %v12096_v31  ;;  %v7548_v31 = vrot.slane %v13673_v24, %v13588_v52 }
0x10f3   : > { %8038 = vmatprep.subr.bf16.mxu0 %v12101_v17 }
0x10f6   : > { %8039 = vmatpush2.bf16.msra.mxu0 %v12099_v25 }
0x10f7   : > { %8040 = vmatprep.subr.bf16.mxu0 %v12104_v30 }
0x10fa   : > { %8041 = vmatpush2.bf16.msra.mxu0 %v12102_v32 }
0x10fb   : > { %8042 = vmatprep.subr.bf16.mxu0 %v12107_v34 }
0x10fe   : > { %8043 = vmatpush2.bf16.msra.mxu0 %v12105_v35 }
0x10ff   : > { %8044 = vmatprep.subr.bf16.mxu0 %v12110_v38 }
0x1102   : > { %8045 = vmatpush2.bf16.msra.mxu0 %v12108_v39 }
0x1103   : > { %8046 = vmatprep.subr.bf16.mxu0 %v12113_v41 }
0x1106   : > { %8047 = vmatpush2.bf16.msra.mxu0 %v12111_v43 }
0x1107   : > { %10430 = vmatprep.subr.bf16.mxu0 %v12189_v13  ;;  %v12223_v13 = vld [vmem:[#allocation22 + $0x84] ss:$8 sps:$4 sm:$0xff]  }
0x1109   : > { %8049 = vmatmul.mubr.bf16.vlgmr.msra.gmra.mxu0 %v13650_v18 }
0x1189   : > { %v7530_v57 = vpop.f32.mrf.mxu0 }
0x118a   : > { %v7531_v58 = vadd.f32 %v7530_v57, %v7331_v55  ;;  %v12199_v55 = vld [vmem:[#allocation26 + $0x68] sm:$0xff]  }
0x118b   : > { %v7532_v1 = vpop.f32.mrf.mxu0  ;;  %v12200_v57 = vld [vmem:[#allocation26 + $0x28] sm:$0xff]  }
0x118c   : > { %v7533_v59 = vadd.f32 %v7532_v1, %v7335_v50  ;;  %v7537_v62 = vmax.f32 %v7531_v58, 0.0  ;;  %v12196_v50 = vld [vmem:[#allocation22 + $0xd0] ss:$8 sps:$4 sm:$0xff]   ;;  %v12203_v58 = vld [vmem:[#allocation22 + $0xc4] ss:$8 sps:$4 sm:$0xff]  }
0x118d   : > { %v7534_v18 = vpop.f32.mrf.mxu0  ;;  %v12204_v1 = vld [vmem:[#allocation26 + $0x60] sm:$0xff]  }
0x118e   : > { %v7538_v0 = vmax.f32 %v7533_v59, 0.0  ;;  %v7539_v3 = vpack.c.bf16 %v7537_v62, %v7537_v62  ;;  %v12201_v59 = vld [vmem:[#allocation22 + $0xc0] ss:$8 sps:$4 sm:$0xff]   ;;  %v12208_v18 = vld [vmem:[#allocation22 + $0xb4] ss:$8 sps:$4 sm:$0xff]  }
0x118f   : > { %v7535_v10 = vpop.f32.mrf.mxu0  ;;  %v12205_v62 = vld [vmem:[#allocation26 + $0x20] sm:$0xff]  }
0x1190   : > { %v7540_v2 = vpack.c.bf16 %v7538_v0, %v7538_v0  ;;  %v12209_v0 = vld [vmem:[#allocation26 + $0x58] sm:$0xff]  }
0x1191   : > { %v12206_v10 = vld [vmem:[#allocation22 + $0xb0] ss:$8 sps:$4 sm:$0xff]  }
0x1192   : > { %7741 = vmatprep.mubr.bf16.mxu1 %v7540_v2  ;;  %v12210_v2 = vld [vmem:[#allocation26 + $0x18] sm:$0xff]  }
0x1193   : > { %7742 = vmatmul.mubr.bf16.vlgmr.msra.gmra.mxu1 %v7539_v3  ;;  %v12213_v3 = vld [vmem:[#allocation22 + $0xa4] ss:$8 sps:$4 sm:$0xff]  }
0x1194   : > { %8218 = vmatpush1.bf16.msra.mxu1 %v12162_v6  ;;  %v12215_v6 = vld [vmem:[#allocation26 + $0x10] sm:$0xff]  }
0x1195   : > { %8219 = vmatprep.subr.bf16.mxu1 %v12167_v26  ;;  %v12219_v26 = vld [vmem:[#allocation26 + $0x48] sm:$0xff]  }
0x1198   : > { %8220 = vmatpush1.bf16.msra.mxu1 %v12165_v42  ;;  %v12216_v42 = vld [vmem:[#allocation22 + $0x90] ss:$8 sps:$4 sm:$0xff]  }
0x1199   : > { %8221 = vmatprep.subr.bf16.mxu1 %v12170_v12  ;;  %v12220_v12 = vld [vmem:[#allocation26 + $0x8] sm:$0xff]  }
0x119c   : > { %8222 = vmatpush1.bf16.msra.mxu1 %v12168_v16  ;;  %v12224_v16 = vld [vmem:[#allocation26 + $0x40] sm:$0xff]  }
0x119d   : > { %8223 = vmatprep.subr.bf16.mxu1 %v12173_v63  ;;  %v12221_v63 = vld [vmem:[#allocation22 + $0x80] ss:$8 sps:$4 sm:$0xff]  }
0x11a0   : > { %8224 = vmatpush1.bf16.msra.mxu1 %v12171_v14  ;;  %v12225_v14 = vld [vmem:[#allocation26] sm:$0xff]  }
0x11a1   : > { %8225 = vmatprep.subr.bf16.mxu1 %v12176_v61  ;;  %v13761_v61 = vld [vmem:[#allocation32] sm:$0xff] }
0x11a4   : > { %8226 = vmatpush1.bf16.msra.mxu1 %v12174_v37  ;;  %v8456_v37 = vrot.slane %v13761_v61, %v13473_v28 }
0x11a5   : > { %8227 = vmatprep.subr.bf16.mxu1 %v12179_v44 }
0x11a8   : > { %8228 = vmatpush1.bf16.msra.mxu1 %v12177_v8 }
0x11a9   : > { %8229 = vmatprep.subr.bf16.mxu1 %v12182_v19 }
0x11ac   : > { %8230 = vmatpush1.bf16.msra.mxu1 %v12180_v46 }
0x11ad   : > { %8231 = vmatprep.subr.bf16.mxu1 %v12185_v20 }
0x11b0   : > { %8232 = vmatpush1.bf16.msra.mxu1 %v12183_v47 }
0x11b1   : > { %8233 = vmatprep.subr.bf16.mxu1 %v12188_v21 }
0x11b4   : > { %8234 = vmatpush2.bf16.msra.mxu1 %v12186_v22  ;;  %v13766_v22 = vld [vmem:[#allocation25 + $0x18] sm:$0x7] }
0x11b5   : > { %8235 = vmatprep.subr.bf16.mxu1 %v12193_v48 }
0x11b8   : > { %8236 = vmatpush2.bf16.msra.mxu1 %v12191_v53  ;;  %v12228_v53 = vld [vmem:[%s13979_s17 + $0x70] sm:$0xff]  }
0x11b9   : > { %8237 = vmatprep.subr.bf16.mxu1 %v12198_v54  ;;  %v12230_v54 = vld [vmem:[%s13979_s17 + $0x68] sm:$0xff]  }
0x11bc   : > { %8238 = vmatpush2.bf16.msra.mxu1 %v12196_v50  ;;  %v12232_v50 = vld [vmem:[%s13979_s17 + $0x60] sm:$0xff]  }
0x11bd   : > { %8239 = vmatprep.subr.bf16.mxu1 %v12203_v58  ;;  %v12234_v58 = vld [vmem:[%s13979_s17 + $0x58] sm:$0xff]  }
0x11c0   : > { %8240 = vmatpush2.bf16.msra.mxu1 %v12201_v59  ;;  %v12236_v59 = vld [vmem:[%s13979_s17 + $0x50] sm:$0xff]  }
0x11c1   : > { %8241 = vmatprep.subr.bf16.mxu1 %v12208_v18  ;;  %v12238_v18 = vld [vmem:[%s13979_s17 + $0x48] sm:$0xff]  }
0x11c4   : > { %8242 = vmatpush2.bf16.msra.mxu1 %v12206_v10  ;;  %v12240_v10 = vld [vmem:[%s13979_s17 + $0x40] sm:$0xff]  }
0x11c5   : > { %8243 = vmatprep.subr.bf16.mxu1 %v12213_v3 }
0x11c9   : > { %v13740_v60 = vpop.f32.mrf.mxu0 }
0x11cb   : > { %v13742_v51 = vpop.f32.mrf.mxu0 }
0x11cd   : > { %v8054_v4 = vpop.f32.mrf.mxu0 }
0x11ce   : > { %v12214_v4 = vld [vmem:[#allocation26 + $0x50] sm:$0xff]  }
0x11cf   : > { %v8055_v5 = vpop.f32.mrf.mxu0 }
0x11d0   : > { %v12211_v5 = vld [vmem:[#allocation22 + $0xa0] ss:$8 sps:$4 sm:$0xff]  }
0x11d1   : > { %8244 = vmatpush2.bf16.msra.mxu1 %v12211_v5 }
0x11d2   : > { %8245 = vmatprep.subr.bf16.mxu1 %v12218_v23  ;;  %v8265_v23 = vrot.slane %v13766_v22, %v13493_v11 }
0x11d5   : > { %8246 = vmatpush2.bf16.msra.mxu1 %v12216_v42 }
0x11d6   : > { %8247 = vmatprep.subr.bf16.mxu1 %v12223_v13 }
0x11d9   : > { %8248 = vmatpush2.bf16.msra.mxu1 %v12221_v63 }
0x11da   : > { %10545 = vmatprep.subr.bf16.mxu1 %v12960_v15 }
0x1253   : > { %v7743_v17 = vpop.f32.mrf.mxu1 }
0x1254   : > { %v7744_v25 = vadd.f32 %v7743_v17, %v7544_v29  ;;  %v13768_v29 = vld [vmem:[#allocation25 + $0x10] sm:$0x7] }
0x1255   : > { %v7745_v30 = vpop.f32.mrf.mxu1  ;;  %v8261_v3 = vrot.slane %v13768_v29, %v13493_v11 }
0x1256   : > { %v13749_v32 = vadd.f32 %v7744_v25, %v13728_v45  ;;  %v7746_v34 = vadd.f32 %v7745_v30, %v7548_v31  ;;  %v12190_v45 = vld [vmem:[#allocation26 + $0x38] sm:$0xff]   ;;  %v7777_v25 = vrot.slane %v13766_v22, %v13470_v27  ;;  %v7773_v30 = vrot.slane %v13768_v29, %v13470_v27 }
0x1257   : > { %v7747_v35 = vpop.f32.mrf.mxu1  ;;  %10431 = vmatpush3.bf16.msra.mxu0 %v12190_v45 }
0x1258   : > { %v13752_v38 = vadd.f32 %v7746_v34, %v13726_v36  ;;  %v7756_v7 = vmul.f32 %v13749_v32, %v13749_v32  ;;  %v12195_v36 = vld [vmem:[#allocation26 + $0x30] sm:$0xff]   ;;  %10432 = vmatprep.subr.bf16.mxu0 %v12194_v49  ;;  %v12227_v49 = vld [vmem:[%s13979_s17 + $0x38] sm:$0xff]  }
0x1259   : > { %v7748_v39 = vpop.f32.mrf.mxu1 }
0x125a   : > { %v7752_v41 = vadd.f32 %v13752_v38, %v13749_v32  ;;  %v7757_v24 = vmul.f32 %v13752_v38, %v13752_v38  ;;  %v7787_v39 = vrot.slane %v13766_v22, %v13473_v28 }
0x125b   : > { %10433 = vmatpush3.bf16.msra.mxu0 %v12195_v36  ;;  %v12229_v36 = vld [vmem:[%s13979_s17 + $0x30] sm:$0xff]  }
0x125c   : > { %7753 = vadd.xlane.f32.xlu0 %v7752_v41  ;;  %v7758_v43 = vadd.f32 %v7757_v24, %v7756_v7  ;;  %10434 = vmatprep.subr.bf16.mxu0 %v12199_v55  ;;  %v7783_v7 = vrot.slane %v13768_v29, %v13473_v28  ;;  %v12226_v28 = vld [vmem:[%s13979_s17 + $0x78] sm:$0xff]   ;;  %v12231_v55 = vld [vmem:[%s13979_s17 + $0x28] sm:$0xff]  }
0x125e   : > { %7759 = vadd.xlane.f32.xlu1 %v7758_v43 }
0x125f   : > { %10435 = vmatpush3.bf16.msra.mxu0 %v12200_v57  ;;  %v12233_v57 = vld [vmem:[%s13979_s17 + $0x20] sm:$0xff]  }
0x1260   : > { %10436 = vmatprep.subr.bf16.mxu0 %v12204_v1  ;;  %v12235_v1 = vld [vmem:[%s13979_s17 + $0x18] sm:$0xff]  }
0x1263   : > { %10437 = vmatpush3.bf16.msra.mxu0 %v12205_v62  ;;  %v12237_v62 = vld [vmem:[%s13979_s17 + $0x10] sm:$0xff]  }
0x1264   : > { %10438 = vmatprep.subr.bf16.mxu0 %v12209_v0  ;;  %v12239_v0 = vld [vmem:[%s13979_s17 + $0x8] sm:$0xff]  }
0x1267   : > { %10439 = vmatpush3.bf16.msra.mxu0 %v12210_v2  ;;  %v12241_v2 = vld [vmem:[%s13979_s17] sm:$0xff]  }
0x1268   : > { %10440 = vmatprep.subr.bf16.mxu0 %v12214_v4 }
0x126b   : > { %10441 = vmatpush3.bf16.msra.mxu0 %v12215_v6 }
0x126c   : > { %10442 = vmatprep.subr.bf16.mxu0 %v12219_v26 }
0x126f   : > { %10443 = vmatpush3.bf16.msra.mxu0 %v12220_v12 }
0x1270   : > { %10444 = vmatprep.subr.bf16.mxu0 %v12224_v16 }
0x1272   : > { %8458 = vrot.lane.b32.xlu0 %v8456_v37, %s12962_s6 }
0x1273   : > { %10445 = vmatpush3.bf16.msra.mxu0 %v12225_v14 }
0x1274   : > { %10452 = vmatprep.subr.bf16.mxu0 %v12226_v28 }
0x12e5   : > { %v7754_v44 = vpop.xlane.xlu0 %7753 }
0x12e6   : > { %v7755_v8 = vmul.f32 0.00390625, %v7754_v44 }
0x12e7   : > { %v7760_v19 = vpop.xlane.xlu1 %7759 }
0x12e8   : > { %v7761_v46 = vmul.f32 0.00390625, %v7760_v19  ;;  %v7762_v20 = vmul.f32 %v7755_v8, %v7755_v8  ;;  %v7764_v31 = vsub.f32 %v13749_v32, %v7755_v8  ;;  %v7765_v17 = vsub.f32 %v13752_v38, %v7755_v8 }
0x12e9   : > { %v8459_v26 = vpop.permute.xlu0 %8458 }
0x12ea   : > { %v7763_v47 = vsub.f32 %v7761_v46, %v7762_v20 }
0x12ec   : > { %v7766_v21 = vadd.f32 1e-05, %v7763_v47 }
0x12ee   : > { %12284 = vrsqrt.f32 %v7766_v21 }
0x12fb   : > { %v12285_v34 = vpop.eup %12284 }
0x12fc   : > { %v7769_v35 = vmul.f32 %v12285_v34, %v7765_v17  ;;  %v7768_v41 = vmul.f32 %v12285_v34, %v7764_v31 }
0x12fe   : > { %v7779_v24 = vmul.f32 %v7777_v25, %v7769_v35  ;;  %v7778_v43 = vmul.f32 %v7773_v30, %v7768_v41 }
0x1300   : > { %v13780_v32 = vadd.f32 %v7787_v39, %v7779_v24  ;;  %v13782_v38 = vadd.f32 %v7783_v7, %v7778_v43  ;;  %v8451_v7 = vrot.slane %v13761_v61, %v13470_v27 }
0x1302   : > { %v7855_v45 = vpack.c.bf16 %v13780_v32, %v13780_v32  ;;  %v7854_v48 = vpack.c.bf16 %v13782_v38, %v13782_v38 }
0x1304   : > { %8249 = vmatprep.mubr.bf16.mxu1 %v7855_v45  ;;  %8440 = vmatprep.mubr.bf16.mxu0 %v7855_v45 }
0x1305   : > { %8250 = vmatmul.mubr.bf16.vlgmr.msra.gmra.mxu1 %v7854_v48  ;;  %8441 = vmatmul.mubr.bf16.vlgmr.msra.gmra.mxu0 %v7854_v48  ;;  %v8499_v48 = vrot.slane %v13761_v61, %v13493_v11 }
0x1306   : > { %10547 = vmatprep.mubr.msk.bf16.mxu1 %vm12961_vm0, %v12960_v15  ;;  %10453 = vmatpush3.bf16.msra.mxu0 %v12227_v49 }
0x1307   : > { %10454 = vmatprep.subr.bf16.mxu0 %v12228_v53 }
0x130a   : > { %10455 = vmatpush3.bf16.msra.mxu0 %v12229_v36 }
0x130b   : > { %10456 = vmatprep.subr.bf16.mxu0 %v12230_v54 }
0x130e   : > { %10457 = vmatpush3.bf16.msra.mxu0 %v12231_v55 }
0x130f   : > { %10458 = vmatprep.subr.bf16.mxu0 %v12232_v50 }
0x1312   : > { %10459 = vmatpush3.bf16.msra.mxu0 %v12233_v57 }
0x1313   : > { %10460 = vmatprep.subr.bf16.mxu0 %v12234_v58 }
0x1316   : > { %10461 = vmatpush3.bf16.msra.mxu0 %v12235_v1 }
0x1317   : > { %10462 = vmatprep.subr.bf16.mxu0 %v12236_v59 }
0x131a   : > { %10463 = vmatpush3.bf16.msra.mxu0 %v12237_v62 }
0x131b   : > { %10464 = vmatprep.subr.bf16.mxu0 %v12238_v18 }
0x131e   : > { %10465 = vmatpush3.bf16.msra.mxu0 %v12239_v0 }
0x131f   : > { %10466 = vmatprep.subr.bf16.mxu0 %v12240_v10 }
0x1322   : > { %10467 = vmatpush3.bf16.msra.mxu0 %v12241_v2 }
0x1323   : > { %10569 = vmatprep.subr.bf16.mxu0 %v12960_v15 }
0x13c5   : > { %v8251_v4 = vpop.f32.mrf.mxu1  ;;  %v10446_v5 = vpop.f32.mrf.mxu0 }
0x13c6   : > { %v8252_v6 = vadd.f32 %v8251_v4, %v13740_v60 }
0x13c7   : > { %v8253_v42 = vpop.f32.mrf.mxu1  ;;  %v10447_v12 = vpop.f32.mrf.mxu0 }
0x13c8   : > { %v8266_v13 = vadd.f32 %v8261_v3, %v8252_v6  ;;  %v8254_v16 = vadd.f32 %v8253_v42, %v13742_v51  ;;  %v10448_v63 = vadd.f32 %v10447_v12, %v10446_v5 }
0x13c9   : > { %v8255_v14 = vpop.f32.mrf.mxu1  ;;  %v10449_v37 = vpop.f32.mrf.mxu0 }
0x13ca   : > { %v8268_v44 = vsub.f32 0.0, %v8266_v13  ;;  %v8267_v8 = vadd.f32 %v8265_v23, %v8254_v16  ;;  %v8461_v19 = vadd.f32 %v10448_v63, %v8459_v26  ;;  %v8452_v45 = vadd.f32 %v10448_v63, %v8451_v7 }
0x13cb   : > { %v8256_v46 = vpop.f32.mrf.mxu1  ;;  %v10450_v20 = vpop.f32.mrf.mxu0 }
0x13cc   : > { %v8270_v47 = vmul.f32 1.442695, %v8268_v44  ;;  %v8269_v21 = vsub.f32 0.0, %v8267_v8  ;;  %v8645_v60 = vpack.c.bf16 %v8461_v19, %v8461_v19 }
0x13ce   : > { %12286 = vpow2.f32 %v8270_v47  ;;  %v8272_v29 = vmul.f32 1.442695, %v8269_v21  ;;  %8648 = vrot.lane.b32.xlu1 %v8645_v60, %s12962_s6  ;;  %s12963_s6 = smov 96  }
0x13d0   : > { %12288 = vpow2.f32 %v8272_v29 }
0x13db   : > { %v12287_v22 = vpop.eup %12286 }
0x13dc   : > { %v8274_v31 = vadd.f32 1.0, %v12287_v22 }
0x13dd   : > { %v12289_v17 = vpop.eup %12288 }
0x13de   : > { %12290 = vrcp.f32 %v8274_v31  ;;  %v8275_v51 = vadd.f32 1.0, %v12289_v17 }
0x13e0   : > { %12292 = vrcp.f32 %v8275_v51 }
0x13eb   : > { %v12291_v25 = vpop.eup %12290 }
0x13ec   : > { %v8278_v34 = vmul.f32 %v12291_v25, %v13782_v38  ;;  %v8644_v38 = vpack.c.bf16 %v8452_v45, %v8452_v45 }
0x13ed   : > { %v12293_v30 = vpop.eup %12292 }
0x13ee   : > { %v8279_v35 = vmul.f32 %v12293_v30, %v13780_v32  ;;  %v8494_v41 = vpack.c.bf16 %v8278_v34, %v8278_v34  ;;  %v12242_v34 = vld [vmem:[#allocation28 + $0x18] sm:$0xff]  }
0x13f0   : > { %v8495_v39 = vpack.c.bf16 %v8279_v35, %v8279_v35  ;;  %v12243_v35 = vld [vmem:[#allocation28 + $0x10] sm:$0xff]  }
0x13f2   : > { %8628 = vmatprep.mubr.bf16.mxu0 %v8495_v39  ;;  %v12244_v39 = vld [vmem:[#allocation28 + $0x8] sm:$0xff]  }
0x13f3   : > { %8629 = vmatmul.mubr.bf16.vlgmr.msra.gmra.mxu0 %v8494_v41  ;;  %v12245_v41 = vld [vmem:[#allocation28] sm:$0xff]  }
0x13f4   : > { %10577 = vmatprep.mubr.msk.bf16.mxu0 %vm12961_vm0, %v12960_v15  ;;  %10570 = vmatpush3.bf16.msra.mxu0 %v12242_v34 }
0x13f5   : > { %10571 = vmatprep.subr.bf16.mxu0 %v12960_v15 }
0x13f8   : > { %10572 = vmatpush3.bf16.msra.mxu0 %v12243_v35 }
0x13f9   : > { %10573 = vmatprep.subr.bf16.mxu0 %v12960_v15 }
0x13fc   : > { %10574 = vmatpush3.bf16.msra.mxu0 %v12244_v39 }
0x13fd   : > { %10575 = vmatprep.subr.bf16.mxu0 %v12960_v15 }
0x1400   : > { %10576 = vmatpush3.bf16.msra.mxu0 %v12245_v41 }
0x1401   : > { %10593 = vmatprep.subr.bf16.mxu0 %v12960_v15 }
0x1440   : > { %v8649_v24 = vpop.permute.xlu1 %8648 }
0x1441   : > { %v8655_v43 = vsel %vm8650_vm3, %v8649_v24, 0 }
0x1442   : > { %10546 = vmatpush3.bf16.xpose.msra.mxu1 %v8655_v43 }
0x1443   : > { %10551 = vmatprep.subr.bf16.mxu1 %v12960_v15 }
0x1449   : > { %10548 = vmatmul.mubr.msk.bf16.vlgmr.msra.gmra.mxu1 %vm8650_vm3, %v8644_v38 }
0x144a   : > { %10553 = vmatprep.mubr.msk.bf16.mxu1 %vm12961_vm0, %v12960_v15 }
0x14b3   : > { %v10468_v32 = vpop.f32.mrf.mxu0 }
0x14b5   : > { %v10469_v28 = vpop.f32.mrf.mxu0 }
0x14b6   : > { %v10470_v49 = vadd.f32 %v10469_v28, %v10468_v32  ;;  %v8878_v28 = vrot.slane %v13761_v61, %v13530_v33  ;;  %v12248_v33 = vld [vmem:[#allocation29 + $0x8] sm:$0xff]  }
0x14b7   : > { %v10471_v27 = vpop.f32.mrf.mxu0 }
0x14b8   : > { %v13859_v53 = vadd.f32 %v10470_v49, %v8499_v48 }
0x14b9   : > { %v10472_v36 = vpop.f32.mrf.mxu0 }
0x14ba   : > { %v8646_v54 = vpack.c.bf16 %v13859_v53, %v13859_v53 }
0x14bc   : > { %v8714_v55 = vsel %vm3931_vm1, %v8646_v54, 0 }
0x14bd   : > { %10552 = vmatpush3.bf16.msra.mxu1 %v8714_v55 }
0x14be   : > { %10557 = vmatprep.subr.bf16.mxu1 %v12960_v15 }
0x1509   : > { %v8691_v50 = vpop.f32.mrf.mxu1 }
0x150a   : > { %v8697_v57 = vmul.f32 0.17677669, %v8691_v50 }
0x150b   : > { %v10549_v58 = vpop.f32.mrf.mxu1 }
0x150c   : > { %v8698_v1 = vsel %vm3915_vm2, %v8697_v57, -inf }
0x150d   : > { %8699 = vmax.xlane.f32.xlu1 %v8698_v1  ;;  %v8694_v11 = vpop.f32.mrf.mxu1 }
0x150e   : > { %v12246_v11 = vld [vmem:[#allocation29 + $0x18] sm:$0xff]  }
0x150f   : > { %v10550_v59 = vpop.f32.mrf.mxu1 }
0x1510   : > { %v12247_v59 = vld [vmem:[#allocation29 + $0x10] sm:$0xff]  }
0x151e   : > { %8757 = vrot.lane.b32.xlu1 %v8644_v38, %s12963_s6 }
0x1596   : > { %v8700_v62 = vpop.xlane.xlu1 %8699 }
0x1597   : > { %v8701_v18 = vsub.f32 %v8697_v57, %v8700_v62  ;;  %v12250_v62 = vld [vmem:[#allocation31 + $0x18] sm:$0xff]  }
0x1599   : > { %v8702_v0 = vmul.f32 1.442695, %v8701_v18  ;;  %v12251_v18 = vld [vmem:[#allocation31 + $0x10] sm:$0xff]  }
0x159a   : > { %v8758_v42 = vpop.permute.xlu1 %8757 }
0x159b   : > { %12294 = vpow2.f32 %v8702_v0 }
0x15a8   : > { %v12295_v10 = vpop.eup %12294 }
0x15a9   : > { %v8704_v2 = vsel %vm3915_vm2, %v12295_v10, 0.0 }
0x15aa   : > { %8705 = vadd.xlane.f32.xlu0 %v8704_v2 }
0x15c0   : > { %8759 = vrot.lane.b32.xlu0 %v8645_v60, %s12964_s22 }
0x1633   : > { %v8706_v3 = vpop.xlane.xlu0 %8705 }
0x1634   : > { %12296 = vrcp.f32 %v8706_v3 }
0x1637   : > { %v8760_v6 = vpop.permute.xlu0 %8759 }
0x1638   : > { %v8765_v26 = vsel %vm8650_vm3, %v8760_v6, 0 }
0x1641   : > { %v12297_v4 = vpop.eup %12296 }
0x1642   : > { %v8708_v5 = vmul.f32 %v12297_v4, %v12295_v10 }
0x1644   : > { %v8709_v23 = vpack.c.bf16 %v8708_v5, %v8708_v5 }
0x1646   : > { %10554 = vmatmul.mubr.msk.bf16.vlgmr.msra.gmra.mxu1 %vm3915_vm2, %v8709_v23 }
0x1647   : > { %10558 = vmatpush3.bf16.xpose.msra.mxu1 %v8765_v26  ;;  %10559 = vmatprep.mubr.msk.bf16.mxu1 %vm12961_vm0, %v12960_v15  ;;  %v8967_v26 = vrot.slane %v13761_v61, %v13549_v40  ;;  %v8994_v40 = vrot.slane %v13761_v61, %v13576_v9 }
0x1648   : > { %10563 = vmatprep.subr.bf16.mxu1 %v12960_v15 }
0x164e   : > { %10560 = vmatmul.mubr.msk.bf16.vlgmr.msra.gmra.mxu1 %vm8650_vm3, %v8758_v42 }
0x164f   : > { %10565 = vmatprep.mubr.msk.bf16.mxu1 %vm12961_vm0, %v12960_v15 }
0x1706   : > { %v8750_v12 = vpop.f32.mrf.mxu1 }
0x1708   : > { %v10555_v13 = vpop.f32.mrf.mxu1 }
0x1709   : > { %v8972_v13 = vrot.slane %v13761_v61, %v13552_v56 }
0x170a   : > { %v8753_v16 = vpop.f32.mrf.mxu1 }
0x170c   : > { %v10556_v63 = vpop.f32.mrf.mxu1 }
0x170e   : > { %v8801_v14 = vpop.f32.mrf.mxu1 }
0x170f   : > { %v8807_v37 = vmul.f32 0.17677669, %v8801_v14 }
0x1710   : > { %v10561_v44 = vpop.f32.mrf.mxu1 }
0x1711   : > { %v8808_v8 = vsel %vm3915_vm2, %v8807_v37, -inf  ;;  %v12253_v44 = vld [vmem:[#allocation31] sm:$0xff]  }
0x1712   : > { %8809 = vmax.xlane.f32.xlu1 %v8808_v8  ;;  %v8804_v19 = vpop.f32.mrf.mxu1 }
0x1714   : > { %v10562_v46 = vpop.f32.mrf.mxu1 }
0x179b   : > { %v8810_v20 = vpop.xlane.xlu1 %8809 }
0x179c   : > { %v8811_v47 = vsub.f32 %v8807_v37, %v8810_v20  ;;  %v12252_v37 = vld [vmem:[#allocation31 + $0x8] sm:$0xff]  }
0x179e   : > { %v8812_v21 = vmul.f32 1.442695, %v8811_v47 }
0x17a0   : > { %12298 = vpow2.f32 %v8812_v21 }
0x17ad   : > { %v12299_v60 = vpop.eup %12298 }
0x17ae   : > { %v8814_v29 = vsel %vm3915_vm2, %v12299_v60, 0.0 }
0x17af   : > { %8815 = vadd.xlane.f32.xlu0 %v8814_v29 }
0x17c5   : > { %8821 = vrot.lane.b32.xlu0 %v8646_v54, %s12963_s6  ;;  %s12830_s6 = sshll.u32 %s12965_s27, 4  ;;  %s12831_s6 = int_to_ptr.vmem [resolvable:$false] %s12830_s6 }
0x17c6   : > { %p12833_p6 = scmp.lt.s32.totalorder %s13922_s30, %s12831_s6 }
0x1838   : > { %v8816_v22 = vpop.xlane.xlu0 %8815 }
0x1839   : > { %12300 = vrcp.f32 %v8816_v22 }
0x183c   : > { %v8822_v31 = vpop.permute.xlu0 %8821 }
0x183d   : > { %v8827_v17 = vsel %vm3931_vm1, %v8822_v31, 0 }
0x183e   : > { %10564 = vmatpush3.bf16.msra.mxu1 %v8827_v17 }
0x183f   : > { %10581 = vmatprep.subr.bf16.mxu1 %v12960_v15 }
0x1846   : > { %v12301_v51 = vpop.eup %12300 }
0x1847   : > { %v8818_v25 = vmul.f32 %v12301_v51, %v12299_v60 }
0x1849   : > { %v8819_v30 = vpack.c.bf16 %v8818_v25, %v8818_v25 }
0x184b   : > { %10566 = vmatmul.mubr.msk.bf16.vlgmr.msra.gmra.mxu1 %vm3915_vm2, %v8819_v30 }
0x184c   : > { %10589 = vmatprep.mubr.msk.bf16.mxu1 %vm12961_vm0, %v12960_v15  ;;  %10582 = vmatpush3.bf16.msra.mxu1 %v12246_v11 }
0x184d   : > { %10583 = vmatprep.subr.bf16.mxu1 %v12960_v15 }
0x1850   : > { %10584 = vmatpush3.bf16.msra.mxu1 %v12247_v59 }
0x1851   : > { %10585 = vmatprep.subr.bf16.mxu1 %v12960_v15 }
0x1854   : > { %10586 = vmatpush3.bf16.msra.mxu1 %v12248_v33 }
0x1855   : > { %10587 = vmatprep.subr.bf16.mxu1 %v12960_v15 }
0x190b   : > { %v8863_v7 = vpop.f32.mrf.mxu1 }
0x190c   : > { %8870 = vrot.lane.b32.xlu1 %v8863_v7, %s12964_s22  ;;  %s12832_s22 = scalar_lea.vmem %s12831_s6, 256 }
0x190d   : > { %v10567_v24 = vpop.f32.mrf.mxu1  ;;  %p12834_p13 = scmp.lt.s32.totalorder %s12832_s22, %s12826_s1 }
0x190f   : > { %v8866_v43 = vpop.f32.mrf.mxu1  ;;  %p12835_p8 = por %p12834_p13, %p12833_p6 }
0x1911   : > { %v10568_v45 = vpop.f32.mrf.mxu1  ;;  %p12836_p0 = pnand %p12835_p8, %p12829_p7 }
0x197e   : > { %v8871_v38 = vpop.permute.xlu1 %8870 }
0x197f   : > { %v8873_v32 = vsel %vm8650_vm3, %v8750_v12, %v8871_v38 }
0x1980   : > { %v8874_v48 = vpack.c.bf16 %v8873_v32, %v8873_v32 }
0x1982   : > { %10578 = vmatmul.mubr.msk.bf16.vlgmr.msra.gmra.mxu0 %vm8903_vm4, %v8874_v48 }
0x1983   : > { %10601 = vmatprep.mubr.msk.bf16.mxu0 %vm12961_vm0, %v12960_v15  ;;  %10594 = vmatpush3.bf16.msra.mxu0 %v12250_v62 }
0x1984   : > { %10595 = vmatprep.subr.bf16.mxu0 %v12960_v15 }
0x1987   : > { %10596 = vmatpush3.bf16.msra.mxu0 %v12251_v18 }
0x1988   : > { %10597 = vmatprep.subr.bf16.mxu0 %v12960_v15 }
0x198b   : > { %10598 = vmatpush3.bf16.msra.mxu0 %v12252_v37 }
0x198c   : > { %10599 = vmatprep.subr.bf16.mxu0 %v12960_v15  ;;  %v9067_v15 = vrot.slane %v13761_v61, %v13588_v52 }
0x198f   : > { %10600 = vmatpush3.bf16.msra.mxu0 %v12253_v44 }
0x1a42   : > { %v8941_v49 = vpop.f32.mrf.mxu0 }
0x1a43   : > { %v8942_v27 = vadd.f32 %v8941_v49, %v8878_v28 }
0x1a44   : > { %v10579_v36 = vpop.f32.mrf.mxu0 }
0x1a45   : > { %v8947_v54 = vadd.f32 %v8942_v27, %v13859_v53  ;;  %v12249_v53 = vld [vmem:[#allocation29] sm:$0xff]  }
0x1a46   : > { %v8944_v55 = vpop.f32.mrf.mxu0  ;;  %10588 = vmatpush3.bf16.msra.mxu1 %v12249_v53 }
0x1a47   : > { %v8948_v50 = vsel %vm8903_vm4, %v8947_v54, 0.0  ;;  %v8953_v57 = vmul.f32 %v8947_v54, %v8947_v54 }
0x1a48   : > { %8949 = vadd.xlane.f32.xlu1 %v8948_v50  ;;  %v10580_v58 = vpop.f32.mrf.mxu0 }
0x1a49   : > { %v8954_v1 = vsel %vm8903_vm4, %v8953_v57, 0.0 }
0x1a4a   : > { %8955 = vadd.xlane.f32.xlu0 %v8954_v1 }
0x1ad1   : > { %v8950_v0 = vpop.xlane.xlu1 %8949 }
0x1ad2   : > { %v8952_v10 = vmul.f32 0.015625, %v8950_v0 }
0x1ad3   : > { %v8956_v2 = vpop.xlane.xlu0 %8955 }
0x1ad4   : > { %v8958_v3 = vmul.f32 %v8952_v10, %v8952_v10  ;;  %v8957_v4 = vmul.f32 0.015625, %v8956_v2  ;;  %v8960_v23 = vsub.f32 %v8947_v54, %v8952_v10 }
0x1ad6   : > { %v8959_v5 = vsub.f32 %v8957_v4, %v8958_v3 }
0x1ad8   : > { %v8961_v6 = vadd.f32 1e-05, %v8959_v5 }
0x1ada   : > { %12302 = vrsqrt.f32 %v8961_v6 }
0x1ae7   : > { %v12303_v42 = vpop.eup %12302 }
0x1ae8   : > { %v8963_v12 = vmul.f32 %v12303_v42, %v8960_v23 }
0x1aea   : > { %v8968_v16 = vmul.f32 %v8967_v26, %v8963_v12 }
0x1aec   : > { %v8973_v63 = vadd.f32 %v8972_v13, %v8968_v16 }
0x1aee   : > { %v8990_v14 = vpack.c.bf16 %v8973_v63, %v8973_v63 }
0x1af0   : > { %10590 = vmatmul.mubr.msk.bf16.vlgmr.msra.gmra.mxu1 %vm8903_vm4, %v8990_v14 }
0x1bb0   : > { %v9056_v8 = vpop.f32.mrf.mxu1 }
0x1bb1   : > { %v9057_v19 = vadd.f32 %v9056_v8, %v8994_v40 }
0x1bb2   : > { %v10591_v46 = vpop.f32.mrf.mxu1 }
0x1bb3   : > { %v9062_v56 = vmax.f32 %v9057_v19, 0.0 }
0x1bb4   : > { %v9059_v20 = vpop.f32.mrf.mxu1 }
0x1bb5   : > { %v9063_v47 = vpack.c.bf16 %v9062_v56, %v9062_v56 }
0x1bb6   : > { %v10592_v21 = vpop.f32.mrf.mxu1 }
0x1bb7   : > { %10602 = vmatmul.mubr.msk.bf16.vlgmr.msra.gmra.mxu0 %vm8903_vm4, %v9063_v47 }
0x1c77   : > { %v9129_v60 = vpop.f32.mrf.mxu0 }
0x1c78   : > { %v9130_v9 = vadd.f32 %v9129_v60, %v9067_v15 }
0x1c79   : > { %v10603_v29 = vpop.f32.mrf.mxu0 }
0x1c7a   : > { %v9135_v22 = vadd.f32 %v9130_v9, %v8973_v63 }
0x1c7b   : > { %v9132_v31 = vpop.f32.mrf.mxu0 }
0x1c7c   : > { %9136 = vst.msk [vmem:[%s965_s0] sm:$0xff] %vm8903_vm4, %v9135_v22 }
0x1c7d   : > { %v10604_v52 = vpop.f32.mrf.mxu0 }
0x1c7e   : > { %12839 = shalt.err (!%p12836_p0)
}
0x1c7f   : > { %s12840_s29 = scalar_lea.hbm %s13920_s28, 128  ;;  %s12844_s26 = scalar_lea.hbm %s14065_s2, 256 }
0x1c80   : > { %p12841_p11 = scmp.ne.s32.totalorder %s13920_s28, %s12840_s29  ;;  %p12845_p2 = scmp.lt.s32.totalorder %s13920_s28, %s14065_s2 }
0x1c81   : > { %p12846_p3 = scmp.lt.s32.totalorder %s12844_s26, %s12840_s29 }
0x1c82   : > { %p12842_p12 = pnand %p12841_p11, %p13119_p5 }
0x1c83   : > { %p12847_p4 = por %p12846_p3, %p12845_p2 }
0x1c84   : > { %p12843_p10 = pneg %p12842_p12 }
0x1c86   : > { %p12848_p1 = pnand %p12847_p4, %p12843_p10 }
0x1c88   : > { %12851 = shalt.err (!%p12848_p1)
}
0x1c89   : > { %10685 = dma.vmem_to_hbm [thread:$0]  (%p13119_p5), %s13922_s30, 128, %s13920_s28, %s9138_s4  }
0x1c8a PF: > { %s14066_s25 = sld [smem:[#allocation50_spill]] }
0x1c8b   : > { %s14067_s1 = sld [smem:[#allocation47_spill]] }
0x1c8c   : > { %s14068_s27 = sld [smem:[#allocation54_spill]] }
0x1c90   : > { %p10792_p9 = scmp.ge.s32.totalorder %s14066_s25, 2 }
0x1c91   : > { %s9163_s6 = sand.u32 1, %s14067_s1  }
0x1c92   : > { %p14069_p7 = scmp.ne.s32.totalorder %s14068_s27, 0  ;;  %s9164_s22 = scalar_lea.sflag [#allocation4], %s9163_s6 }
0x1c94   : > { %p10749_p6 = pnand %p10792_p9, %p14069_p7 }
0x1c96   : > { %p10750_p13 = pneg %p10749_p6 }
0x1c98   : > { %12913 = dma.done.wait (%p10750_p13), %s9164_s22, 128  }
0x1c99   : > { %12915 = vsyncadd (%p10750_p13), %s9164_s22, 4294967168  ;;  %s14070_s30 = sld [smem:[#allocation51_spill]] }
0x1c9a   : > { %s14071_s3 = sld [smem:[#allocation48_spill]] }
0x1c9b   : > { %s14072_s28 = sld [smem:[#allocation49_spill]] }
0x1c9c   : > { %s14073_s29 = sld [smem:[#allocation52_spill]] }
0x1c9f   : > { %p43_p8 = scmp.ge.s32.totalorder %s14070_s30, 4  }
0x1ca1   :  { %45 = sbr.rel (!%p43_p8) target bundleno = 23 (0x17), region = 224 }
0x1ca6   :  { %9169 = vsyncpa [#allocation3], 1 }
0x1ca7   :  { %9171 = vsyncpa [#allocation3 + $0x1], 1 }
0x1ca8   :  { %9172 = vsyncpa [#allocation6], 1 }
0x1ca9   :  { %9173 = vsyncpa [#allocation9], 1 }
0x1caa   :  { %9174 = vsyncpa [#allocation12], 1 }
0x1cab   :  { %9175 = vsyncpa [#allocation15], 1 }
0x1cac   :  { %9176 = vsyncpa [#allocation18], 1 }
0x1cad   :  { %9177 = vsyncpa [#allocation21], 1 }
0x1cae   :  { %9178 = vsyncpa [#allocation24], 1 }
0x1caf   :  { %9179 = vsyncpa [#allocation27], 1 }
0x1cb0   :  { %9180 = vsyncpa [#allocation30], 1 }
0x1cb1   :  { %9181 = vsyncpa [#allocation33], 1 }
0x1cb2   :  { %9182 = vsyncpa [#allocation4], 1 }
0x1cb3   :  { %9184 = vsyncpa [#allocation4 + $0x1], 1 }

</bundles_post_ra>
